<compile_context>
chip_gen: v7x
topology: tpu7x:2x2x1
jax: 0.10.0
libtpu: 0.0.40
codegen_flags: <defaults>
</compile_context>

<pallas_src>
import jax
import jax.numpy as jnp
from jax import lax
from jax.experimental import pallas as pl
from jax.experimental.pallas import tpu as pltpu

# ----------------------------- static architecture -----------------------------
B = 8                                     # images per grid step (batch-in-lanes)
H_IN, W_IN, C_IN = 32, 32, 3
K = 5
C1_OC, C1_OH = 6, 28                      # conv1: 3->6, valid 5x5
P1_H, P1_W = 14, 14                       # after 2x2/2 pool
C2_OC, C2_OH = 16, 10                     # conv2: 6->16, valid 5x5
P2_H, P2_W = 5, 5                         # after 2x2/2 pool
FC1_OUT, FC2_OUT, FC3_OUT = 120, 84, 121
OUT_PAD = 128                             # logits padded to a full lane group

PATCH_K = K * K * C_IN                    # 75  per-image conv1 contraction
C1_ROWS = C1_OH * C1_OH                   # 784 conv1 output rows (i*28 + j)
P1_ROWS = P1_H * P1_W                     # 196 pooled1 rows (p*14 + q)
P1_ROWS_PAD = 208                         # conv2 taps overrun to row 199
C2_ROWS = C2_OH * P1_W                    # 140 conv2 output rows (i*14 + j, j>=10 slack)
C2_ROWS_PAD = 144
P2_ROWS = P2_H * P2_W                     # 25
P2_ROWS_PAD = 32

L_IN = B * PATCH_K                        # 600 conv1 LHS lanes   (b*75 + k)
L_C1 = B * C1_OC                          # 48  conv1/pool1 lanes (b*6  + c)
L_C2 = C2_OC * B                          # 128 conv2/pool2 lanes (oc*8 + b)


# ------------------------------- fused kernel ----------------------------------

def _lenet_kernel(x_ref, w1_ref, b1_ref, w2_ref, b2_ref,
                  wf1_ref, bf1_ref, wf2_ref, bf2_ref, wf3_ref, bf3_ref,
                  out_ref,
                  c1_ref, p1_ref, c2_ref, p2_ref):
    f32 = jnp.float32
    bf16 = jnp.bfloat16

    # Zero the whole pooled1 slab (conv2 tap slices overrun rows 196..199; keep the
    # slack zeroed every step -- not gated on program_id, so megacore-safe).
    p1_ref[...] = jnp.zeros_like(p1_ref)

    # ---- conv1: ONE K-packed matmul (784, 600) @ (600, 48), 2 row chunks ---------
    half = C1_ROWS // 2                                           # 392 (8-aligned)
    for h in range(2):
        lhs = x_ref[0, pl.ds(h * half, half), :]                  # (392, 600) bf16
        acc = jnp.dot(lhs, w1_ref[...], preferred_element_type=f32)   # (392, 48)
        c1_ref[pl.ds(h * half, half), :] = jnp.maximum(acc + b1_ref[...], 0.0)

    # ---- pool1: 2x2/2 on 28x28 -> 14x14, lanes (b, c) stay dense -----------------
    for p in range(P1_H):
        base = 2 * p * C1_OH
        r00 = c1_ref[pl.ds(base,             P1_W, stride=2), :]
        r01 = c1_ref[pl.ds(base + 1,         P1_W, stride=2), :]
        r10 = c1_ref[pl.ds(base + C1_OH,     P1_W, stride=2), :]
        r11 = c1_ref[pl.ds(base + C1_OH + 1, P1_W, stride=2), :]
        p1_ref[pl.ds(p * P1_W, P1_W), :] = jnp.maximum(
            jnp.maximum(r00, r01), jnp.maximum(r10, r11))

    # ---- conv2: 25 taps, each (140, 48) @ (48, 128), f32 register accumulator ----
    acc2 = jnp.zeros((C2_ROWS, L_C2), f32)
    for t in range(K * K):
        kh, kw = divmod(t, K)
        lhs = p1_ref[pl.ds(kh * P1_W + kw, C2_ROWS), :].astype(bf16)   # (140, 48)
        acc2 = acc2 + jnp.dot(lhs, w2_ref[t], preferred_element_type=f32)
    c2_ref[pl.ds(0, C2_ROWS), :] = jnp.maximum(acc2 + b2_ref[...], 0.0)

    # ---- pool2: 10x10 -> 5x5 (rows s = p*5 + q, lanes oc*8 + b) ------------------
    for p in range(P2_H):
        base = 2 * p * P1_W
        r00 = c2_ref[pl.ds(base,             P2_W, stride=2), :]
        r01 = c2_ref[pl.ds(base + 1,         P2_W, stride=2), :]
        r10 = c2_ref[pl.ds(base + P1_W,      P2_W, stride=2), :]
        r11 = c2_ref[pl.ds(base + P1_W + 1,  P2_W, stride=2), :]
        p2_ref[pl.ds(p * P2_W, P2_W), :] = jnp.maximum(
            jnp.maximum(r00, r01), jnp.maximum(r10, r11))

    # ---- fc1 (400 -> 120): contract (s, oc); batch stays in lanes ----------------
    p2 = p2_ref[...]                                              # (32, 128) f32
    h1t = jnp.zeros((FC1_OUT, B), f32)                            # (120, 8)
    for oc in range(C2_OC):
        rhs = p2[0:P2_ROWS, oc * B:(oc + 1) * B].astype(bf16)     # (25, 8)
        h1t = h1t + jnp.dot(wf1_ref[oc], rhs, preferred_element_type=f32)
    h1t = jnp.maximum(h1t + bf1_ref[...], 0.0)                    # (120, 8)

    # ---- fc2 (120 -> 84) ----------------------------------------------------------
    h2t = jnp.maximum(
        jnp.dot(wf2_ref[...], h1t.astype(bf16), preferred_element_type=f32)
        + bf2_ref[...], 0.0)                                      # (84, 8)

    # ---- move batch back to sublanes via identity matmul (A @ B^T, no transpose) --
    row = lax.broadcasted_iota(jnp.int32, (B, B), 0)
    col = lax.broadcasted_iota(jnp.int32, (B, B), 1)
    eye_b = (row == col).astype(bf16)                             # (8, 8)
    h2b = lax.dot_general(eye_b, h2t.astype(bf16),
                          dimension_numbers=(((1,), (1,)), ((), ())),
                          preferred_element_type=f32)             # (8, 84)

    # ---- fc3 (84 -> 121, lane-padded to 128) --------------------------------------
    logits = (jnp.dot(h2b.astype(bf16), wf3_ref[...], preferred_element_type=f32)
              + bf3_ref[...])                                     # (8, 128)
    out_ref[...] = logits.astype(out_ref.dtype)


# ------------------------------ parameter packing -------------------------------

def init_params(key):
    """PyTorch-layout parameters (same shapes as nn.Conv2d / nn.Linear)."""
    def uniform(k, shape, fan_in):
        bound = 1.0 / jnp.sqrt(float(fan_in))
        return jax.random.uniform(k, shape, jnp.float32, -bound, bound)

    ks = jax.random.split(key, 10)
    return {
        "conv1_w": uniform(ks[0], (6, 3, 5, 5), 3 * 5 * 5),
        "conv1_b": uniform(ks[1], (6,), 3 * 5 * 5),
        "conv2_w": uniform(ks[2], (16, 6, 5, 5), 6 * 5 * 5),
        "conv2_b": uniform(ks[3], (16,), 6 * 5 * 5),
        "fc1_w": uniform(ks[4], (120, 400), 400),
        "fc1_b": uniform(ks[5], (120,), 400),
        "fc2_w": uniform(ks[6], (84, 120), 120),
        "fc2_b": uniform(ks[7], (84,), 120),
        "fc3_w": uniform(ks[8], (121, 84), 84),
        "fc3_b": uniform(ks[9], (121,), 84),
    }


def prepare_params(params):
    """One-time pre-pack of weights into kernel layout (block-diag over batch, bf16)."""
    f32, bf16 = jnp.float32, jnp.bfloat16

    # conv1 weight in (kh,kw,c)-major tap order, then block-diag over the B images:
    # W1_bd[b*75 + k, b'*6 + oc] = w1[k, oc] iff b == b'.
    w1 = params["conv1_w"].transpose(2, 3, 1, 0).reshape(PATCH_K, C1_OC)   # (75, 6)
    w1bd = jnp.kron(jnp.eye(B, dtype=f32), w1).astype(bf16)                # (600, 48)
    b1bd = jnp.tile(params["conv1_b"], B).reshape(1, L_C1).astype(f32)     # lane b*6+c

    # conv2 per-tap weights, block-diag: in lane b*6+c  ->  out lane oc*8+b.
    w2_taps = params["conv2_w"].transpose(2, 3, 1, 0).reshape(K * K, C1_OC, C2_OC)
    eye_b = jnp.eye(B, dtype=f32)
    w2bd = jnp.einsum("tco,bd->tbcod", w2_taps, eye_b)                     # (25,B,6,16,B)
    w2bd = w2bd.reshape(K * K, L_C1, L_C2).astype(bf16)                    # (25, 48, 128)
    b2bd = jnp.repeat(params["conv2_b"], B).reshape(1, L_C2).astype(f32)   # lane oc*8+b

    # fc1: PyTorch flatten index = oc*25 + s  ->  per-channel (120, 25) blocks.
    wf1 = params["fc1_w"].reshape(FC1_OUT, C2_OC, P2_ROWS)
    wf1 = wf1.transpose(1, 0, 2).astype(bf16)                              # (16, 120, 25)

    wf3p = jnp.zeros((FC2_OUT, OUT_PAD), f32).at[:, :FC3_OUT].set(
        params["fc3_w"].T).astype(bf16)                                    # (84, 128)
    bf3p = jnp.zeros((1, OUT_PAD), f32).at[0, :FC3_OUT].set(params["fc3_b"])

    return {
        "w1": w1bd, "b1": b1bd,
        "w2": w2bd, "b2": b2bd,
        "wf1": wf1, "bf1": params["fc1_b"].reshape(FC1_OUT, 1).astype(f32),
        "wf2": params["fc2_w"].astype(bf16),                               # (84, 120)
        "bf2": params["fc2_b"].reshape(FC2_OUT, 1).astype(f32),
        "wf3": wf3p, "bf3": bf3p,
    }


# ----------------------------------- forward ------------------------------------

@jax.jit
def forward(prep, x):
    n = x.shape[0]
    g = -(-n // B)                        # number of grid steps
    npad = g * B
    if npad != n:
        x = jnp.pad(x, ((0, npad - n), (0, 0), (0, 0), (0, 0)))

    # Wrapper-side K-packing of conv1 (tiny input, explicitly sanctioned):
    # patch slab (g, 784, B*75) bf16, lane = b*75 + ((kh*5+kw)*3 + c).
    xn = x.transpose(0, 2, 3, 1)                                  # (npad, 32, 32, 3)
    pats = [xn[:, kh:kh + C1_OH, kw:kw + C1_OH, :]
            for kh in range(K) for kw in range(K)]
    pat = jnp.stack(pats, axis=3).reshape(npad, C1_ROWS, PATCH_K)
    pat = (pat.reshape(g, B, C1_ROWS, PATCH_K)
              .transpose(0, 2, 1, 3)
              .reshape(g, C1_ROWS, L_IN)
              .astype(jnp.bfloat16))

    def full(a):
        nd = a.ndim
        return pl.BlockSpec(a.shape, lambda i, nd=nd: (0,) * nd)

    flops_per_step = 2 * (C1_ROWS * L_IN * L_C1
                          + K * K * C2_ROWS * L_C1 * L_C2
                          + C2_OC * FC1_OUT * P2_ROWS * B
                          + FC2_OUT * FC1_OUT * B
                          + B * B * FC2_OUT
                          + B * FC2_OUT * OUT_PAD)
    bytes_accessed = (pat.size * 2
                      + sum(int(v.size) * v.dtype.itemsize for v in prep.values())
                      + npad * OUT_PAD * 4)

    out = pl.pallas_call(
        _lenet_kernel,
        out_shape=jax.ShapeDtypeStruct((npad, OUT_PAD), jnp.float32),
        grid=(g,),
        in_specs=[
            pl.BlockSpec((1, C1_ROWS, L_IN), lambda i: (i, 0, 0)),
            full(prep["w1"]), full(prep["b1"]),
            full(prep["w2"]), full(prep["b2"]),
            full(prep["wf1"]), full(prep["bf1"]),
            full(prep["wf2"]), full(prep["bf2"]),
            full(prep["wf3"]), full(prep["bf3"]),
        ],
        out_specs=pl.BlockSpec((B, OUT_PAD), lambda i: (i, 0)),
        scratch_shapes=[
            pltpu.VMEM((C1_ROWS, L_C1), jnp.float32),       # conv1 output slab
            pltpu.VMEM((P1_ROWS_PAD, L_C1), jnp.float32),   # pooled1 (+ zeroed slack)
            pltpu.VMEM((C2_ROWS_PAD, L_C2), jnp.float32),   # conv2 output slab
            pltpu.VMEM((P2_ROWS_PAD, L_C2), jnp.float32),   # pooled2
        ],
        compiler_params=pltpu.CompilerParams(
            dimension_semantics=("parallel",),
            vmem_limit_bytes=32 * 1024 * 1024),
        cost_estimate=pl.CostEstimate(
            flops=int(g * flops_per_step),
            transcendentals=0,
            bytes_accessed=int(bytes_accessed)),
    )(pat, prep["w1"], prep["b1"], prep["w2"], prep["b2"],
      prep["wf1"], prep["bf1"], prep["wf2"], prep["bf2"],
      prep["wf3"], prep["bf3"])
    return out[:n, :FC3_OUT]


# ------------------------------ pure-JAX reference -------------------------------

def forward_reference(params, x):
    def conv(x, w, b):
        y = lax.conv_general_dilated(
            x, w, window_strides=(1, 1), padding="VALID",
            dimension_numbers=("NCHW", "OIHW", "NCHW"))
        return jnp.maximum(y + b[None, :, None, None], 0.0)

    def pool(x):
        n, c, h, w = x.shape
        return x.reshape(n, c, h // 2, 2, w // 2, 2).max(axis=(3, 5))

    x = pool(conv(x, params["conv1_w"], params["conv1_b"]))
    x = pool(conv(x, params["conv2_w"], params["conv2_b"]))
    x = x.reshape(-1, 16 * 5 * 5)
    x = jnp.maximum(x @ params["fc1_w"].T + params["fc1_b"], 0.0)
    x = jnp.maximum(x @ params["fc2_w"].T + params["fc2_b"], 0.0)
    return x @ params["fc3_w"].T + params["fc3_b"]


if __name__ == "__main__":
    key = jax.random.PRNGKey(0)
    k_params, k_x = jax.random.split(key)
    params = init_params(k_params)
    prep = prepare_params(params)

    # LeNet-style architecture requires 3x32x32 inputs (16*5*5 flatten).
    # batch=16 -> two grid steps of 8 images (keeps both v7x TensorCores busy).
    x = jax.random.normal(k_x, (16, 3, 32, 32), jnp.float32)

    out = jax.block_until_ready(forward(prep, x))
    ref = jax.block_until_ready(forward_reference(params, x))

    assert out.shape == (16, 121), out.shape
    assert bool(jnp.all(jnp.isfinite(out)))
    err = float(jnp.max(jnp.abs(out - ref)))
    assert jnp.allclose(out, ref, rtol=5e-2, atol=5e-2), err

    print("KERNEL_OK")
</pallas_src>

<mosaic_0001>
module attributes {stable_mosaic.version = 11 : i64} {
  func.func @_lenet_kernel(%arg0: i32, %arg1: memref<1x784x600xbf16, #tpu.memory_space<vmem>>, %arg2: memref<600x48xbf16, #tpu.memory_space<vmem>>, %arg3: memref<1x48xf32, #tpu.memory_space<vmem>>, %arg4: memref<25x48x128xbf16, #tpu.memory_space<vmem>>, %arg5: memref<1x128xf32, #tpu.memory_space<vmem>>, %arg6: memref<16x120x25xbf16, #tpu.memory_space<vmem>>, %arg7: memref<120x1xf32, #tpu.memory_space<vmem>>, %arg8: memref<84x120xbf16, #tpu.memory_space<vmem>>, %arg9: memref<84x1xf32, #tpu.memory_space<vmem>>, %arg10: memref<84x128xbf16, #tpu.memory_space<vmem>>, %arg11: memref<1x128xf32, #tpu.memory_space<vmem>>, %arg12: memref<8x128xf32, #tpu.memory_space<vmem>>, %arg13: memref<784x48xf32, #tpu.memory_space<vmem>>, %arg14: memref<208x48xf32, #tpu.memory_space<vmem>>, %arg15: memref<144x128xf32, #tpu.memory_space<vmem>>, %arg16: memref<32x128xf32, #tpu.memory_space<vmem>>) attributes {dimension_semantics = [#tpu.dimension_semantics<parallel>], iteration_bounds = array<i64: 2>, scalar_prefetch = 0 : i64, scratch_operands = 4 : i64, tpu.core_type = #tpu.core_type<tc>, window_params = [{transform_indices = @transform_0, window_bounds = array<i64: 1, 784, 600>}, {pipeline_mode = #tpu.pipeline_mode<synchronous>, transform_indices = @transform_1, window_bounds = array<i64: 600, 48>}, {pipeline_mode = #tpu.pipeline_mode<synchronous>, transform_indices = @transform_2, window_bounds = array<i64: 1, 48>}, {pipeline_mode = #tpu.pipeline_mode<synchronous>, transform_indices = @transform_3, window_bounds = array<i64: 25, 48, 128>}, {pipeline_mode = #tpu.pipeline_mode<synchronous>, transform_indices = @transform_4, window_bounds = array<i64: 1, 128>}, {pipeline_mode = #tpu.pipeline_mode<synchronous>, transform_indices = @transform_5, window_bounds = array<i64: 16, 120, 25>}, {pipeline_mode = #tpu.pipeline_mode<synchronous>, transform_indices = @transform_6, window_bounds = array<i64: 120, 1>}, {pipeline_mode = #tpu.pipeline_mode<synchronous>, transform_indices = @transform_7, window_bounds = array<i64: 84, 120>}, {pipeline_mode = #tpu.pipeline_mode<synchronous>, transform_indices = @transform_8, window_bounds = array<i64: 84, 1>}, {pipeline_mode = #tpu.pipeline_mode<synchronous>, transform_indices = @transform_9, window_bounds = array<i64: 84, 128>}, {pipeline_mode = #tpu.pipeline_mode<synchronous>, transform_indices = @transform_10, window_bounds = array<i64: 1, 128>}, {transform_indices = @transform_11, window_bounds = array<i64: 8, 128>}]} {
    %cst = arith.constant 0.000000e+00 : f32
    %0 = vector.broadcast %cst : f32 to vector<208x48xf32>
    %c0 = arith.constant 0 : index
    %c0_0 = arith.constant 0 : index
    %1 = vector.load %arg14[%c0, %c0_0] : memref<208x48xf32, #tpu.memory_space<vmem>>, vector<208x48xf32>
    tpu.vector_store %arg14[%c0, %c0_0], %0 {strides = array<i32>} : memref<208x48xf32, #tpu.memory_space<vmem>>, vector<208x48xf32>,
    %c0_1 = arith.constant 0 : index
    %c0_2 = arith.constant 0 : index
    %c0_3 = arith.constant 0 : index
    %2 = vector.load %arg1[%c0_1, %c0_2, %c0_3] : memref<1x784x600xbf16, #tpu.memory_space<vmem>>, vector<1x392x600xbf16>
    %3 = vector.shape_cast %2 : vector<1x392x600xbf16> to vector<392x600xbf16>
    %c0_4 = arith.constant 0 : index
    %c0_5 = arith.constant 0 : index
    %4 = vector.load %arg2[%c0_4, %c0_5] : memref<600x48xbf16, #tpu.memory_space<vmem>>, vector<600x48xbf16>
    %cst_6 = arith.constant dense<0.000000e+00> : vector<392x48xf32>
    %5 = tpu.matmul %3, %4, %cst_6 {dimension_numbers = #tpu.dot_dimension_numbers<[1], [0], [0], [1], [0, 0, 1, 1], [], []>} : vector<392x600xbf16>, vector<600x48xbf16>, vector<392x48xf32> -> vector<392x48xf32>
    %c0_7 = arith.constant 0 : index
    %c0_8 = arith.constant 0 : index
    %6 = vector.load %arg3[%c0_7, %c0_8] : memref<1x48xf32, #tpu.memory_space<vmem>>, vector<1x48xf32>
    %7 = vector.broadcast %6 : vector<1x48xf32> to vector<392x48xf32>
    %8 = arith.addf %5, %7 : vector<392x48xf32>
    %cst_9 = arith.constant 0.000000e+00 : f32
    %9 = vector.broadcast %cst_9 : f32 to vector<392x48xf32>
    %10 = arith.maximumf %8, %9 : vector<392x48xf32>
    %c0_10 = arith.constant 0 : index
    %c0_11 = arith.constant 0 : index
    %11 = vector.load %arg13[%c0_10, %c0_11] : memref<784x48xf32, #tpu.memory_space<vmem>>, vector<392x48xf32>
    tpu.vector_store %arg13[%c0_10, %c0_11], %10 {strides = array<i32>} : memref<784x48xf32, #tpu.memory_space<vmem>>, vector<392x48xf32>,
    %c0_12 = arith.constant 0 : index
    %c392 = arith.constant 392 : index
    %c0_13 = arith.constant 0 : index
    %12 = vector.load %arg1[%c0_12, %c392, %c0_13] : memref<1x784x600xbf16, #tpu.memory_space<vmem>>, vector<1x392x600xbf16>
    %13 = vector.shape_cast %12 : vector<1x392x600xbf16> to vector<392x600xbf16>
    %c0_14 = arith.constant 0 : index
    %c0_15 = arith.constant 0 : index
    %14 = vector.load %arg2[%c0_14, %c0_15] : memref<600x48xbf16, #tpu.memory_space<vmem>>, vector<600x48xbf16>
    %cst_16 = arith.constant dense<0.000000e+00> : vector<392x48xf32>
    %15 = tpu.matmul %13, %14, %cst_16 {dimension_numbers = #tpu.dot_dimension_numbers<[1], [0], [0], [1], [0, 0, 1, 1], [], []>} : vector<392x600xbf16>, vector<600x48xbf16>, vector<392x48xf32> -> vector<392x48xf32>
    %c0_17 = arith.constant 0 : index
    %c0_18 = arith.constant 0 : index
    %16 = vector.load %arg3[%c0_17, %c0_18] : memref<1x48xf32, #tpu.memory_space<vmem>>, vector<1x48xf32>
    %17 = vector.broadcast %16 : vector<1x48xf32> to vector<392x48xf32>
    %18 = arith.addf %15, %17 : vector<392x48xf32>
    %cst_19 = arith.constant 0.000000e+00 : f32
    %19 = vector.broadcast %cst_19 : f32 to vector<392x48xf32>
    %20 = arith.maximumf %18, %19 : vector<392x48xf32>
    %c392_20 = arith.constant 392 : index
    %c0_21 = arith.constant 0 : index
    %21 = vector.load %arg13[%c392_20, %c0_21] : memref<784x48xf32, #tpu.memory_space<vmem>>, vector<392x48xf32>
    tpu.vector_store %arg13[%c392_20, %c0_21], %20 {strides = array<i32>} : memref<784x48xf32, #tpu.memory_space<vmem>>, vector<392x48xf32>,
    %c0_22 = arith.constant 0 : index
    %c0_23 = arith.constant 0 : index
    %22 = tpu.strided_load %arg13[%c0_22, %c0_23] {strides = array<i32: 2, 1>} : memref<784x48xf32, #tpu.memory_space<vmem>>, vector<14x48xf32>
    %c1 = arith.constant 1 : index
    %c0_24 = arith.constant 0 : index
    %23 = tpu.strided_load %arg13[%c1, %c0_24] {strides = array<i32: 2, 1>} : memref<784x48xf32, #tpu.memory_space<vmem>>, vector<14x48xf32>
    %c28 = arith.constant 28 : index
    %c0_25 = arith.constant 0 : index
    %24 = tpu.strided_load %arg13[%c28, %c0_25] {strides = array<i32: 2, 1>} : memref<784x48xf32, #tpu.memory_space<vmem>>, vector<14x48xf32>
    %c29 = arith.constant 29 : index
    %c0_26 = arith.constant 0 : index
    %25 = tpu.strided_load %arg13[%c29, %c0_26] {strides = array<i32: 2, 1>} : memref<784x48xf32, #tpu.memory_space<vmem>>, vector<14x48xf32>
    %26 = arith.maximumf %22, %23 : vector<14x48xf32>
    %27 = arith.maximumf %24, %25 : vector<14x48xf32>
    %28 = arith.maximumf %26, %27 : vector<14x48xf32>
    %c0_27 = arith.constant 0 : index
    %c0_28 = arith.constant 0 : index
    %29 = vector.load %arg14[%c0_27, %c0_28] : memref<208x48xf32, #tpu.memory_space<vmem>>, vector<14x48xf32>
    tpu.vector_store %arg14[%c0_27, %c0_28], %28 {strides = array<i32>} : memref<208x48xf32, #tpu.memory_space<vmem>>, vector<14x48xf32>,
    %c56 = arith.constant 56 : index
    %c0_29 = arith.constant 0 : index
    %30 = tpu.strided_load %arg13[%c56, %c0_29] {strides = array<i32: 2, 1>} : memref<784x48xf32, #tpu.memory_space<vmem>>, vector<14x48xf32>
    %c57 = arith.constant 57 : index
    %c0_30 = arith.constant 0 : index
    %31 = tpu.strided_load %arg13[%c57, %c0_30] {strides = array<i32: 2, 1>} : memref<784x48xf32, #tpu.memory_space<vmem>>, vector<14x48xf32>
    %c84 = arith.constant 84 : index
    %c0_31 = arith.constant 0 : index
    %32 = tpu.strided_load %arg13[%c84, %c0_31] {strides = array<i32: 2, 1>} : memref<784x48xf32, #tpu.memory_space<vmem>>, vector<14x48xf32>
    %c85 = arith.constant 85 : index
    %c0_32 = arith.constant 0 : index
    %33 = tpu.strided_load %arg13[%c85, %c0_32] {strides = array<i32: 2, 1>} : memref<784x48xf32, #tpu.memory_space<vmem>>, vector<14x48xf32>
    %34 = arith.maximumf %30, %31 : vector<14x48xf32>
    %35 = arith.maximumf %32, %33 : vector<14x48xf32>
    %36 = arith.maximumf %34, %35 : vector<14x48xf32>
    %c14 = arith.constant 14 : index
    %c0_33 = arith.constant 0 : index
    %37 = vector.load %arg14[%c14, %c0_33] : memref<208x48xf32, #tpu.memory_space<vmem>>, vector<14x48xf32>
    tpu.vector_store %arg14[%c14, %c0_33], %36 {strides = array<i32>} : memref<208x48xf32, #tpu.memory_space<vmem>>, vector<14x48xf32>,
    %c112 = arith.constant 112 : index
    %c0_34 = arith.constant 0 : index
    %38 = tpu.strided_load %arg13[%c112, %c0_34] {strides = array<i32: 2, 1>} : memref<784x48xf32, #tpu.memory_space<vmem>>, vector<14x48xf32>
    %c113 = arith.constant 113 : index
    %c0_35 = arith.constant 0 : index
    %39 = tpu.strided_load %arg13[%c113, %c0_35] {strides = array<i32: 2, 1>} : memref<784x48xf32, #tpu.memory_space<vmem>>, vector<14x48xf32>
    %c140 = arith.constant 140 : index
    %c0_36 = arith.constant 0 : index
    %40 = tpu.strided_load %arg13[%c140, %c0_36] {strides = array<i32: 2, 1>} : memref<784x48xf32, #tpu.memory_space<vmem>>, vector<14x48xf32>
    %c141 = arith.constant 141 : index
    %c0_37 = arith.constant 0 : index
    %41 = tpu.strided_load %arg13[%c141, %c0_37] {strides = array<i32: 2, 1>} : memref<784x48xf32, #tpu.memory_space<vmem>>, vector<14x48xf32>
    %42 = arith.maximumf %38, %39 : vector<14x48xf32>
    %43 = arith.maximumf %40, %41 : vector<14x48xf32>
    %44 = arith.maximumf %42, %43 : vector<14x48xf32>
    %c28_38 = arith.constant 28 : index
    %c0_39 = arith.constant 0 : index
    %45 = vector.load %arg14[%c28_38, %c0_39] : memref<208x48xf32, #tpu.memory_space<vmem>>, vector<14x48xf32>
    tpu.vector_store %arg14[%c28_38, %c0_39], %44 {strides = array<i32>} : memref<208x48xf32, #tpu.memory_space<vmem>>, vector<14x48xf32>,
    %c168 = arith.constant 168 : index
    %c0_40 = arith.constant 0 : index
    %46 = tpu.strided_load %arg13[%c168, %c0_40] {strides = array<i32: 2, 1>} : memref<784x48xf32, #tpu.memory_space<vmem>>, vector<14x48xf32>
    %c169 = arith.constant 169 : index
    %c0_41 = arith.constant 0 : index
    %47 = tpu.strided_load %arg13[%c169, %c0_41] {strides = array<i32: 2, 1>} : memref<784x48xf32, #tpu.memory_space<vmem>>, vector<14x48xf32>
    %c196 = arith.constant 196 : index
    %c0_42 = arith.constant 0 : index
    %48 = tpu.strided_load %arg13[%c196, %c0_42] {strides = array<i32: 2, 1>} : memref<784x48xf32, #tpu.memory_space<vmem>>, vector<14x48xf32>
    %c197 = arith.constant 197 : index
    %c0_43 = arith.constant 0 : index
    %49 = tpu.strided_load %arg13[%c197, %c0_43] {strides = array<i32: 2, 1>} : memref<784x48xf32, #tpu.memory_space<vmem>>, vector<14x48xf32>
    %50 = arith.maximumf %46, %47 : vector<14x48xf32>
    %51 = arith.maximumf %48, %49 : vector<14x48xf32>
    %52 = arith.maximumf %50, %51 : vector<14x48xf32>
    %c42 = arith.constant 42 : index
    %c0_44 = arith.constant 0 : index
    %53 = vector.load %arg14[%c42, %c0_44] : memref<208x48xf32, #tpu.memory_space<vmem>>, vector<14x48xf32>
    tpu.vector_store %arg14[%c42, %c0_44], %52 {strides = array<i32>} : memref<208x48xf32, #tpu.memory_space<vmem>>, vector<14x48xf32>,
    %c224 = arith.constant 224 : index
    %c0_45 = arith.constant 0 : index
    %54 = tpu.strided_load %arg13[%c224, %c0_45] {strides = array<i32: 2, 1>} : memref<784x48xf32, #tpu.memory_space<vmem>>, vector<14x48xf32>
    %c225 = arith.constant 225 : index
    %c0_46 = arith.constant 0 : index
    %55 = tpu.strided_load %arg13[%c225, %c0_46] {strides = array<i32: 2, 1>} : memref<784x48xf32, #tpu.memory_space<vmem>>, vector<14x48xf32>
    %c252 = arith.constant 252 : index
    %c0_47 = arith.constant 0 : index
    %56 = tpu.strided_load %arg13[%c252, %c0_47] {strides = array<i32: 2, 1>} : memref<784x48xf32, #tpu.memory_space<vmem>>, vector<14x48xf32>
    %c253 = arith.constant 253 : index
    %c0_48 = arith.constant 0 : index
    %57 = tpu.strided_load %arg13[%c253, %c0_48] {strides = array<i32: 2, 1>} : memref<784x48xf32, #tpu.memory_space<vmem>>, vector<14x48xf32>
    %58 = arith.maximumf %54, %55 : vector<14x48xf32>
    %59 = arith.maximumf %56, %57 : vector<14x48xf32>
    %60 = arith.maximumf %58, %59 : vector<14x48xf32>
    %c56_49 = arith.constant 56 : index
    %c0_50 = arith.constant 0 : index
    %61 = vector.load %arg14[%c56_49, %c0_50] : memref<208x48xf32, #tpu.memory_space<vmem>>, vector<14x48xf32>
    tpu.vector_store %arg14[%c56_49, %c0_50], %60 {strides = array<i32>} : memref<208x48xf32, #tpu.memory_space<vmem>>, vector<14x48xf32>,
    %c280 = arith.constant 280 : index
    %c0_51 = arith.constant 0 : index
    %62 = tpu.strided_load %arg13[%c280, %c0_51] {strides = array<i32: 2, 1>} : memref<784x48xf32, #tpu.memory_space<vmem>>, vector<14x48xf32>
    %c281 = arith.constant 281 : index
    %c0_52 = arith.constant 0 : index
    %63 = tpu.strided_load %arg13[%c281, %c0_52] {strides = array<i32: 2, 1>} : memref<784x48xf32, #tpu.memory_space<vmem>>, vector<14x48xf32>
    %c308 = arith.constant 308 : index
    %c0_53 = arith.constant 0 : index
    %64 = tpu.strided_load %arg13[%c308, %c0_53] {strides = array<i32: 2, 1>} : memref<784x48xf32, #tpu.memory_space<vmem>>, vector<14x48xf32>
    %c309 = arith.constant 309 : index
    %c0_54 = arith.constant 0 : index
    %65 = tpu.strided_load %arg13[%c309, %c0_54] {strides = array<i32: 2, 1>} : memref<784x48xf32, #tpu.memory_space<vmem>>, vector<14x48xf32>
    %66 = arith.maximumf %62, %63 : vector<14x48xf32>
    %67 = arith.maximumf %64, %65 : vector<14x48xf32>
    %68 = arith.maximumf %66, %67 : vector<14x48xf32>
    %c70 = arith.constant 70 : index
    %c0_55 = arith.constant 0 : index
    %69 = vector.load %arg14[%c70, %c0_55] : memref<208x48xf32, #tpu.memory_space<vmem>>, vector<14x48xf32>
    tpu.vector_store %arg14[%c70, %c0_55], %68 {strides = array<i32>} : memref<208x48xf32, #tpu.memory_space<vmem>>, vector<14x48xf32>,
    %c336 = arith.constant 336 : index
    %c0_56 = arith.constant 0 : index
    %70 = tpu.strided_load %arg13[%c336, %c0_56] {strides = array<i32: 2, 1>} : memref<784x48xf32, #tpu.memory_space<vmem>>, vector<14x48xf32>
    %c337 = arith.constant 337 : index
    %c0_57 = arith.constant 0 : index
    %71 = tpu.strided_load %arg13[%c337, %c0_57] {strides = array<i32: 2, 1>} : memref<784x48xf32, #tpu.memory_space<vmem>>, vector<14x48xf32>
    %c364 = arith.constant 364 : index
    %c0_58 = arith.constant 0 : index
    %72 = tpu.strided_load %arg13[%c364, %c0_58] {strides = array<i32: 2, 1>} : memref<784x48xf32, #tpu.memory_space<vmem>>, vector<14x48xf32>
    %c365 = arith.constant 365 : index
    %c0_59 = arith.constant 0 : index
    %73 = tpu.strided_load %arg13[%c365, %c0_59] {strides = array<i32: 2, 1>} : memref<784x48xf32, #tpu.memory_space<vmem>>, vector<14x48xf32>
    %74 = arith.maximumf %70, %71 : vector<14x48xf32>
    %75 = arith.maximumf %72, %73 : vector<14x48xf32>
    %76 = arith.maximumf %74, %75 : vector<14x48xf32>
    %c84_60 = arith.constant 84 : index
    %c0_61 = arith.constant 0 : index
    %77 = vector.load %arg14[%c84_60, %c0_61] : memref<208x48xf32, #tpu.memory_space<vmem>>, vector<14x48xf32>
    tpu.vector_store %arg14[%c84_60, %c0_61], %76 {strides = array<i32>} : memref<208x48xf32, #tpu.memory_space<vmem>>, vector<14x48xf32>,
    %c392_62 = arith.constant 392 : index
    %c0_63 = arith.constant 0 : index
    %78 = tpu.strided_load %arg13[%c392_62, %c0_63] {strides = array<i32: 2, 1>} : memref<784x48xf32, #tpu.memory_space<vmem>>, vector<14x48xf32>
    %c393 = arith.constant 393 : index
    %c0_64 = arith.constant 0 : index
    %79 = tpu.strided_load %arg13[%c393, %c0_64] {strides = array<i32: 2, 1>} : memref<784x48xf32, #tpu.memory_space<vmem>>, vector<14x48xf32>
    %c420 = arith.constant 420 : index
    %c0_65 = arith.constant 0 : index
    %80 = tpu.strided_load %arg13[%c420, %c0_65] {strides = array<i32: 2, 1>} : memref<784x48xf32, #tpu.memory_space<vmem>>, vector<14x48xf32>
    %c421 = arith.constant 421 : index
    %c0_66 = arith.constant 0 : index
    %81 = tpu.strided_load %arg13[%c421, %c0_66] {strides = array<i32: 2, 1>} : memref<784x48xf32, #tpu.memory_space<vmem>>, vector<14x48xf32>
    %82 = arith.maximumf %78, %79 : vector<14x48xf32>
    %83 = arith.maximumf %80, %81 : vector<14x48xf32>
    %84 = arith.maximumf %82, %83 : vector<14x48xf32>
    %c98 = arith.constant 98 : index
    %c0_67 = arith.constant 0 : index
    %85 = vector.load %arg14[%c98, %c0_67] : memref<208x48xf32, #tpu.memory_space<vmem>>, vector<14x48xf32>
    tpu.vector_store %arg14[%c98, %c0_67], %84 {strides = array<i32>} : memref<208x48xf32, #tpu.memory_space<vmem>>, vector<14x48xf32>,
    %c448 = arith.constant 448 : index
    %c0_68 = arith.constant 0 : index
    %86 = tpu.strided_load %arg13[%c448, %c0_68] {strides = array<i32: 2, 1>} : memref<784x48xf32, #tpu.memory_space<vmem>>, vector<14x48xf32>
    %c449 = arith.constant 449 : index
    %c0_69 = arith.constant 0 : index
    %87 = tpu.strided_load %arg13[%c449, %c0_69] {strides = array<i32: 2, 1>} : memref<784x48xf32, #tpu.memory_space<vmem>>, vector<14x48xf32>
    %c476 = arith.constant 476 : index
    %c0_70 = arith.constant 0 : index
    %88 = tpu.strided_load %arg13[%c476, %c0_70] {strides = array<i32: 2, 1>} : memref<784x48xf32, #tpu.memory_space<vmem>>, vector<14x48xf32>
    %c477 = arith.constant 477 : index
    %c0_71 = arith.constant 0 : index
    %89 = tpu.strided_load %arg13[%c477, %c0_71] {strides = array<i32: 2, 1>} : memref<784x48xf32, #tpu.memory_space<vmem>>, vector<14x48xf32>
    %90 = arith.maximumf %86, %87 : vector<14x48xf32>
    %91 = arith.maximumf %88, %89 : vector<14x48xf32>
    %92 = arith.maximumf %90, %91 : vector<14x48xf32>
    %c112_72 = arith.constant 112 : index
    %c0_73 = arith.constant 0 : index
    %93 = vector.load %arg14[%c112_72, %c0_73] : memref<208x48xf32, #tpu.memory_space<vmem>>, vector<14x48xf32>
    tpu.vector_store %arg14[%c112_72, %c0_73], %92 {strides = array<i32>} : memref<208x48xf32, #tpu.memory_space<vmem>>, vector<14x48xf32>,
    %c504 = arith.constant 504 : index
    %c0_74 = arith.constant 0 : index
    %94 = tpu.strided_load %arg13[%c504, %c0_74] {strides = array<i32: 2, 1>} : memref<784x48xf32, #tpu.memory_space<vmem>>, vector<14x48xf32>
    %c505 = arith.constant 505 : index
    %c0_75 = arith.constant 0 : index
    %95 = tpu.strided_load %arg13[%c505, %c0_75] {strides = array<i32: 2, 1>} : memref<784x48xf32, #tpu.memory_space<vmem>>, vector<14x48xf32>
    %c532 = arith.constant 532 : index
    %c0_76 = arith.constant 0 : index
    %96 = tpu.strided_load %arg13[%c532, %c0_76] {strides = array<i32: 2, 1>} : memref<784x48xf32, #tpu.memory_space<vmem>>, vector<14x48xf32>
    %c533 = arith.constant 533 : index
    %c0_77 = arith.constant 0 : index
    %97 = tpu.strided_load %arg13[%c533, %c0_77] {strides = array<i32: 2, 1>} : memref<784x48xf32, #tpu.memory_space<vmem>>, vector<14x48xf32>
    %98 = arith.maximumf %94, %95 : vector<14x48xf32>
    %99 = arith.maximumf %96, %97 : vector<14x48xf32>
    %100 = arith.maximumf %98, %99 : vector<14x48xf32>
    %c126 = arith.constant 126 : index
    %c0_78 = arith.constant 0 : index
    %101 = vector.load %arg14[%c126, %c0_78] : memref<208x48xf32, #tpu.memory_space<vmem>>, vector<14x48xf32>
    tpu.vector_store %arg14[%c126, %c0_78], %100 {strides = array<i32>} : memref<208x48xf32, #tpu.memory_space<vmem>>, vector<14x48xf32>,
    %c560 = arith.constant 560 : index
    %c0_79 = arith.constant 0 : index
    %102 = tpu.strided_load %arg13[%c560, %c0_79] {strides = array<i32: 2, 1>} : memref<784x48xf32, #tpu.memory_space<vmem>>, vector<14x48xf32>
    %c561 = arith.constant 561 : index
    %c0_80 = arith.constant 0 : index
    %103 = tpu.strided_load %arg13[%c561, %c0_80] {strides = array<i32: 2, 1>} : memref<784x48xf32, #tpu.memory_space<vmem>>, vector<14x48xf32>
    %c588 = arith.constant 588 : index
    %c0_81 = arith.constant 0 : index
    %104 = tpu.strided_load %arg13[%c588, %c0_81] {strides = array<i32: 2, 1>} : memref<784x48xf32, #tpu.memory_space<vmem>>, vector<14x48xf32>
    %c589 = arith.constant 589 : index
    %c0_82 = arith.constant 0 : index
    %105 = tpu.strided_load %arg13[%c589, %c0_82] {strides = array<i32: 2, 1>} : memref<784x48xf32, #tpu.memory_space<vmem>>, vector<14x48xf32>
    %106 = arith.maximumf %102, %103 : vector<14x48xf32>
    %107 = arith.maximumf %104, %105 : vector<14x48xf32>
    %108 = arith.maximumf %106, %107 : vector<14x48xf32>
    %c140_83 = arith.constant 140 : index
    %c0_84 = arith.constant 0 : index
    %109 = vector.load %arg14[%c140_83, %c0_84] : memref<208x48xf32, #tpu.memory_space<vmem>>, vector<14x48xf32>
    tpu.vector_store %arg14[%c140_83, %c0_84], %108 {strides = array<i32>} : memref<208x48xf32, #tpu.memory_space<vmem>>, vector<14x48xf32>,
    %c616 = arith.constant 616 : index
    %c0_85 = arith.constant 0 : index
    %110 = tpu.strided_load %arg13[%c616, %c0_85] {strides = array<i32: 2, 1>} : memref<784x48xf32, #tpu.memory_space<vmem>>, vector<14x48xf32>
    %c617 = arith.constant 617 : index
    %c0_86 = arith.constant 0 : index
    %111 = tpu.strided_load %arg13[%c617, %c0_86] {strides = array<i32: 2, 1>} : memref<784x48xf32, #tpu.memory_space<vmem>>, vector<14x48xf32>
    %c644 = arith.constant 644 : index
    %c0_87 = arith.constant 0 : index
    %112 = tpu.strided_load %arg13[%c644, %c0_87] {strides = array<i32: 2, 1>} : memref<784x48xf32, #tpu.memory_space<vmem>>, vector<14x48xf32>
    %c645 = arith.constant 645 : index
    %c0_88 = arith.constant 0 : index
    %113 = tpu.strided_load %arg13[%c645, %c0_88] {strides = array<i32: 2, 1>} : memref<784x48xf32, #tpu.memory_space<vmem>>, vector<14x48xf32>
    %114 = arith.maximumf %110, %111 : vector<14x48xf32>
    %115 = arith.maximumf %112, %113 : vector<14x48xf32>
    %116 = arith.maximumf %114, %115 : vector<14x48xf32>
    %c154 = arith.constant 154 : index
    %c0_89 = arith.constant 0 : index
    %117 = vector.load %arg14[%c154, %c0_89] : memref<208x48xf32, #tpu.memory_space<vmem>>, vector<14x48xf32>
    tpu.vector_store %arg14[%c154, %c0_89], %116 {strides = array<i32>} : memref<208x48xf32, #tpu.memory_space<vmem>>, vector<14x48xf32>,
    %c672 = arith.constant 672 : index
    %c0_90 = arith.constant 0 : index
    %118 = tpu.strided_load %arg13[%c672, %c0_90] {strides = array<i32: 2, 1>} : memref<784x48xf32, #tpu.memory_space<vmem>>, vector<14x48xf32>
    %c673 = arith.constant 673 : index
    %c0_91 = arith.constant 0 : index
    %119 = tpu.strided_load %arg13[%c673, %c0_91] {strides = array<i32: 2, 1>} : memref<784x48xf32, #tpu.memory_space<vmem>>, vector<14x48xf32>
    %c700 = arith.constant 700 : index
    %c0_92 = arith.constant 0 : index
    %120 = tpu.strided_load %arg13[%c700, %c0_92] {strides = array<i32: 2, 1>} : memref<784x48xf32, #tpu.memory_space<vmem>>, vector<14x48xf32>
    %c701 = arith.constant 701 : index
    %c0_93 = arith.constant 0 : index
    %121 = tpu.strided_load %arg13[%c701, %c0_93] {strides = array<i32: 2, 1>} : memref<784x48xf32, #tpu.memory_space<vmem>>, vector<14x48xf32>
    %122 = arith.maximumf %118, %119 : vector<14x48xf32>
    %123 = arith.maximumf %120, %121 : vector<14x48xf32>
    %124 = arith.maximumf %122, %123 : vector<14x48xf32>
    %c168_94 = arith.constant 168 : index
    %c0_95 = arith.constant 0 : index
    %125 = vector.load %arg14[%c168_94, %c0_95] : memref<208x48xf32, #tpu.memory_space<vmem>>, vector<14x48xf32>
    tpu.vector_store %arg14[%c168_94, %c0_95], %124 {strides = array<i32>} : memref<208x48xf32, #tpu.memory_space<vmem>>, vector<14x48xf32>,
    %c728 = arith.constant 728 : index
    %c0_96 = arith.constant 0 : index
    %126 = tpu.strided_load %arg13[%c728, %c0_96] {strides = array<i32: 2, 1>} : memref<784x48xf32, #tpu.memory_space<vmem>>, vector<14x48xf32>
    %c729 = arith.constant 729 : index
    %c0_97 = arith.constant 0 : index
    %127 = tpu.strided_load %arg13[%c729, %c0_97] {strides = array<i32: 2, 1>} : memref<784x48xf32, #tpu.memory_space<vmem>>, vector<14x48xf32>
    %c756 = arith.constant 756 : index
    %c0_98 = arith.constant 0 : index
    %128 = tpu.strided_load %arg13[%c756, %c0_98] {strides = array<i32: 2, 1>} : memref<784x48xf32, #tpu.memory_space<vmem>>, vector<14x48xf32>
    %c757 = arith.constant 757 : index
    %c0_99 = arith.constant 0 : index
    %129 = tpu.strided_load %arg13[%c757, %c0_99] {strides = array<i32: 2, 1>} : memref<784x48xf32, #tpu.memory_space<vmem>>, vector<14x48xf32>
    %130 = arith.maximumf %126, %127 : vector<14x48xf32>
    %131 = arith.maximumf %128, %129 : vector<14x48xf32>
    %132 = arith.maximumf %130, %131 : vector<14x48xf32>
    %c182 = arith.constant 182 : index
    %c0_100 = arith.constant 0 : index
    %133 = vector.load %arg14[%c182, %c0_100] : memref<208x48xf32, #tpu.memory_space<vmem>>, vector<14x48xf32>
    tpu.vector_store %arg14[%c182, %c0_100], %132 {strides = array<i32>} : memref<208x48xf32, #tpu.memory_space<vmem>>, vector<14x48xf32>,
    %cst_101 = arith.constant 0.000000e+00 : f32
    %134 = vector.broadcast %cst_101 : f32 to vector<140x128xf32>
    %c0_102 = arith.constant 0 : index
    %c0_103 = arith.constant 0 : index
    %135 = vector.load %arg14[%c0_102, %c0_103] : memref<208x48xf32, #tpu.memory_space<vmem>>, vector<140x48xf32>
    %136 = arith.truncf %135 : vector<140x48xf32> to vector<140x48xbf16>
    %c0_104 = arith.constant 0 : index
    %c0_105 = arith.constant 0 : index
    %c0_106 = arith.constant 0 : index
    %137 = vector.load %arg4[%c0_104, %c0_105, %c0_106] : memref<25x48x128xbf16, #tpu.memory_space<vmem>>, vector<1x48x128xbf16>
    %138 = vector.shape_cast %137 : vector<1x48x128xbf16> to vector<48x128xbf16>
    %cst_107 = arith.constant dense<0.000000e+00> : vector<140x128xf32>
    %139 = tpu.matmul %136, %138, %cst_107 {dimension_numbers = #tpu.dot_dimension_numbers<[1], [0], [0], [1], [0, 0, 1, 1], [], []>} : vector<140x48xbf16>, vector<48x128xbf16>, vector<140x128xf32> -> vector<140x128xf32>
    %140 = arith.addf %134, %139 : vector<140x128xf32>
    %c1_108 = arith.constant 1 : index
    %c0_109 = arith.constant 0 : index
    %141 = vector.load %arg14[%c1_108, %c0_109] : memref<208x48xf32, #tpu.memory_space<vmem>>, vector<140x48xf32>
    %142 = arith.truncf %141 : vector<140x48xf32> to vector<140x48xbf16>
    %c1_110 = arith.constant 1 : index
    %c0_111 = arith.constant 0 : index
    %c0_112 = arith.constant 0 : index
    %143 = vector.load %arg4[%c1_110, %c0_111, %c0_112] : memref<25x48x128xbf16, #tpu.memory_space<vmem>>, vector<1x48x128xbf16>
    %144 = vector.shape_cast %143 : vector<1x48x128xbf16> to vector<48x128xbf16>
    %cst_113 = arith.constant dense<0.000000e+00> : vector<140x128xf32>
    %145 = tpu.matmul %142, %144, %cst_113 {dimension_numbers = #tpu.dot_dimension_numbers<[1], [0], [0], [1], [0, 0, 1, 1], [], []>} : vector<140x48xbf16>, vector<48x128xbf16>, vector<140x128xf32> -> vector<140x128xf32>
    %146 = arith.addf %140, %145 : vector<140x128xf32>
    %c2 = arith.constant 2 : index
    %c0_114 = arith.constant 0 : index
    %147 = vector.load %arg14[%c2, %c0_114] : memref<208x48xf32, #tpu.memory_space<vmem>>, vector<140x48xf32>
    %148 = arith.truncf %147 : vector<140x48xf32> to vector<140x48xbf16>
    %c2_115 = arith.constant 2 : index
    %c0_116 = arith.constant 0 : index
    %c0_117 = arith.constant 0 : index
    %149 = vector.load %arg4[%c2_115, %c0_116, %c0_117] : memref<25x48x128xbf16, #tpu.memory_space<vmem>>, vector<1x48x128xbf16>
    %150 = vector.shape_cast %149 : vector<1x48x128xbf16> to vector<48x128xbf16>
    %cst_118 = arith.constant dense<0.000000e+00> : vector<140x128xf32>
    %151 = tpu.matmul %148, %150, %cst_118 {dimension_numbers = #tpu.dot_dimension_numbers<[1], [0], [0], [1], [0, 0, 1, 1], [], []>} : vector<140x48xbf16>, vector<48x128xbf16>, vector<140x128xf32> -> vector<140x128xf32>
    %152 = arith.addf %146, %151 : vector<140x128xf32>
    %c3 = arith.constant 3 : index
    %c0_119 = arith.constant 0 : index
    %153 = vector.load %arg14[%c3, %c0_119] : memref<208x48xf32, #tpu.memory_space<vmem>>, vector<140x48xf32>
    %154 = arith.truncf %153 : vector<140x48xf32> to vector<140x48xbf16>
    %c3_120 = arith.constant 3 : index
    %c0_121 = arith.constant 0 : index
    %c0_122 = arith.constant 0 : index
    %155 = vector.load %arg4[%c3_120, %c0_121, %c0_122] : memref<25x48x128xbf16, #tpu.memory_space<vmem>>, vector<1x48x128xbf16>
    %156 = vector.shape_cast %155 : vector<1x48x128xbf16> to vector<48x128xbf16>
    %cst_123 = arith.constant dense<0.000000e+00> : vector<140x128xf32>
    %157 = tpu.matmul %154, %156, %cst_123 {dimension_numbers = #tpu.dot_dimension_numbers<[1], [0], [0], [1], [0, 0, 1, 1], [], []>} : vector<140x48xbf16>, vector<48x128xbf16>, vector<140x128xf32> -> vector<140x128xf32>
    %158 = arith.addf %152, %157 : vector<140x128xf32>
    %c4 = arith.constant 4 : index
    %c0_124 = arith.constant 0 : index
    %159 = vector.load %arg14[%c4, %c0_124] : memref<208x48xf32, #tpu.memory_space<vmem>>, vector<140x48xf32>
    %160 = arith.truncf %159 : vector<140x48xf32> to vector<140x48xbf16>
    %c4_125 = arith.constant 4 : index
    %c0_126 = arith.constant 0 : index
    %c0_127 = arith.constant 0 : index
    %161 = vector.load %arg4[%c4_125, %c0_126, %c0_127] : memref<25x48x128xbf16, #tpu.memory_space<vmem>>, vector<1x48x128xbf16>
    %162 = vector.shape_cast %161 : vector<1x48x128xbf16> to vector<48x128xbf16>
    %cst_128 = arith.constant dense<0.000000e+00> : vector<140x128xf32>
    %163 = tpu.matmul %160, %162, %cst_128 {dimension_numbers = #tpu.dot_dimension_numbers<[1], [0], [0], [1], [0, 0, 1, 1], [], []>} : vector<140x48xbf16>, vector<48x128xbf16>, vector<140x128xf32> -> vector<140x128xf32>
    %164 = arith.addf %158, %163 : vector<140x128xf32>
    %c14_129 = arith.constant 14 : index
    %c0_130 = arith.constant 0 : index
    %165 = vector.load %arg14[%c14_129, %c0_130] : memref<208x48xf32, #tpu.memory_space<vmem>>, vector<140x48xf32>
    %166 = arith.truncf %165 : vector<140x48xf32> to vector<140x48xbf16>
    %c5 = arith.constant 5 : index
    %c0_131 = arith.constant 0 : index
    %c0_132 = arith.constant 0 : index
    %167 = vector.load %arg4[%c5, %c0_131, %c0_132] : memref<25x48x128xbf16, #tpu.memory_space<vmem>>, vector<1x48x128xbf16>
    %168 = vector.shape_cast %167 : vector<1x48x128xbf16> to vector<48x128xbf16>
    %cst_133 = arith.constant dense<0.000000e+00> : vector<140x128xf32>
    %169 = tpu.matmul %166, %168, %cst_133 {dimension_numbers = #tpu.dot_dimension_numbers<[1], [0], [0], [1], [0, 0, 1, 1], [], []>} : vector<140x48xbf16>, vector<48x128xbf16>, vector<140x128xf32> -> vector<140x128xf32>
    %170 = arith.addf %164, %169 : vector<140x128xf32>
    %c15 = arith.constant 15 : index
    %c0_134 = arith.constant 0 : index
    %171 = vector.load %arg14[%c15, %c0_134] : memref<208x48xf32, #tpu.memory_space<vmem>>, vector<140x48xf32>
    %172 = arith.truncf %171 : vector<140x48xf32> to vector<140x48xbf16>
    %c6 = arith.constant 6 : index
    %c0_135 = arith.constant 0 : index
    %c0_136 = arith.constant 0 : index
    %173 = vector.load %arg4[%c6, %c0_135, %c0_136] : memref<25x48x128xbf16, #tpu.memory_space<vmem>>, vector<1x48x128xbf16>
    %174 = vector.shape_cast %173 : vector<1x48x128xbf16> to vector<48x128xbf16>
    %cst_137 = arith.constant dense<0.000000e+00> : vector<140x128xf32>
    %175 = tpu.matmul %172, %174, %cst_137 {dimension_numbers = #tpu.dot_dimension_numbers<[1], [0], [0], [1], [0, 0, 1, 1], [], []>} : vector<140x48xbf16>, vector<48x128xbf16>, vector<140x128xf32> -> vector<140x128xf32>
    %176 = arith.addf %170, %175 : vector<140x128xf32>
    %c16 = arith.constant 16 : index
    %c0_138 = arith.constant 0 : index
    %177 = vector.load %arg14[%c16, %c0_138] : memref<208x48xf32, #tpu.memory_space<vmem>>, vector<140x48xf32>
    %178 = arith.truncf %177 : vector<140x48xf32> to vector<140x48xbf16>
    %c7 = arith.constant 7 : index
    %c0_139 = arith.constant 0 : index
    %c0_140 = arith.constant 0 : index
    %179 = vector.load %arg4[%c7, %c0_139, %c0_140] : memref<25x48x128xbf16, #tpu.memory_space<vmem>>, vector<1x48x128xbf16>
    %180 = vector.shape_cast %179 : vector<1x48x128xbf16> to vector<48x128xbf16>
    %cst_141 = arith.constant dense<0.000000e+00> : vector<140x128xf32>
    %181 = tpu.matmul %178, %180, %cst_141 {dimension_numbers = #tpu.dot_dimension_numbers<[1], [0], [0], [1], [0, 0, 1, 1], [], []>} : vector<140x48xbf16>, vector<48x128xbf16>, vector<140x128xf32> -> vector<140x128xf32>
    %182 = arith.addf %176, %181 : vector<140x128xf32>
    %c17 = arith.constant 17 : index
    %c0_142 = arith.constant 0 : index
    %183 = vector.load %arg14[%c17, %c0_142] : memref<208x48xf32, #tpu.memory_space<vmem>>, vector<140x48xf32>
    %184 = arith.truncf %183 : vector<140x48xf32> to vector<140x48xbf16>
    %c8 = arith.constant 8 : index
    %c0_143 = arith.constant 0 : index
    %c0_144 = arith.constant 0 : index
    %185 = vector.load %arg4[%c8, %c0_143, %c0_144] : memref<25x48x128xbf16, #tpu.memory_space<vmem>>, vector<1x48x128xbf16>
    %186 = vector.shape_cast %185 : vector<1x48x128xbf16> to vector<48x128xbf16>
    %cst_145 = arith.constant dense<0.000000e+00> : vector<140x128xf32>
    %187 = tpu.matmul %184, %186, %cst_145 {dimension_numbers = #tpu.dot_dimension_numbers<[1], [0], [0], [1], [0, 0, 1, 1], [], []>} : vector<140x48xbf16>, vector<48x128xbf16>, vector<140x128xf32> -> vector<140x128xf32>
    %188 = arith.addf %182, %187 : vector<140x128xf32>
    %c18 = arith.constant 18 : index
    %c0_146 = arith.constant 0 : index
    %189 = vector.load %arg14[%c18, %c0_146] : memref<208x48xf32, #tpu.memory_space<vmem>>, vector<140x48xf32>
    %190 = arith.truncf %189 : vector<140x48xf32> to vector<140x48xbf16>
    %c9 = arith.constant 9 : index
    %c0_147 = arith.constant 0 : index
    %c0_148 = arith.constant 0 : index
    %191 = vector.load %arg4[%c9, %c0_147, %c0_148] : memref<25x48x128xbf16, #tpu.memory_space<vmem>>, vector<1x48x128xbf16>
    %192 = vector.shape_cast %191 : vector<1x48x128xbf16> to vector<48x128xbf16>
    %cst_149 = arith.constant dense<0.000000e+00> : vector<140x128xf32>
    %193 = tpu.matmul %190, %192, %cst_149 {dimension_numbers = #tpu.dot_dimension_numbers<[1], [0], [0], [1], [0, 0, 1, 1], [], []>} : vector<140x48xbf16>, vector<48x128xbf16>, vector<140x128xf32> -> vector<140x128xf32>
    %194 = arith.addf %188, %193 : vector<140x128xf32>
    %c28_150 = arith.constant 28 : index
    %c0_151 = arith.constant 0 : index
    %195 = vector.load %arg14[%c28_150, %c0_151] : memref<208x48xf32, #tpu.memory_space<vmem>>, vector<140x48xf32>
    %196 = arith.truncf %195 : vector<140x48xf32> to vector<140x48xbf16>
    %c10 = arith.constant 10 : index
    %c0_152 = arith.constant 0 : index
    %c0_153 = arith.constant 0 : index
    %197 = vector.load %arg4[%c10, %c0_152, %c0_153] : memref<25x48x128xbf16, #tpu.memory_space<vmem>>, vector<1x48x128xbf16>
    %198 = vector.shape_cast %197 : vector<1x48x128xbf16> to vector<48x128xbf16>
    %cst_154 = arith.constant dense<0.000000e+00> : vector<140x128xf32>
    %199 = tpu.matmul %196, %198, %cst_154 {dimension_numbers = #tpu.dot_dimension_numbers<[1], [0], [0], [1], [0, 0, 1, 1], [], []>} : vector<140x48xbf16>, vector<48x128xbf16>, vector<140x128xf32> -> vector<140x128xf32>
    %200 = arith.addf %194, %199 : vector<140x128xf32>
    %c29_155 = arith.constant 29 : index
    %c0_156 = arith.constant 0 : index
    %201 = vector.load %arg14[%c29_155, %c0_156] : memref<208x48xf32, #tpu.memory_space<vmem>>, vector<140x48xf32>
    %202 = arith.truncf %201 : vector<140x48xf32> to vector<140x48xbf16>
    %c11 = arith.constant 11 : index
    %c0_157 = arith.constant 0 : index
    %c0_158 = arith.constant 0 : index
    %203 = vector.load %arg4[%c11, %c0_157, %c0_158] : memref<25x48x128xbf16, #tpu.memory_space<vmem>>, vector<1x48x128xbf16>
    %204 = vector.shape_cast %203 : vector<1x48x128xbf16> to vector<48x128xbf16>
    %cst_159 = arith.constant dense<0.000000e+00> : vector<140x128xf32>
    %205 = tpu.matmul %202, %204, %cst_159 {dimension_numbers = #tpu.dot_dimension_numbers<[1], [0], [0], [1], [0, 0, 1, 1], [], []>} : vector<140x48xbf16>, vector<48x128xbf16>, vector<140x128xf32> -> vector<140x128xf32>
    %206 = arith.addf %200, %205 : vector<140x128xf32>
    %c30 = arith.constant 30 : index
    %c0_160 = arith.constant 0 : index
    %207 = vector.load %arg14[%c30, %c0_160] : memref<208x48xf32, #tpu.memory_space<vmem>>, vector<140x48xf32>
    %208 = arith.truncf %207 : vector<140x48xf32> to vector<140x48xbf16>
    %c12 = arith.constant 12 : index
    %c0_161 = arith.constant 0 : index
    %c0_162 = arith.constant 0 : index
    %209 = vector.load %arg4[%c12, %c0_161, %c0_162] : memref<25x48x128xbf16, #tpu.memory_space<vmem>>, vector<1x48x128xbf16>
    %210 = vector.shape_cast %209 : vector<1x48x128xbf16> to vector<48x128xbf16>
    %cst_163 = arith.constant dense<0.000000e+00> : vector<140x128xf32>
    %211 = tpu.matmul %208, %210, %cst_163 {dimension_numbers = #tpu.dot_dimension_numbers<[1], [0], [0], [1], [0, 0, 1, 1], [], []>} : vector<140x48xbf16>, vector<48x128xbf16>, vector<140x128xf32> -> vector<140x128xf32>
    %212 = arith.addf %206, %211 : vector<140x128xf32>
    %c31 = arith.constant 31 : index
    %c0_164 = arith.constant 0 : index
    %213 = vector.load %arg14[%c31, %c0_164] : memref<208x48xf32, #tpu.memory_space<vmem>>, vector<140x48xf32>
    %214 = arith.truncf %213 : vector<140x48xf32> to vector<140x48xbf16>
    %c13 = arith.constant 13 : index
    %c0_165 = arith.constant 0 : index
    %c0_166 = arith.constant 0 : index
    %215 = vector.load %arg4[%c13, %c0_165, %c0_166] : memref<25x48x128xbf16, #tpu.memory_space<vmem>>, vector<1x48x128xbf16>
    %216 = vector.shape_cast %215 : vector<1x48x128xbf16> to vector<48x128xbf16>
    %cst_167 = arith.constant dense<0.000000e+00> : vector<140x128xf32>
    %217 = tpu.matmul %214, %216, %cst_167 {dimension_numbers = #tpu.dot_dimension_numbers<[1], [0], [0], [1], [0, 0, 1, 1], [], []>} : vector<140x48xbf16>, vector<48x128xbf16>, vector<140x128xf32> -> vector<140x128xf32>
    %218 = arith.addf %212, %217 : vector<140x128xf32>
    %c32 = arith.constant 32 : index
    %c0_168 = arith.constant 0 : index
    %219 = vector.load %arg14[%c32, %c0_168] : memref<208x48xf32, #tpu.memory_space<vmem>>, vector<140x48xf32>
    %220 = arith.truncf %219 : vector<140x48xf32> to vector<140x48xbf16>
    %c14_169 = arith.constant 14 : index
    %c0_170 = arith.constant 0 : index
    %c0_171 = arith.constant 0 : index
    %221 = vector.load %arg4[%c14_169, %c0_170, %c0_171] : memref<25x48x128xbf16, #tpu.memory_space<vmem>>, vector<1x48x128xbf16>
    %222 = vector.shape_cast %221 : vector<1x48x128xbf16> to vector<48x128xbf16>
    %cst_172 = arith.constant dense<0.000000e+00> : vector<140x128xf32>
    %223 = tpu.matmul %220, %222, %cst_172 {dimension_numbers = #tpu.dot_dimension_numbers<[1], [0], [0], [1], [0, 0, 1, 1], [], []>} : vector<140x48xbf16>, vector<48x128xbf16>, vector<140x128xf32> -> vector<140x128xf32>
    %224 = arith.addf %218, %223 : vector<140x128xf32>
    %c42_173 = arith.constant 42 : index
    %c0_174 = arith.constant 0 : index
    %225 = vector.load %arg14[%c42_173, %c0_174] : memref<208x48xf32, #tpu.memory_space<vmem>>, vector<140x48xf32>
    %226 = arith.truncf %225 : vector<140x48xf32> to vector<140x48xbf16>
    %c15_175 = arith.constant 15 : index
    %c0_176 = arith.constant 0 : index
    %c0_177 = arith.constant 0 : index
    %227 = vector.load %arg4[%c15_175, %c0_176, %c0_177] : memref<25x48x128xbf16, #tpu.memory_space<vmem>>, vector<1x48x128xbf16>
    %228 = vector.shape_cast %227 : vector<1x48x128xbf16> to vector<48x128xbf16>
    %cst_178 = arith.constant dense<0.000000e+00> : vector<140x128xf32>
    %229 = tpu.matmul %226, %228, %cst_178 {dimension_numbers = #tpu.dot_dimension_numbers<[1], [0], [0], [1], [0, 0, 1, 1], [], []>} : vector<140x48xbf16>, vector<48x128xbf16>, vector<140x128xf32> -> vector<140x128xf32>
    %230 = arith.addf %224, %229 : vector<140x128xf32>
    %c43 = arith.constant 43 : index
    %c0_179 = arith.constant 0 : index
    %231 = vector.load %arg14[%c43, %c0_179] : memref<208x48xf32, #tpu.memory_space<vmem>>, vector<140x48xf32>
    %232 = arith.truncf %231 : vector<140x48xf32> to vector<140x48xbf16>
    %c16_180 = arith.constant 16 : index
    %c0_181 = arith.constant 0 : index
    %c0_182 = arith.constant 0 : index
    %233 = vector.load %arg4[%c16_180, %c0_181, %c0_182] : memref<25x48x128xbf16, #tpu.memory_space<vmem>>, vector<1x48x128xbf16>
    %234 = vector.shape_cast %233 : vector<1x48x128xbf16> to vector<48x128xbf16>
    %cst_183 = arith.constant dense<0.000000e+00> : vector<140x128xf32>
    %235 = tpu.matmul %232, %234, %cst_183 {dimension_numbers = #tpu.dot_dimension_numbers<[1], [0], [0], [1], [0, 0, 1, 1], [], []>} : vector<140x48xbf16>, vector<48x128xbf16>, vector<140x128xf32> -> vector<140x128xf32>
    %236 = arith.addf %230, %235 : vector<140x128xf32>
    %c44 = arith.constant 44 : index
    %c0_184 = arith.constant 0 : index
    %237 = vector.load %arg14[%c44, %c0_184] : memref<208x48xf32, #tpu.memory_space<vmem>>, vector<140x48xf32>
    %238 = arith.truncf %237 : vector<140x48xf32> to vector<140x48xbf16>
    %c17_185 = arith.constant 17 : index
    %c0_186 = arith.constant 0 : index
    %c0_187 = arith.constant 0 : index
    %239 = vector.load %arg4[%c17_185, %c0_186, %c0_187] : memref<25x48x128xbf16, #tpu.memory_space<vmem>>, vector<1x48x128xbf16>
    %240 = vector.shape_cast %239 : vector<1x48x128xbf16> to vector<48x128xbf16>
    %cst_188 = arith.constant dense<0.000000e+00> : vector<140x128xf32>
    %241 = tpu.matmul %238, %240, %cst_188 {dimension_numbers = #tpu.dot_dimension_numbers<[1], [0], [0], [1], [0, 0, 1, 1], [], []>} : vector<140x48xbf16>, vector<48x128xbf16>, vector<140x128xf32> -> vector<140x128xf32>
    %242 = arith.addf %236, %241 : vector<140x128xf32>
    %c45 = arith.constant 45 : index
    %c0_189 = arith.constant 0 : index
    %243 = vector.load %arg14[%c45, %c0_189] : memref<208x48xf32, #tpu.memory_space<vmem>>, vector<140x48xf32>
    %244 = arith.truncf %243 : vector<140x48xf32> to vector<140x48xbf16>
    %c18_190 = arith.constant 18 : index
    %c0_191 = arith.constant 0 : index
    %c0_192 = arith.constant 0 : index
    %245 = vector.load %arg4[%c18_190, %c0_191, %c0_192] : memref<25x48x128xbf16, #tpu.memory_space<vmem>>, vector<1x48x128xbf16>
    %246 = vector.shape_cast %245 : vector<1x48x128xbf16> to vector<48x128xbf16>
    %cst_193 = arith.constant dense<0.000000e+00> : vector<140x128xf32>
    %247 = tpu.matmul %244, %246, %cst_193 {dimension_numbers = #tpu.dot_dimension_numbers<[1], [0], [0], [1], [0, 0, 1, 1], [], []>} : vector<140x48xbf16>, vector<48x128xbf16>, vector<140x128xf32> -> vector<140x128xf32>
    %248 = arith.addf %242, %247 : vector<140x128xf32>
    %c46 = arith.constant 46 : index
    %c0_194 = arith.constant 0 : index
    %249 = vector.load %arg14[%c46, %c0_194] : memref<208x48xf32, #tpu.memory_space<vmem>>, vector<140x48xf32>
    %250 = arith.truncf %249 : vector<140x48xf32> to vector<140x48xbf16>
    %c19 = arith.constant 19 : index
    %c0_195 = arith.constant 0 : index
    %c0_196 = arith.constant 0 : index
    %251 = vector.load %arg4[%c19, %c0_195, %c0_196] : memref<25x48x128xbf16, #tpu.memory_space<vmem>>, vector<1x48x128xbf16>
    %252 = vector.shape_cast %251 : vector<1x48x128xbf16> to vector<48x128xbf16>
    %cst_197 = arith.constant dense<0.000000e+00> : vector<140x128xf32>
    %253 = tpu.matmul %250, %252, %cst_197 {dimension_numbers = #tpu.dot_dimension_numbers<[1], [0], [0], [1], [0, 0, 1, 1], [], []>} : vector<140x48xbf16>, vector<48x128xbf16>, vector<140x128xf32> -> vector<140x128xf32>
    %254 = arith.addf %248, %253 : vector<140x128xf32>
    %c56_198 = arith.constant 56 : index
    %c0_199 = arith.constant 0 : index
    %255 = vector.load %arg14[%c56_198, %c0_199] : memref<208x48xf32, #tpu.memory_space<vmem>>, vector<140x48xf32>
    %256 = arith.truncf %255 : vector<140x48xf32> to vector<140x48xbf16>
    %c20 = arith.constant 20 : index
    %c0_200 = arith.constant 0 : index
    %c0_201 = arith.constant 0 : index
    %257 = vector.load %arg4[%c20, %c0_200, %c0_201] : memref<25x48x128xbf16, #tpu.memory_space<vmem>>, vector<1x48x128xbf16>
    %258 = vector.shape_cast %257 : vector<1x48x128xbf16> to vector<48x128xbf16>
    %cst_202 = arith.constant dense<0.000000e+00> : vector<140x128xf32>
    %259 = tpu.matmul %256, %258, %cst_202 {dimension_numbers = #tpu.dot_dimension_numbers<[1], [0], [0], [1], [0, 0, 1, 1], [], []>} : vector<140x48xbf16>, vector<48x128xbf16>, vector<140x128xf32> -> vector<140x128xf32>
    %260 = arith.addf %254, %259 : vector<140x128xf32>
    %c57_203 = arith.constant 57 : index
    %c0_204 = arith.constant 0 : index
    %261 = vector.load %arg14[%c57_203, %c0_204] : memref<208x48xf32, #tpu.memory_space<vmem>>, vector<140x48xf32>
    %262 = arith.truncf %261 : vector<140x48xf32> to vector<140x48xbf16>
    %c21 = arith.constant 21 : index
    %c0_205 = arith.constant 0 : index
    %c0_206 = arith.constant 0 : index
    %263 = vector.load %arg4[%c21, %c0_205, %c0_206] : memref<25x48x128xbf16, #tpu.memory_space<vmem>>, vector<1x48x128xbf16>
    %264 = vector.shape_cast %263 : vector<1x48x128xbf16> to vector<48x128xbf16>
    %cst_207 = arith.constant dense<0.000000e+00> : vector<140x128xf32>
    %265 = tpu.matmul %262, %264, %cst_207 {dimension_numbers = #tpu.dot_dimension_numbers<[1], [0], [0], [1], [0, 0, 1, 1], [], []>} : vector<140x48xbf16>, vector<48x128xbf16>, vector<140x128xf32> -> vector<140x128xf32>
    %266 = arith.addf %260, %265 : vector<140x128xf32>
    %c58 = arith.constant 58 : index
    %c0_208 = arith.constant 0 : index
    %267 = vector.load %arg14[%c58, %c0_208] : memref<208x48xf32, #tpu.memory_space<vmem>>, vector<140x48xf32>
    %268 = arith.truncf %267 : vector<140x48xf32> to vector<140x48xbf16>
    %c22 = arith.constant 22 : index
    %c0_209 = arith.constant 0 : index
    %c0_210 = arith.constant 0 : index
    %269 = vector.load %arg4[%c22, %c0_209, %c0_210] : memref<25x48x128xbf16, #tpu.memory_space<vmem>>, vector<1x48x128xbf16>
    %270 = vector.shape_cast %269 : vector<1x48x128xbf16> to vector<48x128xbf16>
    %cst_211 = arith.constant dense<0.000000e+00> : vector<140x128xf32>
    %271 = tpu.matmul %268, %270, %cst_211 {dimension_numbers = #tpu.dot_dimension_numbers<[1], [0], [0], [1], [0, 0, 1, 1], [], []>} : vector<140x48xbf16>, vector<48x128xbf16>, vector<140x128xf32> -> vector<140x128xf32>
    %272 = arith.addf %266, %271 : vector<140x128xf32>
    %c59 = arith.constant 59 : index
    %c0_212 = arith.constant 0 : index
    %273 = vector.load %arg14[%c59, %c0_212] : memref<208x48xf32, #tpu.memory_space<vmem>>, vector<140x48xf32>
    %274 = arith.truncf %273 : vector<140x48xf32> to vector<140x48xbf16>
    %c23 = arith.constant 23 : index
    %c0_213 = arith.constant 0 : index
    %c0_214 = arith.constant 0 : index
    %275 = vector.load %arg4[%c23, %c0_213, %c0_214] : memref<25x48x128xbf16, #tpu.memory_space<vmem>>, vector<1x48x128xbf16>
    %276 = vector.shape_cast %275 : vector<1x48x128xbf16> to vector<48x128xbf16>
    %cst_215 = arith.constant dense<0.000000e+00> : vector<140x128xf32>
    %277 = tpu.matmul %274, %276, %cst_215 {dimension_numbers = #tpu.dot_dimension_numbers<[1], [0], [0], [1], [0, 0, 1, 1], [], []>} : vector<140x48xbf16>, vector<48x128xbf16>, vector<140x128xf32> -> vector<140x128xf32>
    %278 = arith.addf %272, %277 : vector<140x128xf32>
    %c60 = arith.constant 60 : index
    %c0_216 = arith.constant 0 : index
    %279 = vector.load %arg14[%c60, %c0_216] : memref<208x48xf32, #tpu.memory_space<vmem>>, vector<140x48xf32>
    %280 = arith.truncf %279 : vector<140x48xf32> to vector<140x48xbf16>
    %c24 = arith.constant 24 : index
    %c0_217 = arith.constant 0 : index
    %c0_218 = arith.constant 0 : index
    %281 = vector.load %arg4[%c24, %c0_217, %c0_218] : memref<25x48x128xbf16, #tpu.memory_space<vmem>>, vector<1x48x128xbf16>
    %282 = vector.shape_cast %281 : vector<1x48x128xbf16> to vector<48x128xbf16>
    %cst_219 = arith.constant dense<0.000000e+00> : vector<140x128xf32>
    %283 = tpu.matmul %280, %282, %cst_219 {dimension_numbers = #tpu.dot_dimension_numbers<[1], [0], [0], [1], [0, 0, 1, 1], [], []>} : vector<140x48xbf16>, vector<48x128xbf16>, vector<140x128xf32> -> vector<140x128xf32>
    %284 = arith.addf %278, %283 : vector<140x128xf32>
    %c0_220 = arith.constant 0 : index
    %c0_221 = arith.constant 0 : index
    %285 = vector.load %arg5[%c0_220, %c0_221] : memref<1x128xf32, #tpu.memory_space<vmem>>, vector<1x128xf32>
    %286 = vector.broadcast %285 : vector<1x128xf32> to vector<140x128xf32>
    %287 = arith.addf %284, %286 : vector<140x128xf32>
    %cst_222 = arith.constant 0.000000e+00 : f32
    %288 = vector.broadcast %cst_222 : f32 to vector<140x128xf32>
    %289 = arith.maximumf %287, %288 : vector<140x128xf32>
    %c0_223 = arith.constant 0 : index
    %c0_224 = arith.constant 0 : index
    %290 = vector.load %arg15[%c0_223, %c0_224] : memref<144x128xf32, #tpu.memory_space<vmem>>, vector<140x128xf32>
    tpu.vector_store %arg15[%c0_223, %c0_224], %289 {strides = array<i32>} : memref<144x128xf32, #tpu.memory_space<vmem>>, vector<140x128xf32>,
    %c0_225 = arith.constant 0 : index
    %c0_226 = arith.constant 0 : index
    %291 = tpu.strided_load %arg15[%c0_225, %c0_226] {strides = array<i32: 2, 1>} : memref<144x128xf32, #tpu.memory_space<vmem>>, vector<5x128xf32>
    %c1_227 = arith.constant 1 : index
    %c0_228 = arith.constant 0 : index
    %292 = tpu.strided_load %arg15[%c1_227, %c0_228] {strides = array<i32: 2, 1>} : memref<144x128xf32, #tpu.memory_space<vmem>>, vector<5x128xf32>
    %c14_229 = arith.constant 14 : index
    %c0_230 = arith.constant 0 : index
    %293 = tpu.strided_load %arg15[%c14_229, %c0_230] {strides = array<i32: 2, 1>} : memref<144x128xf32, #tpu.memory_space<vmem>>, vector<5x128xf32>
    %c15_231 = arith.constant 15 : index
    %c0_232 = arith.constant 0 : index
    %294 = tpu.strided_load %arg15[%c15_231, %c0_232] {strides = array<i32: 2, 1>} : memref<144x128xf32, #tpu.memory_space<vmem>>, vector<5x128xf32>
    %295 = arith.maximumf %291, %292 : vector<5x128xf32>
    %296 = arith.maximumf %293, %294 : vector<5x128xf32>
    %297 = arith.maximumf %295, %296 : vector<5x128xf32>
    %c0_233 = arith.constant 0 : index
    %c0_234 = arith.constant 0 : index
    %298 = vector.load %arg16[%c0_233, %c0_234] : memref<32x128xf32, #tpu.memory_space<vmem>>, vector<5x128xf32>
    tpu.vector_store %arg16[%c0_233, %c0_234], %297 {strides = array<i32>} : memref<32x128xf32, #tpu.memory_space<vmem>>, vector<5x128xf32>,
    %c28_235 = arith.constant 28 : index
    %c0_236 = arith.constant 0 : index
    %299 = tpu.strided_load %arg15[%c28_235, %c0_236] {strides = array<i32: 2, 1>} : memref<144x128xf32, #tpu.memory_space<vmem>>, vector<5x128xf32>
    %c29_237 = arith.constant 29 : index
    %c0_238 = arith.constant 0 : index
    %300 = tpu.strided_load %arg15[%c29_237, %c0_238] {strides = array<i32: 2, 1>} : memref<144x128xf32, #tpu.memory_space<vmem>>, vector<5x128xf32>
    %c42_239 = arith.constant 42 : index
    %c0_240 = arith.constant 0 : index
    %301 = tpu.strided_load %arg15[%c42_239, %c0_240] {strides = array<i32: 2, 1>} : memref<144x128xf32, #tpu.memory_space<vmem>>, vector<5x128xf32>
    %c43_241 = arith.constant 43 : index
    %c0_242 = arith.constant 0 : index
    %302 = tpu.strided_load %arg15[%c43_241, %c0_242] {strides = array<i32: 2, 1>} : memref<144x128xf32, #tpu.memory_space<vmem>>, vector<5x128xf32>
    %303 = arith.maximumf %299, %300 : vector<5x128xf32>
    %304 = arith.maximumf %301, %302 : vector<5x128xf32>
    %305 = arith.maximumf %303, %304 : vector<5x128xf32>
    %c5_243 = arith.constant 5 : index
    %c0_244 = arith.constant 0 : index
    %306 = vector.load %arg16[%c5_243, %c0_244] : memref<32x128xf32, #tpu.memory_space<vmem>>, vector<5x128xf32>
    tpu.vector_store %arg16[%c5_243, %c0_244], %305 {strides = array<i32>} : memref<32x128xf32, #tpu.memory_space<vmem>>, vector<5x128xf32>,
    %c56_245 = arith.constant 56 : index
    %c0_246 = arith.constant 0 : index
    %307 = tpu.strided_load %arg15[%c56_245, %c0_246] {strides = array<i32: 2, 1>} : memref<144x128xf32, #tpu.memory_space<vmem>>, vector<5x128xf32>
    %c57_247 = arith.constant 57 : index
    %c0_248 = arith.constant 0 : index
    %308 = tpu.strided_load %arg15[%c57_247, %c0_248] {strides = array<i32: 2, 1>} : memref<144x128xf32, #tpu.memory_space<vmem>>, vector<5x128xf32>
    %c70_249 = arith.constant 70 : index
    %c0_250 = arith.constant 0 : index
    %309 = tpu.strided_load %arg15[%c70_249, %c0_250] {strides = array<i32: 2, 1>} : memref<144x128xf32, #tpu.memory_space<vmem>>, vector<5x128xf32>
    %c71 = arith.constant 71 : index
    %c0_251 = arith.constant 0 : index
    %310 = tpu.strided_load %arg15[%c71, %c0_251] {strides = array<i32: 2, 1>} : memref<144x128xf32, #tpu.memory_space<vmem>>, vector<5x128xf32>
    %311 = arith.maximumf %307, %308 : vector<5x128xf32>
    %312 = arith.maximumf %309, %310 : vector<5x128xf32>
    %313 = arith.maximumf %311, %312 : vector<5x128xf32>
    %c10_252 = arith.constant 10 : index
    %c0_253 = arith.constant 0 : index
    %314 = vector.load %arg16[%c10_252, %c0_253] : memref<32x128xf32, #tpu.memory_space<vmem>>, vector<5x128xf32>
    tpu.vector_store %arg16[%c10_252, %c0_253], %313 {strides = array<i32>} : memref<32x128xf32, #tpu.memory_space<vmem>>, vector<5x128xf32>,
    %c84_254 = arith.constant 84 : index
    %c0_255 = arith.constant 0 : index
    %315 = tpu.strided_load %arg15[%c84_254, %c0_255] {strides = array<i32: 2, 1>} : memref<144x128xf32, #tpu.memory_space<vmem>>, vector<5x128xf32>
    %c85_256 = arith.constant 85 : index
    %c0_257 = arith.constant 0 : index
    %316 = tpu.strided_load %arg15[%c85_256, %c0_257] {strides = array<i32: 2, 1>} : memref<144x128xf32, #tpu.memory_space<vmem>>, vector<5x128xf32>
    %c98_258 = arith.constant 98 : index
    %c0_259 = arith.constant 0 : index
    %317 = tpu.strided_load %arg15[%c98_258, %c0_259] {strides = array<i32: 2, 1>} : memref<144x128xf32, #tpu.memory_space<vmem>>, vector<5x128xf32>
    %c99 = arith.constant 99 : index
    %c0_260 = arith.constant 0 : index
    %318 = tpu.strided_load %arg15[%c99, %c0_260] {strides = array<i32: 2, 1>} : memref<144x128xf32, #tpu.memory_space<vmem>>, vector<5x128xf32>
    %319 = arith.maximumf %315, %316 : vector<5x128xf32>
    %320 = arith.maximumf %317, %318 : vector<5x128xf32>
    %321 = arith.maximumf %319, %320 : vector<5x128xf32>
    %c15_261 = arith.constant 15 : index
    %c0_262 = arith.constant 0 : index
    %322 = vector.load %arg16[%c15_261, %c0_262] : memref<32x128xf32, #tpu.memory_space<vmem>>, vector<5x128xf32>
    tpu.vector_store %arg16[%c15_261, %c0_262], %321 {strides = array<i32>} : memref<32x128xf32, #tpu.memory_space<vmem>>, vector<5x128xf32>,
    %c112_263 = arith.constant 112 : index
    %c0_264 = arith.constant 0 : index
    %323 = tpu.strided_load %arg15[%c112_263, %c0_264] {strides = array<i32: 2, 1>} : memref<144x128xf32, #tpu.memory_space<vmem>>, vector<5x128xf32>
    %c113_265 = arith.constant 113 : index
    %c0_266 = arith.constant 0 : index
    %324 = tpu.strided_load %arg15[%c113_265, %c0_266] {strides = array<i32: 2, 1>} : memref<144x128xf32, #tpu.memory_space<vmem>>, vector<5x128xf32>
    %c126_267 = arith.constant 126 : index
    %c0_268 = arith.constant 0 : index
    %325 = tpu.strided_load %arg15[%c126_267, %c0_268] {strides = array<i32: 2, 1>} : memref<144x128xf32, #tpu.memory_space<vmem>>, vector<5x128xf32>
    %c127 = arith.constant 127 : index
    %c0_269 = arith.constant 0 : index
    %326 = tpu.strided_load %arg15[%c127, %c0_269] {strides = array<i32: 2, 1>} : memref<144x128xf32, #tpu.memory_space<vmem>>, vector<5x128xf32>
    %327 = arith.maximumf %323, %324 : vector<5x128xf32>
    %328 = arith.maximumf %325, %326 : vector<5x128xf32>
    %329 = arith.maximumf %327, %328 : vector<5x128xf32>
    %c20_270 = arith.constant 20 : index
    %c0_271 = arith.constant 0 : index
    %330 = vector.load %arg16[%c20_270, %c0_271] : memref<32x128xf32, #tpu.memory_space<vmem>>, vector<5x128xf32>
    tpu.vector_store %arg16[%c20_270, %c0_271], %329 {strides = array<i32>} : memref<32x128xf32, #tpu.memory_space<vmem>>, vector<5x128xf32>,
    %c0_272 = arith.constant 0 : index
    %c0_273 = arith.constant 0 : index
    %331 = vector.load %arg16[%c0_272, %c0_273] : memref<32x128xf32, #tpu.memory_space<vmem>>, vector<32x128xf32>
    %cst_274 = arith.constant 0.000000e+00 : f32
    %332 = vector.broadcast %cst_274 : f32 to vector<120x8xf32>
    %333 = vector.extract_strided_slice %331 {offsets = [0, 0], sizes = [25, 8], strides = [1, 1]} : vector<32x128xf32> to vector<25x8xf32>
    %334 = arith.truncf %333 : vector<25x8xf32> to vector<25x8xbf16>
    %c0_275 = arith.constant 0 : index
    %c0_276 = arith.constant 0 : index
    %c0_277 = arith.constant 0 : index
    %335 = vector.load %arg6[%c0_275, %c0_276, %c0_277] : memref<16x120x25xbf16, #tpu.memory_space<vmem>>, vector<1x120x25xbf16>
    %336 = vector.shape_cast %335 : vector<1x120x25xbf16> to vector<120x25xbf16>
    %cst_278 = arith.constant dense<0.000000e+00> : vector<120x8xf32>
    %337 = tpu.matmul %336, %334, %cst_278 {dimension_numbers = #tpu.dot_dimension_numbers<[1], [0], [0], [1], [0, 0, 1, 1], [], []>} : vector<120x25xbf16>, vector<25x8xbf16>, vector<120x8xf32> -> vector<120x8xf32>
    %338 = arith.addf %332, %337 : vector<120x8xf32>
    %339 = vector.extract_strided_slice %331 {offsets = [0, 8], sizes = [25, 8], strides = [1, 1]} : vector<32x128xf32> to vector<25x8xf32>
    %340 = arith.truncf %339 : vector<25x8xf32> to vector<25x8xbf16>
    %c1_279 = arith.constant 1 : index
    %c0_280 = arith.constant 0 : index
    %c0_281 = arith.constant 0 : index
    %341 = vector.load %arg6[%c1_279, %c0_280, %c0_281] : memref<16x120x25xbf16, #tpu.memory_space<vmem>>, vector<1x120x25xbf16>
    %342 = vector.shape_cast %341 : vector<1x120x25xbf16> to vector<120x25xbf16>
    %cst_282 = arith.constant dense<0.000000e+00> : vector<120x8xf32>
    %343 = tpu.matmul %342, %340, %cst_282 {dimension_numbers = #tpu.dot_dimension_numbers<[1], [0], [0], [1], [0, 0, 1, 1], [], []>} : vector<120x25xbf16>, vector<25x8xbf16>, vector<120x8xf32> -> vector<120x8xf32>
    %344 = arith.addf %338, %343 : vector<120x8xf32>
    %345 = vector.extract_strided_slice %331 {offsets = [0, 16], sizes = [25, 8], strides = [1, 1]} : vector<32x128xf32> to vector<25x8xf32>
    %346 = arith.truncf %345 : vector<25x8xf32> to vector<25x8xbf16>
    %c2_283 = arith.constant 2 : index
    %c0_284 = arith.constant 0 : index
    %c0_285 = arith.constant 0 : index
    %347 = vector.load %arg6[%c2_283, %c0_284, %c0_285] : memref<16x120x25xbf16, #tpu.memory_space<vmem>>, vector<1x120x25xbf16>
    %348 = vector.shape_cast %347 : vector<1x120x25xbf16> to vector<120x25xbf16>
    %cst_286 = arith.constant dense<0.000000e+00> : vector<120x8xf32>
    %349 = tpu.matmul %348, %346, %cst_286 {dimension_numbers = #tpu.dot_dimension_numbers<[1], [0], [0], [1], [0, 0, 1, 1], [], []>} : vector<120x25xbf16>, vector<25x8xbf16>, vector<120x8xf32> -> vector<120x8xf32>
    %350 = arith.addf %344, %349 : vector<120x8xf32>
    %351 = vector.extract_strided_slice %331 {offsets = [0, 24], sizes = [25, 8], strides = [1, 1]} : vector<32x128xf32> to vector<25x8xf32>
    %352 = arith.truncf %351 : vector<25x8xf32> to vector<25x8xbf16>
    %c3_287 = arith.constant 3 : index
    %c0_288 = arith.constant 0 : index
    %c0_289 = arith.constant 0 : index
    %353 = vector.load %arg6[%c3_287, %c0_288, %c0_289] : memref<16x120x25xbf16, #tpu.memory_space<vmem>>, vector<1x120x25xbf16>
    %354 = vector.shape_cast %353 : vector<1x120x25xbf16> to vector<120x25xbf16>
    %cst_290 = arith.constant dense<0.000000e+00> : vector<120x8xf32>
    %355 = tpu.matmul %354, %352, %cst_290 {dimension_numbers = #tpu.dot_dimension_numbers<[1], [0], [0], [1], [0, 0, 1, 1], [], []>} : vector<120x25xbf16>, vector<25x8xbf16>, vector<120x8xf32> -> vector<120x8xf32>
    %356 = arith.addf %350, %355 : vector<120x8xf32>
    %357 = vector.extract_strided_slice %331 {offsets = [0, 32], sizes = [25, 8], strides = [1, 1]} : vector<32x128xf32> to vector<25x8xf32>
    %358 = arith.truncf %357 : vector<25x8xf32> to vector<25x8xbf16>
    %c4_291 = arith.constant 4 : index
    %c0_292 = arith.constant 0 : index
    %c0_293 = arith.constant 0 : index
    %359 = vector.load %arg6[%c4_291, %c0_292, %c0_293] : memref<16x120x25xbf16, #tpu.memory_space<vmem>>, vector<1x120x25xbf16>
    %360 = vector.shape_cast %359 : vector<1x120x25xbf16> to vector<120x25xbf16>
    %cst_294 = arith.constant dense<0.000000e+00> : vector<120x8xf32>
    %361 = tpu.matmul %360, %358, %cst_294 {dimension_numbers = #tpu.dot_dimension_numbers<[1], [0], [0], [1], [0, 0, 1, 1], [], []>} : vector<120x25xbf16>, vector<25x8xbf16>, vector<120x8xf32> -> vector<120x8xf32>
    %362 = arith.addf %356, %361 : vector<120x8xf32>
    %363 = vector.extract_strided_slice %331 {offsets = [0, 40], sizes = [25, 8], strides = [1, 1]} : vector<32x128xf32> to vector<25x8xf32>
    %364 = arith.truncf %363 : vector<25x8xf32> to vector<25x8xbf16>
    %c5_295 = arith.constant 5 : index
    %c0_296 = arith.constant 0 : index
    %c0_297 = arith.constant 0 : index
    %365 = vector.load %arg6[%c5_295, %c0_296, %c0_297] : memref<16x120x25xbf16, #tpu.memory_space<vmem>>, vector<1x120x25xbf16>
    %366 = vector.shape_cast %365 : vector<1x120x25xbf16> to vector<120x25xbf16>
    %cst_298 = arith.constant dense<0.000000e+00> : vector<120x8xf32>
    %367 = tpu.matmul %366, %364, %cst_298 {dimension_numbers = #tpu.dot_dimension_numbers<[1], [0], [0], [1], [0, 0, 1, 1], [], []>} : vector<120x25xbf16>, vector<25x8xbf16>, vector<120x8xf32> -> vector<120x8xf32>
    %368 = arith.addf %362, %367 : vector<120x8xf32>
    %369 = vector.extract_strided_slice %331 {offsets = [0, 48], sizes = [25, 8], strides = [1, 1]} : vector<32x128xf32> to vector<25x8xf32>
    %370 = arith.truncf %369 : vector<25x8xf32> to vector<25x8xbf16>
    %c6_299 = arith.constant 6 : index
    %c0_300 = arith.constant 0 : index
    %c0_301 = arith.constant 0 : index
    %371 = vector.load %arg6[%c6_299, %c0_300, %c0_301] : memref<16x120x25xbf16, #tpu.memory_space<vmem>>, vector<1x120x25xbf16>
    %372 = vector.shape_cast %371 : vector<1x120x25xbf16> to vector<120x25xbf16>
    %cst_302 = arith.constant dense<0.000000e+00> : vector<120x8xf32>
    %373 = tpu.matmul %372, %370, %cst_302 {dimension_numbers = #tpu.dot_dimension_numbers<[1], [0], [0], [1], [0, 0, 1, 1], [], []>} : vector<120x25xbf16>, vector<25x8xbf16>, vector<120x8xf32> -> vector<120x8xf32>
    %374 = arith.addf %368, %373 : vector<120x8xf32>
    %375 = vector.extract_strided_slice %331 {offsets = [0, 56], sizes = [25, 8], strides = [1, 1]} : vector<32x128xf32> to vector<25x8xf32>
    %376 = arith.truncf %375 : vector<25x8xf32> to vector<25x8xbf16>
    %c7_303 = arith.constant 7 : index
    %c0_304 = arith.constant 0 : index
    %c0_305 = arith.constant 0 : index
    %377 = vector.load %arg6[%c7_303, %c0_304, %c0_305] : memref<16x120x25xbf16, #tpu.memory_space<vmem>>, vector<1x120x25xbf16>
    %378 = vector.shape_cast %377 : vector<1x120x25xbf16> to vector<120x25xbf16>
    %cst_306 = arith.constant dense<0.000000e+00> : vector<120x8xf32>
    %379 = tpu.matmul %378, %376, %cst_306 {dimension_numbers = #tpu.dot_dimension_numbers<[1], [0], [0], [1], [0, 0, 1, 1], [], []>} : vector<120x25xbf16>, vector<25x8xbf16>, vector<120x8xf32> -> vector<120x8xf32>
    %380 = arith.addf %374, %379 : vector<120x8xf32>
    %381 = vector.extract_strided_slice %331 {offsets = [0, 64], sizes = [25, 8], strides = [1, 1]} : vector<32x128xf32> to vector<25x8xf32>
    %382 = arith.truncf %381 : vector<25x8xf32> to vector<25x8xbf16>
    %c8_307 = arith.constant 8 : index
    %c0_308 = arith.constant 0 : index
    %c0_309 = arith.constant 0 : index
    %383 = vector.load %arg6[%c8_307, %c0_308, %c0_309] : memref<16x120x25xbf16, #tpu.memory_space<vmem>>, vector<1x120x25xbf16>
    %384 = vector.shape_cast %383 : vector<1x120x25xbf16> to vector<120x25xbf16>
    %cst_310 = arith.constant dense<0.000000e+00> : vector<120x8xf32>
    %385 = tpu.matmul %384, %382, %cst_310 {dimension_numbers = #tpu.dot_dimension_numbers<[1], [0], [0], [1], [0, 0, 1, 1], [], []>} : vector<120x25xbf16>, vector<25x8xbf16>, vector<120x8xf32> -> vector<120x8xf32>
    %386 = arith.addf %380, %385 : vector<120x8xf32>
    %387 = vector.extract_strided_slice %331 {offsets = [0, 72], sizes = [25, 8], strides = [1, 1]} : vector<32x128xf32> to vector<25x8xf32>
    %388 = arith.truncf %387 : vector<25x8xf32> to vector<25x8xbf16>
    %c9_311 = arith.constant 9 : index
    %c0_312 = arith.constant 0 : index
    %c0_313 = arith.constant 0 : index
    %389 = vector.load %arg6[%c9_311, %c0_312, %c0_313] : memref<16x120x25xbf16, #tpu.memory_space<vmem>>, vector<1x120x25xbf16>
    %390 = vector.shape_cast %389 : vector<1x120x25xbf16> to vector<120x25xbf16>
    %cst_314 = arith.constant dense<0.000000e+00> : vector<120x8xf32>
    %391 = tpu.matmul %390, %388, %cst_314 {dimension_numbers = #tpu.dot_dimension_numbers<[1], [0], [0], [1], [0, 0, 1, 1], [], []>} : vector<120x25xbf16>, vector<25x8xbf16>, vector<120x8xf32> -> vector<120x8xf32>
    %392 = arith.addf %386, %391 : vector<120x8xf32>
    %393 = vector.extract_strided_slice %331 {offsets = [0, 80], sizes = [25, 8], strides = [1, 1]} : vector<32x128xf32> to vector<25x8xf32>
    %394 = arith.truncf %393 : vector<25x8xf32> to vector<25x8xbf16>
    %c10_315 = arith.constant 10 : index
    %c0_316 = arith.constant 0 : index
    %c0_317 = arith.constant 0 : index
    %395 = vector.load %arg6[%c10_315, %c0_316, %c0_317] : memref<16x120x25xbf16, #tpu.memory_space<vmem>>, vector<1x120x25xbf16>
    %396 = vector.shape_cast %395 : vector<1x120x25xbf16> to vector<120x25xbf16>
    %cst_318 = arith.constant dense<0.000000e+00> : vector<120x8xf32>
    %397 = tpu.matmul %396, %394, %cst_318 {dimension_numbers = #tpu.dot_dimension_numbers<[1], [0], [0], [1], [0, 0, 1, 1], [], []>} : vector<120x25xbf16>, vector<25x8xbf16>, vector<120x8xf32> -> vector<120x8xf32>
    %398 = arith.addf %392, %397 : vector<120x8xf32>
    %399 = vector.extract_strided_slice %331 {offsets = [0, 88], sizes = [25, 8], strides = [1, 1]} : vector<32x128xf32> to vector<25x8xf32>
    %400 = arith.truncf %399 : vector<25x8xf32> to vector<25x8xbf16>
    %c11_319 = arith.constant 11 : index
    %c0_320 = arith.constant 0 : index
    %c0_321 = arith.constant 0 : index
    %401 = vector.load %arg6[%c11_319, %c0_320, %c0_321] : memref<16x120x25xbf16, #tpu.memory_space<vmem>>, vector<1x120x25xbf16>
    %402 = vector.shape_cast %401 : vector<1x120x25xbf16> to vector<120x25xbf16>
    %cst_322 = arith.constant dense<0.000000e+00> : vector<120x8xf32>
    %403 = tpu.matmul %402, %400, %cst_322 {dimension_numbers = #tpu.dot_dimension_numbers<[1], [0], [0], [1], [0, 0, 1, 1], [], []>} : vector<120x25xbf16>, vector<25x8xbf16>, vector<120x8xf32> -> vector<120x8xf32>
    %404 = arith.addf %398, %403 : vector<120x8xf32>
    %405 = vector.extract_strided_slice %331 {offsets = [0, 96], sizes = [25, 8], strides = [1, 1]} : vector<32x128xf32> to vector<25x8xf32>
    %406 = arith.truncf %405 : vector<25x8xf32> to vector<25x8xbf16>
    %c12_323 = arith.constant 12 : index
    %c0_324 = arith.constant 0 : index
    %c0_325 = arith.constant 0 : index
    %407 = vector.load %arg6[%c12_323, %c0_324, %c0_325] : memref<16x120x25xbf16, #tpu.memory_space<vmem>>, vector<1x120x25xbf16>
    %408 = vector.shape_cast %407 : vector<1x120x25xbf16> to vector<120x25xbf16>
    %cst_326 = arith.constant dense<0.000000e+00> : vector<120x8xf32>
    %409 = tpu.matmul %408, %406, %cst_326 {dimension_numbers = #tpu.dot_dimension_numbers<[1], [0], [0], [1], [0, 0, 1, 1], [], []>} : vector<120x25xbf16>, vector<25x8xbf16>, vector<120x8xf32> -> vector<120x8xf32>
    %410 = arith.addf %404, %409 : vector<120x8xf32>
    %411 = vector.extract_strided_slice %331 {offsets = [0, 104], sizes = [25, 8], strides = [1, 1]} : vector<32x128xf32> to vector<25x8xf32>
    %412 = arith.truncf %411 : vector<25x8xf32> to vector<25x8xbf16>
    %c13_327 = arith.constant 13 : index
    %c0_328 = arith.constant 0 : index
    %c0_329 = arith.constant 0 : index
    %413 = vector.load %arg6[%c13_327, %c0_328, %c0_329] : memref<16x120x25xbf16, #tpu.memory_space<vmem>>, vector<1x120x25xbf16>
    %414 = vector.shape_cast %413 : vector<1x120x25xbf16> to vector<120x25xbf16>
    %cst_330 = arith.constant dense<0.000000e+00> : vector<120x8xf32>
    %415 = tpu.matmul %414, %412, %cst_330 {dimension_numbers = #tpu.dot_dimension_numbers<[1], [0], [0], [1], [0, 0, 1, 1], [], []>} : vector<120x25xbf16>, vector<25x8xbf16>, vector<120x8xf32> -> vector<120x8xf32>
    %416 = arith.addf %410, %415 : vector<120x8xf32>
    %417 = vector.extract_strided_slice %331 {offsets = [0, 112], sizes = [25, 8], strides = [1, 1]} : vector<32x128xf32> to vector<25x8xf32>
    %418 = arith.truncf %417 : vector<25x8xf32> to vector<25x8xbf16>
    %c14_331 = arith.constant 14 : index
    %c0_332 = arith.constant 0 : index
    %c0_333 = arith.constant 0 : index
    %419 = vector.load %arg6[%c14_331, %c0_332, %c0_333] : memref<16x120x25xbf16, #tpu.memory_space<vmem>>, vector<1x120x25xbf16>
    %420 = vector.shape_cast %419 : vector<1x120x25xbf16> to vector<120x25xbf16>
    %cst_334 = arith.constant dense<0.000000e+00> : vector<120x8xf32>
    %421 = tpu.matmul %420, %418, %cst_334 {dimension_numbers = #tpu.dot_dimension_numbers<[1], [0], [0], [1], [0, 0, 1, 1], [], []>} : vector<120x25xbf16>, vector<25x8xbf16>, vector<120x8xf32> -> vector<120x8xf32>
    %422 = arith.addf %416, %421 : vector<120x8xf32>
    %423 = vector.extract_strided_slice %331 {offsets = [0, 120], sizes = [25, 8], strides = [1, 1]} : vector<32x128xf32> to vector<25x8xf32>
    %424 = arith.truncf %423 : vector<25x8xf32> to vector<25x8xbf16>
    %c15_335 = arith.constant 15 : index
    %c0_336 = arith.constant 0 : index
    %c0_337 = arith.constant 0 : index
    %425 = vector.load %arg6[%c15_335, %c0_336, %c0_337] : memref<16x120x25xbf16, #tpu.memory_space<vmem>>, vector<1x120x25xbf16>
    %426 = vector.shape_cast %425 : vector<1x120x25xbf16> to vector<120x25xbf16>
    %cst_338 = arith.constant dense<0.000000e+00> : vector<120x8xf32>
    %427 = tpu.matmul %426, %424, %cst_338 {dimension_numbers = #tpu.dot_dimension_numbers<[1], [0], [0], [1], [0, 0, 1, 1], [], []>} : vector<120x25xbf16>, vector<25x8xbf16>, vector<120x8xf32> -> vector<120x8xf32>
    %428 = arith.addf %422, %427 : vector<120x8xf32>
    %c0_339 = arith.constant 0 : index
    %c0_340 = arith.constant 0 : index
    %429 = vector.load %arg7[%c0_339, %c0_340] : memref<120x1xf32, #tpu.memory_space<vmem>>, vector<120x1xf32>
    %430 = vector.broadcast %429 : vector<120x1xf32> to vector<120x8xf32>
    %431 = arith.addf %428, %430 : vector<120x8xf32>
    %cst_341 = arith.constant 0.000000e+00 : f32
    %432 = vector.broadcast %cst_341 : f32 to vector<120x8xf32>
    %433 = arith.maximumf %431, %432 : vector<120x8xf32>
    %c0_342 = arith.constant 0 : index
    %c0_343 = arith.constant 0 : index
    %434 = vector.load %arg8[%c0_342, %c0_343] : memref<84x120xbf16, #tpu.memory_space<vmem>>, vector<84x120xbf16>
    %435 = arith.truncf %433 : vector<120x8xf32> to vector<120x8xbf16>
    %cst_344 = arith.constant dense<0.000000e+00> : vector<84x8xf32>
    %436 = tpu.matmul %434, %435, %cst_344 {dimension_numbers = #tpu.dot_dimension_numbers<[1], [0], [0], [1], [0, 0, 1, 1], [], []>} : vector<84x120xbf16>, vector<120x8xbf16>, vector<84x8xf32> -> vector<84x8xf32>
    %c0_345 = arith.constant 0 : index
    %c0_346 = arith.constant 0 : index
    %437 = vector.load %arg9[%c0_345, %c0_346] : memref<84x1xf32, #tpu.memory_space<vmem>>, vector<84x1xf32>
    %438 = vector.broadcast %437 : vector<84x1xf32> to vector<84x8xf32>
    %439 = arith.addf %436, %438 : vector<84x8xf32>
    %cst_347 = arith.constant 0.000000e+00 : f32
    %440 = vector.broadcast %cst_347 : f32 to vector<84x8xf32>
    %441 = arith.maximumf %439, %440 : vector<84x8xf32>
    %442 = tpu.iota {dimensions = array<i32: 0>} : vector<8x8xi32>
    %443 = tpu.iota {dimensions = array<i32: 1>} : vector<8x8xi32>
    %444 = arith.cmpi eq, %442, %443 : vector<8x8xi32>
    %445 = arith.extui %444 : vector<8x8xi1> to vector<8x8xi32>
    %446 = arith.sitofp %445 : vector<8x8xi32> to vector<8x8xf32>
    %447 = arith.truncf %446 : vector<8x8xf32> to vector<8x8xbf16>
    %448 = arith.truncf %441 : vector<84x8xf32> to vector<84x8xbf16>
    %cst_348 = arith.constant dense<0.000000e+00> : vector<8x84xf32>
    %449 = tpu.matmul %447, %448, %cst_348 {dimension_numbers = #tpu.dot_dimension_numbers<[1], [1], [0], [0], [0, 0, 1, 0], [], []>} : vector<8x8xbf16>, vector<84x8xbf16>, vector<8x84xf32> -> vector<8x84xf32>
    %450 = arith.truncf %449 : vector<8x84xf32> to vector<8x84xbf16>
    %c0_349 = arith.constant 0 : index
    %c0_350 = arith.constant 0 : index
    %451 = vector.load %arg10[%c0_349, %c0_350] : memref<84x128xbf16, #tpu.memory_space<vmem>>, vector<84x128xbf16>
    %cst_351 = arith.constant dense<0.000000e+00> : vector<8x128xf32>
    %452 = tpu.matmul %450, %451, %cst_351 {dimension_numbers = #tpu.dot_dimension_numbers<[1], [0], [0], [1], [0, 0, 1, 1], [], []>} : vector<8x84xbf16>, vector<84x128xbf16>, vector<8x128xf32> -> vector<8x128xf32>
    %c0_352 = arith.constant 0 : index
    %c0_353 = arith.constant 0 : index
    %453 = vector.load %arg11[%c0_352, %c0_353] : memref<1x128xf32, #tpu.memory_space<vmem>>, vector<1x128xf32>
    %454 = vector.broadcast %453 : vector<1x128xf32> to vector<8x128xf32>
    %455 = arith.addf %452, %454 : vector<8x128xf32>
    %c0_354 = arith.constant 0 : index
    %c0_355 = arith.constant 0 : index
    %456 = vector.load %arg12[%c0_354, %c0_355] : memref<8x128xf32, #tpu.memory_space<vmem>>, vector<8x128xf32>
    tpu.vector_store %arg12[%c0_354, %c0_355], %455 {strides = array<i32>} : memref<8x128xf32, #tpu.memory_space<vmem>>, vector<8x128xf32>,
    return
  }
  func.func @transform_0(%arg0: i32) -> (i32, i32, i32) {
    %c0_i32 = arith.constant 0 : i32
    %c0_i32_0 = arith.constant 0 : i32
    %c0_i32_1 = arith.constant 0 : i32
    return %arg0, %c0_i32, %c0_i32_0 : i32, i32, i32
  }
  func.func @transform_1(%arg0: i32) -> (i32, i32) {
    %c0_i32 = arith.constant 0 : i32
    %c0_i32_0 = arith.constant 0 : i32
    %c0_i32_1 = arith.constant 0 : i32
    return %c0_i32, %c0_i32_0 : i32, i32
  }
  func.func @transform_2(%arg0: i32) -> (i32, i32) {
    %c0_i32 = arith.constant 0 : i32
    %c0_i32_0 = arith.constant 0 : i32
    %c0_i32_1 = arith.constant 0 : i32
    return %c0_i32, %c0_i32_0 : i32, i32
  }
  func.func @transform_3(%arg0: i32) -> (i32, i32, i32) {
    %c0_i32 = arith.constant 0 : i32
    %c0_i32_0 = arith.constant 0 : i32
    %c0_i32_1 = arith.constant 0 : i32
    %c0_i32_2 = arith.constant 0 : i32
    return %c0_i32, %c0_i32_0, %c0_i32_1 : i32, i32, i32
  }
  func.func @transform_4(%arg0: i32) -> (i32, i32) {
    %c0_i32 = arith.constant 0 : i32
    %c0_i32_0 = arith.constant 0 : i32
    %c0_i32_1 = arith.constant 0 : i32
    return %c0_i32, %c0_i32_0 : i32, i32
  }
  func.func @transform_5(%arg0: i32) -> (i32, i32, i32) {
    %c0_i32 = arith.constant 0 : i32
    %c0_i32_0 = arith.constant 0 : i32
    %c0_i32_1 = arith.constant 0 : i32
    %c0_i32_2 = arith.constant 0 : i32
    return %c0_i32, %c0_i32_0, %c0_i32_1 : i32, i32, i32
  }
  func.func @transform_6(%arg0: i32) -> (i32, i32) {
    %c0_i32 = arith.constant 0 : i32
    %c0_i32_0 = arith.constant 0 : i32
    %c0_i32_1 = arith.constant 0 : i32
    return %c0_i32, %c0_i32_0 : i32, i32
  }
  func.func @transform_7(%arg0: i32) -> (i32, i32) {
    %c0_i32 = arith.constant 0 : i32
    %c0_i32_0 = arith.constant 0 : i32
    %c0_i32_1 = arith.constant 0 : i32
    return %c0_i32, %c0_i32_0 : i32, i32
  }
  func.func @transform_8(%arg0: i32) -> (i32, i32) {
    %c0_i32 = arith.constant 0 : i32
    %c0_i32_0 = arith.constant 0 : i32
    %c0_i32_1 = arith.constant 0 : i32
    return %c0_i32, %c0_i32_0 : i32, i32
  }
  func.func @transform_9(%arg0: i32) -> (i32, i32) {
    %c0_i32 = arith.constant 0 : i32
    %c0_i32_0 = arith.constant 0 : i32
    %c0_i32_1 = arith.constant 0 : i32
    return %c0_i32, %c0_i32_0 : i32, i32
  }
  func.func @transform_10(%arg0: i32) -> (i32, i32) {
    %c0_i32 = arith.constant 0 : i32
    %c0_i32_0 = arith.constant 0 : i32
    %c0_i32_1 = arith.constant 0 : i32
    return %c0_i32, %c0_i32_0 : i32, i32
  }
  func.func @transform_11(%arg0: i32) -> (i32, i32) {
    %c0_i32 = arith.constant 0 : i32
    %c0_i32_0 = arith.constant 0 : i32
    return %arg0, %c0_i32 : i32, i32
  }
}

</mosaic_0001>

<bundles_post_ra>
// kernel: forward.1
= control target key start
LH: loop header
LB: loop body
LE: loop exit
PB: predicated region body
PF: predicated region fallthrough
CT: control target
= control target key end

     0   :  { %16 = vsyncpa [#allocation7], 0  ;;  %s22722_s0 = inlined_call_operand.vmem [shape: bf16[2,784,600], index: 0, kind: input, shape index: {}]   ;;  %s22723_s1 = inlined_call_operand.vmem [shape: bf16[600,48], index: 1, kind: input, shape index: {}]   ;;  %s22724_s2 = inlined_call_operand.vmem [shape: f32[1,48], index: 2, kind: input, shape index: {}]   ;;  %s22725_s3 = inlined_call_operand.vmem [shape: bf16[25,48,128], index: 3, kind: input, shape index: {}]   ;;  %s22726_s4 = inlined_call_operand.vmem [shape: f32[1,128], index: 4, kind: input, shape index: {}]   ;;  %s22727_s5 = inlined_call_operand.vmem [shape: bf16[16,120,25], index: 5, kind: input, shape index: {}]   ;;  %s22728_s6 = inlined_call_operand.vmem [shape: f32[120,1], index: 6, kind: input, shape index: {}]   ;;  %s22729_s7 = inlined_call_operand.vmem [shape: bf16[84,120], index: 7, kind: input, shape index: {}]   ;;  %s22730_s8 = inlined_call_operand.vmem [shape: f32[84,1], index: 8, kind: input, shape index: {}]   ;;  %s22731_s9 = inlined_call_operand.vmem [shape: bf16[84,128], index: 9, kind: input, shape index: {}]   ;;  %s22732_s10 = inlined_call_operand.vmem [shape: f32[1,128], index: 10, kind: input, shape index: {}]   ;;  %s22733_s11 = inlined_call_operand.hbm [shape: f32[16,128], index: 11, kind: output, shape index: {}]  }
   0x1   :  { %18 = vsyncpa [#allocation7 + $0x1], 0  ;;  %s18518_s17 = smov 0   ;;  %s18520_s18 = smov 0  }
   0x2   :  { %s18522_s19 = smov 0   ;;  %s18524_s20 = smov 0  }
   0x3 LB: > { %s18539_s21 = sadd.s32 4294967295, %s18436_s20   ;;  %s13494_s22 = sadd.s32 4294967294, %s18436_s20   ;;  %s18436_s20 = sphi %s18524_s20, %s22842_s20   ;;  %s18432_s19 = sphi %s18522_s19, %s22841_s19   ;;  %s18428_s18 = sphi %s18520_s18, %s22840_s18   ;;  %s18424_s17 = sphi %s18518_s17, %s22839_s17  }
   0x4   : > { %s18543_s23 = sadd.s32 1, %s18436_s20   ;;  %s267_s24 = sadd.s32 1, %s18432_s19 }
   0x5   : > { %s264_s25 = ssub.s32 %s18436_s20, %s18543_s23  ;;  %p277_p0 = scmp.ne.s32.totalorder %s18432_s19, %s18428_s18 }
   0x6   : > { %p265_p1 = scmp.eq.s32.totalorder %s264_s25, 0  ;;  %p278_p2 = scmp.eq.s32.totalorder %s18539_s21, 1 }
   0x7   : > { %p283_p3 = scmp.ne.s32.totalorder %s18428_s18, %s18424_s17  ;;  %p284_p4 = scmp.eq.s32.totalorder %s13494_s22, 1 }
   0x8   : > { %s18554_s26 = scalar_select %p265_p1, %s18432_s19, %s267_s24  }
   0x9   : > { %p18556_p5 = por %p278_p2, %p277_p0  ;;  %p18560_p6 = por %p284_p4, %p283_p3 }
   0xa   : > { %p13497_p7 = scmp.ge.s32.totalorder %s18436_s20, 1  ;;  %p340_p8 = scmp.lt.s32.totalorder %s18436_s20, 3 }
   0xc   : > { %p341_p9 = pnand %p13497_p7, %p340_p8 }
   0xe   : > { %344 = sbr.rel (%p341_p9) target bundleno = 3702 (0xe76), region = 64 }
  0x15   : > { %v17718_v0 = vld [vmem:[%s22723_s1] sm:$0xff]   ;;  %v18438_v1 = vmov 0   ;;  %v17719_v2 = vld [vmem:[%s22723_s1 + $0x8] sm:$0xff]   ;;  %p380_p10 = scmp.lt.s32.totalorder %s18539_s21, 1  ;;  %v17720_v3 = vld [vmem:[%s22723_s1 + $0x10] sm:$0xff]   ;;  %vm1560_vm0 = vcmask 1043456  }
  0x16   : > { %1564 = vmatprep.subr.bf16.mxu0 %v18438_v1  ;;  %3507 = vmatprep.subr.bf16.mxu1 %v18438_v1  ;;  %v17721_v4 = vld [vmem:[%s22723_s1 + $0x18] sm:$0xff]   ;;  %v17722_v5 = vld [vmem:[%s22723_s1 + $0x20] sm:$0xff]   ;;  %v17723_v7 = vld [vmem:[%s22723_s1 + $0x28] sm:$0xff]   ;;  %vm1484_vm1 = vcmask 719872   ;;  %vm18440_vm2 = vmmov 0   ;;  %vm386_vm3 = vcmask 392192  }
  0x17   : > { %1565 = vmatpush1.bf16.msra.mxu0 %v17718_v0  ;;  %17717 = vset.pattern.permute.xlu1 %v18438_v1  ;;  %s381_s16 = scalar_select %p380_p10, %s18539_s21, 1  ;;  %v17724_v8 = vld [vmem:[%s22723_s1 + $0x30] sm:$0xff]   ;;  %v17725_v9 = vld [vmem:[%s22723_s1 + $0x38] sm:$0xff]   ;;  %v17726_v10 = vld [vmem:[%s22723_s1 + $0x40] sm:$0xff]   ;;  %vm4323_vm4 = vcmask 390144   ;;  %vm9852_vm5 = vcmask 203776  }
  0x18   : > { %1566 = vmatprep.subr.bf16.mxu0 %v18438_v1  ;;  %17716 = vset.pattern.permute.xlu0 %v18438_v1  ;;  %v17766_v11 = vld [vmem:[%s22723_s1] sm:$0xff]   ;;  %v17727_v12 = vld [vmem:[%s22723_s1 + $0x48] sm:$0xff]   ;;  %v17728_v14 = vld [vmem:[%s22723_s1 + $0x50] sm:$0xff]   ;;  %s18442_s24 = smov 120   ;;  %s18443_s30 = smov 104   ;;  %vm9877_vm6 = vcmask 1044480  }
  0x19   : > { %s17657_s25 = smul.u32 1960, %s381_s16  ;;  %3508 = vmatpush1.bf16.msra.mxu1 %v17766_v11  ;;  %v17770_v13 = vld [vmem:[%s22723_s1 + $0x8] sm:$0xff]   ;;  %v17772_v15 = vld [vmem:[%s22723_s1 + $0x10] sm:$0xff]   ;;  %v17729_v16 = vld [vmem:[%s22723_s1 + $0x58] sm:$0xff]   ;;  %s18441_s16 = smov 112   ;;  %vm13131_vm7 = vcmask 982016  }
  0x1a   : > { %3509 = vmatprep.subr.bf16.mxu1 %v18438_v1  ;;  %v17775_v17 = vld [vmem:[%s22723_s1 + $0x18] sm:$0xff]   ;;  %v17730_v18 = vld [vmem:[%s22723_s1 + $0x60] sm:$0xff]   ;;  %v17731_v20 = vld [vmem:[%s22723_s1 + $0x68] sm:$0xff]   ;;  %s18444_s12 = smov 96   ;;  %s18446_s13 = smov 80   ;;  %vm13258_vm8 = vcmask 64512  }
  0x1b   : > { %1567 = vmatpush1.bf16.msra.mxu0 %v17719_v2  ;;  %s18593_s14 = scalar_lea.vmem %s22722_s0, %s17657_s25  ;;  %v17778_v19 = vld [vmem:[%s22723_s1 + $0x20] sm:$0xff]   ;;  %v17781_v21 = vld [vmem:[%s22723_s1 + $0x28] sm:$0xff]   ;;  %v17732_v22 = vld [vmem:[%s22723_s1 + $0x70] sm:$0xff]   ;;  %s18447_s15 = smov 72   ;;  %vm13376_vm10 = vcmask 1041408   ;;  %vm13372_vm11 = vcmask 687104  }
  0x1c   : > { %1568 = vmatprep.subr.bf16.mxu0 %v18438_v1  ;;  %v17736_v6 = vld [vmem:[%s18593_s14 + $0x4] ss:$20 sps:$4 sm:$0xff]   ;;  %v17783_v23 = vld [vmem:[%s22723_s1 + $0x30] sm:$0xff]   ;;  %v17737_v27 = vld [vmem:[%s18593_s14 + $0x2c] ss:$20 sps:$4 sm:$0xff]   ;;  %s18448_s22 = smov 64  }
  0x1d   : > { %1596 = vmatprep.mubr.bf16.mxu0 %v17736_v6  ;;  %3510 = vmatpush1.bf16.msra.mxu1 %v17770_v13  ;;  %v17733_v24 = vld [vmem:[%s22723_s1 + $0x78] sm:$0xff]   ;;  %v17734_v26 = vld [vmem:[%s18593_s14] ss:$20 sps:$4 sm:$0xff]   ;;  %v17762_v30 = vld [vmem:[%s22723_s1 + $0x88] sm:$0xff]   ;;  %s18451_s25 = smov 40   ;;  %s18452_s29 = smov 32  }
  0x1e   : > { %3511 = vmatprep.subr.bf16.mxu1 %v18438_v1  ;;  %v17787_v25 = vld [vmem:[%s22723_s1 + $0x38] sm:$0xff]   ;;  %v17755_v28 = vld [vmem:[%s22723_s1 + $0x80] sm:$0xff]   ;;  %v17792_v31 = vld [vmem:[%s22723_s1 + $0x48] sm:$0xff]  }
  0x1f   : > { %1569 = vmatpush1.bf16.msra.mxu0 %v17720_v3  ;;  %v17789_v29 = vld [vmem:[%s22723_s1 + $0x40] sm:$0xff]   ;;  %v17739_v32 = vld [vmem:[%s18593_s14 + $0x28] ss:$20 sps:$4 sm:$0xff]   ;;  %v17767_v34 = vld [vmem:[%s22723_s1 + $0x90] sm:$0xff]  }
  0x20   : > { %1570 = vmatprep.subr.bf16.mxu0 %v18438_v1  ;;  %v17740_v33 = vld [vmem:[%s18593_s14 + $0x54] ss:$20 sps:$4 sm:$0xff]   ;;  %v17813_v36 = vld [vmem:[%s18593_s14 + $0x3d8] ss:$20 sps:$4 sm:$0xff]   ;;  %v17742_v39 = vld [vmem:[%s18593_s14 + $0x50] ss:$20 sps:$4 sm:$0xff]  }
  0x21   : > { %3512 = vmatpush1.bf16.msra.mxu1 %v17772_v15  ;;  %v17794_v35 = vld [vmem:[%s22723_s1 + $0x50] sm:$0xff]   ;;  %v17777_v37 = vld [vmem:[%s22723_s1 + $0x98] sm:$0xff]   ;;  %v17786_v41 = vld [vmem:[%s22723_s1 + $0xa0] sm:$0xff]   ;;  %3539 = vmatprep.mubr.bf16.mxu1 %v17813_v36 }
  0x22   : > { %3513 = vmatprep.subr.bf16.mxu1 %v18438_v1  ;;  %v17798_v38 = vld [vmem:[%s22723_s1 + $0x58] sm:$0xff]   ;;  %v17800_v42 = vld [vmem:[%s22723_s1 + $0x60] sm:$0xff]   ;;  %v17795_v43 = vld [vmem:[%s22723_s1 + $0xa8] sm:$0xff]  }
  0x23   : > { %1571 = vmatpush1.bf16.msra.mxu0 %v17721_v4  ;;  %v17743_v40 = vld [vmem:[%s18593_s14 + $0x7c] ss:$20 sps:$4 sm:$0xff]   ;;  %v17803_v44 = vld [vmem:[%s22723_s1 + $0x68] sm:$0xff]   ;;  %v17746_v46 = vld [vmem:[%s18593_s14 + $0xa4] ss:$20 sps:$4 sm:$0xff]  }
  0x24   : > { %1572 = vmatprep.subr.bf16.mxu0 %v18438_v1  ;;  %v17745_v45 = vld [vmem:[%s18593_s14 + $0x78] ss:$20 sps:$4 sm:$0xff]   ;;  %v17805_v47 = vld [vmem:[%s22723_s1 + $0xb0] sm:$0xff]   ;;  %v17824_v55 = vld [vmem:[%s22723_s1 + $0xc0] sm:$0xff]  }
  0x25   : > { %3514 = vmatpush1.bf16.msra.mxu1 %v17775_v17  ;;  %v17806_v48 = vld [vmem:[%s22723_s1 + $0x70] sm:$0xff]   ;;  %v17809_v49 = vld [vmem:[%s22723_s1 + $0x78] sm:$0xff]   ;;  %v17749_v52 = vld [vmem:[%s18593_s14 + $0xcc] ss:$20 sps:$4 sm:$0xff]  }
  0x26   : > { %3515 = vmatprep.subr.bf16.mxu1 %v18438_v1  ;;  %v17814_v50 = vld [vmem:[%s22723_s1 + $0xb8] sm:$0xff]   ;;  %v17748_v51 = vld [vmem:[%s18593_s14 + $0xa0] ss:$20 sps:$4 sm:$0xff]   ;;  %v17834_v56 = vld [vmem:[%s22723_s1 + $0xc8] sm:$0xff]  }
  0x27   : > { %1573 = vmatpush1.bf16.msra.mxu0 %v17722_v5  ;;  %v17811_v53 = vld [vmem:[%s18593_s14 + $0x3d4] ss:$20 sps:$4 sm:$0xff]   ;;  %v17820_v59 = vld [vmem:[%s18593_s14 + $0x3fc] ss:$20 sps:$4 sm:$0xff]   ;;  %v17827_v63 = vld [vmem:[%s18593_s14 + $0x424] ss:$20 sps:$4 sm:$0xff]  }
  0x28   : > { %1574 = vmatprep.subr.bf16.mxu0 %v18438_v1  ;;  %v17818_v54 = vld [vmem:[%s18593_s14 + $0x400] ss:$20 sps:$4 sm:$0xff]   ;;  %v17751_v57 = vld [vmem:[%s18593_s14 + $0xc8] ss:$20 sps:$4 sm:$0xff]   ;;  %v17754_v61 = vld [vmem:[%s18593_s14 + $0xf0] ss:$20 sps:$4 sm:$0xff]  }
  0x29   : > { %3516 = vmatpush1.bf16.msra.mxu1 %v17778_v19  ;;  %v17752_v58 = vld [vmem:[%s18593_s14 + $0xf4] ss:$20 sps:$4 sm:$0xff]   ;;  %v17756_v62 = vld [vmem:[%s18593_s14 + $0x11c] ss:$20 sps:$4 sm:$0xff]   ;;  %v17758_v4 = vld [vmem:[%s18593_s14 + $0x118] ss:$20 sps:$4 sm:$0xff]  }
  0x2a   : > { %3517 = vmatprep.subr.bf16.mxu1 %v18438_v1  ;;  %v17825_v60 = vld [vmem:[%s18593_s14 + $0x428] ss:$20 sps:$4 sm:$0xff]   ;;  %v17831_v0 = vld [vmem:[%s18593_s14 + $0x450] ss:$20 sps:$4 sm:$0xff]   ;;  %v17833_v6 = vld [vmem:[%s18593_s14 + $0x44c] ss:$20 sps:$4 sm:$0xff]  }
  0x2b   : > { %1575 = vmatpush1.bf16.msra.mxu0 %v17723_v7  ;;  %v17844_v2 = vld [vmem:[%s22723_s1 + $0xd0] sm:$0xff]   ;;  %v17848_v3 = vld [vmem:[%s22723_s1 + $0xd8] sm:$0xff]   ;;  %v17763_v11 = vld [vmem:[%s18593_s14 + $0x16c] ss:$20 sps:$4 sm:$0xff]  }
  0x2c   : > { %1576 = vmatprep.subr.bf16.mxu0 %v18438_v1  ;;  %v17759_v5 = vld [vmem:[%s18593_s14 + $0x144] ss:$20 sps:$4 sm:$0xff]   ;;  %v17845_v13 = vld [vmem:[%s18593_s14 + $0x4a0] ss:$20 sps:$4 sm:$0xff]   ;;  %v17853_v19 = vld [vmem:[%s18593_s14 + $0x4c8] ss:$20 sps:$4 sm:$0xff]  }
  0x2d   : > { %3518 = vmatpush1.bf16.msra.mxu1 %v17781_v21  ;;  %v17838_v7 = vld [vmem:[%s18593_s14 + $0x478] ss:$20 sps:$4 sm:$0xff]   ;;  %v17768_v17 = vld [vmem:[%s18593_s14 + $0x194] ss:$20 sps:$4 sm:$0xff]   ;;  %v17773_v21 = vld [vmem:[%s18593_s14 + $0x1bc] ss:$20 sps:$4 sm:$0xff]  }
  0x2e   : > { %3519 = vmatprep.subr.bf16.mxu1 %v18438_v1  ;;  %v17863_v15 = vld [vmem:[%s22723_s1 + $0xf8] sm:$0xff]   ;;  %v17793_v36 = vld [vmem:[%s18593_s14 + $0x230] ss:$20 sps:$4 sm:$0xff]  }
  0x2f   : > { %1577 = vmatpush1.bf16.msra.mxu0 %v17724_v8  ;;  %v17852_v8 = vld [vmem:[%s22723_s1 + $0xe0] sm:$0xff]  }
  0x30   : > { %1578 = vmatprep.subr.bf16.mxu0 %v18438_v1 }
  0x31   : > { %3520 = vmatpush1.bf16.msra.mxu1 %v17783_v23  ;;  %v17860_v23 = vld [vmem:[%s18593_s14 + $0x4f0] ss:$20 sps:$4 sm:$0xff]  }
  0x32   : > { %3521 = vmatprep.subr.bf16.mxu1 %v18438_v1 }
  0x33   : > { %1579 = vmatpush1.bf16.msra.mxu0 %v17725_v9  ;;  %v17856_v9 = vld [vmem:[%s22723_s1 + $0xe8] sm:$0xff]  }
  0x34   : > { %1580 = vmatprep.subr.bf16.mxu0 %v18438_v1 }
  0x35   : > { %3522 = vmatpush1.bf16.msra.mxu1 %v17787_v25  ;;  %v17779_v25 = vld [vmem:[%s18593_s14 + $0x1e4] ss:$20 sps:$4 sm:$0xff]  }
  0x36   : > { %3523 = vmatprep.subr.bf16.mxu1 %v18438_v1 }
  0x37   : > { %1581 = vmatpush1.bf16.msra.mxu0 %v17726_v10  ;;  %v17761_v10 = vld [vmem:[%s18593_s14 + $0x140] ss:$20 sps:$4 sm:$0xff]  }
  0x38   : > { %1582 = vmatprep.subr.bf16.mxu0 %v18438_v1 }
  0x39   : > { %3524 = vmatpush1.bf16.msra.mxu1 %v17789_v29  ;;  %v17784_v29 = vld [vmem:[%s18593_s14 + $0x20c] ss:$20 sps:$4 sm:$0xff]  }
  0x3a   : > { %3525 = vmatprep.subr.bf16.mxu1 %v18438_v1 }
  0x3b   : > { %1583 = vmatpush1.bf16.msra.mxu0 %v17727_v12  ;;  %v17840_v12 = vld [vmem:[%s18593_s14 + $0x474] ss:$20 sps:$4 sm:$0xff]  }
  0x3c   : > { %1584 = vmatprep.subr.bf16.mxu0 %v18438_v1 }
  0x3d   : > { %3526 = vmatpush1.bf16.msra.mxu1 %v17792_v31  ;;  %v17873_v31 = vld [vmem:[%s18593_s14 + $0x540] ss:$20 sps:$4 sm:$0xff]  }
  0x3e   : > { %3527 = vmatprep.subr.bf16.mxu1 %v18438_v1 }
  0x3f   : > { %1585 = vmatpush1.bf16.msra.mxu0 %v17728_v14  ;;  %v17859_v14 = vld [vmem:[%s22723_s1 + $0xf0] sm:$0xff]  }
  0x40   : > { %1586 = vmatprep.subr.bf16.mxu0 %v18438_v1 }
  0x41   : > { %3528 = vmatpush1.bf16.msra.mxu1 %v17794_v35  ;;  %v17879_v35 = vld [vmem:[%s18593_s14 + $0x568] ss:$20 sps:$4 sm:$0xff]  }
  0x42   : > { %3529 = vmatprep.subr.bf16.mxu1 %v18438_v1 }
  0x43   : > { %1587 = vmatpush1.bf16.msra.mxu0 %v17729_v16  ;;  %v17765_v16 = vld [vmem:[%s18593_s14 + $0x168] ss:$20 sps:$4 sm:$0xff]  }
  0x44   : > { %1588 = vmatprep.subr.bf16.mxu0 %v18438_v1 }
  0x45   : > { %3530 = vmatpush1.bf16.msra.mxu1 %v17798_v38  ;;  %v17881_v38 = vld [vmem:[%s18593_s14 + $0x564] ss:$20 sps:$4 sm:$0xff]  }
  0x46   : > { %3531 = vmatprep.subr.bf16.mxu1 %v18438_v1 }
  0x47   : > { %1589 = vmatpush1.bf16.msra.mxu0 %v17730_v18  ;;  %v17847_v18 = vld [vmem:[%s18593_s14 + $0x49c] ss:$20 sps:$4 sm:$0xff]  }
  0x48   : > { %1590 = vmatprep.subr.bf16.mxu0 %v18438_v1 }
  0x49   : > { %3532 = vmatpush1.bf16.msra.mxu1 %v17800_v42  ;;  %v17887_v42 = vld [vmem:[%s18593_s14 + $0x58c] ss:$20 sps:$4 sm:$0xff]  }
  0x4a   : > { %3533 = vmatprep.subr.bf16.mxu1 %v18438_v1 }
  0x4b   : > { %1591 = vmatpush1.bf16.msra.mxu0 %v17731_v20  ;;  %v17771_v20 = vld [vmem:[%s18593_s14 + $0x190] ss:$20 sps:$4 sm:$0xff]  }
  0x4c   : > { %1592 = vmatprep.subr.bf16.mxu0 %v18438_v1 }
  0x4d   : > { %3534 = vmatpush1.bf16.msra.mxu1 %v17803_v44  ;;  %v17804_v44 = vld [vmem:[%s18593_s14 + $0x280] ss:$20 sps:$4 sm:$0xff]  }
  0x4e   : > { %3535 = vmatprep.subr.bf16.mxu1 %v18438_v1 }
  0x4f   : > { %1593 = vmatpush1.bf16.msra.mxu0 %v17732_v22  ;;  %v17855_v22 = vld [vmem:[%s18593_s14 + $0x4c4] ss:$20 sps:$4 sm:$0xff]  }
  0x50   : > { %1594 = vmatprep.subr.bf16.mxu0 %v18438_v1 }
  0x51   : > { %3536 = vmatpush1.bf16.msra.mxu1 %v17806_v48  ;;  %v17897_v48 = vld [vmem:[%s18593_s14 + $0x5e0] ss:$20 sps:$4 sm:$0xff]  }
  0x52   : > { %3537 = vmatprep.subr.bf16.mxu1 %v18438_v1 }
  0x53   : > { %1595 = vmatpush1.bf16.msra.mxu0 %v17733_v24  ;;  %v17776_v24 = vld [vmem:[%s18593_s14 + $0x1b8] ss:$20 sps:$4 sm:$0xff]  }
  0x54   : > { %1796 = vmatprep.subr.bf16.mxu0 %v18438_v1 }
  0x55   : > { %3538 = vmatpush1.bf16.msra.mxu1 %v17809_v49  ;;  %v17810_v49 = vld [vmem:[%s18593_s14 + $0x2a8] ss:$20 sps:$4 sm:$0xff]  }
  0x56   : > { %1597 = vmatmul.mubr.bf16.vlgmr.msra.gmra.mrb[0].mxu0 %v17734_v26  ;;  %17034 = vmatprep.subr.bf16.mxu1 %v18438_v1  ;;  %v17862_v26 = vld [vmem:[%s18593_s14 + $0x4ec] ss:$20 sps:$4 sm:$0xff]  }
  0x57   : > { %1604 = vmatprep.mubr.bf16.mxu0 %v17737_v27  ;;  %1797 = vmatpush1.bf16.msra.mxu0 %v17755_v28  ;;  %v17867_v27 = vld [vmem:[%s18593_s14 + $0x518] ss:$20 sps:$4 sm:$0xff]   ;;  %v17782_v28 = vld [vmem:[%s18593_s14 + $0x1e0] ss:$20 sps:$4 sm:$0xff]  }
  0x58   : > { %1798 = vmatprep.subr.bf16.mxu0 %v18438_v1  ;;  %3540 = vmatmul.mubr.bf16.vlgmr.msra.gmra.mrb[0].mxu1 %v17811_v53  ;;  %v17817_v53 = vld [vmem:[%s18593_s14 + $0x2d0] ss:$20 sps:$4 sm:$0xff]  }
  0x59   : > { %3547 = vmatprep.mubr.bf16.mxu1 %v17818_v54  ;;  %v17821_v54 = vld [vmem:[%s18593_s14 + $0x2fc] ss:$20 sps:$4 sm:$0xff]  }
  0x5b   : > { %1799 = vmatpush1.bf16.msra.mxu0 %v17762_v30  ;;  %v17869_v30 = vld [vmem:[%s18593_s14 + $0x514] ss:$20 sps:$4 sm:$0xff]  }
  0x5c   : > { %1800 = vmatprep.subr.bf16.mxu0 %v18438_v1 }
  0x5e   : > { %1605 = vmatmul.mubr.bf16.gmra.mrb[4].mxu0 %v17739_v32  ;;  %v17788_v32 = vld [vmem:[%s18593_s14 + $0x208] ss:$20 sps:$4 sm:$0xff]  }
  0x5f   : > { %1612 = vmatprep.mubr.bf16.mxu0 %v17740_v33  ;;  %1801 = vmatpush1.bf16.msra.mxu0 %v17767_v34  ;;  %v17790_v33 = vld [vmem:[%s18593_s14 + $0x234] ss:$20 sps:$4 sm:$0xff]   ;;  %v17875_v34 = vld [vmem:[%s18593_s14 + $0x53c] ss:$20 sps:$4 sm:$0xff]  }
  0x60   : > { %1802 = vmatprep.subr.bf16.mxu0 %v18438_v1  ;;  %3548 = vmatmul.mubr.bf16.gmra.mrb[4].mxu1 %v17820_v59  ;;  %v17823_v59 = vld [vmem:[%s18593_s14 + $0x2f8] ss:$20 sps:$4 sm:$0xff]  }
  0x61   : > { %3555 = vmatprep.mubr.bf16.mxu1 %v17825_v60  ;;  %v17828_v60 = vld [vmem:[%s18593_s14 + $0x324] ss:$20 sps:$4 sm:$0xff]  }
  0x63   : > { %1803 = vmatpush1.bf16.msra.mxu0 %v17777_v37  ;;  %v17796_v37 = vld [vmem:[%s18593_s14 + $0x25c] ss:$20 sps:$4 sm:$0xff]  }
  0x64   : > { %1804 = vmatprep.subr.bf16.mxu0 %v18438_v1 }
  0x66   : > { %1613 = vmatmul.mubr.bf16.gmra.mrb[8].mxu0 %v17742_v39  ;;  %v17885_v39 = vld [vmem:[%s18593_s14 + $0x590] ss:$20 sps:$4 sm:$0xff]  }
  0x67   : > { %1620 = vmatprep.mubr.bf16.mxu0 %v17743_v40  ;;  %1805 = vmatpush1.bf16.msra.mxu0 %v17786_v41  ;;  %v17799_v40 = vld [vmem:[%s18593_s14 + $0x258] ss:$20 sps:$4 sm:$0xff]  }
  0x68   : > { %1806 = vmatprep.subr.bf16.mxu0 %v18438_v1  ;;  %3556 = vmatmul.mubr.bf16.gmra.mrb[8].mxu1 %v17827_v63  ;;  %v17801_v41 = vld [vmem:[%s18593_s14 + $0x284] ss:$20 sps:$4 sm:$0xff]   ;;  %v17933_v63 = vld [vmem:[%s22723_s1 + $0x90] sm:$0xff]  }
  0x69   : > { %3563 = vmatprep.mubr.bf16.mxu1 %v17831_v0  ;;  %v17937_v0 = vld [vmem:[%s22723_s1 + $0x98] sm:$0xff]  }
  0x6b   : > { %1807 = vmatpush1.bf16.msra.mxu0 %v17795_v43  ;;  %v17891_v43 = vld [vmem:[%s18593_s14 + $0x5b8] ss:$20 sps:$4 sm:$0xff]  }
  0x6c   : > { %1808 = vmatprep.subr.bf16.mxu0 %v18438_v1 }
  0x6e   : > { %1621 = vmatmul.mubr.bf16.gmra.mrb[12].mxu0 %v17745_v45  ;;  %v22734_v45 = vmov 0.0  }
  0x6f   : > { %1628 = vmatprep.mubr.bf16.mxu0 %v17746_v46  ;;  %1809 = vmatpush1.bf16.msra.mxu0 %v17805_v47  ;;  %v17807_v46 = vld [vmem:[%s18593_s14 + $0x2ac] ss:$20 sps:$4 sm:$0xff]   ;;  %v17893_v47 = vld [vmem:[%s18593_s14 + $0x5b4] ss:$20 sps:$4 sm:$0xff]   ;;  %387 = vst.msk [vmem:[#allocation3] sm:$0xff] %vm386_vm3, %v22734_v45  ;;  %388 = vst.msk [vmem:[#allocation3 + $0x8] sm:$0xff] %vm386_vm3, %v22734_v45 }
  0x70   : > { %1810 = vmatprep.subr.bf16.mxu0 %v18438_v1  ;;  %3564 = vmatmul.mubr.bf16.gmra.mrb[12].mxu1 %v17833_v6  ;;  %v17942_v6 = vld [vmem:[%s22723_s1 + $0xa0] sm:$0xff]   ;;  %389 = vst.msk [vmem:[#allocation3 + $0x10] sm:$0xff] %vm386_vm3, %v22734_v45  ;;  %390 = vst.msk [vmem:[#allocation3 + $0x18] sm:$0xff] %vm386_vm3, %v22734_v45 }
  0x71   : > { %3571 = vmatprep.mubr.bf16.mxu1 %v17838_v7  ;;  %v17945_v7 = vld [vmem:[%s22723_s1 + $0xa8] sm:$0xff]   ;;  %391 = vst.msk [vmem:[#allocation3 + $0x20] sm:$0xff] %vm386_vm3, %v22734_v45  ;;  %392 = vst.msk [vmem:[#allocation3 + $0x28] sm:$0xff] %vm386_vm3, %v22734_v45 }
  0x72   : > { %393 = vst.msk [vmem:[#allocation3 + $0x30] sm:$0xff] %vm386_vm3, %v22734_v45  ;;  %394 = vst.msk [vmem:[#allocation3 + $0x38] sm:$0xff] %vm386_vm3, %v22734_v45 }
  0x73   : > { %1811 = vmatpush1.bf16.msra.mxu0 %v17814_v50  ;;  %v17815_v50 = vld [vmem:[%s18593_s14 + $0x2d4] ss:$20 sps:$4 sm:$0xff]   ;;  %395 = vst.msk [vmem:[#allocation3 + $0x40] sm:$0xff] %vm386_vm3, %v22734_v45  ;;  %396 = vst.msk [vmem:[#allocation3 + $0x48] sm:$0xff] %vm386_vm3, %v22734_v45 }
  0x74   : > { %1812 = vmatprep.subr.bf16.mxu0 %v18438_v1  ;;  %397 = vst.msk [vmem:[#allocation3 + $0x50] sm:$0xff] %vm386_vm3, %v22734_v45  ;;  %398 = vst.msk [vmem:[#allocation3 + $0x58] sm:$0xff] %vm386_vm3, %v22734_v45 }
  0x75   : > { %399 = vst.msk [vmem:[#allocation3 + $0x60] sm:$0xff] %vm386_vm3, %v22734_v45  ;;  %400 = vst.msk [vmem:[#allocation3 + $0x68] sm:$0xff] %vm386_vm3, %v22734_v45 }
  0x76   : > { %1629 = vmatmul.mubr.bf16.gmra.mrb[16].mxu0 %v17748_v51  ;;  %v17899_v51 = vld [vmem:[%s18593_s14 + $0x5dc] ss:$20 sps:$4 sm:$0xff]   ;;  %401 = vst.msk [vmem:[#allocation3 + $0x70] sm:$0xff] %vm386_vm3, %v22734_v45  ;;  %402 = vst.msk [vmem:[#allocation3 + $0x78] sm:$0xff] %vm386_vm3, %v22734_v45 }
  0x77   : > { %1636 = vmatprep.mubr.bf16.mxu0 %v17749_v52  ;;  %1813 = vmatpush1.bf16.msra.mxu0 %v17824_v55  ;;  %v17903_v52 = vld [vmem:[%s18593_s14 + $0x608] ss:$20 sps:$4 sm:$0xff]   ;;  %v17905_v55 = vld [vmem:[%s18593_s14 + $0x604] ss:$20 sps:$4 sm:$0xff]   ;;  %403 = vst.msk [vmem:[#allocation3 + $0x80] sm:$0xff] %vm386_vm3, %v22734_v45  ;;  %404 = vst.msk [vmem:[#allocation3 + $0x88] sm:$0xff] %vm386_vm3, %v22734_v45 }
  0x78   : > { %1814 = vmatprep.subr.bf16.mxu0 %v18438_v1  ;;  %3572 = vmatmul.mubr.bf16.gmra.mrb[16].mxu1 %v17840_v12  ;;  %v17950_v12 = vld [vmem:[%s22723_s1 + $0xb0] sm:$0xff]   ;;  %405 = vst.msk [vmem:[#allocation3 + $0x90] sm:$0xff] %vm386_vm3, %v22734_v45  ;;  %406 = vst.msk [vmem:[#allocation3 + $0x98] sm:$0xff] %vm386_vm3, %v22734_v45 }
  0x79   : > { %3579 = vmatprep.mubr.bf16.mxu1 %v17845_v13  ;;  %v17953_v13 = vld [vmem:[%s22723_s1 + $0xb8] sm:$0xff]   ;;  %407 = vst.msk [vmem:[#allocation3 + $0xa0] sm:$0xff] %vm386_vm3, %v22734_v45  ;;  %408 = vst.msk [vmem:[#allocation3 + $0xa8] sm:$0xff] %vm386_vm3, %v22734_v45 }
  0x7a   : > { %409 = vst.msk [vmem:[#allocation3 + $0xb0] sm:$0xff] %vm386_vm3, %v22734_v45  ;;  %410 = vst.msk [vmem:[#allocation3 + $0xb8] sm:$0xff] %vm386_vm3, %v22734_v45 }
  0x7b   : > { %1815 = vmatpush1.bf16.msra.mxu0 %v17834_v56  ;;  %v17910_v56 = vld [vmem:[%s18593_s14 + $0x630] ss:$20 sps:$4 sm:$0xff]   ;;  %411 = vst.msk [vmem:[#allocation3 + $0xc0] sm:$0xff] %vm386_vm3, %v22734_v45 }
  0x7c   : > { %1816 = vmatprep.subr.bf16.mxu0 %v18438_v1 }
  0x7e   : > { %1637 = vmatmul.mubr.bf16.gmra.mrb[20].mxu0 %v17751_v57  ;;  %v17925_v57 = vld [vmem:[%s22723_s1 + $0x80] sm:$0xff]  }
  0x7f   : > { %1644 = vmatprep.mubr.bf16.mxu0 %v17752_v58  ;;  %1817 = vmatpush1.bf16.msra.mxu0 %v17844_v2  ;;  %v17928_v58 = vld [vmem:[%s22723_s1 + $0x88] sm:$0xff]   ;;  %v17830_v2 = vld [vmem:[%s18593_s14 + $0x320] ss:$20 sps:$4 sm:$0xff]  }
  0x80   : > { %1818 = vmatprep.subr.bf16.mxu0 %v18438_v1  ;;  %3580 = vmatmul.mubr.bf16.gmra.mrb[20].mxu1 %v17847_v18  ;;  %v17958_v18 = vld [vmem:[%s22723_s1 + $0xc0] sm:$0xff]  }
  0x81   : > { %3587 = vmatprep.mubr.bf16.mxu1 %v17853_v19  ;;  %17050 = vmatpush1.bf16.msra.mxu1 %v17925_v57  ;;  %v557_v19 = vld [vmem:[%s18593_s14 + $0x3c0] sm:$0xff]  ;;  %v17890_v57 = vld [vmem:[%s18593_s14 + $0xa8] ss:$20 sps:$4 sm:$0xff]  }
  0x82   : > { %17035 = vmatprep.subr.bf16.mxu1 %v18438_v1 }
  0x83   : > { %1819 = vmatpush1.bf16.msra.mxu0 %v17848_v3  ;;  %v17835_v3 = vld [vmem:[%s18593_s14 + $0x34c] ss:$20 sps:$4 sm:$0xff]  }
  0x84   : > { %1820 = vmatprep.subr.bf16.mxu0 %v18438_v1 }
  0x85   : > { %17051 = vmatpush1.bf16.msra.mxu1 %v17928_v58  ;;  %v17894_v58 = vld [vmem:[%s18593_s14 + $0xd4] ss:$20 sps:$4 sm:$0xff]  }
  0x86   : > { %1645 = vmatmul.mubr.bf16.gmra.mrb[24].mxu0 %v17754_v61  ;;  %v17912_v61 = vld [vmem:[%s18593_s14 + $0x62c] ss:$20 sps:$4 sm:$0xff]   ;;  %17036 = vmatprep.subr.bf16.mxu1 %v18438_v1 }
  0x87   : > { %1652 = vmatprep.mubr.bf16.mxu0 %v17756_v62  ;;  %1821 = vmatpush1.bf16.msra.mxu0 %v17852_v8  ;;  %v17916_v62 = vld [vmem:[%s18593_s14 + $0x658] ss:$20 sps:$4 sm:$0xff]   ;;  %v17837_v8 = vld [vmem:[%s18593_s14 + $0x348] ss:$20 sps:$4 sm:$0xff]  }
  0x88   : > { %1822 = vmatprep.subr.bf16.mxu0 %v18438_v1  ;;  %3588 = vmatmul.mubr.bf16.gmra.mrb[24].mxu1 %v17855_v22  ;;  %v17941_v22 = vld [vmem:[%s18593_s14 + $0x6cc] ss:$20 sps:$4 sm:$0xff]  }
  0x89   : > { %3595 = vmatprep.mubr.bf16.mxu1 %v17860_v23  ;;  %17052 = vmatpush1.bf16.msra.mxu1 %v17933_v63  ;;  %v17947_v23 = vld [vmem:[%s18593_s14 + $0x6f8] ss:$20 sps:$4 sm:$0xff]   ;;  %v17896_v63 = vld [vmem:[%s18593_s14 + $0xd0] ss:$20 sps:$4 sm:$0xff]  }
  0x8a   : > { %17037 = vmatprep.subr.bf16.mxu1 %v18438_v1 }
  0x8b   : > { %1823 = vmatpush1.bf16.msra.mxu0 %v17856_v9  ;;  %v17841_v9 = vld [vmem:[%s18593_s14 + $0x374] ss:$20 sps:$4 sm:$0xff]  }
  0x8c   : > { %1824 = vmatprep.subr.bf16.mxu0 %v18438_v1 }
  0x8d   : > { %17053 = vmatpush1.bf16.msra.mxu1 %v17937_v0  ;;  %v2503_v0 = vld [vmem:[%s18593_s14 + $0x79c] sm:$0xff] }
  0x8e   : > { %1653 = vmatmul.mubr.bf16.gmra.mrb[28].mxu0 %v17758_v4  ;;  %v17918_v4 = vld [vmem:[%s18593_s14 + $0x654] ss:$20 sps:$4 sm:$0xff]   ;;  %17038 = vmatprep.subr.bf16.mxu1 %v18438_v1 }
  0x8f   : > { %1660 = vmatprep.mubr.bf16.mxu0 %v17759_v5  ;;  %1825 = vmatpush1.bf16.msra.mxu0 %v17859_v14  ;;  %v17922_v5 = vld [vmem:[%s18593_s14 + $0x680] ss:$20 sps:$4 sm:$0xff]   ;;  %v17843_v14 = vld [vmem:[%s18593_s14 + $0x370] ss:$20 sps:$4 sm:$0xff]  }
  0x90   : > { %1826 = vmatprep.subr.bf16.mxu0 %v18438_v1  ;;  %3596 = vmatmul.mubr.bf16.gmra.mrb[28].mxu1 %v17862_v26  ;;  %v17969_v26 = vld [vmem:[%s22723_s1 + $0xd8] sm:$0xff]  }
  0x91   : > { %3603 = vmatprep.mubr.bf16.mxu1 %v17867_v27  ;;  %17054 = vmatpush1.bf16.msra.mxu1 %v17942_v6  ;;  %v17866_v27 = vld [vmem:[%s18593_s14 + $0xc] ss:$20 sps:$4 sm:$0xff]   ;;  %v18001_v6 = vld [vmem:[%s22723_s1 + $0x118] sm:$0xff]  }
  0x92   : > { %17039 = vmatprep.subr.bf16.mxu1 %v18438_v1 }
  0x93   : > { %1827 = vmatpush1.bf16.msra.mxu0 %v17863_v15  ;;  %v17849_v15 = vld [vmem:[%s18593_s14 + $0x39c] ss:$20 sps:$4 sm:$0xff]  }
  0x94   : > { %15380 = vmatprep.subr.bf16.mxu0 %v22734_v45 }
  0x95   : > { %17055 = vmatpush1.bf16.msra.mxu1 %v17945_v7  ;;  %v17902_v7 = vld [vmem:[%s18593_s14 + $0xf8] ss:$20 sps:$4 sm:$0xff]  }
  0x96   : > { %1661 = vmatmul.mubr.bf16.gmra.mrb[32].mxu0 %v17761_v10  ;;  %v17924_v10 = vld [vmem:[%s18593_s14 + $0x67c] ss:$20 sps:$4 sm:$0xff]   ;;  %17040 = vmatprep.subr.bf16.mxu1 %v18438_v1 }
  0x97   : > { %1668 = vmatprep.mubr.bf16.mxu0 %v17763_v11  ;;  %v17930_v11 = vld [vmem:[%s18593_s14 + $0x6a8] ss:$20 sps:$4 sm:$0xff]  }
  0x98   : > { %3604 = vmatmul.mubr.bf16.gmra.mrb[32].mxu1 %v17869_v30  ;;  %v17955_v30 = vld [vmem:[%s18593_s14 + $0x720] ss:$20 sps:$4 sm:$0xff]  }
  0x99   : > { %3611 = vmatprep.mubr.bf16.mxu1 %v17873_v31  ;;  %17056 = vmatpush1.bf16.msra.mxu1 %v17950_v12  ;;  %v17975_v31 = vld [vmem:[%s22723_s1 + $0xe0] sm:$0xff]  }
  0x9a   : > { %17041 = vmatprep.subr.bf16.mxu1 %v18438_v1 }
  0x9d   : > { %17057 = vmatpush1.bf16.msra.mxu1 %v17953_v13  ;;  %v17909_v13 = vld [vmem:[%s18593_s14 + $0x120] ss:$20 sps:$4 sm:$0xff]  }
  0x9e   : > { %1669 = vmatmul.mubr.bf16.gmra.mrb[36].mxu0 %v17765_v16  ;;  %v17932_v16 = vld [vmem:[%s18593_s14 + $0x6a4] ss:$20 sps:$4 sm:$0xff]   ;;  %17042 = vmatprep.subr.bf16.mxu1 %v18438_v1 }
  0x9f   : > { %1676 = vmatprep.mubr.bf16.mxu0 %v17768_v17  ;;  %v17939_v17 = vld [vmem:[%s18593_s14 + $0x6d0] ss:$20 sps:$4 sm:$0xff]  }
  0xa0   : > { %3612 = vmatmul.mubr.bf16.gmra.mrb[36].mxu1 %v17875_v34  ;;  %v17870_v34 = vld [vmem:[%s18593_s14 + $0x34] ss:$20 sps:$4 sm:$0xff]  }
  0xa1   : > { %3619 = vmatprep.mubr.bf16.mxu1 %v17879_v35  ;;  %17058 = vmatpush1.bf16.msra.mxu1 %v17958_v18  ;;  %v17906_v35 = vld [vmem:[%s22723_s1 + $0x100] sm:$0xff]   ;;  %v17919_v18 = vld [vmem:[%s18593_s14 + $0x174] ss:$20 sps:$4 sm:$0xff]  }
  0xa2   : > { %17043 = vmatprep.subr.bf16.mxu1 %v18438_v1 }
  0xa6   : > { %1677 = vmatmul.mubr.bf16.gmra.mrb[40].mxu0 %v17771_v20  ;;  %v17961_v20 = vld [vmem:[%s22723_s1 + $0xc8] sm:$0xff]  }
  0xa7   : > { %1684 = vmatprep.mubr.bf16.mxu0 %v17773_v21  ;;  %v17851_v21 = vld [vmem:[%s18593_s14 + $0x398] ss:$20 sps:$4 sm:$0xff]   ;;  %17059 = vmatpush1.bf16.msra.mxu1 %v17961_v20  ;;  %v18028_v20 = vld [vmem:[%s22723_s1 + $0x128] ss:$0 sps:$4 sm:$0xff]  }
  0xa8   : > { %3620 = vmatmul.mubr.bf16.gmra.mrb[40].mxu1 %v17881_v38  ;;  %17044 = vmatprep.subr.bf16.mxu1 %v18438_v1  ;;  %v17982_v38 = vld [vmem:[%s22723_s1 + $0xf0] sm:$0xff]  }
  0xa9   : > { %3627 = vmatprep.mubr.bf16.mxu1 %v17885_v39  ;;  %v17936_v39 = vld [vmem:[%s22723_s1 + $0x108] sm:$0xff]  }
  0xae   : > { %1685 = vmatmul.mubr.bf16.gmra.mrb[44].mxu0 %v17776_v24  ;;  %v13622_v24 = vcombine.high %v557_v19, %v557_v19 }
  0xaf   : > { %1692 = vmatprep.mubr.bf16.mxu0 %v17779_v25  ;;  %v17966_v25 = vld [vmem:[%s22723_s1 + $0xd0] sm:$0xff]  }
  0xb0   : > { %3628 = vmatmul.mubr.bf16.gmra.mrb[44].mxu1 %v17887_v42  ;;  %v17876_v42 = vld [vmem:[%s18593_s14 + $0x5c] ss:$20 sps:$4 sm:$0xff]  }
  0xb1   : > { %3635 = vmatprep.mubr.bf16.mxu1 %v17891_v43  ;;  %17060 = vmatpush1.bf16.msra.mxu1 %v17966_v25  ;;  %v17971_v43 = vld [vmem:[%s22723_s1 + $0x110] sm:$0xff]   ;;  %v17929_v25 = vld [vmem:[%s18593_s14 + $0x198] ss:$20 sps:$4 sm:$0xff]  }
  0xb2   : > { %17045 = vmatprep.subr.bf16.mxu1 %v18438_v1 }
  0xb5   : > { %17061 = vmatpush1.bf16.msra.mxu1 %v17969_v26  ;;  %v17934_v26 = vld [vmem:[%s18593_s14 + $0x1c4] ss:$20 sps:$4 sm:$0xff]  }
  0xb6   : > { %1693 = vmatmul.mubr.bf16.gmra.mrb[48].mxu0 %v17782_v28  ;;  %v17949_v28 = vld [vmem:[%s18593_s14 + $0x6f4] ss:$20 sps:$4 sm:$0xff]   ;;  %17046 = vmatprep.subr.bf16.mxu1 %v18438_v1 }
  0xb7   : > { %1700 = vmatprep.mubr.bf16.mxu0 %v17784_v29  ;;  %v13621_v29 = vcombine.low %v557_v19, %v557_v19  ;;  %v18015_v19 = vld [vmem:[%s18593_s14 + $0x40c] ss:$20 sps:$4 sm:$0xff]  }
  0xb8   : > { %3636 = vmatmul.mubr.bf16.gmra.mrb[48].mxu1 %v17893_v47  ;;  %v17878_v47 = vld [vmem:[%s18593_s14 + $0x58] ss:$20 sps:$4 sm:$0xff]  }
  0xb9   : > { %3643 = vmatprep.mubr.bf16.mxu1 %v17897_v48  ;;  %17062 = vmatpush1.bf16.msra.mxu1 %v17975_v31  ;;  %v2502_v48 = vld [vmem:[%s18593_s14 + $0x794] sm:$0xff]  ;;  %v17946_v31 = vld [vmem:[%s18593_s14 + $0x1e8] ss:$20 sps:$4 sm:$0xff]  }
  0xba   : > { %17047 = vmatprep.subr.bf16.mxu1 %v18438_v1 }
  0xbe   : > { %1701 = vmatmul.mubr.bf16.gmra.mrb[52].mxu0 %v17788_v32  ;;  %v17978_v32 = vld [vmem:[%s22723_s1 + $0xe8] sm:$0xff]  }
  0xbf   : > { %1708 = vmatprep.mubr.bf16.mxu0 %v17790_v33  ;;  %v17864_v33 = vld [vmem:[%s18593_s14 + $0x8] ss:$20 sps:$4 sm:$0xff]   ;;  %17063 = vmatpush1.bf16.msra.mxu1 %v17978_v32 }
  0xc0   : > { %3644 = vmatmul.mubr.bf16.gmra.mrb[52].mxu1 %v17899_v51  ;;  %17048 = vmatprep.subr.bf16.mxu1 %v18438_v1  ;;  %v13811_v51 = vcombine.high %v2502_v48, %v2502_v48  ;;  %v17951_v32 = vld [vmem:[%s18593_s14 + $0x214] ss:$20 sps:$4 sm:$0xff]  }
  0xc1   : > { %3651 = vmatprep.mubr.bf16.mxu1 %v17903_v52  ;;  %v17884_v52 = vld [vmem:[%s18593_s14 + $0x80] ss:$20 sps:$4 sm:$0xff]  }
  0xc3   : > { %17064 = vmatpush1.bf16.msra.mxu1 %v17982_v38  ;;  %v17967_v38 = vld [vmem:[%s18593_s14 + $0x264] ss:$20 sps:$4 sm:$0xff]  }
  0xc4   : > { %17049 = vmatprep.subr.bf16.mxu1 %v18438_v1 }
  0xc6   : > { %1709 = vmatmul.mubr.bf16.gmra.mrb[56].mxu0 %v17793_v36  ;;  %v17957_v36 = vld [vmem:[%s18593_s14 + $0x71c] ss:$20 sps:$4 sm:$0xff]  }
  0xc7   : > { %1716 = vmatprep.mubr.bf16.mxu0 %v17796_v37  ;;  %v17963_v37 = vld [vmem:[%s18593_s14 + $0x748] ss:$20 sps:$4 sm:$0xff]  }
  0xc8   : > { %3652 = vmatmul.mubr.bf16.gmra.mrb[56].mxu1 %v17905_v55  ;;  %v17989_v55 = vld [vmem:[%s18593_s14 + $0x750] ss:$20 sps:$4 sm:$0xff]  }
  0xc9   : > { %3659 = vmatprep.mubr.bf16.mxu1 %v17910_v56  ;;  %v18003_v56 = vld [vmem:[%s22723_s1 + $0x118] sm:$0xff]  }
  0xce   : > { %1717 = vmatmul.mubr.bf16.gmra.mrb[60].mxu0 %v17799_v40  ;;  %v17985_v40 = vld [vmem:[%s22723_s1 + $0xf8] sm:$0xff]  }
  0xcf   : > { %1724 = vmatprep.mubr.bf16.mxu0 %v17801_v41  ;;  %v17872_v41 = vld [vmem:[%s18593_s14 + $0x30] ss:$20 sps:$4 sm:$0xff]   ;;  %17065 = vmatpush1.bf16.msra.mxu1 %v17985_v40  ;;  %v17970_v40 = vld [vmem:[%s18593_s14 + $0x260] ss:$20 sps:$4 sm:$0xff]  }
  0xd0   : > { %3660 = vmatmul.mubr.bf16.gmra.mrb[60].mxu1 %v17912_v61  ;;  %15492 = vmatprep.subr.bf16.mxu1 %v22734_v45  ;;  %v17995_v61 = vld [vmem:[%s18593_s14 + $0x778] ss:$20 sps:$4 sm:$0xff]  }
  0xd1   : > { %3667 = vmatprep.mubr.bf16.mxu1 %v17916_v62  ;;  %v17993_v62 = vld [vmem:[%s22723_s1 + $0x108] sm:$0xff]  }
  0xd6   : > { %1725 = vmatmul.mubr.bf16.gmra.mrb[64].mxu0 %v17804_v44  ;;  %v17965_v44 = vld [vmem:[%s18593_s14 + $0x744] ss:$20 sps:$4 sm:$0xff]  }
  0xd7   : > { %1732 = vmatprep.mubr.bf16.mxu0 %v17807_v46  ;;  %v17972_v46 = vld [vmem:[%s18593_s14 + $0x770] ss:$20 sps:$4 sm:$0xff]  }
  0xd8   : > { %3668 = vmatmul.mubr.bf16.gmra.mrb[64].mxu1 %v17918_v4  ;;  %v17998_v4 = vld [vmem:[%s22723_s1 + $0x110] sm:$0xff]  }
  0xd9   : > { %3675 = vmatprep.mubr.bf16.mxu1 %v17922_v5  ;;  %v13813_v5 = vcombine.high %v2503_v0, %v2503_v0 }
  0xde   : > { %1733 = vmatmul.mubr.bf16.gmra.mrb[68].mxu0 %v17810_v49  ;;  %v17882_v49 = vld [vmem:[%s18593_s14 + $0x84] ss:$20 sps:$4 sm:$0xff]  }
  0xdf   : > { %1740 = vmatprep.mubr.bf16.mxu0 %v17815_v50  ;;  %v17974_v50 = vld [vmem:[%s18593_s14 + $0x76c] ss:$20 sps:$4 sm:$0xff]  }
  0xe0   : > { %3676 = vmatmul.mubr.bf16.gmra.mrb[68].mxu1 %v17924_v10  ;;  %v18006_v10 = vld [vmem:[%s22723_s1 + $0x120] sm:$0xff]  }
  0xe1   : > { %3683 = vmatprep.mubr.bf16.mxu1 %v17930_v11  ;;  %v13812_v11 = vcombine.low %v2503_v0, %v2503_v0  ;;  %v18050_v0 = vld [vmem:[%s18593_s14 + $0x63c] ss:$20 sps:$4 sm:$0xff]  }
  0xe6   : > { %1741 = vmatmul.mubr.bf16.gmra.mrb[72].mxu0 %v17817_v53  ;;  %v17888_v53 = vld [vmem:[%s18593_s14 + $0xac] ss:$20 sps:$4 sm:$0xff]  }
  0xe7   : > { %1748 = vmatprep.mubr.bf16.mxu0 %v17821_v54  ;;  %v13810_v54 = vcombine.low %v2502_v48, %v2502_v48  ;;  %v17991_v48 = vld [vmem:[%s18593_s14 + $0x2dc] ss:$20 sps:$4 sm:$0xff]  }
  0xe8   : > { %3684 = vmatmul.mubr.bf16.gmra.mrb[72].mxu1 %v17932_v16  ;;  %v18024_v16 = vld [vmem:[%s22723_s1 + $0x120] sm:$0xff]  }
  0xe9   : > { %3691 = vmatprep.mubr.bf16.mxu1 %v17939_v17  ;;  %v17915_v17 = vld [vmem:[%s18593_s14 + $0x148] ss:$20 sps:$4 sm:$0xff]  }
  0xee   : > { %1749 = vmatmul.mubr.bf16.gmra.mrb[76].mxu0 %v17823_v59  ;;  %v17987_v59 = vld [vmem:[%s18593_s14 + $0x74c] ss:$20 sps:$4 sm:$0xff]  }
  0xef   : > { %1756 = vmatprep.mubr.bf16.mxu0 %v17828_v60  ;;  %v17990_v60 = vld [vmem:[%s22723_s1 + $0x100] sm:$0xff]  }
  0xf0   : > { %3692 = vmatmul.mubr.bf16.gmra.mrb[76].mxu1 %v17941_v22  ;;  %v1562_v22 = vsel %vm1560_vm0, %v18028_v20, 0  ;;  %v18359_v20 = vld [vmem:[%s22723_s1 + $0xa8] sm:$0xff]  }
  0xf1   : > { %3699 = vmatprep.mubr.bf16.mxu1 %v17947_v23  ;;  %v17926_v23 = vld [vmem:[%s18593_s14 + $0x19c] ss:$20 sps:$4 sm:$0xff]  }
  0xf6   : > { %1757 = vmatmul.mubr.bf16.gmra.mrb[80].mxu0 %v17830_v2  ;;  %v17900_v2 = vld [vmem:[%s18593_s14 + $0xfc] ss:$20 sps:$4 sm:$0xff]  }
  0xf7   : > { %1764 = vmatprep.mubr.bf16.mxu0 %v17835_v3  ;;  %v17997_v3 = vld [vmem:[%s18593_s14 + $0x774] ss:$20 sps:$4 sm:$0xff]  }
  0xf8   : > { %3700 = vmatmul.mubr.bf16.gmra.mrb[80].mxu1 %v17949_v28  ;;  %v17938_v28 = vld [vmem:[%s18593_s14 + $0x1c0] ss:$20 sps:$4 sm:$0xff]  }
  0xf9   : > { %3707 = vmatprep.mubr.bf16.mxu1 %v17955_v30  ;;  %v18027_v30 = vld [vmem:[%s18593_s14 + $0x484] ss:$20 sps:$4 sm:$0xff]  }
  0xfe   : > { %1765 = vmatmul.mubr.bf16.gmra.mrb[84].mxu0 %v17837_v8  ;;  %v17907_v8 = vld [vmem:[%s18593_s14 + $0x124] ss:$20 sps:$4 sm:$0xff]  }
  0xff   : > { %1772 = vmatprep.mubr.bf16.mxu0 %v17841_v9  ;;  %v18009_v9 = vld [vmem:[%s22723_s1 + $0x128] ss:$0 sps:$4 sm:$0xff]  }
 0x100   : > { %3708 = vmatmul.mubr.bf16.gmra.mrb[84].mxu1 %v17957_v36  ;;  %v3505_v12 = vsel %vm1560_vm0, %v18009_v9, 0  ;;  %v18032_v36 = vld [vmem:[%s18593_s14 + $0x4d4] ss:$20 sps:$4 sm:$0xff]  }
 0x101   : > { %3715 = vmatprep.mubr.bf16.mxu1 %v17963_v37  ;;  %v17962_v37 = vld [vmem:[%s18593_s14 + $0x238] ss:$20 sps:$4 sm:$0xff]   ;;  %v18056_v9 = vld [vmem:[%s18593_s14 + $0x6b4] ss:$20 sps:$4 sm:$0xff]  }
 0x106   : > { %1773 = vmatmul.mubr.bf16.gmra.mrb[88].mxu0 %v17843_v14  ;;  %v17913_v14 = vld [vmem:[%s18593_s14 + $0x14c] ss:$20 sps:$4 sm:$0xff]  }
 0x107   : > { %1780 = vmatprep.mubr.bf16.mxu0 %v17849_v15  ;;  %v18011_v15 = vld [vmem:[%s18593_s14 + $0x3e4] ss:$20 sps:$4 sm:$0xff]  }
 0x108   : > { %3716 = vmatmul.mubr.bf16.gmra.mrb[88].mxu1 %v17965_v44  ;;  %v17983_v44 = vld [vmem:[%s18593_s14 + $0x2b4] ss:$20 sps:$4 sm:$0xff]  }
 0x109   : > { %3723 = vmatprep.mubr.bf16.mxu1 %v17972_v46  ;;  %v18038_v46 = vld [vmem:[%s18593_s14 + $0x54c] ss:$20 sps:$4 sm:$0xff]  }
 0x10e   : > { %1781 = vmatmul.mubr.bf16.gmra.mrb[92].mxu0 %v17851_v21  ;;  %v17921_v21 = vld [vmem:[%s18593_s14 + $0x170] ss:$20 sps:$4 sm:$0xff]  }
 0x10f   : > { %1788 = vmatprep.mubr.bf16.mxu0 %v13622_v24  ;;  %v18019_v24 = vld [vmem:[%s18593_s14 + $0x434] ss:$20 sps:$4 sm:$0xff]  }
 0x110   : > { %3724 = vmatmul.mubr.bf16.gmra.mrb[92].mxu1 %v17974_v50  ;;  %v17994_v50 = vld [vmem:[%s18593_s14 + $0x2d8] ss:$20 sps:$4 sm:$0xff]  }
 0x111   : > { %3731 = vmatprep.mubr.bf16.mxu1 %v13811_v51  ;;  %v17999_v51 = vld [vmem:[%s18593_s14 + $0x304] ss:$20 sps:$4 sm:$0xff]  }
 0x116   : > { %1789 = vmatmul.mubr.bf16.gmra.mrb[96].mxu0 %v13621_v29  ;;  %v17943_v29 = vld [vmem:[%s18593_s14 + $0x1ec] ss:$20 sps:$4 sm:$0xff]  }
 0x117   : > { %1828 = vmatprep.mubr.bf16.mxu0 %v17866_v27  ;;  %v18023_v27 = vld [vmem:[%s18593_s14 + $0x45c] ss:$20 sps:$4 sm:$0xff]  }
 0x118   : > { %3732 = vmatmul.mubr.bf16.gmra.mrb[96].mxu1 %v13810_v54  ;;  %v18007_v54 = vld [vmem:[%s18593_s14 + $0x32c] ss:$20 sps:$4 sm:$0xff]  }
 0x119   : > { %3947 = vmatprep.mubr.bf16.mxu1 %v17989_v55  ;;  %v18044_v55 = vld [vmem:[%s18593_s14 + $0x5c4] ss:$20 sps:$4 sm:$0xff]  }
 0x11e   : > { %1829 = vmatmul.mubr.bf16.vlgmr.msra.gmra.mrb[0].mxu0 %v17864_v33  ;;  %v18030_v33 = vld [vmem:[%s18593_s14 + $0x4ac] ss:$20 sps:$4 sm:$0xff]  }
 0x11f   : > { %1836 = vmatprep.mubr.bf16.mxu0 %v17870_v34  ;;  %15381 = vmatpush3.bf16.msra.mxu0 %v17906_v35  ;;  %v17954_v34 = vld [vmem:[%s18593_s14 + $0x210] ss:$20 sps:$4 sm:$0xff]  }
 0x120   : > { %15382 = vmatprep.subr.bf16.mxu0 %v22734_v45  ;;  %3948 = vmatmul.mubr.bf16.vlgmr.msra.gmra.mrb[88].mxu1 %v17987_v59  ;;  %v17959_v35 = vld [vmem:[%s18593_s14 + $0x23c] ss:$20 sps:$4 sm:$0xff]  }
 0x121   : > { %15493 = vmatpush3.bf16.msra.mxu1 %v17990_v60  ;;  %3955 = vmatprep.mubr.bf16.mxu1 %v17995_v61  ;;  %v18014_v59 = vld [vmem:[%s18593_s14 + $0x350] ss:$20 sps:$4 sm:$0xff]   ;;  %v18048_v61 = vld [vmem:[%s18593_s14 + $0x614] ss:$20 sps:$4 sm:$0xff]  }
 0x122   : > { %15494 = vmatprep.subr.bf16.mxu1 %v22734_v45  ;;  %v18016_v60 = vld [vmem:[%s18593_s14 + $0x37c] ss:$20 sps:$4 sm:$0xff]  }
 0x123   : > { %15383 = vmatpush3.bf16.msra.mxu0 %v17936_v39  ;;  %v18034_v39 = vld [vmem:[%s18593_s14 + $0x4fc] ss:$20 sps:$4 sm:$0xff]  }
 0x124   : > { %15384 = vmatprep.subr.bf16.mxu0 %v22734_v45 }
 0x125   : > { %15495 = vmatpush3.bf16.msra.mxu1 %v17993_v62  ;;  %v18018_v62 = vld [vmem:[%s18593_s14 + $0x378] ss:$20 sps:$4 sm:$0xff]  }
 0x126   : > { %1837 = vmatmul.mubr.bf16.gmra.mrb[4].mxu0 %v17872_v41  ;;  %15496 = vmatprep.subr.bf16.mxu1 %v22734_v45  ;;  %v17976_v41 = vld [vmem:[%s18593_s14 + $0x28c] ss:$20 sps:$4 sm:$0xff]  }
 0x127   : > { %1844 = vmatprep.mubr.bf16.mxu0 %v17876_v42  ;;  %15385 = vmatpush3.bf16.msra.mxu0 %v17971_v43  ;;  %v18036_v42 = vld [vmem:[%s18593_s14 + $0x524] ss:$20 sps:$4 sm:$0xff]   ;;  %v17979_v43 = vld [vmem:[%s18593_s14 + $0x288] ss:$20 sps:$4 sm:$0xff]  }
 0x128   : > { %15386 = vmatprep.subr.bf16.mxu0 %v22734_v45  ;;  %3956 = vmatmul.mubr.bf16.gmra.mrb[92].mxu1 %v17997_v3  ;;  %v18022_v3 = vld [vmem:[%s18593_s14 + $0x3a0] ss:$20 sps:$4 sm:$0xff]  }
 0x129   : > { %15497 = vmatpush3.bf16.msra.mxu1 %v17998_v4  ;;  %3963 = vmatprep.mubr.bf16.mxu1 %v13813_v5  ;;  %v18052_v5 = vld [vmem:[%s18593_s14 + $0x664] ss:$20 sps:$4 sm:$0xff]  }
 0x12a   : > { %15498 = vmatprep.subr.bf16.mxu1 %v22734_v45 }
 0x12b   : > { %15387 = vmatpush3.bf16.msra.mxu0 %v18003_v56  ;;  %v18010_v56 = vld [vmem:[%s18593_s14 + $0x328] ss:$20 sps:$4 sm:$0xff]  }
 0x12c   : > { %15388 = vmatprep.subr.bf16.mxu0 %v22734_v45 }
 0x12d   : > { %15499 = vmatpush3.bf16.msra.mxu1 %v18001_v6 }
 0x12e   : > { %1845 = vmatmul.mubr.bf16.gmra.mrb[8].mxu0 %v17878_v47  ;;  %15500 = vmatprep.subr.bf16.mxu1 %v22734_v45  ;;  %v17986_v47 = vld [vmem:[%s18593_s14 + $0x2b0] ss:$20 sps:$4 sm:$0xff]  }
 0x12f   : > { %1852 = vmatprep.mubr.bf16.mxu0 %v17882_v49  ;;  %15389 = vmatpush3.bf16.msra.mxu0 %v18024_v16  ;;  %v18040_v49 = vld [vmem:[%s18593_s14 + $0x574] ss:$20 sps:$4 sm:$0xff]   ;;  %v18357_v16 = vld [vmem:[%s22723_s1 + $0x98] sm:$0xff]  }
 0x130   : > { %3964 = vmatmul.mubr.bf16.gmra.mrb[96].mxu1 %v13812_v11  ;;  %15390 = vmatprep.subr.bf16.mxu0 %v22734_v45  ;;  %v18031_v11 = vld [vmem:[%s18593_s14 + $0x38] ss:$20 sps:$4 sm:$0xff]  }
 0x131   : > { %15501 = vmatpush3.bf16.msra.mxu1 %v18006_v10  ;;  %15504 = vmatprep.mubr.msk.bf16.mxu1 %vm18440_vm2, %v22734_v45  ;;  %v18354_v10 = vld [vmem:[%s22723_s1 + $0x80] sm:$0xff]  }
 0x132   : > { %15502 = vmatprep.subr.bf16.mxu1 %v22734_v45 }
 0x133   : > { %15391 = vmatpush3.bf16.msra.mxu0 %v1562_v22  ;;  %v18360_v22 = vld [vmem:[%s22723_s1 + $0xb0] sm:$0xff]  }
 0x134   : > { %3739 = vmatprep.subr.bf16.mxu0 %v18438_v1 }
 0x135   : > { %15503 = vmatpush3.bf16.msra.mxu1 %v3505_v12  ;;  %v18355_v12 = vld [vmem:[%s22723_s1 + $0x88] sm:$0xff]  }
 0x136   : > { %1853 = vmatmul.mubr.bf16.gmra.mrb[12].mxu0 %v17884_v52  ;;  %15646 = vmatprep.subr.bf16.mxu1 %v22734_v45  ;;  %v18042_v52 = vld [vmem:[%s18593_s14 + $0x59c] ss:$20 sps:$4 sm:$0xff]  }
 0x137   : > { %1860 = vmatprep.mubr.bf16.mxu0 %v17888_v53  ;;  %v18002_v53 = vld [vmem:[%s18593_s14 + $0x300] ss:$20 sps:$4 sm:$0xff]  }
 0x138   : > { %15505 = vmatmul.mubr.msk.bf16.vlgmr.msra.gmra.mrb[100].mxu1 %vm1484_vm1, %v18011_v15  ;;  %v18033_v15 = vld [vmem:[%s18593_s14 + $0x60] ss:$20 sps:$4 sm:$0xff]  }
 0x139   : > { %15508 = vmatprep.mubr.msk.bf16.mxu1 %vm18440_vm2, %v22734_v45 }
 0x13e   : > { %1861 = vmatmul.mubr.bf16.gmra.mrb[16].mxu0 %v17890_v57  ;;  %v18012_v57 = vld [vmem:[%s18593_s14 + $0x354] ss:$20 sps:$4 sm:$0xff]  }
 0x13f   : > { %1868 = vmatprep.mubr.bf16.mxu0 %v17894_v58  ;;  %v18046_v58 = vld [vmem:[%s18593_s14 + $0x5ec] ss:$20 sps:$4 sm:$0xff]  }
 0x140   : > { %15509 = vmatmul.mubr.msk.bf16.gmra.mrb[104].mxu1 %vm1484_vm1, %v18015_v19  ;;  %v18035_v19 = vld [vmem:[%s18593_s14 + $0x88] ss:$20 sps:$4 sm:$0xff]  }
 0x141   : > { %15512 = vmatprep.mubr.msk.bf16.mxu1 %vm18440_vm2, %v22734_v45 }
 0x146   : > { %1869 = vmatmul.mubr.bf16.gmra.mrb[20].mxu0 %v17896_v63  ;;  %v18020_v63 = vld [vmem:[%s18593_s14 + $0x3a4] ss:$20 sps:$4 sm:$0xff]  }
 0x147   : > { %1876 = vmatprep.mubr.bf16.mxu0 %v17900_v2  ;;  %v558_v2 = vld [vmem:[%s18593_s14 + $0x3c8] sm:$0xff] }
 0x148   : > { %15513 = vmatmul.mubr.msk.bf16.gmra.mrb[108].mxu1 %vm1484_vm1, %v18019_v24  ;;  %v13624_v4 = vcombine.high %v558_v2, %v558_v2  ;;  %v13623_v6 = vcombine.low %v558_v2, %v558_v2  ;;  %v18361_v24 = vld [vmem:[%s22723_s1 + $0xb8] sm:$0xff]   ;;  %v18049_v2 = vld [vmem:[%s18593_s14 + $0x1a0] ss:$20 sps:$4 sm:$0xff]  }
 0x149   : > { %15516 = vmatprep.mubr.msk.bf16.mxu1 %vm18440_vm2, %v22734_v45 }
 0x14e   : > { %1877 = vmatmul.mubr.bf16.gmra.mrb[24].mxu0 %v17902_v7  ;;  %v18054_v7 = vld [vmem:[%s18593_s14 + $0x68c] ss:$20 sps:$4 sm:$0xff]  }
 0x14f   : > { %1884 = vmatprep.mubr.bf16.mxu0 %v17907_v8  ;;  %v18029_v8 = vld [vmem:[%s18593_s14 + $0x10] ss:$20 sps:$4 sm:$0xff]  }
 0x150   : > { %15517 = vmatmul.mubr.msk.bf16.gmra.mrb[112].mxu1 %vm1484_vm1, %v18023_v27  ;;  %v18039_v27 = vld [vmem:[%s18593_s14 + $0xd8] ss:$20 sps:$4 sm:$0xff]  }
 0x151   : > { %15520 = vmatprep.mubr.msk.bf16.mxu1 %vm18440_vm2, %v22734_v45 }
 0x156   : > { %1885 = vmatmul.mubr.bf16.gmra.mrb[28].mxu0 %v17909_v13  ;;  %v18058_v13 = vld [vmem:[%s18593_s14 + $0x6dc] ss:$20 sps:$4 sm:$0xff]  }
 0x157   : > { %1892 = vmatprep.mubr.bf16.mxu0 %v17913_v14  ;;  %v18356_v14 = vld [vmem:[%s22723_s1 + $0x90] sm:$0xff]  }
 0x158   : > { %15521 = vmatmul.mubr.msk.bf16.gmra.mrb[116].mxu1 %vm1484_vm1, %v18027_v30  ;;  %v18364_v30 = vld [vmem:[%s22723_s1 + $0xd0] sm:$0xff]  }
 0x159   : > { %15524 = vmatprep.mubr.msk.bf16.mxu1 %vm18440_vm2, %v22734_v45 }
 0x15e   : > { %1893 = vmatmul.mubr.bf16.gmra.mrb[32].mxu0 %v17915_v17  ;;  %v18060_v17 = vld [vmem:[%s18593_s14 + $0x704] ss:$20 sps:$4 sm:$0xff]  }
 0x15f   : > { %1900 = vmatprep.mubr.bf16.mxu0 %v17919_v18  ;;  %v18358_v18 = vld [vmem:[%s22723_s1 + $0xa0] sm:$0xff]  }
 0x160   : > { %15525 = vmatmul.mubr.msk.bf16.gmra.mrb[120].mxu1 %vm1484_vm1, %v18030_v33  ;;  %v18068_v33 = vld [vmem:[%s18593_s14 + $0x7a4] ss:$0 sps:$4 sm:$0xff]  }
 0x161   : > { %15528 = vmatprep.mubr.msk.bf16.mxu1 %vm18440_vm2, %v22734_v45 }
 0x166   : > { %1901 = vmatmul.mubr.bf16.gmra.mrb[36].mxu0 %v17921_v21  ;;  %v18062_v21 = vld [vmem:[%s18593_s14 + $0x72c] ss:$20 sps:$4 sm:$0xff]  }
 0x167   : > { %1908 = vmatprep.mubr.bf16.mxu0 %v17926_v23  ;;  %v18037_v23 = vld [vmem:[%s18593_s14 + $0xb0] ss:$20 sps:$4 sm:$0xff]  }
 0x168   : > { %15529 = vmatmul.mubr.msk.bf16.gmra.mrb[124].mxu1 %vm1484_vm1, %v18032_v36  ;;  %v18366_v36 = vld [vmem:[%s22723_s1 + $0xe0] sm:$0xff]  }
 0x169   : > { %15532 = vmatprep.mubr.msk.bf16.mxu1 %vm18440_vm2, %v22734_v45 }
 0x16e   : > { %1909 = vmatmul.mubr.bf16.gmra.mrb[40].mxu0 %v17929_v25  ;;  %v18064_v25 = vld [vmem:[%s18593_s14 + $0x754] ss:$20 sps:$4 sm:$0xff]  }
 0x16f   : > { %1916 = vmatprep.mubr.bf16.mxu0 %v17934_v26  ;;  %v18362_v26 = vld [vmem:[%s22723_s1 + $0xc0] sm:$0xff]  }
 0x170   : > { %15533 = vmatmul.mubr.msk.bf16.gmra.mrb[128].mxu1 %vm1484_vm1, %v18034_v39  ;;  %v18043_v39 = vld [vmem:[%s18593_s14 + $0x128] ss:$20 sps:$4 sm:$0xff]  }
 0x171   : > { %15536 = vmatprep.mubr.msk.bf16.mxu1 %vm18440_vm2, %v22734_v45 }
 0x176   : > { %1917 = vmatmul.mubr.bf16.gmra.mrb[44].mxu0 %v17938_v28  ;;  %v18363_v28 = vld [vmem:[%s22723_s1 + $0xc8] sm:$0xff]  }
 0x177   : > { %1924 = vmatprep.mubr.bf16.mxu0 %v17943_v29  ;;  %v18066_v29 = vld [vmem:[%s18593_s14 + $0x77c] ss:$20 sps:$4 sm:$0xff]  }
 0x178   : > { %15537 = vmatmul.mubr.msk.bf16.gmra.mrb[132].mxu1 %vm1484_vm1, %v18036_v42 }
 0x179   : > { %15540 = vmatprep.mubr.msk.bf16.mxu1 %vm18440_vm2, %v22734_v45 }
 0x17e   : > { %1925 = vmatmul.mubr.bf16.gmra.mrb[48].mxu0 %v17946_v31  ;;  %v18041_v31 = vld [vmem:[%s18593_s14 + $0x100] ss:$20 sps:$4 sm:$0xff]  }
 0x17f   : > { %1932 = vmatprep.mubr.bf16.mxu0 %v17951_v32  ;;  %v18365_v32 = vld [vmem:[%s22723_s1 + $0xd8] sm:$0xff]  }
 0x180   : > { %15541 = vmatmul.mubr.msk.bf16.gmra.mrb[136].mxu1 %vm1484_vm1, %v18038_v46 }
 0x181   : > { %15544 = vmatprep.mubr.msk.bf16.mxu1 %vm18440_vm2, %v22734_v45 }
 0x186   : > { %1933 = vmatmul.mubr.bf16.gmra.mrb[52].mxu0 %v17954_v34  ;;  %v19210_v34 = vpop.f32.mrb[0].mxu1 }
 0x187   : > { %1940 = vmatprep.mubr.bf16.mxu0 %v17959_v35  ;;  %v3543_v35 = vpop.f32.mrb[1].mxu1 }
 0x188   : > { %15545 = vmatmul.mubr.msk.bf16.gmra.mrb[140].mxu1 %vm1484_vm1, %v18040_v49 }
 0x189   : > { %15548 = vmatprep.mubr.msk.bf16.mxu1 %vm18440_vm2, %v22734_v45 }
 0x18e   : > { %1941 = vmatmul.mubr.bf16.gmra.mrb[56].mxu0 %v17962_v37  ;;  %v19218_v37 = vpop.f32.mrb[2].mxu1 }
 0x18f   : > { %1948 = vmatprep.mubr.bf16.mxu0 %v17967_v38  ;;  %v3546_v38 = vpop.f32.mrb[3].mxu1 }
 0x190   : > { %15549 = vmatmul.mubr.msk.bf16.gmra.mrb[144].mxu1 %vm1484_vm1, %v18042_v52 }
 0x191   : > { %15552 = vmatprep.mubr.msk.bf16.mxu1 %vm18440_vm2, %v22734_v45 }
 0x196   : > { %1949 = vmatmul.mubr.bf16.gmra.mrb[60].mxu0 %v17970_v40  ;;  %v18367_v40 = vld [vmem:[%s22723_s1 + $0xe8] sm:$0xff]  }
 0x197   : > { %1956 = vmatprep.mubr.bf16.mxu0 %v17976_v41  ;;  %v19229_v41 = vpop.f32.mrb[4].mxu1 }
 0x198   : > { %15553 = vmatmul.mubr.msk.bf16.gmra.mrb[148].mxu1 %vm1484_vm1, %v18044_v55  ;;  %v3551_v42 = vpop.f32.mrb[5].mxu1 }
 0x199   : > { %15556 = vmatprep.mubr.msk.bf16.mxu1 %vm18440_vm2, %v22734_v45 }
 0x19e   : > { %1957 = vmatmul.mubr.bf16.gmra.mrb[64].mxu0 %v17979_v43  ;;  %v18368_v43 = vld [vmem:[%s22723_s1 + $0xf0] sm:$0xff]  }
 0x19f   : > { %1964 = vmatprep.mubr.bf16.mxu0 %v17983_v44  ;;  %v19236_v44 = vpop.f32.mrb[6].mxu1 }
 0x1a0   : > { %15557 = vmatmul.mubr.msk.bf16.gmra.mrb[152].mxu1 %vm1484_vm1, %v18046_v58  ;;  %v3554_v46 = vpop.f32.mrb[7].mxu1 }
 0x1a1   : > { %15560 = vmatprep.mubr.msk.bf16.mxu1 %vm18440_vm2, %v22734_v45 }
 0x1a6   : > { %1965 = vmatmul.mubr.bf16.gmra.mrb[68].mxu0 %v17986_v47  ;;  %v18045_v47 = vld [vmem:[%s18593_s14 + $0x150] ss:$20 sps:$4 sm:$0xff]  }
 0x1a7   : > { %1972 = vmatprep.mubr.bf16.mxu0 %v17991_v48  ;;  %v19240_v48 = vpop.f32.mrb[8].mxu1 }
 0x1a8   : > { %15561 = vmatmul.mubr.msk.bf16.gmra.mrb[156].mxu1 %vm1484_vm1, %v18048_v61  ;;  %v3559_v49 = vpop.f32.mrb[9].mxu1 }
 0x1a9   : > { %15564 = vmatprep.mubr.msk.bf16.mxu1 %vm18440_vm2, %v22734_v45 }
 0x1ae   : > { %1973 = vmatmul.mubr.bf16.gmra.mrb[72].mxu0 %v17994_v50  ;;  %v18369_v50 = vld [vmem:[%s22723_s1 + $0xf8] sm:$0xff]  }
 0x1af   : > { %1980 = vmatprep.mubr.bf16.mxu0 %v17999_v51  ;;  %v19245_v51 = vpop.f32.mrb[10].mxu1 }
 0x1b0   : > { %15565 = vmatmul.mubr.msk.bf16.gmra.mrb[160].mxu1 %vm1484_vm1, %v18050_v0  ;;  %v3562_v52 = vpop.f32.mrb[11].mxu1 }
 0x1b1   : > { %15568 = vmatprep.mubr.msk.bf16.mxu1 %vm18440_vm2, %v22734_v45 }
 0x1b6   : > { %1981 = vmatmul.mubr.bf16.gmra.mrb[76].mxu0 %v18002_v53  ;;  %v19249_v53 = vpop.f32.mrb[12].mxu1 }
 0x1b7   : > { %1988 = vmatprep.mubr.bf16.mxu0 %v18007_v54 }
 0x1b8   : > { %15569 = vmatmul.mubr.msk.bf16.gmra.mrb[164].mxu1 %vm1484_vm1, %v18052_v5 }
 0x1b9   : > { %15572 = vmatprep.mubr.msk.bf16.mxu1 %vm18440_vm2, %v22734_v45 }
 0x1be   : > { %1989 = vmatmul.mubr.bf16.gmra.mrb[80].mxu0 %v18010_v56  ;;  %v18047_v56 = vld [vmem:[%s18593_s14 + $0x178] ss:$20 sps:$4 sm:$0xff]  }
 0x1bf   : > { %1996 = vmatprep.mubr.bf16.mxu0 %v18012_v57 }
 0x1c0   : > { %15573 = vmatmul.mubr.msk.bf16.gmra.mrb[168].mxu1 %vm1484_vm1, %v18054_v7 }
 0x1c1   : > { %15576 = vmatprep.mubr.msk.bf16.mxu1 %vm18440_vm2, %v22734_v45 }
 0x1c6   : > { %1997 = vmatmul.mubr.bf16.gmra.mrb[84].mxu0 %v18014_v59 }
 0x1c7   : > { %2004 = vmatprep.mubr.bf16.mxu0 %v18016_v60 }
 0x1c8   : > { %15577 = vmatmul.mubr.msk.bf16.gmra.mrb[172].mxu1 %vm1484_vm1, %v18056_v9 }
 0x1c9   : > { %15580 = vmatprep.mubr.msk.bf16.mxu1 %vm18440_vm2, %v22734_v45 }
 0x1ce   : > { %2005 = vmatmul.mubr.bf16.gmra.mrb[88].mxu0 %v18018_v62 }
 0x1cf   : > { %2012 = vmatprep.mubr.bf16.mxu0 %v18020_v63 }
 0x1d0   : > { %15581 = vmatmul.mubr.msk.bf16.gmra.mrb[176].mxu1 %vm1484_vm1, %v18058_v13 }
 0x1d1   : > { %15584 = vmatprep.mubr.msk.bf16.mxu1 %vm18440_vm2, %v22734_v45 }
 0x1d6   : > { %2013 = vmatmul.mubr.bf16.gmra.mrb[92].mxu0 %v18022_v3 }
 0x1d7   : > { %2020 = vmatprep.mubr.bf16.mxu0 %v13624_v4 }
 0x1d8   : > { %15585 = vmatmul.mubr.msk.bf16.gmra.mrb[180].mxu1 %vm1484_vm1, %v18060_v17 }
 0x1d9   : > { %15588 = vmatprep.mubr.msk.bf16.mxu1 %vm18440_vm2, %v22734_v45 }
 0x1de   : > { %2021 = vmatmul.mubr.bf16.gmra.mrb[96].mxu0 %v13623_v6 }
 0x1df   : > { %15392 = vmatprep.mubr.msk.bf16.mxu0 %vm18440_vm2, %v22734_v45 }
 0x1e0   : > { %15589 = vmatmul.mubr.msk.bf16.gmra.mrb[184].mxu1 %vm1484_vm1, %v18062_v21 }
 0x1e1   : > { %15592 = vmatprep.mubr.msk.bf16.mxu1 %vm18440_vm2, %v22734_v45 }
 0x1e6   : > { %15393 = vmatmul.mubr.msk.bf16.vlgmr.msra.gmra.mrb[0].mxu0 %vm1484_vm1, %v18029_v8 }
 0x1e7   : > { %15396 = vmatprep.mubr.msk.bf16.mxu0 %vm18440_vm2, %v22734_v45  ;;  %3740 = vmatpush1.bf16.msra.mxu0 %v18354_v10  ;;  %v18051_v10 = vld [vmem:[%s18593_s14 + $0x1c8] ss:$20 sps:$4 sm:$0xff]  }
 0x1e8   : > { %3741 = vmatprep.subr.bf16.mxu0 %v18438_v1  ;;  %15593 = vmatmul.mubr.msk.bf16.gmra.mrb[88].mxu1 %vm1484_vm1, %v18064_v25 }
 0x1e9   : > { %15596 = vmatprep.mubr.msk.bf16.mxu1 %vm18440_vm2, %v22734_v45 }
 0x1eb   : > { %3742 = vmatpush1.bf16.msra.mxu0 %v18355_v12 }
 0x1ec   : > { %3743 = vmatprep.subr.bf16.mxu0 %v18438_v1 }
 0x1ee   : > { %15397 = vmatmul.mubr.msk.bf16.gmra.mrb[4].mxu0 %vm1484_vm1, %v18031_v11 }
 0x1ef   : > { %15400 = vmatprep.mubr.msk.bf16.mxu0 %vm18440_vm2, %v22734_v45  ;;  %3744 = vmatpush1.bf16.msra.mxu0 %v18356_v14 }
 0x1f0   : > { %3745 = vmatprep.subr.bf16.mxu0 %v18438_v1  ;;  %15597 = vmatmul.mubr.msk.bf16.gmra.mrb[92].mxu1 %vm1484_vm1, %v18066_v29 }
 0x1f1   : > { %15600 = vmatprep.mubr.msk.bf16.mxu1 %vm18440_vm2, %v22734_v45 }
 0x1f3   : > { %3746 = vmatpush1.bf16.msra.mxu0 %v18357_v16 }
 0x1f4   : > { %3747 = vmatprep.subr.bf16.mxu0 %v18438_v1 }
 0x1f6   : > { %15401 = vmatmul.mubr.msk.bf16.gmra.mrb[8].mxu0 %vm1484_vm1, %v18033_v15 }
 0x1f7   : > { %15404 = vmatprep.mubr.msk.bf16.mxu0 %vm18440_vm2, %v22734_v45  ;;  %3748 = vmatpush1.bf16.msra.mxu0 %v18358_v18 }
 0x1f8   : > { %3749 = vmatprep.subr.bf16.mxu0 %v18438_v1  ;;  %15601 = vmatmul.mubr.msk.bf16.gmra.mrb[96].mxu1 %vm1484_vm1, %v18068_v33 }
 0x1f9   : > { %15652 = vmatprep.mubr.msk.bf16.mxu1 %vm18440_vm2, %v22734_v45 }
 0x1fb   : > { %3750 = vmatpush1.bf16.msra.mxu0 %v18359_v20 }
 0x1fc   : > { %3751 = vmatprep.subr.bf16.mxu0 %v18438_v1 }
 0x1fe   : > { %15405 = vmatmul.mubr.msk.bf16.gmra.mrb[12].mxu0 %vm1484_vm1, %v18035_v19  ;;  %v18053_v19 = vld [vmem:[%s18593_s14 + $0x1f0] ss:$20 sps:$4 sm:$0xff]  }
 0x1ff   : > { %15408 = vmatprep.mubr.msk.bf16.mxu0 %vm18440_vm2, %v22734_v45  ;;  %3752 = vmatpush1.bf16.msra.mxu0 %v18360_v22 }
 0x200   : > { %3753 = vmatprep.subr.bf16.mxu0 %v18438_v1 }
 0x203   : > { %3754 = vmatpush1.bf16.msra.mxu0 %v18361_v24 }
 0x204   : > { %3755 = vmatprep.subr.bf16.mxu0 %v18438_v1 }
 0x206   : > { %15409 = vmatmul.mubr.msk.bf16.gmra.mrb[16].mxu0 %vm1484_vm1, %v18037_v23 }
 0x207   : > { %15412 = vmatprep.mubr.msk.bf16.mxu0 %vm18440_vm2, %v22734_v45  ;;  %3756 = vmatpush1.bf16.msra.mxu0 %v18362_v26 }
 0x208   : > { %3757 = vmatprep.subr.bf16.mxu0 %v18438_v1 }
 0x20b   : > { %3758 = vmatpush1.bf16.msra.mxu0 %v18363_v28  ;;  %v18055_v28 = vld [vmem:[%s18593_s14 + $0x218] ss:$20 sps:$4 sm:$0xff]  }
 0x20c   : > { %3759 = vmatprep.subr.bf16.mxu0 %v18438_v1 }
 0x20e   : > { %15413 = vmatmul.mubr.msk.bf16.gmra.mrb[20].mxu0 %vm1484_vm1, %v18039_v27 }
 0x20f   : > { %15416 = vmatprep.mubr.msk.bf16.mxu0 %vm18440_vm2, %v22734_v45  ;;  %3760 = vmatpush1.bf16.msra.mxu0 %v18364_v30 }
 0x210   : > { %3761 = vmatprep.subr.bf16.mxu0 %v18438_v1 }
 0x213   : > { %3762 = vmatpush1.bf16.msra.mxu0 %v18365_v32 }
 0x214   : > { %3763 = vmatprep.subr.bf16.mxu0 %v18438_v1 }
 0x216   : > { %15417 = vmatmul.mubr.msk.bf16.gmra.mrb[24].mxu0 %vm1484_vm1, %v18041_v31 }
 0x217   : > { %15420 = vmatprep.mubr.msk.bf16.mxu0 %vm18440_vm2, %v22734_v45  ;;  %3764 = vmatpush1.bf16.msra.mxu0 %v18366_v36 }
 0x218   : > { %3765 = vmatprep.subr.bf16.mxu0 %v18438_v1 }
 0x21b   : > { %3766 = vmatpush1.bf16.msra.mxu0 %v18367_v40 }
 0x21c   : > { %3767 = vmatprep.subr.bf16.mxu0 %v18438_v1 }
 0x21e   : > { %15421 = vmatmul.mubr.msk.bf16.gmra.mrb[28].mxu0 %vm1484_vm1, %v18043_v39  ;;  %v18057_v39 = vld [vmem:[%s18593_s14 + $0x240] ss:$20 sps:$4 sm:$0xff]  }
 0x21f   : > { %15424 = vmatprep.mubr.msk.bf16.mxu0 %vm18440_vm2, %v22734_v45  ;;  %3768 = vmatpush1.bf16.msra.mxu0 %v18368_v43 }
 0x220   : > { %3769 = vmatprep.subr.bf16.mxu0 %v18438_v1  ;;  %v3567_v1 = vpop.f32.mrb[13].mxu1 }
 0x221   : > { %v19253_v54 = vpop.f32.mrb[14].mxu1  ;;  %v18059_v1 = vld [vmem:[%s18593_s14 + $0x268] ss:$20 sps:$4 sm:$0xff]  }
 0x222   : > { %v3570_v55 = vpop.f32.mrb[15].mxu1 }
 0x223   : > { %3770 = vmatpush1.bf16.msra.mxu0 %v18369_v50  ;;  %v19256_v57 = vpop.f32.mrb[16].mxu1 }
 0x224   : > { %15604 = vmatprep.subr.bf16.mxu0 %v22734_v45  ;;  %v3575_v58 = vpop.f32.mrb[17].mxu1 }
 0x225   : > { %v19258_v59 = vpop.f32.mrb[18].mxu1 }
 0x226   : > { %15425 = vmatmul.mubr.msk.bf16.gmra.mrb[32].mxu0 %vm1484_vm1, %v18045_v47  ;;  %v3578_v60 = vpop.f32.mrb[19].mxu1 }
 0x227   : > { %15428 = vmatprep.mubr.msk.bf16.mxu0 %vm18440_vm2, %v22734_v45  ;;  %v19261_v61 = vpop.f32.mrb[20].mxu1 }
 0x228   : > { %v3583_v62 = vpop.f32.mrb[21].mxu1 }
 0x229   : > { %v19265_v63 = vpop.f32.mrb[22].mxu1 }
 0x22a   : > { %v3586_v0 = vpop.f32.mrb[23].mxu1 }
 0x22b   : > { %v19268_v3 = vpop.f32.mrb[24].mxu1 }
 0x22c   : > { %v3591_v4 = vpop.f32.mrb[25].mxu1 }
 0x22d   : > { %v19270_v5 = vpop.f32.mrb[26].mxu1 }
 0x22e   : > { %15429 = vmatmul.mubr.msk.bf16.gmra.mrb[36].mxu0 %vm1484_vm1, %v18047_v56  ;;  %v3594_v6 = vpop.f32.mrb[27].mxu1 }
 0x22f   : > { %15432 = vmatprep.mubr.msk.bf16.mxu0 %vm18440_vm2, %v22734_v45  ;;  %v19273_v7 = vpop.f32.mrb[28].mxu1  ;;  %v18061_v6 = vld [vmem:[%s18593_s14 + $0x290] ss:$20 sps:$4 sm:$0xff]  }
 0x230   : > { %v3599_v8 = vpop.f32.mrb[29].mxu1 }
 0x231   : > { %v19327_v9 = vpop.f32.mrb[30].mxu1 }
 0x232   : > { %v3602_v11 = vpop.f32.mrb[31].mxu1 }
 0x233   : > { %v19330_v12 = vpop.f32.mrb[32].mxu1 }
 0x234   : > { %v3607_v13 = vpop.f32.mrb[33].mxu1 }
 0x235   : > { %v19332_v14 = vpop.f32.mrb[34].mxu1 }
 0x236   : > { %15433 = vmatmul.mubr.msk.bf16.gmra.mrb[40].mxu0 %vm1484_vm1, %v18049_v2  ;;  %v3610_v15 = vpop.f32.mrb[35].mxu1 }
 0x237   : > { %15436 = vmatprep.mubr.msk.bf16.mxu0 %vm18440_vm2, %v22734_v45  ;;  %v19337_v16 = vpop.f32.mrb[36].mxu1 }
 0x238   : > { %v3615_v17 = vpop.f32.mrb[37].mxu1 }
 0x239   : > { %v19339_v18 = vpop.f32.mrb[38].mxu1 }
 0x23a   : > { %v3618_v20 = vpop.f32.mrb[39].mxu1 }
 0x23b   : > { %v19342_v21 = vpop.f32.mrb[40].mxu1 }
 0x23c   : > { %22738 = vst [vmem:[#allocation9_spill] sm:$0xff] %v19342_v21  ;;  %v3623_v22 = vpop.f32.mrb[41].mxu1 }
 0x23d   : > { %v19344_v23 = vpop.f32.mrb[42].mxu1  ;;  %v18063_v22 = vld [vmem:[%s18593_s14 + $0x2b8] ss:$20 sps:$4 sm:$0xff]  }
 0x23e   : > { %15437 = vmatmul.mubr.msk.bf16.gmra.mrb[44].mxu0 %vm1484_vm1, %v18051_v10  ;;  %22739 = vst [vmem:[#allocation10_spill] sm:$0xff] %v19344_v23  ;;  %v3626_v24 = vpop.f32.mrb[43].mxu1 }
 0x23f   : > { %15440 = vmatprep.mubr.msk.bf16.mxu0 %vm18440_vm2, %v22734_v45  ;;  %v19349_v25 = vpop.f32.mrb[44].mxu1 }
 0x240   : > { %22740 = vst [vmem:[#allocation11_spill] sm:$0xff] %v19349_v25  ;;  %v3631_v26 = vpop.f32.mrb[45].mxu1 }
 0x241   : > { %v19351_v27 = vpop.f32.mrb[46].mxu1 }
 0x242   : > { %22741 = vst [vmem:[#allocation12_spill] sm:$0xff] %v19351_v27  ;;  %v3634_v29 = vpop.f32.mrb[47].mxu1  ;;  %v18095_v27 = vld [vmem:[%s18593_s14 + $0x4f8] ss:$20 sps:$4 sm:$0xff]  }
 0x243   : > { %v19354_v30 = vpop.f32.mrb[48].mxu1 }
 0x244   : > { %22742 = vst [vmem:[#allocation13_spill] sm:$0xff] %v19354_v30  ;;  %v3639_v31 = vpop.f32.mrb[49].mxu1 }
 0x245   : > { %v19356_v32 = vpop.f32.mrb[50].mxu1 }
 0x246   : > { %15441 = vmatmul.mubr.msk.bf16.gmra.mrb[48].mxu0 %vm1484_vm1, %v18053_v19  ;;  %22743 = vst [vmem:[#allocation14_spill] sm:$0xff] %v19356_v32  ;;  %v3642_v33 = vpop.f32.mrb[51].mxu1 }
 0x247   : > { %15444 = vmatprep.mubr.msk.bf16.mxu0 %vm18440_vm2, %v22734_v45  ;;  %v19361_v35 = vpop.f32.mrb[52].mxu1 }
 0x248   : > { %22744 = vst [vmem:[#allocation15_spill] sm:$0xff] %v19361_v35  ;;  %v3647_v36 = vpop.f32.mrb[53].mxu1 }
 0x249   : > { %v19363_v38 = vpop.f32.mrb[54].mxu1 }
 0x24a   : > { %22745 = vst [vmem:[#allocation16_spill] sm:$0xff] %v19363_v38  ;;  %v3650_v40 = vpop.f32.mrb[55].mxu1 }
 0x24b   : > { %v19366_v42 = vpop.f32.mrb[56].mxu1  ;;  %v18065_v40 = vld [vmem:[%s18593_s14 + $0x2e0] ss:$20 sps:$4 sm:$0xff]  }
 0x24c   : > { %22746 = vst [vmem:[#allocation17_spill] sm:$0xff] %v19366_v42  ;;  %v3655_v43 = vpop.f32.mrb[57].mxu1 }
 0x24d   : > { %v19368_v46 = vpop.f32.mrb[58].mxu1 }
 0x24e   : > { %15445 = vmatmul.mubr.msk.bf16.gmra.mrb[52].mxu0 %vm1484_vm1, %v18055_v28  ;;  %22747 = vst [vmem:[#allocation18_spill] sm:$0xff] %v19368_v46  ;;  %v3658_v47 = vpop.f32.mrb[59].mxu1  ;;  %v18074_v46 = vld [vmem:[%s18593_s14 + $0x3dc] ss:$20 sps:$4 sm:$0xff]  }
 0x24f   : > { %15448 = vmatprep.mubr.msk.bf16.mxu0 %vm18440_vm2, %v22734_v45  ;;  %v19373_v49 = vpop.f32.mrb[60].mxu1 }
 0x250   : > { %22748 = vst [vmem:[#allocation19_spill] sm:$0xff] %v19373_v49  ;;  %v3663_v50 = vpop.f32.mrb[61].mxu1 }
 0x251   : > { %v19375_v52 = vpop.f32.mrb[62].mxu1 }
 0x252   : > { %22749 = vst [vmem:[#allocation20_spill] sm:$0xff] %v19375_v52  ;;  %v3666_v55 = vpop.f32.mrb[63].mxu1 }
 0x253   : > { %v19378_v56 = vpop.f32.mrb[64].mxu1 }
 0x254   : > { %22750 = vst [vmem:[#allocation21_spill] sm:$0xff] %v19378_v56  ;;  %v3671_v58 = vpop.f32.mrb[65].mxu1  ;;  %v18076_v56 = vld [vmem:[%s18593_s14 + $0x3e0] ss:$20 sps:$4 sm:$0xff]  }
 0x255   : > { %v19380_v60 = vpop.f32.mrb[66].mxu1 }
 0x256   : > { %15449 = vmatmul.mubr.msk.bf16.gmra.mrb[56].mxu0 %vm1484_vm1, %v18057_v39  ;;  %22751 = vst [vmem:[#allocation22_spill] sm:$0xff] %v19380_v60  ;;  %v3674_v62 = vpop.f32.mrb[67].mxu1  ;;  %v18073_v60 = vld [vmem:[%s18593_s14 + $0x3d0] ss:$0 sps:$4 sm:$0xff]  }
 0x257   : > { %15452 = vmatprep.mubr.msk.bf16.mxu0 %vm18440_vm2, %v22734_v45  ;;  %v19385_v0 = vpop.f32.mrb[68].mxu1  ;;  %v18104_v62 = vld [vmem:[%s22725_s3] sm:$0xff]  }
 0x258   : > { %22752 = vst [vmem:[#allocation23_spill] sm:$0xff] %v19385_v0  ;;  %v3679_v2 = vpop.f32.mrb[69].mxu1  ;;  %15647 = vmatpush3.bf16.msra.mxu1 %v18104_v62 }
 0x259   : > { %v19387_v4 = vpop.f32.mrb[70].mxu1  ;;  %15648 = vmatprep.subr.bf16.mxu1 %v22734_v45 }
 0x25a   : > { %22753 = vst [vmem:[#allocation24_spill] sm:$0xff] %v19387_v4  ;;  %v3682_v8 = vpop.f32.mrb[71].mxu1 }
 0x25b   : > { %v19390_v10 = vpop.f32.mrb[72].mxu1  ;;  %v18067_v8 = vld [vmem:[%s18593_s14 + $0x308] ss:$20 sps:$4 sm:$0xff]  }
 0x25c   : > { %22754 = vst [vmem:[#allocation25_spill] sm:$0xff] %v19390_v10  ;;  %v3687_v11 = vpop.f32.mrb[73].mxu1 }
 0x25d   : > { %v19392_v13 = vpop.f32.mrb[74].mxu1 }
 0x25e   : > { %15453 = vmatmul.mubr.msk.bf16.gmra.mrb[60].mxu0 %vm1484_vm1, %v18059_v1  ;;  %22755 = vst [vmem:[#allocation26_spill] sm:$0xff] %v19392_v13  ;;  %v3690_v15 = vpop.f32.mrb[75].mxu1  ;;  %v18072_v13 = vld [vmem:[%s18593_s14 + $0x3a8] ss:$20 sps:$4 sm:$0xff]  }
 0x25f   : > { %15456 = vmatprep.mubr.msk.bf16.mxu0 %vm18440_vm2, %v22734_v45  ;;  %v19397_v17 = vpop.f32.mrb[76].mxu1 }
 0x260   : > { %22756 = vst [vmem:[#allocation27_spill] sm:$0xff] %v19397_v17  ;;  %v3695_v19 = vpop.f32.mrb[77].mxu1 }
 0x261   : > { %v19399_v20 = vpop.f32.mrb[78].mxu1  ;;  %v18107_v19 = vld [vmem:[%s22725_s3 + $0x8] sm:$0xff]  }
 0x262   : > { %22757 = vst [vmem:[#allocation28_spill] sm:$0xff] %v19399_v20  ;;  %v3698_v24 = vpop.f32.mrb[79].mxu1  ;;  %15649 = vmatpush3.bf16.msra.mxu1 %v18107_v19 }
 0x263   : > { %v19402_v26 = vpop.f32.mrb[80].mxu1  ;;  %15650 = vmatprep.subr.bf16.mxu1 %v22734_v45 }
 0x264   : > { %22758 = vst [vmem:[#allocation29_spill] sm:$0xff] %v19402_v26  ;;  %v3703_v28 = vpop.f32.mrb[81].mxu1 }
 0x265   : > { %v19404_v29 = vpop.f32.mrb[82].mxu1 }
 0x266   : > { %15457 = vmatmul.mubr.msk.bf16.gmra.mrb[64].mxu0 %vm1484_vm1, %v18061_v6  ;;  %22759 = vst [vmem:[#allocation30_spill] sm:$0xff] %v19404_v29  ;;  %v3706_v31 = vpop.f32.mrb[83].mxu1  ;;  %v18071_v29 = vld [vmem:[%s18593_s14 + $0x380] ss:$20 sps:$4 sm:$0xff]  }
 0x267   : > { %15460 = vmatprep.mubr.msk.bf16.mxu0 %vm18440_vm2, %v22734_v45  ;;  %v19409_v33 = vpop.f32.mrb[84].mxu1 }
 0x268   : > { %22760 = vst [vmem:[#allocation31_spill] sm:$0xff] %v19409_v33  ;;  %v3711_v36 = vpop.f32.mrb[85].mxu1 }
 0x269   : > { %v19411_v39 = vpop.f32.mrb[86].mxu1  ;;  %v18109_v36 = vld [vmem:[%s22725_s3 + $0x10] sm:$0xff]  }
 0x26a   : > { %22761 = vst [vmem:[#allocation32_spill] sm:$0xff] %v19411_v39  ;;  %v3714_v43 = vpop.f32.mrb[87].mxu1  ;;  %15651 = vmatpush3.bf16.msra.mxu1 %v18109_v36  ;;  %v18070_v36 = vld [vmem:[%s18593_s14 + $0x358] ss:$20 sps:$4 sm:$0xff]  }
 0x26b   : > { %v19414_v47 = vpop.f32.mrb[100].mxu1  ;;  %15730 = vmatprep.subr.bf16.mxu1 %v22734_v45 }
 0x26c   : > { %v15506_v50 = vpop.f32.mrb[101].mxu1 }
 0x26d   : > { %v19416_v1 = vpop.f32.mrb[102].mxu1  ;;  %v18069_v50 = vld [vmem:[%s18593_s14 + $0x330] ss:$20 sps:$4 sm:$0xff]  }
 0x26e   : > { %15461 = vmatmul.mubr.msk.bf16.gmra.mrb[68].mxu0 %vm1484_vm1, %v18063_v22  ;;  %v15507_v55 = vpop.f32.mrb[103].mxu1 }
 0x26f   : > { %15464 = vmatprep.mubr.msk.bf16.mxu0 %vm18440_vm2, %v22734_v45  ;;  %v19421_v58 = vpop.f32.mrb[104].mxu1 }
 0x270   : > { %v15510_v2 = vpop.f32.mrb[105].mxu1 }
 0x271   : > { %v19426_v6 = vpop.f32.mrb[106].mxu1 }
 0x272   : > { %v15511_v11 = vpop.f32.mrb[107].mxu1 }
 0x273   : > { %v19430_v15 = vpop.f32.mrb[108].mxu1 }
 0x274   : > { %v15514_v22 = vpop.f32.mrb[109].mxu1 }
 0x275   : > { %v19435_v24 = vpop.f32.mrb[110].mxu1 }
 0x276   : > { %15465 = vmatmul.mubr.msk.bf16.gmra.mrb[72].mxu0 %vm1484_vm1, %v18065_v40  ;;  %v15515_v28 = vpop.f32.mrb[111].mxu1 }
 0x277   : > { %15468 = vmatprep.mubr.msk.bf16.mxu0 %vm18440_vm2, %v22734_v45  ;;  %v19441_v31 = vpop.f32.mrb[112].mxu1 }
 0x278   : > { %v15518_v40 = vpop.f32.mrb[113].mxu1 }
 0x279   : > { %v19446_v43 = vpop.f32.mrb[114].mxu1 }
 0x27a   : > { %v15519_v55 = vpop.f32.mrb[115].mxu1 }
 0x27b   : > { %v19450_v62 = vpop.f32.mrb[116].mxu1 }
 0x27c   : > { %v15522_v2 = vpop.f32.mrb[117].mxu1 }
 0x27e   : > { %15469 = vmatmul.mubr.msk.bf16.gmra.mrb[76].mxu0 %vm1484_vm1, %v18067_v8  ;;  %v19452_v8 = vpop.f32.mrb[118].mxu1 }
 0x27f   : > { %15472 = vmatprep.mubr.msk.bf16.mxu0 %vm18440_vm2, %v22734_v45  ;;  %v15523_v11 = vpop.f32.mrb[119].mxu1 }
 0x280   : > { %v19457_v19 = vpop.f32.mrb[120].mxu1 }
 0x281   : > { %v15526_v22 = vpop.f32.mrb[121].mxu1 }
 0x282   : > { %v19459_v28 = vpop.f32.mrb[122].mxu1 }
 0x283   : > { %v15527_v40 = vpop.f32.mrb[123].mxu1 }
 0x284   : > { %v19462_v55 = vpop.f32.mrb[124].mxu1 }
 0x285   : > { %v15530_v39 = vpop.f32.mrb[125].mxu1 }
 0x286   : > { %15473 = vmatmul.mubr.msk.bf16.gmra.mrb[80].mxu0 %vm1484_vm1, %v18069_v50  ;;  %v19464_v2 = vpop.f32.mrb[126].mxu1 }
 0x287   : > { %15476 = vmatprep.mubr.msk.bf16.mxu0 %vm18440_vm2, %v22734_v45  ;;  %v15531_v50 = vpop.f32.mrb[127].mxu1 }
 0x288   : > { %v19469_v11 = vpop.f32.mrb[128].mxu1 }
 0x289   : > { %v15534_v33 = vpop.f32.mrb[129].mxu1 }
 0x28a   : > { %v19471_v22 = vpop.f32.mrb[130].mxu1 }
 0x28b   : > { %v15535_v26 = vpop.f32.mrb[131].mxu1 }
 0x28c   : > { %v19474_v40 = vpop.f32.mrb[132].mxu1 }
 0x28d   : > { %v15538_v20 = vpop.f32.mrb[133].mxu1 }
 0x28e   : > { %15477 = vmatmul.mubr.msk.bf16.gmra.mrb[84].mxu0 %vm1484_vm1, %v18070_v36  ;;  %v19476_v39 = vpop.f32.mrb[134].mxu1 }
 0x28f   : > { %15480 = vmatprep.mubr.msk.bf16.mxu0 %vm18440_vm2, %v22734_v45  ;;  %v15539_v36 = vpop.f32.mrb[135].mxu1 }
 0x290   : > { %v19481_v50 = vpop.f32.mrb[136].mxu1 }
 0x291   : > { %22762 = vst [vmem:[#allocation33_spill] sm:$0xff] %v19481_v50  ;;  %v15542_v33 = vpop.f32.mrb[137].mxu1 }
 0x292   : > { %v19483_v17 = vpop.f32.mrb[138].mxu1 }
 0x293   : > { %22763 = vst [vmem:[#allocation34_spill] sm:$0xff] %v19483_v17  ;;  %v15543_v26 = vpop.f32.mrb[139].mxu1 }
 0x294   : > { %v19486_v10 = vpop.f32.mrb[140].mxu1 }
 0x295   : > { %22764 = vst [vmem:[#allocation35_spill] sm:$0xff] %v19486_v10  ;;  %v15546_v20 = vpop.f32.mrb[141].mxu1 }
 0x296   : > { %15481 = vmatmul.mubr.msk.bf16.gmra.mrb[88].mxu0 %vm1484_vm1, %v18071_v29  ;;  %v19488_v4 = vpop.f32.mrb[142].mxu1 }
 0x297   : > { %15484 = vmatprep.mubr.msk.bf16.mxu0 %vm18440_vm2, %v22734_v45  ;;  %22765 = vst [vmem:[#allocation36_spill] sm:$0xff] %v19488_v4  ;;  %v15547_v29 = vpop.f32.mrb[143].mxu1 }
 0x298   : > { %v19493_v36 = vpop.f32.mrb[144].mxu1 }
 0x299   : > { %22766 = vst [vmem:[#allocation37_spill] sm:$0xff] %v19493_v36  ;;  %v15550_v0 = vpop.f32.mrb[145].mxu1 }
 0x29a   : > { %v19495_v33 = vpop.f32.mrb[146].mxu1 }
 0x29b   : > { %22767 = vst [vmem:[#allocation38_spill] sm:$0xff] %v19495_v33  ;;  %v15551_v26 = vpop.f32.mrb[147].mxu1  ;;  %v18086_v33 = vld [vmem:[%s18593_s14 + $0x480] ss:$20 sps:$4 sm:$0xff]  }
 0x29c   : > { %v19499_v52 = vpop.f32.mrb[148].mxu1  ;;  %v18077_v26 = vld [vmem:[%s18593_s14 + $0x408] ss:$20 sps:$4 sm:$0xff]  }
 0x29d   : > { %22768 = vst [vmem:[#allocation39_spill] sm:$0xff] %v19499_v52  ;;  %v15554_v20 = vpop.f32.mrb[149].mxu1 }
 0x29e   : > { %15485 = vmatmul.mubr.msk.bf16.gmra.mrb[92].mxu0 %vm1484_vm1, %v18072_v13  ;;  %v19501_v49 = vpop.f32.mrb[150].mxu1 }
 0x29f   : > { %15488 = vmatprep.mubr.msk.bf16.mxu0 %vm18440_vm2, %v22734_v45  ;;  %22769 = vst [vmem:[#allocation40_spill] sm:$0xff] %v19501_v49  ;;  %v15555_v13 = vpop.f32.mrb[151].mxu1 }
 0x2a0   : > { %v19504_v29 = vpop.f32.mrb[152].mxu1 }
 0x2a1   : > { %22770 = vst [vmem:[#allocation41_spill] sm:$0xff] %v19504_v29  ;;  %v15558_v45 = vpop.f32.mrb[153].mxu1 }
 0x2a2   : > { %v19506_v0 = vpop.f32.mrb[154].mxu1  ;;  %v18079_v45 = vld [vmem:[%s18593_s14 + $0x404] ss:$20 sps:$4 sm:$0xff]  }
 0x2a3   : > { %22771 = vst [vmem:[#allocation42_spill] sm:$0xff] %v19506_v0  ;;  %v15559_v42 = vpop.f32.mrb[155].mxu1  ;;  %v18080_v0 = vld [vmem:[%s18593_s14 + $0x430] ss:$20 sps:$4 sm:$0xff]  }
 0x2a4   : > { %v19510_v38 = vpop.f32.mrb[156].mxu1 }
 0x2a5   : > { %22772 = vst [vmem:[#allocation43_spill] sm:$0xff] %v19510_v38  ;;  %v15562_v35 = vpop.f32.mrb[157].mxu1 }
 0x2a6   : > { %15489 = vmatmul.mubr.msk.bf16.gmra.mrb[96].mxu0 %vm1484_vm1, %v18073_v60  ;;  %v19512_v20 = vpop.f32.mrb[158].mxu1 }
 0x2a7   : > { %3771 = vmatprep.mubr.bf16.mxu0 %v18076_v56  ;;  %22773 = vst [vmem:[#allocation44_spill] sm:$0xff] %v19512_v20  ;;  %v15563_v49 = vpop.f32.mrb[159].mxu1 }
 0x2a8   : > { %v19514_v60 = vpop.f32.mrb[160].mxu1 }
 0x2a9   : > { %22774 = vst [vmem:[#allocation45_spill] sm:$0xff] %v19514_v60  ;;  %v15566_v56 = vpop.f32.mrb[161].mxu1 }
 0x2aa   : > { %v19516_v13 = vpop.f32.mrb[162].mxu1 }
 0x2ab   : > { %22775 = vst [vmem:[#allocation46_spill] sm:$0xff] %v19516_v13  ;;  %v15567_v29 = vpop.f32.mrb[163].mxu1 }
 0x2ac   : > { %v19520_v52 = vpop.f32.mrb[164].mxu1 }
 0x2ad   : > { %22776 = vst [vmem:[#allocation47_spill] sm:$0xff] %v19520_v52  ;;  %v15570_v42 = vpop.f32.mrb[165].mxu1 }
 0x2ae   : > { %3772 = vmatmul.mubr.bf16.vlgmr.msra.gmra.mrb[100].mxu0 %v18074_v46  ;;  %v19522_v38 = vpop.f32.mrb[166].mxu1  ;;  %v18082_v42 = vld [vmem:[%s18593_s14 + $0x42c] ss:$20 sps:$4 sm:$0xff]  }
 0x2af   : > { %3779 = vmatprep.mubr.bf16.mxu0 %v18077_v26  ;;  %22777 = vst [vmem:[#allocation48_spill] sm:$0xff] %v19522_v38  ;;  %v15571_v35 = vpop.f32.mrb[167].mxu1  ;;  %v19529_v26 = vld [vmem:[%s22724_s2] ss:$0 sm:$0xff] }
 0x2b0   : > { %v19524_v46 = vpop.f32.mrb[168].mxu1 }
 0x2b1   : > { %22778 = vst [vmem:[#allocation49_spill] sm:$0xff] %v19524_v46  ;;  %v15574_v49 = vpop.f32.mrb[169].mxu1 }
 0x2b2   : > { %v19531_v29 = vpop.f32.mrb[170].mxu1 }
 0x2b3   : > { %22779 = vst [vmem:[#allocation50_spill] sm:$0xff] %v19531_v29  ;;  %v15575_v60 = vpop.f32.mrb[171].mxu1 }
 0x2b6   : > { %3780 = vmatmul.mubr.bf16.gmra.mrb[104].mxu0 %v18079_v45  ;;  %v18083_v45 = vld [vmem:[%s18593_s14 + $0x458] ss:$20 sps:$4 sm:$0xff]  }
 0x2b7   : > { %3787 = vmatprep.mubr.bf16.mxu0 %v18080_v0  ;;  %v19536_v0 = vpop.f32.mrb[172].mxu1 }
 0x2b8   : > { %22780 = vst [vmem:[#allocation51_spill] sm:$0xff] %v19536_v0  ;;  %v15578_v20 = vpop.f32.mrb[173].mxu1 }
 0x2b9   : > { %v2062_v56 = vpop.f32.mrb[0].mxu0  ;;  %v19539_v32 = vpop.f32.mrb[174].mxu1 }
 0x2ba   : > { %v17066_v52 = vadd.f32 %v19529_v26, %v2062_v56  ;;  %v15394_v13 = vpop.f32.mrb[1].mxu0  ;;  %22781 = vst [vmem:[#allocation52_spill] sm:$0xff] %v19539_v32  ;;  %v18089_v32 = vld [vmem:[%s18593_s14 + $0x4a8] ss:$20 sps:$4 sm:$0xff]  }
 0x2bb   : > { %v2065_v38 = vpop.f32.mrb[2].mxu0  ;;  %v15579_v13 = vpop.f32.mrb[175].mxu1 }
 0x2bc   : > { %v2260_v35 = vmax.f32 %v17066_v52, 0.0  ;;  %v17067_v49 = vadd.f32 %v19529_v26, %v2065_v38  ;;  %v15395_v46 = vpop.f32.mrb[3].mxu0  ;;  %v18085_v52 = vld [vmem:[%s18593_s14 + $0x454] ss:$20 sps:$4 sm:$0xff]   ;;  %v19546_v38 = vpop.f32.mrb[176].mxu1 }
 0x2bd   : > { %22782 = vst [vmem:[#allocation53_spill] sm:$0xff] %v19546_v38 }
 0x2be   : > { %2309 = vst.msk [vmem:[#allocation2] sm:$0xff] %vm386_vm3, %v2260_v35  ;;  %v2261_v29 = vmax.f32 %v17067_v49, 0.0  ;;  %3788 = vmatmul.mubr.bf16.gmra.mrb[108].mxu0 %v18082_v42  ;;  %v15582_v42 = vpop.f32.mrb[177].mxu1 }
 0x2bf   : > { %3795 = vmatprep.mubr.bf16.mxu0 %v18083_v45  ;;  %v19549_v49 = vpop.f32.mrb[178].mxu1 }
 0x2c0   : > { %2310 = vst.msk [vmem:[#allocation2 + $0x8] sm:$0xff] %vm386_vm3, %v2261_v29  ;;  %22783 = vst [vmem:[#allocation54_spill] sm:$0xff] %v19549_v49  ;;  %v15583_v45 = vpop.f32.mrb[179].mxu1 }
 0x2c1   : > { %v2070_v60 = vpop.f32.mrb[4].mxu0 }
 0x2c2   : > { %v17068_v56 = vadd.f32 %v19529_v26, %v2070_v60  ;;  %v15398_v0 = vpop.f32.mrb[5].mxu0 }
 0x2c3   : > { %v2073_v30 = vpop.f32.mrb[6].mxu0 }
 0x2c4   : > { %v2262_v20 = vmax.f32 %v17068_v56, 0.0  ;;  %v17069_v46 = vadd.f32 %v19529_v26, %v2073_v30  ;;  %v15399_v35 = vpop.f32.mrb[7].mxu0  ;;  %v18088_v56 = vld [vmem:[%s18593_s14 + $0x47c] ss:$20 sps:$4 sm:$0xff]   ;;  %v19556_v30 = vpop.f32.mrb[180].mxu1 }
 0x2c5   : > { %22784 = vst [vmem:[#allocation55_spill] sm:$0xff] %v19556_v30 }
 0x2c6   : > { %2311 = vst.msk [vmem:[#allocation2 + $0x10] sm:$0xff] %vm386_vm3, %v2262_v20  ;;  %v2263_v29 = vmax.f32 %v17069_v46, 0.0  ;;  %3796 = vmatmul.mubr.bf16.gmra.mrb[112].mxu0 %v18085_v52  ;;  %v15586_v52 = vpop.f32.mrb[181].mxu1 }
 0x2c7   : > { %3803 = vmatprep.mubr.bf16.mxu0 %v18086_v33  ;;  %v19559_v46 = vpop.f32.mrb[182].mxu1  ;;  %v18092_v52 = vld [vmem:[%s18593_s14 + $0x4d0] ss:$20 sps:$4 sm:$0xff]  }
 0x2c8   : > { %2312 = vst.msk [vmem:[#allocation2 + $0x18] sm:$0xff] %vm386_vm3, %v2263_v29  ;;  %22785 = vst [vmem:[#allocation56_spill] sm:$0xff] %v19559_v46  ;;  %v15587_v29 = vpop.f32.mrb[183].mxu1  ;;  %v4305_v30 = vld [vmem:[#allocation2 + $0x1] ss:$2 sm:$0xff] }
 0x2c9   : > { %v2078_v0 = vpop.f32.mrb[8].mxu0  ;;  %v19569_v46 = vpop.f32.mrb[184].mxu1  ;;  %v4301_v29 = vld [vmem:[#allocation2] ss:$2 sm:$0xff] }
 0x2ca   : > { %v17070_v13 = vadd.f32 %v19529_v26, %v2078_v0  ;;  %v15402_v60 = vpop.f32.mrb[9].mxu0  ;;  %v18137_v0 = vld [vmem:[%s22725_s3 + $0x18] sm:$0xff]   ;;  %22786 = vst [vmem:[#allocation57_spill] sm:$0xff] %v19569_v46  ;;  %v18094_v46 = vld [vmem:[%s18593_s14 + $0x4cc] ss:$20 sps:$4 sm:$0xff]  }
 0x2cb   : > { %v2081_v38 = vpop.f32.mrb[10].mxu0  ;;  %v18091_v60 = vld [vmem:[%s18593_s14 + $0x4a4] ss:$20 sps:$4 sm:$0xff]   ;;  %15605 = vmatpush3.bf16.msra.mxu0 %v18137_v0 }
 0x2cc   : > { %v2264_v35 = vmax.f32 %v17070_v13, 0.0  ;;  %v17071_v42 = vadd.f32 %v19529_v26, %v2081_v38  ;;  %v15403_v20 = vpop.f32.mrb[11].mxu0 }
 0x2ce   : > { %2313 = vst.msk [vmem:[#allocation2 + $0x20] sm:$0xff] %vm386_vm3, %v2264_v35  ;;  %v2265_v33 = vmax.f32 %v17071_v42, 0.0  ;;  %3804 = vmatmul.mubr.bf16.gmra.mrb[116].mxu0 %v18088_v56  ;;  %v15590_v42 = vpop.f32.mrb[185].mxu1 }
 0x2cf   : > { %3811 = vmatprep.mubr.bf16.mxu0 %v18089_v32  ;;  %v19573_v49 = vpop.f32.mrb[186].mxu1 }
 0x2d0   : > { %2314 = vst.msk [vmem:[#allocation2 + $0x28] sm:$0xff] %vm386_vm3, %v2265_v33  ;;  %v22787_v33 = vmov 0.0   ;;  %22788 = vst [vmem:[#allocation58_spill] sm:$0xff] %v19573_v49  ;;  %v15591_v0 = vpop.f32.mrb[187].mxu1 }
 0x2d1   : > { %v2086_v45 = vpop.f32.mrb[12].mxu0  ;;  %15606 = vmatprep.subr.bf16.mxu0 %v22787_v33 }
 0x2d2   : > { %v17072_v38 = vadd.f32 %v19529_v26, %v2086_v45  ;;  %v15406_v13 = vpop.f32.mrb[13].mxu0  ;;  %v18143_v45 = vld [vmem:[%s22725_s3 + $0x20] sm:$0xff]  }
 0x2d3   : > { %v2089_v20 = vpop.f32.mrb[14].mxu0  ;;  %15607 = vmatpush3.bf16.msra.mxu0 %v18143_v45 }
 0x2d4   : > { %v2266_v35 = vmax.f32 %v17072_v38, 0.0  ;;  %v17073_v56 = vadd.f32 %v19529_v26, %v2089_v20  ;;  %v15407_v32 = vpop.f32.mrb[15].mxu0  ;;  %15608 = vmatprep.subr.bf16.mxu0 %v22787_v33 }
 0x2d5   : > { %v4316_v32 = vmax.f32 %v4301_v29, %v4305_v30  ;;  %v4181_v30 = vpop.f32.mrb[88].mxu1 }
 0x2d6   : > { %2315 = vst.msk [vmem:[#allocation2 + $0x30] sm:$0xff] %vm386_vm3, %v2266_v35  ;;  %v2267_v13 = vmax.f32 %v17073_v56, 0.0  ;;  %3812 = vmatmul.mubr.bf16.gmra.mrb[120].mxu0 %v18091_v60  ;;  %v18144_v35 = vld [vmem:[%s22725_s3 + $0x28] sm:$0xff]   ;;  %v4303_v56 = vld [vmem:[#allocation2 + $0x10] ss:$2 sm:$0x3f] }
 0x2d7   : > { %v4309_v38 = vld [vmem:[#allocation2 + $0x1c] ss:$2 sm:$0xff]  ;;  %v4313_v20 = vld [vmem:[#allocation2 + $0x1d] ss:$2 sm:$0xff]  ;;  %3819 = vmatprep.mubr.bf16.mxu0 %v18092_v52  ;;  %15609 = vmatpush3.bf16.msra.mxu0 %v18144_v35  ;;  %v15594_v25 = vpop.f32.mrb[89].mxu1 }
 0x2d8   : > { %v4318_v42 = vmax.f32 %v4309_v38, %v4313_v20  ;;  %2316 = vst.msk [vmem:[#allocation2 + $0x38] sm:$0xff] %vm386_vm3, %v2267_v13  ;;  %v4307_v52 = vld [vmem:[#allocation2 + $0x11] ss:$2 sm:$0x3f]  ;;  %v17247_v20 = vadd.f32 %v19529_v26, %v4181_v30  ;;  %15688 = vmatprep.subr.bf16.mxu0 %v22787_v33 }
 0x2d9   : > { %v2094_v49 = vpop.f32.mrb[16].mxu0 }
 0x2da   : > { %v4320_v60 = vmax.f32 %v4316_v32, %v4318_v42  ;;  %v17074_v0 = vadd.f32 %v19529_v26, %v2094_v49  ;;  %v15410_v36 = vpop.f32.mrb[17].mxu0  ;;  %v4317_v49 = vmax.f32 %v4303_v56, %v4307_v52  ;;  %v4247_v35 = vmax.f32 %v17247_v20, 0.0 }
 0x2db   : > { %v2097_v45 = vpop.f32.mrb[18].mxu0 }
 0x2dc   : > { %4322 = vst.msk [vmem:[#allocation3] sm:$0xff] %vm386_vm3, %v4320_v60  ;;  %v2268_v29 = vmax.f32 %v17074_v0, 0.0  ;;  %v17075_v13 = vadd.f32 %v19529_v26, %v2097_v45  ;;  %v15411_v38 = vpop.f32.mrb[19].mxu0  ;;  %v4184_v60 = vpop.f32.mrb[90].mxu1  ;;  %4296 = vst.msk [vmem:[#allocation2 + $0x2e8] sm:$0xff] %vm386_vm3, %v4247_v35 }
 0x2dd   : > { %v4311_v32 = vld [vmem:[#allocation2 + $0x2c] ss:$2 sm:$0x3f]  ;;  %v4315_v42 = vld [vmem:[#allocation2 + $0x2d] ss:$2 sm:$0x3f]  ;;  %v17248_v0 = vadd.f32 %v19529_v26, %v4184_v60 }
 0x2de   : > { %v4319_v36 = vmax.f32 %v4311_v32, %v4315_v42  ;;  %2317 = vst.msk [vmem:[#allocation2 + $0x40] sm:$0xff] %vm386_vm3, %v2268_v29  ;;  %v2269_v4 = vmax.f32 %v17075_v13, 0.0  ;;  %3820 = vmatmul.mubr.bf16.gmra.mrb[124].mxu0 %v18094_v46  ;;  %v15595_v45 = vpop.f32.mrb[91].mxu1  ;;  %v18097_v29 = vld [vmem:[%s18593_s14 + $0x4f4] ss:$20 sps:$4 sm:$0xff]  }
 0x2df   : > { %3827 = vmatprep.mubr.bf16.mxu0 %v18095_v27  ;;  %v4248_v52 = vmax.f32 %v17248_v0, 0.0  ;;  %v18098_v38 = vld [vmem:[%s18593_s14 + $0x520] ss:$20 sps:$4 sm:$0xff]   ;;  %v4189_v27 = vpop.f32.mrb[92].mxu1 }
 0x2e0   : > { %v4321_v25 = vmax.f32 %v4317_v49, %v4319_v36  ;;  %2318 = vst.msk [vmem:[#allocation2 + $0x48] sm:$0xff] %vm386_vm3, %v2269_v4  ;;  %v17249_v4 = vadd.f32 %v19529_v26, %v4189_v27  ;;  %v15598_v49 = vpop.f32.mrb[93].mxu1  ;;  %v18101_v27 = vld [vmem:[%s18593_s14 + $0x548] ss:$20 sps:$4 sm:$0xff]  }
 0x2e1   : > { %v2102_v56 = vpop.f32.mrb[20].mxu0  ;;  %4297 = vst.msk [vmem:[#allocation2 + $0x2f0] sm:$0xff] %vm386_vm3, %v4248_v52  ;;  %v4192_v36 = vpop.f32.mrb[94].mxu1 }
 0x2e2   : > { %4324 = vst.msk [vmem:[#allocation3 + $0x8] sm:$0x3f] %vm4323_vm4, %v4321_v25  ;;  %v17076_v30 = vadd.f32 %v19529_v26, %v2102_v56  ;;  %v15414_v46 = vpop.f32.mrb[21].mxu0  ;;  %v4249_v60 = vmax.f32 %v17249_v4, 0.0  ;;  %v17250_v0 = vadd.f32 %v19529_v26, %v4192_v36  ;;  %v15599_v45 = vpop.f32.mrb[95].mxu1 }
 0x2e3   : > { %v2105_v13 = vpop.f32.mrb[22].mxu0  ;;  %v18100_v46 = vld [vmem:[%s18593_s14 + $0x51c] ss:$20 sps:$4 sm:$0xff]   ;;  %v18103_v45 = vld [vmem:[%s18593_s14 + $0x544] ss:$20 sps:$4 sm:$0xff]  }
 0x2e4   : > { %v2270_v20 = vmax.f32 %v17076_v30, 0.0  ;;  %v17077_v32 = vadd.f32 %v19529_v26, %v2105_v13  ;;  %v15415_v42 = vpop.f32.mrb[23].mxu0  ;;  %4298 = vst.msk [vmem:[#allocation2 + $0x2f8] sm:$0xff] %vm386_vm3, %v4249_v60  ;;  %v4250_v25 = vmax.f32 %v17250_v0, 0.0 }
 0x2e6   : > { %2319 = vst.msk [vmem:[#allocation2 + $0x50] sm:$0xff] %vm386_vm3, %v2270_v20  ;;  %v2271_v35 = vmax.f32 %v17077_v32, 0.0  ;;  %3828 = vmatmul.mubr.bf16.gmra.mrb[128].mxu0 %v18097_v29  ;;  %4299 = vst.msk [vmem:[#allocation2 + $0x300] sm:$0xff] %vm386_vm3, %v4250_v25  ;;  %v4197_v29 = vpop.f32.mrb[96].mxu1  ;;  %v18105_v25 = vld [vmem:[%s18593_s14 + $0x570] ss:$20 sps:$4 sm:$0xff]  }
 0x2e7   : > { %3835 = vmatprep.mubr.bf16.mxu0 %v18098_v38  ;;  %v17251_v42 = vadd.f32 %v19529_v26, %v4197_v29  ;;  %v15602_v4 = vpop.f32.mrb[97].mxu1 }
 0x2e8   : > { %2320 = vst.msk [vmem:[#allocation2 + $0x58] sm:$0xff] %vm386_vm3, %v2271_v35  ;;  %v4200_v35 = vpop.f32.mrb[98].mxu1  ;;  %v4620_v29 = vld [vmem:[#allocation2 + $0x2e9] ss:$2 sm:$0x3f] }
 0x2e9   : > { %v2110_v56 = vpop.f32.mrb[24].mxu0  ;;  %v4251_v36 = vmax.f32 %v17251_v42, 0.0  ;;  %v15603_v60 = vpop.f32.mrb[99].mxu1 }
 0x2ea   : > { %v17078_v52 = vadd.f32 %v19529_v26, %v2110_v56  ;;  %v15418_v30 = vpop.f32.mrb[25].mxu0  ;;  %v4326_v56 = vld [vmem:[#allocation2 + $0x38] ss:$2 sm:$0xff] }
 0x2eb   : > { %v2113_v13 = vpop.f32.mrb[26].mxu0  ;;  %4300 = vst.msk [vmem:[#allocation2 + $0x308] sm:$0xff] %vm386_vm3, %v4251_v36 }
 0x2ec   : > { %v2272_v20 = vmax.f32 %v17078_v52, 0.0  ;;  %v17079_v38 = vadd.f32 %v19529_v26, %v2113_v13  ;;  %v15419_v32 = vpop.f32.mrb[27].mxu0  ;;  %v4616_v13 = vld [vmem:[#allocation2 + $0x2e8] ss:$2 sm:$0x3f] }
 0x2ed   : > { %v4332_v32 = vld [vmem:[#allocation2 + $0x49] ss:$2 sm:$0x3f]  ;;  %v4630_v23 = vmax.f32 %v4616_v13, %v4620_v29 }
 0x2ee   : > { %2321 = vst.msk [vmem:[#allocation2 + $0x60] sm:$0xff] %vm386_vm3, %v2272_v20  ;;  %v2273_v49 = vmax.f32 %v17079_v38, 0.0  ;;  %3836 = vmatmul.mubr.bf16.gmra.mrb[132].mxu0 %v18100_v46  ;;  %v4330_v20 = vld [vmem:[#allocation2 + $0x39] ss:$2 sm:$0xff] }
 0x2ef   : > { %3843 = vmatprep.mubr.bf16.mxu0 %v18101_v27  ;;  %v4328_v38 = vld [vmem:[#allocation2 + $0x48] ss:$2 sm:$0x3f]  ;;  %v4341_v36 = vmax.f32 %v4326_v56, %v4330_v20 }
 0x2f0   : > { %2322 = vst.msk [vmem:[#allocation2 + $0x68] sm:$0xff] %vm386_vm3, %v2273_v49  ;;  %v4342_v21 = vmax.f32 %v4328_v38, %v4332_v32 }
 0x2f1   : > { %v2118_v0 = vpop.f32.mrb[28].mxu0 }
 0x2f2   : > { %v17080_v52 = vadd.f32 %v19529_v26, %v2118_v0  ;;  %v15422_v30 = vpop.f32.mrb[29].mxu0 }
 0x2f3   : > { %v2121_v46 = vpop.f32.mrb[30].mxu0 }
 0x2f4   : > { %v2274_v42 = vmax.f32 %v17080_v52, 0.0  ;;  %v17081_v27 = vadd.f32 %v19529_v26, %v2121_v46  ;;  %v15423_v4 = vpop.f32.mrb[31].mxu0  ;;  %v4624_v46 = vld [vmem:[#allocation2 + $0x304] ss:$2 sm:$0x3f] }
 0x2f5   : > { %v4334_v49 = vld [vmem:[#allocation2 + $0x54] ss:$2 sm:$0xff]  ;;  %v4338_v35 = vld [vmem:[#allocation2 + $0x55] ss:$2 sm:$0xff] }
 0x2f6   : > { %v4343_v60 = vmax.f32 %v4334_v49, %v4338_v35  ;;  %2323 = vst.msk [vmem:[#allocation2 + $0x70] sm:$0xff] %vm386_vm3, %v2274_v42  ;;  %v2275_v10 = vmax.f32 %v17081_v27, 0.0  ;;  %3844 = vmatmul.mubr.bf16.gmra.mrb[136].mxu0 %v18103_v45  ;;  %v4628_v4 = vld [vmem:[#allocation2 + $0x305] ss:$2 sm:$0x3f] }
 0x2f7   : > { %v4336_v0 = vld [vmem:[#allocation2 + $0x64] ss:$2 sm:$0x3f]  ;;  %v4340_v30 = vld [vmem:[#allocation2 + $0x65] ss:$2 sm:$0x3f]  ;;  %3851 = vmatprep.mubr.bf16.mxu0 %v18105_v25  ;;  %v4632_v56 = vmax.f32 %v4624_v46, %v4628_v4 }
 0x2f8   : > { %v4345_v17 = vmax.f32 %v4341_v36, %v4343_v60  ;;  %v4344_v52 = vmax.f32 %v4336_v0, %v4340_v30  ;;  %2324 = vst.msk [vmem:[#allocation2 + $0x78] sm:$0xff] %vm386_vm3, %v2275_v10  ;;  %v18108_v27 = vld [vmem:[%s18593_s14 + $0x56c] ss:$20 sps:$4 sm:$0xff]   ;;  %v18112_v60 = vld [vmem:[%s18593_s14 + $0x594] ss:$20 sps:$4 sm:$0xff]  }
 0x2f9   : > { %v2126_v50 = vpop.f32.mrb[32].mxu0  ;;  %v18110_v25 = vld [vmem:[%s18593_s14 + $0x598] ss:$20 sps:$4 sm:$0xff]   ;;  %v4634_v35 = vmax.f32 %v4630_v23, %v4632_v56  ;;  %v18113_v30 = vld [vmem:[%s18593_s14 + $0x5c0] ss:$20 sps:$4 sm:$0xff]  }
 0x2fa   : > { %4347 = vst.msk [vmem:[#allocation3 + $0xe] sm:$0xff] %vm386_vm3, %v4345_v17  ;;  %v4346_v20 = vmax.f32 %v4342_v21, %v4344_v52  ;;  %v17082_v45 = vadd.f32 %v19529_v26, %v2126_v50  ;;  %v15426_v42 = vpop.f32.mrb[33].mxu0  ;;  %v4637_v50 = vld [vmem:[#allocation3] sm:$0xff] }
 0x2fb   : > { %v2129_v49 = vpop.f32.mrb[34].mxu0  ;;  %4636 = vst.msk [vmem:[#allocation3 + $0xbe] sm:$0x3f] %vm4323_vm4, %v4634_v35 }
 0x2fc   : > { %4348 = vst.msk [vmem:[#allocation3 + $0x16] sm:$0x3f] %vm4323_vm4, %v4346_v20  ;;  %v2276_v13 = vmax.f32 %v17082_v45, 0.0  ;;  %v17083_v10 = vadd.f32 %v19529_v26, %v2129_v49  ;;  %v15427_v29 = vpop.f32.mrb[35].mxu0 }
 0x2fe   : > { %2325 = vst.msk [vmem:[#allocation2 + $0x80] sm:$0xff] %vm386_vm3, %v2276_v13  ;;  %v2277_v21 = vmax.f32 %v17083_v10, 0.0  ;;  %3852 = vmatmul.mubr.bf16.gmra.mrb[140].mxu0 %v18108_v27  ;;  %v18115_v27 = vld [vmem:[%s18593_s14 + $0x5bc] ss:$20 sps:$4 sm:$0xff]  }
 0x2ff   : > { %3859 = vmatprep.mubr.bf16.mxu0 %v18110_v25  ;;  %v18116_v25 = vld [vmem:[%s18593_s14 + $0x5e8] ss:$20 sps:$4 sm:$0xff]  }
 0x300   : > { %2326 = vst.msk [vmem:[#allocation2 + $0x88] sm:$0xff] %vm386_vm3, %v2277_v21  ;;  %v4350_v29 = vld [vmem:[#allocation2 + $0x70] ss:$2 sm:$0xff]  ;;  %v4354_v21 = vld [vmem:[#allocation2 + $0x71] ss:$2 sm:$0xff] }
 0x301   : > { %v2134_v17 = vpop.f32.mrb[36].mxu0  ;;  %v4638_v23 = vld [vmem:[#allocation3 + $0x8] sm:$0xff] }
 0x302   : > { %v17084_v38 = vadd.f32 %v19529_v26, %v2134_v17  ;;  %v15430_v32 = vpop.f32.mrb[37].mxu0  ;;  %v4655_v36 = vpack.c.bf16 %v4638_v23, %v4637_v50 }
 0x303   : > { %v2137_v0 = vpop.f32.mrb[38].mxu0 }
 0x304   : > { %v2278_v52 = vmax.f32 %v17084_v38, 0.0  ;;  %v17085_v46 = vadd.f32 %v19529_v26, %v2137_v0  ;;  %v15431_v4 = vpop.f32.mrb[39].mxu0  ;;  %15653 = vmatmul.mubr.msk.bf16.vlgmr.msra.gmra.mrb[188].mxu1 %vm386_vm3, %v4655_v36  ;;  %v4365_v38 = vmax.f32 %v4350_v29, %v4354_v21 }
 0x305   : > { %15656 = vmatprep.mubr.msk.bf16.mxu1 %vm18440_vm2, %v22787_v33 }
 0x306   : > { %2327 = vst.msk [vmem:[#allocation2 + $0x90] sm:$0xff] %vm386_vm3, %v2278_v52  ;;  %v2279_v56 = vmax.f32 %v17085_v46, 0.0  ;;  %3860 = vmatmul.mubr.bf16.gmra.mrb[144].mxu0 %v18112_v60  ;;  %v18118_v46 = vld [vmem:[%s18593_s14 + $0x5e4] ss:$20 sps:$4 sm:$0xff]  }
 0x307   : > { %3867 = vmatprep.mubr.bf16.mxu0 %v18113_v30  ;;  %v4352_v60 = vld [vmem:[#allocation2 + $0x80] ss:$2 sm:$0x3f]  ;;  %v4356_v4 = vld [vmem:[#allocation2 + $0x81] ss:$2 sm:$0x3f] }
 0x308   : > { %2328 = vst.msk [vmem:[#allocation2 + $0x98] sm:$0xff] %vm386_vm3, %v2279_v56 }
 0x309   : > { %v2142_v20 = vpop.f32.mrb[40].mxu0 }
 0x30a   : > { %v17086_v45 = vadd.f32 %v19529_v26, %v2142_v20  ;;  %v15434_v42 = vpop.f32.mrb[41].mxu0  ;;  %v18119_v20 = vld [vmem:[%s18593_s14 + $0x610] ss:$20 sps:$4 sm:$0xff]  }
 0x30b   : > { %v2145_v49 = vpop.f32.mrb[42].mxu0 }
 0x30c   : > { %v2280_v35 = vmax.f32 %v17086_v45, 0.0  ;;  %v17087_v13 = vadd.f32 %v19529_v26, %v2145_v49  ;;  %v15435_v10 = vpop.f32.mrb[43].mxu0 }
 0x30e   : > { %2329 = vst.msk [vmem:[#allocation2 + $0xa0] sm:$0xff] %vm386_vm3, %v2280_v35  ;;  %v2281_v17 = vmax.f32 %v17087_v13, 0.0  ;;  %3868 = vmatmul.mubr.bf16.gmra.mrb[148].mxu0 %v18115_v27  ;;  %v4366_v35 = vmax.f32 %v4352_v60, %v4356_v4  ;;  %v18122_v60 = vld [vmem:[%s18593_s14 + $0x638] ss:$20 sps:$4 sm:$0xff]  }
 0x30f   : > { %v4358_v50 = vld [vmem:[#allocation2 + $0x8c] ss:$2 sm:$0xff]  ;;  %v4362_v23 = vld [vmem:[#allocation2 + $0x8d] ss:$2 sm:$0xff]  ;;  %3875 = vmatprep.mubr.bf16.mxu0 %v18116_v25 }
 0x310   : > { %v4367_v32 = vmax.f32 %v4358_v50, %v4362_v23  ;;  %2330 = vst.msk [vmem:[#allocation2 + $0xa8] sm:$0xff] %vm386_vm3, %v2281_v17  ;;  %v18121_v23 = vld [vmem:[%s18593_s14 + $0x60c] ss:$20 sps:$4 sm:$0xff]  }
 0x311   : > { %v2150_v36 = vpop.f32.mrb[44].mxu0 }
 0x312   : > { %v4369_v0 = vmax.f32 %v4365_v38, %v4367_v32  ;;  %v17088_v30 = vadd.f32 %v19529_v26, %v2150_v36  ;;  %v15438_v52 = vpop.f32.mrb[45].mxu0  ;;  %v4639_v32 = vld [vmem:[#allocation3 + $0x10] sm:$0xff] }
 0x313   : > { %v2153_v56 = vpop.f32.mrb[46].mxu0 }
 0x314   : > { %4371 = vst.msk [vmem:[#allocation3 + $0x1c] sm:$0xff] %vm386_vm3, %v4369_v0  ;;  %v2282_v45 = vmax.f32 %v17088_v30, 0.0  ;;  %v17089_v42 = vadd.f32 %v19529_v26, %v2153_v56  ;;  %v15439_v27 = vpop.f32.mrb[47].mxu0 }
 0x315   : > { %v4360_v49 = vld [vmem:[#allocation2 + $0x9c] ss:$2 sm:$0x3f]  ;;  %v4364_v25 = vld [vmem:[#allocation2 + $0x9d] ss:$2 sm:$0x3f] }
 0x316   : > { %v4368_v13 = vmax.f32 %v4360_v49, %v4364_v25  ;;  %2331 = vst.msk [vmem:[#allocation2 + $0xb0] sm:$0xff] %vm386_vm3, %v2282_v45  ;;  %v2283_v10 = vmax.f32 %v17089_v42, 0.0  ;;  %3876 = vmatmul.mubr.bf16.gmra.mrb[152].mxu0 %v18118_v46  ;;  %v18124_v42 = vld [vmem:[%s18593_s14 + $0x634] ss:$20 sps:$4 sm:$0xff]  }
 0x317   : > { %3883 = vmatprep.mubr.bf16.mxu0 %v18119_v20  ;;  %v18125_v49 = vld [vmem:[%s18593_s14 + $0x660] ss:$20 sps:$4 sm:$0xff]  }
 0x318   : > { %v4370_v29 = vmax.f32 %v4366_v35, %v4368_v13  ;;  %2332 = vst.msk [vmem:[#allocation2 + $0xb8] sm:$0xff] %vm386_vm3, %v2283_v10 }
 0x319   : > { %v2158_v21 = vpop.f32.mrb[48].mxu0 }
 0x31a   : > { %4372 = vst.msk [vmem:[#allocation3 + $0x24] sm:$0x3f] %vm4323_vm4, %v4370_v29  ;;  %v17090_v17 = vadd.f32 %v19529_v26, %v2158_v21  ;;  %v15442_v50 = vpop.f32.mrb[49].mxu0  ;;  %v18127_v21 = vld [vmem:[%s18593_s14 + $0x65c] ss:$20 sps:$4 sm:$0xff]  }
 0x31b   : > { %v2161_v38 = vpop.f32.mrb[50].mxu0  ;;  %v4640_v36 = vld [vmem:[#allocation3 + $0x18] sm:$0xff] }
 0x31c   : > { %v2284_v0 = vmax.f32 %v17090_v17, 0.0  ;;  %v17091_v30 = vadd.f32 %v19529_v26, %v2161_v38  ;;  %v15443_v52 = vpop.f32.mrb[51].mxu0  ;;  %v4656_v46 = vpack.c.bf16 %v4640_v36, %v4639_v32  ;;  %v18128_v38 = vld [vmem:[%s18593_s14 + $0x688] ss:$20 sps:$4 sm:$0xff]  }
 0x31d   : > { %v4374_v17 = vld [vmem:[#allocation2 + $0xa8] ss:$2 sm:$0xff]  ;;  %v4378_v32 = vld [vmem:[#allocation2 + $0xa9] ss:$2 sm:$0xff] }
 0x31e   : > { %2333 = vst.msk [vmem:[#allocation2 + $0xc0] sm:$0xff] %vm386_vm3, %v2284_v0  ;;  %v2285_v4 = vmax.f32 %v17091_v30, 0.0  ;;  %3884 = vmatmul.mubr.bf16.gmra.mrb[156].mxu0 %v18121_v23  ;;  %15657 = vmatmul.mubr.msk.bf16.gmra.mrb[192].mxu1 %vm386_vm3, %v4656_v46 }
 0x31f   : > { %3891 = vmatprep.mubr.bf16.mxu0 %v18122_v60  ;;  %15660 = vmatprep.mubr.msk.bf16.mxu1 %vm18440_vm2, %v22787_v33 }
 0x320   : > { %2334 = vst.msk [vmem:[#allocation2 + $0xc8] sm:$0xff] %vm386_vm3, %v2285_v4 }
 0x321   : > { %v2166_v56 = vpop.f32.mrb[52].mxu0 }
 0x322   : > { %v17092_v20 = vadd.f32 %v19529_v26, %v2166_v56  ;;  %v15446_v45 = vpop.f32.mrb[53].mxu0 }
 0x323   : > { %v2169_v27 = vpop.f32.mrb[54].mxu0 }
 0x324   : > { %v2286_v25 = vmax.f32 %v17092_v20, 0.0  ;;  %v17093_v35 = vadd.f32 %v19529_v26, %v2169_v27  ;;  %v15447_v13 = vpop.f32.mrb[55].mxu0  ;;  %v4389_v20 = vmax.f32 %v4374_v17, %v4378_v32 }
 0x325   : > { %v4376_v36 = vld [vmem:[#allocation2 + $0xb8] ss:$2 sm:$0x3f]  ;;  %v4380_v0 = vld [vmem:[#allocation2 + $0xb9] ss:$2 sm:$0x3f] }
 0x326   : > { %2335 = vst.msk [vmem:[#allocation2 + $0xd0] sm:$0xff] %vm386_vm3, %v2286_v25  ;;  %v2287_v10 = vmax.f32 %v17093_v35, 0.0  ;;  %3892 = vmatmul.mubr.bf16.gmra.mrb[160].mxu0 %v18124_v42  ;;  %v4390_v25 = vmax.f32 %v4376_v36, %v4380_v0 }
 0x327   : > { %3899 = vmatprep.mubr.bf16.mxu0 %v18125_v49 }
 0x328   : > { %2336 = vst.msk [vmem:[#allocation2 + $0xd8] sm:$0xff] %vm386_vm3, %v2287_v10 }
 0x329   : > { %v2174_v29 = vpop.f32.mrb[56].mxu0 }
 0x32a   : > { %v17094_v50 = vadd.f32 %v19529_v26, %v2174_v29  ;;  %v15450_v23 = vpop.f32.mrb[57].mxu0 }
 0x32b   : > { %v2177_v60 = vpop.f32.mrb[58].mxu0  ;;  %v18130_v23 = vld [vmem:[%s18593_s14 + $0x684] ss:$20 sps:$4 sm:$0xff]  }
 0x32c   : > { %v2288_v30 = vmax.f32 %v17094_v50, 0.0  ;;  %v17095_v52 = vadd.f32 %v19529_v26, %v2177_v60  ;;  %v15451_v46 = vpop.f32.mrb[59].mxu0  ;;  %v18131_v60 = vld [vmem:[%s18593_s14 + $0x6b0] ss:$20 sps:$4 sm:$0xff]  }
 0x32d   : > { %v4382_v4 = vld [vmem:[#allocation2 + $0xc4] ss:$2 sm:$0xff]  ;;  %v4386_v56 = vld [vmem:[#allocation2 + $0xc5] ss:$2 sm:$0xff] }
 0x32e   : > { %v4391_v45 = vmax.f32 %v4382_v4, %v4386_v56  ;;  %2337 = vst.msk [vmem:[#allocation2 + $0xe0] sm:$0xff] %vm386_vm3, %v2288_v30  ;;  %v2289_v42 = vmax.f32 %v17095_v52, 0.0  ;;  %3900 = vmatmul.mubr.bf16.gmra.mrb[164].mxu0 %v18127_v21  ;;  %v4641_v52 = vld [vmem:[#allocation3 + $0x20] sm:$0xff] }
 0x32f   : > { %v4384_v27 = vld [vmem:[#allocation2 + $0xd4] ss:$2 sm:$0x3f]  ;;  %v4388_v49 = vld [vmem:[#allocation2 + $0xd5] ss:$2 sm:$0x3f]  ;;  %3907 = vmatprep.mubr.bf16.mxu0 %v18128_v38 }
 0x330   : > { %v4393_v35 = vmax.f32 %v4389_v20, %v4391_v45  ;;  %v4392_v13 = vmax.f32 %v4384_v27, %v4388_v49  ;;  %2338 = vst.msk [vmem:[#allocation2 + $0xe8] sm:$0xff] %vm386_vm3, %v2289_v42  ;;  %v18133_v45 = vld [vmem:[%s18593_s14 + $0x6ac] ss:$20 sps:$4 sm:$0xff]  }
 0x331   : > { %v2182_v10 = vpop.f32.mrb[60].mxu0  ;;  %v19684_v42 = vld [vmem:[#allocation3 + $0x1c] sm:$0xff] }
 0x332   : > { %4395 = vst.msk [vmem:[#allocation3 + $0x2a] sm:$0xff] %vm386_vm3, %v4393_v35  ;;  %v4394_v29 = vmax.f32 %v4390_v25, %v4392_v13  ;;  %v17096_v17 = vadd.f32 %v19529_v26, %v2182_v10  ;;  %v15454_v50 = vpop.f32.mrb[61].mxu0  ;;  %v18134_v25 = vld [vmem:[%s18593_s14 + $0x6d8] ss:$20 sps:$4 sm:$0xff]  }
 0x333   : > { %v2185_v32 = vpop.f32.mrb[62].mxu0 }
 0x334   : > { %4396 = vst.msk [vmem:[#allocation3 + $0x32] sm:$0x3f] %vm4323_vm4, %v4394_v29  ;;  %v2290_v21 = vmax.f32 %v17096_v17, 0.0  ;;  %v17097_v38 = vadd.f32 %v19529_v26, %v2185_v32  ;;  %v15455_v36 = vpop.f32.mrb[63].mxu0 }
 0x336   : > { %2339 = vst.msk [vmem:[#allocation2 + $0xf0] sm:$0xff] %vm386_vm3, %v2290_v21  ;;  %v2291_v0 = vmax.f32 %v17097_v38, 0.0  ;;  %3908 = vmatmul.mubr.bf16.gmra.mrb[168].mxu0 %v18130_v23  ;;  %v18138_v38 = vld [vmem:[%s18593_s14 + $0x700] ss:$20 sps:$4 sm:$0xff]  }
 0x337   : > { %3915 = vmatprep.mubr.bf16.mxu0 %v18131_v60  ;;  %v18136_v60 = vld [vmem:[%s18593_s14 + $0x6d4] ss:$20 sps:$4 sm:$0xff]  }
 0x338   : > { %2340 = vst.msk [vmem:[#allocation2 + $0xf8] sm:$0xff] %vm386_vm3, %v2291_v0 }
 0x339   : > { %v2190_v30 = vpop.f32.mrb[64].mxu0  ;;  %v4642_v46 = vld [vmem:[#allocation3 + $0x28] sm:$0xff] }
 0x33a   : > { %v17098_v4 = vadd.f32 %v19529_v26, %v2190_v30  ;;  %v15458_v56 = vpop.f32.mrb[65].mxu0  ;;  %v4657_v20 = vpack.c.bf16 %v4642_v46, %v4641_v52  ;;  %v19686_v27 = vld [vmem:[#allocation3 + $0x24] sm:$0xff]  ;;  %v4398_v52 = vld [vmem:[#allocation2 + $0xe0] ss:$2 sm:$0xff]  ;;  %v4402_v46 = vld [vmem:[#allocation2 + $0xe1] ss:$2 sm:$0xff] }
 0x33b   : > { %v2193_v49 = vpop.f32.mrb[66].mxu0  ;;  %v6638_v35 = vpack.c.bf16 %v19686_v27, %v19684_v42  ;;  %v2479_v56 = vld [vmem:[%s18593_s14 + $0x6fc] sm:$0xff] }
 0x33c   : > { %v2292_v13 = vmax.f32 %v17098_v4, 0.0  ;;  %v17099_v10 = vadd.f32 %v19529_v26, %v2193_v49  ;;  %v15459_v29 = vpop.f32.mrb[67].mxu0  ;;  %15661 = vmatmul.mubr.msk.bf16.gmra.mrb[196].mxu1 %vm386_vm3, %v4657_v20  ;;  %v2482_v49 = vld [vmem:[%s18593_s14 + $0x710] sm:$0xff] }
 0x33d   : > { %15664 = vmatprep.mubr.msk.bf16.mxu1 %vm18440_vm2, %v22787_v33 }
 0x33e   : > { %2341 = vst.msk [vmem:[#allocation2 + $0x100] sm:$0xff] %vm386_vm3, %v2292_v13  ;;  %v2293_v17 = vmax.f32 %v17099_v10, 0.0  ;;  %3916 = vmatmul.mubr.bf16.gmra.mrb[172].mxu0 %v18133_v45 }
 0x33f   : > { %3923 = vmatprep.mubr.bf16.mxu0 %v18134_v25  ;;  %v4413_v25 = vmax.f32 %v4398_v52, %v4402_v46  ;;  %v4400_v29 = vld [vmem:[#allocation2 + $0xf0] ss:$2 sm:$0x3f] }
 0x340   : > { %2342 = vst.msk [vmem:[#allocation2 + $0x108] sm:$0xff] %vm386_vm3, %v2293_v17 }
 0x341   : > { %v2198_v50 = vpop.f32.mrb[68].mxu0 }
 0x342   : > { %v17100_v23 = vadd.f32 %v19529_v26, %v2198_v50  ;;  %v15462_v32 = vpop.f32.mrb[69].mxu0 }
 0x343   : > { %v2201_v21 = vpop.f32.mrb[70].mxu0  ;;  %v13792_v32 = vcombine.low %v2479_v56, %v2482_v49 }
 0x344   : > { %v2294_v36 = vmax.f32 %v17100_v23, 0.0  ;;  %v17101_v0 = vadd.f32 %v19529_v26, %v2201_v21  ;;  %v15463_v30 = vpop.f32.mrb[71].mxu0  ;;  %v4404_v21 = vld [vmem:[#allocation2 + $0xf1] ss:$2 sm:$0x3f] }
 0x346   : > { %2343 = vst.msk [vmem:[#allocation2 + $0x110] sm:$0xff] %vm386_vm3, %v2294_v36  ;;  %v2295_v4 = vmax.f32 %v17101_v0, 0.0  ;;  %3924 = vmatmul.mubr.bf16.gmra.mrb[176].mxu0 %v18136_v60  ;;  %v18140_v60 = vld [vmem:[%s18593_s14 + $0x728] ss:$20 sps:$4 sm:$0xff]  }
 0x347   : > { %v4406_v20 = vld [vmem:[#allocation2 + $0xfc] ss:$2 sm:$0xff]  ;;  %v4410_v45 = vld [vmem:[#allocation2 + $0xfd] ss:$2 sm:$0xff]  ;;  %3931 = vmatprep.mubr.bf16.mxu0 %v18138_v38 }
 0x348   : > { %v4415_v13 = vmax.f32 %v4406_v20, %v4410_v45  ;;  %2344 = vst.msk [vmem:[#allocation2 + $0x118] sm:$0xff] %vm386_vm3, %v2295_v4  ;;  %v4414_v4 = vmax.f32 %v4400_v29, %v4404_v21 }
 0x349   : > { %v2206_v10 = vpop.f32.mrb[72].mxu0 }
 0x34a   : > { %v4417_v17 = vmax.f32 %v4413_v25, %v4415_v13  ;;  %v17102_v50 = vadd.f32 %v19529_v26, %v2206_v10  ;;  %v15466_v23 = vpop.f32.mrb[73].mxu0  ;;  %v18142_v10 = vld [vmem:[%s18593_s14 + $0x724] ss:$20 sps:$4 sm:$0xff]   ;;  %s18445_s14 = smov 88  }
 0x34b   : > { %v2209_v36 = vpop.f32.mrb[74].mxu0 }
 0x34c   : > { %4419 = vst.msk [vmem:[#allocation3 + $0x38] sm:$0xff] %vm386_vm3, %v4417_v17  ;;  %v2296_v0 = vmax.f32 %v17102_v50, 0.0  ;;  %v17103_v30 = vadd.f32 %v19529_v26, %v2209_v36  ;;  %v15467_v38 = vpop.f32.mrb[75].mxu0  ;;  %v4643_v50 = vld [vmem:[#allocation3 + $0x30] sm:$0xff] }
 0x34d   : > { %v4408_v52 = vld [vmem:[#allocation2 + $0x10c] ss:$2 sm:$0x3f]  ;;  %v4412_v46 = vld [vmem:[#allocation2 + $0x10d] ss:$2 sm:$0x3f] }
 0x34e   : > { %v4416_v20 = vmax.f32 %v4408_v52, %v4412_v46  ;;  %2345 = vst.msk [vmem:[#allocation2 + $0x120] sm:$0xff] %vm386_vm3, %v2296_v0  ;;  %v2297_v45 = vmax.f32 %v17103_v30, 0.0  ;;  %3932 = vmatmul.mubr.bf16.gmra.mrb[180].mxu0 %v13792_v32  ;;  %v4671_v30 = vld [vmem:[#allocation3 + $0x9] sm:$0xff] }
 0x34f   : > { %3939 = vmatprep.mubr.bf16.mxu0 %v18140_v60 }
 0x350   : > { %v4418_v56 = vmax.f32 %v4414_v4, %v4416_v20  ;;  %2346 = vst.msk [vmem:[#allocation2 + $0x128] sm:$0xff] %vm386_vm3, %v2297_v45  ;;  %v4670_v4 = vld [vmem:[#allocation3 + $0x1] sm:$0xff] }
 0x351   : > { %v2214_v49 = vpop.f32.mrb[76].mxu0 }
 0x352   : > { %4420 = vst.msk [vmem:[#allocation3 + $0x40] sm:$0x3f] %vm4323_vm4, %v4418_v56  ;;  %v17104_v25 = vadd.f32 %v19529_v26, %v2214_v49  ;;  %v15470_v13 = vpop.f32.mrb[77].mxu0  ;;  %v4688_v49 = vpack.c.bf16 %v4671_v30, %v4670_v4 }
 0x353   : > { %v2217_v17 = vpop.f32.mrb[78].mxu0  ;;  %v4644_v23 = vld [vmem:[#allocation3 + $0x38] sm:$0xff] }
 0x354   : > { %v2298_v29 = vmax.f32 %v17104_v25, 0.0  ;;  %v17105_v21 = vadd.f32 %v19529_v26, %v2217_v17  ;;  %v15471_v36 = vpop.f32.mrb[79].mxu0  ;;  %v4658_v0 = vpack.c.bf16 %v4644_v23, %v4643_v50 }
 0x355   : > { %v4422_v17 = vld [vmem:[#allocation2 + $0x118] ss:$2 sm:$0xff] }
 0x356   : > { %2347 = vst.msk [vmem:[#allocation2 + $0x130] sm:$0xff] %vm386_vm3, %v2298_v29  ;;  %v2299_v32 = vmax.f32 %v17105_v21, 0.0  ;;  %3940 = vmatmul.mubr.bf16.gmra.mrb[184].mxu0 %v18142_v10  ;;  %15665 = vmatmul.mubr.msk.bf16.gmra.mrb[200].mxu1 %vm386_vm3, %v4658_v0  ;;  %v4673_v10 = vld [vmem:[#allocation3 + $0x19] sm:$0xff]  ;;  %v4672_v29 = vld [vmem:[#allocation3 + $0x11] sm:$0xff] }
 0x357   : > { %15610 = vmatprep.mubr.msk.bf16.mxu0 %vm18440_vm2, %v22787_v33  ;;  %15668 = vmatprep.mubr.msk.bf16.mxu1 %vm18440_vm2, %v22787_v33  ;;  %v4426_v21 = vld [vmem:[#allocation2 + $0x119] ss:$2 sm:$0xff] }
 0x358   : > { %2348 = vst.msk [vmem:[#allocation2 + $0x138] sm:$0xff] %vm386_vm3, %v2299_v32 }
 0x359   : > { %v2222_v60 = vpop.f32.mrb[80].mxu0 }
 0x35a   : > { %v17106_v38 = vadd.f32 %v19529_v26, %v2222_v60  ;;  %v15474_v52 = vpop.f32.mrb[81].mxu0 }
 0x35b   : > { %v2225_v46 = vpop.f32.mrb[82].mxu0  ;;  %v4689_v52 = vpack.c.bf16 %v4673_v10, %v4672_v29  ;;  %v4675_v29 = vld [vmem:[#allocation3 + $0x29] sm:$0xff] }
 0x35c   : > { %v2300_v20 = vmax.f32 %v17106_v38, 0.0  ;;  %v17107_v45 = vadd.f32 %v19529_v26, %v2225_v46  ;;  %v15475_v56 = vpop.f32.mrb[83].mxu0 }
 0x35d   : > { %v4424_v36 = vld [vmem:[#allocation2 + $0x128] ss:$2 sm:$0x3f]  ;;  %v4428_v32 = vld [vmem:[#allocation2 + $0x129] ss:$2 sm:$0x3f] }
 0x35e   : > { %2349 = vst.msk [vmem:[#allocation2 + $0x140] sm:$0xff] %vm386_vm3, %v2300_v20  ;;  %v2301_v25 = vmax.f32 %v17107_v45, 0.0  ;;  %15611 = vmatmul.mubr.msk.bf16.vlgmr.msra.gmra.mrb[188].mxu0 %vm386_vm3, %v4688_v49  ;;  %v4437_v20 = vmax.f32 %v4422_v17, %v4426_v21 }
 0x35f   : > { %15614 = vmatprep.mubr.msk.bf16.mxu0 %vm18440_vm2, %v22787_v33 }
 0x360   : > { %2350 = vst.msk [vmem:[#allocation2 + $0x148] sm:$0xff] %vm386_vm3, %v2301_v25 }
 0x361   : > { %v2230_v13 = vpop.f32.mrb[84].mxu0 }
 0x362   : > { %v17108_v50 = vadd.f32 %v19529_v26, %v2230_v13  ;;  %v15478_v23 = vpop.f32.mrb[85].mxu0  ;;  %v4438_v13 = vmax.f32 %v4424_v36, %v4428_v32 }
 0x363   : > { %v2233_v0 = vpop.f32.mrb[86].mxu0 }
 0x364   : > { %v2302_v60 = vmax.f32 %v17108_v50, 0.0  ;;  %v17109_v30 = vadd.f32 %v19529_v26, %v2233_v0  ;;  %v15479_v38 = vpop.f32.mrb[87].mxu0 }
 0x365   : > { %v4430_v46 = vld [vmem:[#allocation2 + $0x134] ss:$2 sm:$0xff]  ;;  %v4434_v4 = vld [vmem:[#allocation2 + $0x135] ss:$2 sm:$0xff] }
 0x366   : > { %v4439_v45 = vmax.f32 %v4430_v46, %v4434_v4  ;;  %2351 = vst.msk [vmem:[#allocation2 + $0x150] sm:$0xff] %vm386_vm3, %v2302_v60  ;;  %v2303_v56 = vmax.f32 %v17109_v30, 0.0  ;;  %15615 = vmatmul.mubr.msk.bf16.gmra.mrb[192].mxu0 %vm386_vm3, %v4689_v52  ;;  %v4674_v30 = vld [vmem:[#allocation3 + $0x21] sm:$0xff]  ;;  %v18145_v46 = vld [vmem:[%s22725_s3 + $0x48] sm:$0xff]  }
 0x367   : > { %v4432_v49 = vld [vmem:[#allocation2 + $0x144] ss:$2 sm:$0x3f]  ;;  %v4436_v25 = vld [vmem:[#allocation2 + $0x145] ss:$2 sm:$0x3f]  ;;  %15618 = vmatprep.mubr.msk.bf16.mxu0 %vm18440_vm2, %v22787_v33  ;;  %v4690_v32 = vpack.c.bf16 %v4675_v29, %v4674_v30  ;;  %15731 = vmatpush3.bf16.msra.mxu1 %v18145_v46 }
 0x368   : > { %v4441_v50 = vmax.f32 %v4437_v20, %v4439_v45  ;;  %v4440_v23 = vmax.f32 %v4432_v49, %v4436_v25  ;;  %2352 = vst.msk [vmem:[#allocation2 + $0x158] sm:$0xff] %vm386_vm3, %v2303_v56  ;;  %15732 = vmatprep.subr.bf16.mxu1 %v22787_v33  ;;  %v4677_v45 = vld [vmem:[#allocation3 + $0x39] sm:$0xff]  ;;  %v19755_v56 = vld [vmem:[%s22724_s2] ss:$0 sm:$0xff]  ;;  %v18147_v30 = vld [vmem:[%s22725_s3 + $0x58] sm:$0xff]  }
 0x369   : > { %v2238_v10 = vpop.f32.mrb[88].mxu0 }
 0x36a   : > { %4443 = vst.msk [vmem:[#allocation3 + $0x46] sm:$0xff] %vm386_vm3, %v4441_v50  ;;  %v4442_v17 = vmax.f32 %v4438_v13, %v4440_v23  ;;  %v17110_v21 = vadd.f32 %v19529_v26, %v2238_v10  ;;  %v15482_v0 = vpop.f32.mrb[89].mxu0  ;;  %v4676_v50 = vld [vmem:[#allocation3 + $0x31] sm:$0xff] }
 0x36b   : > { %v2241_v60 = vpop.f32.mrb[90].mxu0  ;;  %v4691_v0 = vpack.c.bf16 %v4677_v45, %v4676_v50 }
 0x36c   : > { %4444 = vst.msk [vmem:[#allocation3 + $0x4e] sm:$0x3f] %vm4323_vm4, %v4442_v17  ;;  %v2304_v38 = vmax.f32 %v17110_v21, 0.0  ;;  %v17111_v52 = vadd.f32 %v19529_v26, %v2241_v60  ;;  %v15483_v36 = vpop.f32.mrb[91].mxu0  ;;  %v18146_v26 = vld [vmem:[%s22725_s3 + $0x50] sm:$0xff]  }
 0x36d   : > { %15733 = vmatpush3.bf16.msra.mxu1 %v18146_v26 }
 0x36e   : > { %2353 = vst.msk [vmem:[#allocation2 + $0x160] sm:$0xff] %vm386_vm3, %v2304_v38  ;;  %v2305_v4 = vmax.f32 %v17111_v52, 0.0  ;;  %15619 = vmatmul.mubr.msk.bf16.gmra.mrb[196].mxu0 %vm386_vm3, %v4690_v32  ;;  %15734 = vmatprep.subr.bf16.mxu1 %v22787_v33 }
 0x36f   : > { %15622 = vmatprep.mubr.msk.bf16.mxu0 %vm18440_vm2, %v22787_v33 }
 0x370   : > { %2354 = vst.msk [vmem:[#allocation2 + $0x168] sm:$0xff] %vm386_vm3, %v2305_v4 }
 0x371   : > { %v2246_v20 = vpop.f32.mrb[92].mxu0  ;;  %v4645_v23 = vld [vmem:[#allocation3 + $0x40] sm:$0xff]  ;;  %15735 = vmatpush3.bf16.msra.mxu1 %v18147_v30 }
 0x372   : > { %v17112_v49 = vadd.f32 %v19755_v56, %v2246_v20  ;;  %v15486_v25 = vpop.f32.mrb[93].mxu0  ;;  %15814 = vmatprep.subr.bf16.mxu1 %v22787_v33  ;;  %v4678_v26 = vld [vmem:[#allocation3 + $0x41] sm:$0xff] }
 0x373   : > { %v2249_v13 = vpop.f32.mrb[94].mxu0  ;;  %v4646_v10 = vld [vmem:[#allocation3 + $0x48] sm:$0xff] }
 0x374   : > { %v2306_v29 = vmax.f32 %v17112_v49, 0.0  ;;  %v17113_v17 = vadd.f32 %v19755_v56, %v2249_v13  ;;  %v15487_v21 = vpop.f32.mrb[95].mxu0  ;;  %v4659_v60 = vpack.c.bf16 %v4646_v10, %v4645_v23  ;;  %v4679_v36 = vld [vmem:[#allocation3 + $0x49] sm:$0xff]  ;;  %v3542_v10 = vadd.f32 %v19755_v56, %v19210_v34 }
 0x375   : > { %v4692_v49 = vpack.c.bf16 %v4679_v36, %v4678_v26  ;;  %v4446_v25 = vld [vmem:[#allocation2 + $0x150] ss:$2 sm:$0xff]  ;;  %v4450_v13 = vld [vmem:[#allocation2 + $0x151] ss:$2 sm:$0xff] }
 0x376   : > { %2355 = vst.msk [vmem:[#allocation2 + $0x170] sm:$0xff] %vm386_vm3, %v2306_v29  ;;  %v2307_v38 = vmax.f32 %v17113_v17, 0.0  ;;  %15623 = vmatmul.mubr.msk.bf16.gmra.mrb[200].mxu0 %vm386_vm3, %v4691_v0  ;;  %15669 = vmatmul.mubr.msk.bf16.gmra.mrb[204].mxu1 %vm386_vm3, %v4659_v60  ;;  %v4461_v29 = vmax.f32 %v4446_v25, %v4450_v13  ;;  %v3545_v0 = vadd.f32 %v19755_v56, %v19218_v37  ;;  %v18148_v36 = vld [vmem:[%s22725_s3 + $0x30] sm:$0xff]  }
 0x377   : > { %15626 = vmatprep.mubr.msk.bf16.mxu0 %vm18440_vm2, %v22787_v33  ;;  %15672 = vmatprep.mubr.msk.bf16.mxu1 %vm18440_vm2, %v22787_v33  ;;  %v4448_v60 = vld [vmem:[#allocation2 + $0x160] ss:$2 sm:$0x3f] }
 0x378   : > { %2356 = vst.msk [vmem:[#allocation2 + $0x178] sm:$0xff] %vm386_vm3, %v2307_v38  ;;  %15689 = vmatpush3.bf16.msra.mxu0 %v18148_v36  ;;  %v3558_v36 = vadd.f32 %v19755_v56, %v19240_v48 }
 0x379   : > { %v2254_v52 = vpop.f32.mrb[96].mxu0  ;;  %15690 = vmatprep.subr.bf16.mxu0 %v22787_v33 }
 0x37a   : > { %v17114_v32 = vadd.f32 %v19755_v56, %v2254_v52  ;;  %v15490_v46 = vpop.f32.mrb[97].mxu0 }
 0x37b   : > { %v2257_v4 = vpop.f32.mrb[98].mxu0 }
 0x37c   : > { %v2308_v20 = vmax.f32 %v17114_v32, 0.0  ;;  %v15491_v45 = vpop.f32.mrb[99].mxu0  ;;  %v4452_v32 = vld [vmem:[#allocation2 + $0x161] ss:$2 sm:$0x3f] }
 0x37d   : > { %v4462_v37 = vmax.f32 %v4448_v60, %v4452_v32 }
 0x37e   : > { %2357 = vst.msk [vmem:[#allocation2 + $0x180] sm:$0xff] %vm386_vm3, %v2308_v20  ;;  %15627 = vmatmul.mubr.msk.bf16.gmra.mrb[204].mxu0 %vm386_vm3, %v4692_v49 }
 0x37f   : > { %v4454_v50 = vld [vmem:[#allocation2 + $0x16c] ss:$2 sm:$0xff]  ;;  %v4458_v23 = vld [vmem:[#allocation2 + $0x16d] ss:$2 sm:$0xff]  ;;  %15630 = vmatprep.mubr.msk.bf16.mxu0 %vm18440_vm2, %v22787_v33 }
 0x380   : > { %v4463_v17 = vmax.f32 %v4454_v50, %v4458_v23  ;;  %v18149_v50 = vld [vmem:[%s22725_s3 + $0x38] sm:$0xff]   ;;  %v3550_v23 = vadd.f32 %v19755_v56, %v19229_v41  ;;  %v18150_v41 = vld [vmem:[%s22725_s3 + $0x40] sm:$0xff]  }
 0x381   : > { %v3773_v21 = vpop.f32.mrb[100].mxu0  ;;  %15691 = vmatpush3.bf16.msra.mxu0 %v18149_v50 }
 0x382   : > { %v4465_v30 = vmax.f32 %v4461_v29, %v4463_v17  ;;  %v3774_v38 = vadd.f32 %v3773_v21, %v3542_v10  ;;  %v3775_v52 = vpop.f32.mrb[101].mxu0  ;;  %15692 = vmatprep.subr.bf16.mxu0 %v22787_v33  ;;  %v3553_v17 = vadd.f32 %v19755_v56, %v19236_v44 }
 0x383   : > { %v3776_v46 = vpop.f32.mrb[102].mxu0 }
 0x384   : > { %4467 = vst.msk [vmem:[#allocation3 + $0x54] sm:$0xff] %vm386_vm3, %v4465_v30  ;;  %v4006_v34 = vadd.f32 %v19414_v47, %v3774_v38  ;;  %v3777_v4 = vadd.f32 %v3776_v46, %v3545_v0  ;;  %v3778_v26 = vpop.f32.mrb[103].mxu0 }
 0x385   : > { %v4456_v20 = vld [vmem:[#allocation2 + $0x17c] ss:$2 sm:$0x3f]  ;;  %v4460_v45 = vld [vmem:[#allocation2 + $0x17d] ss:$2 sm:$0x3f]  ;;  %15693 = vmatpush3.bf16.msra.mxu0 %v18150_v41 }
 0x386   : > { %v4464_v49 = vmax.f32 %v4456_v20, %v4460_v45  ;;  %v4203_v25 = vmax.f32 %v4006_v34, 0.0  ;;  %v4009_v13 = vadd.f32 %v19416_v1, %v3777_v4  ;;  %15772 = vmatprep.subr.bf16.mxu0 %v22787_v33 }
 0x388   : > { %v4466_v47 = vmax.f32 %v4462_v37, %v4464_v49  ;;  %4252 = vst.msk [vmem:[#allocation2 + $0x188] sm:$0xff] %vm386_vm3, %v4203_v25  ;;  %v4204_v10 = vmax.f32 %v4009_v13, 0.0 }
 0x389   : > { %v3781_v29 = vpop.f32.mrb[104].mxu0 }
 0x38a   : > { %4468 = vst.msk [vmem:[#allocation3 + $0x5c] sm:$0x3f] %vm4323_vm4, %v4466_v47  ;;  %v3782_v1 = vadd.f32 %v3781_v29, %v3550_v23  ;;  %v3783_v21 = vpop.f32.mrb[105].mxu0  ;;  %v3569_v29 = vadd.f32 %v19755_v56, %v19253_v54 }
 0x38b   : > { %4253 = vst.msk [vmem:[#allocation2 + $0x190] sm:$0xff] %vm386_vm3, %v4204_v10  ;;  %v3784_v0 = vpop.f32.mrb[106].mxu0  ;;  %v4680_v34 = vld [vmem:[#allocation3 + $0x51] sm:$0xff] }
 0x38c   : > { %v4014_v60 = vadd.f32 %v19421_v58, %v3782_v1  ;;  %v3785_v30 = vadd.f32 %v3784_v0, %v3553_v17  ;;  %v3786_v38 = vpop.f32.mrb[107].mxu0  ;;  %v3561_v58 = vadd.f32 %v19755_v56, %v19245_v51  ;;  %v4647_v37 = vld [vmem:[#allocation3 + $0x50] sm:$0xff] }
 0x38e   : > { %v4205_v52 = vmax.f32 %v4014_v60, 0.0  ;;  %v4017_v44 = vadd.f32 %v19426_v6, %v3785_v30 }
 0x390   : > { %4254 = vst.msk [vmem:[#allocation2 + $0x198] sm:$0xff] %vm386_vm3, %v4205_v52  ;;  %v4206_v32 = vmax.f32 %v4017_v44, 0.0 }
 0x391   : > { %v3789_v46 = vpop.f32.mrb[108].mxu0  ;;  %v4681_v4 = vld [vmem:[#allocation3 + $0x59] sm:$0xff] }
 0x392   : > { %4255 = vst.msk [vmem:[#allocation2 + $0x1a0] sm:$0xff] %vm386_vm3, %v4206_v32  ;;  %v3790_v26 = vadd.f32 %v3789_v46, %v3558_v36  ;;  %v3791_v20 = vpop.f32.mrb[109].mxu0  ;;  %v4693_v45 = vpack.c.bf16 %v4681_v4, %v4680_v34  ;;  %v4648_v49 = vld [vmem:[#allocation3 + $0x58] sm:$0xff]  ;;  %v3577_v46 = vadd.f32 %v19755_v56, %v19258_v59  ;;  %v3582_v59 = vadd.f32 %v19755_v56, %v19261_v61 }
 0x393   : > { %v3792_v6 = vpop.f32.mrb[110].mxu0  ;;  %v4660_v25 = vpack.c.bf16 %v4648_v49, %v4647_v37  ;;  %v4470_v60 = vld [vmem:[#allocation2 + $0x188] ss:$2 sm:$0xff]  ;;  %v4474_v30 = vld [vmem:[#allocation2 + $0x189] ss:$2 sm:$0xff] }
 0x394   : > { %v4022_v48 = vadd.f32 %v19430_v15, %v3790_v26  ;;  %v3793_v13 = vadd.f32 %v3792_v6, %v3561_v58  ;;  %v3794_v50 = vpop.f32.mrb[111].mxu0  ;;  %15631 = vmatmul.mubr.msk.bf16.gmra.mrb[208].mxu0 %vm386_vm3, %v4693_v45  ;;  %v3566_v15 = vadd.f32 %v19755_v56, %v19249_v53  ;;  %v3574_v53 = vadd.f32 %v19755_v56, %v19256_v57 }
 0x395   : > { %15673 = vmatmul.mubr.msk.bf16.gmra.mrb[208].mxu1 %vm386_vm3, %v4660_v25  ;;  %15634 = vmatprep.mubr.msk.bf16.mxu0 %vm18440_vm2, %v22787_v33 }
 0x396   : > { %v4207_v51 = vmax.f32 %v4022_v48, 0.0  ;;  %v4025_v23 = vadd.f32 %v19435_v24, %v3793_v13  ;;  %15676 = vmatprep.mubr.msk.bf16.mxu1 %vm18440_vm2, %v22787_v33 }
 0x398   : > { %4256 = vst.msk [vmem:[#allocation2 + $0x1a8] sm:$0xff] %vm386_vm3, %v4207_v51  ;;  %v4208_v47 = vmax.f32 %v4025_v23, 0.0 }
 0x399   : > { %v3797_v10 = vpop.f32.mrb[112].mxu0  ;;  %v4472_v37 = vld [vmem:[#allocation2 + $0x198] ss:$2 sm:$0x3f] }
 0x39a   : > { %4257 = vst.msk [vmem:[#allocation2 + $0x1b0] sm:$0xff] %vm386_vm3, %v4208_v47  ;;  %v3798_v17 = vadd.f32 %v3797_v10, %v3566_v15  ;;  %v3799_v1 = vpop.f32.mrb[113].mxu0  ;;  %v4476_v49 = vld [vmem:[#allocation2 + $0x199] ss:$2 sm:$0x3f]  ;;  %v3585_v47 = vadd.f32 %v19755_v56, %v19265_v63 }
 0x39b   : > { %v3800_v21 = vpop.f32.mrb[114].mxu0  ;;  %v4486_v50 = vmax.f32 %v4472_v37, %v4476_v49 }
 0x39c   : > { %v4030_v24 = vadd.f32 %v19441_v31, %v3798_v17  ;;  %v3801_v41 = vadd.f32 %v3800_v21, %v3569_v29  ;;  %v3802_v0 = vpop.f32.mrb[115].mxu0  ;;  %v4485_v31 = vmax.f32 %v4470_v60, %v4474_v30  ;;  %v3593_v60 = vadd.f32 %v19755_v56, %v19270_v5 }
 0x39d   : > { %v3598_v5 = vadd.f32 %v19755_v56, %v19273_v7 }
 0x39e   : > { %v4209_v38 = vmax.f32 %v4030_v24, 0.0  ;;  %v4033_v52 = vadd.f32 %v19446_v43, %v3801_v41  ;;  %v3590_v41 = vadd.f32 %v19755_v56, %v19268_v3 }
 0x3a0   : > { %4258 = vst.msk [vmem:[#allocation2 + $0x1b8] sm:$0xff] %vm386_vm3, %v4209_v38  ;;  %v4210_v54 = vmax.f32 %v4033_v52, 0.0 }
 0x3a1   : > { %v4478_v44 = vld [vmem:[#allocation2 + $0x1a4] ss:$2 sm:$0xff]  ;;  %v4482_v36 = vld [vmem:[#allocation2 + $0x1a5] ss:$2 sm:$0xff]  ;;  %v3805_v32 = vpop.f32.mrb[116].mxu0 }
 0x3a2   : > { %v4487_v34 = vmax.f32 %v4478_v44, %v4482_v36  ;;  %v3806_v4 = vadd.f32 %v3805_v32, %v3574_v53  ;;  %v3807_v58 = vpop.f32.mrb[117].mxu0  ;;  %4259 = vst.msk [vmem:[#allocation2 + $0x1c0] sm:$0xff] %vm386_vm3, %v4210_v54 }
 0x3a3   : > { %v3808_v26 = vpop.f32.mrb[118].mxu0 }
 0x3a4   : > { %v4489_v43 = vmax.f32 %v4485_v31, %v4487_v34  ;;  %v4038_v20 = vadd.f32 %v19450_v62, %v3806_v4  ;;  %v3809_v57 = vadd.f32 %v3808_v26, %v3577_v46  ;;  %v3810_v45 = vpop.f32.mrb[119].mxu0  ;;  %v3601_v31 = vadd.f32 %v19755_v56, %v19327_v9 }
 0x3a6   : > { %4491 = vst.msk [vmem:[#allocation3 + $0x62] sm:$0xff] %vm386_vm3, %v4489_v43  ;;  %v4211_v6 = vmax.f32 %v4038_v20, 0.0  ;;  %v4041_v25 = vadd.f32 %v19452_v8, %v3809_v57 }
 0x3a7   : > { %v4480_v48 = vld [vmem:[#allocation2 + $0x1b4] ss:$2 sm:$0x3f]  ;;  %v4484_v13 = vld [vmem:[#allocation2 + $0x1b5] ss:$2 sm:$0x3f] }
 0x3a8   : > { %4260 = vst.msk [vmem:[#allocation2 + $0x1c8] sm:$0xff] %vm386_vm3, %v4211_v6  ;;  %v4488_v51 = vmax.f32 %v4480_v48, %v4484_v13  ;;  %v4212_v23 = vmax.f32 %v4041_v25, 0.0  ;;  %v3606_v13 = vadd.f32 %v19755_v56, %v19330_v12 }
 0x3a9   : > { %v3813_v62 = vpop.f32.mrb[120].mxu0 }
 0x3aa   : > { %v3814_v15 = vadd.f32 %v3813_v62, %v3582_v59  ;;  %v3815_v10 = vpop.f32.mrb[121].mxu0  ;;  %v4490_v29 = vmax.f32 %v4486_v50, %v4488_v51  ;;  %4261 = vst.msk [vmem:[#allocation2 + $0x1d0] sm:$0xff] %vm386_vm3, %v4212_v23 }
 0x3ab   : > { %v3816_v8 = vpop.f32.mrb[122].mxu0 }
 0x3ac   : > { %v4046_v17 = vadd.f32 %v19457_v19, %v3814_v15  ;;  %v3817_v61 = vadd.f32 %v3816_v8, %v3585_v47  ;;  %v3818_v1 = vpop.f32.mrb[123].mxu0  ;;  %4492 = vst.msk [vmem:[#allocation3 + $0x6a] sm:$0x3f] %vm4323_vm4, %v4490_v29 }
 0x3ae   : > { %v4213_v21 = vmax.f32 %v4046_v17, 0.0  ;;  %v4049_v24 = vadd.f32 %v19459_v28, %v3817_v61  ;;  %v4649_v28 = vld [vmem:[#allocation3 + $0x60] sm:$0xff] }
 0x3af   : > { %v4494_v58 = vld [vmem:[#allocation2 + $0x1c0] ss:$2 sm:$0xff]  ;;  %v4498_v20 = vld [vmem:[#allocation2 + $0x1c1] ss:$2 sm:$0xff] }
 0x3b0   : > { %4262 = vst.msk [vmem:[#allocation2 + $0x1d8] sm:$0xff] %vm386_vm3, %v4213_v21  ;;  %v4214_v63 = vmax.f32 %v4049_v24, 0.0  ;;  %v4509_v59 = vmax.f32 %v4494_v58, %v4498_v20  ;;  %v3614_v24 = vadd.f32 %v19755_v56, %v19337_v16 }
 0x3b1   : > { %v3821_v0 = vpop.f32.mrb[124].mxu0 }
 0x3b2   : > { %4263 = vst.msk [vmem:[#allocation2 + $0x1e0] sm:$0xff] %vm386_vm3, %v4214_v63  ;;  %v3822_v19 = vadd.f32 %v3821_v0, %v3590_v41  ;;  %v3823_v30 = vpop.f32.mrb[125].mxu0  ;;  %v3617_v63 = vadd.f32 %v19755_v56, %v19339_v18  ;;  %v22791_v18 = vld [vmem:[#allocation9_spill] sm:$0xff] }
 0x3b3   : > { %v3824_v38 = vpop.f32.mrb[126].mxu0  ;;  %v4650_v36 = vld [vmem:[#allocation3 + $0x68] sm:$0xff] }
 0x3b4   : > { %v4054_v52 = vadd.f32 %v19462_v55, %v3822_v19  ;;  %v3825_v53 = vadd.f32 %v3824_v38, %v3593_v60  ;;  %v3826_v44 = vpop.f32.mrb[127].mxu0  ;;  %v4661_v54 = vpack.c.bf16 %v4650_v36, %v4649_v28  ;;  %v4682_v19 = vld [vmem:[#allocation3 + $0x61] sm:$0xff]  ;;  %v22789_v38 = vld [vmem:[#allocation33_spill] sm:$0xff]  ;;  %v22790_v28 = vld [vmem:[#allocation34_spill] sm:$0xff] }
 0x3b6   : > { %v4215_v3 = vmax.f32 %v4054_v52, 0.0  ;;  %v4057_v32 = vadd.f32 %v19464_v2, %v3825_v53  ;;  %15677 = vmatmul.mubr.msk.bf16.gmra.mrb[212].mxu1 %vm386_vm3, %v4661_v54  ;;  %v3622_v54 = vadd.f32 %v19755_v56, %v22791_v18  ;;  %v22801_v18 = vld [vmem:[#allocation39_spill] sm:$0xff] }
 0x3b7   : > { %15680 = vmatprep.mubr.msk.bf16.mxu1 %vm18440_vm2, %v22787_v33  ;;  %v4496_v57 = vld [vmem:[#allocation2 + $0x1d0] ss:$2 sm:$0x3f]  ;;  %v4500_v45 = vld [vmem:[#allocation2 + $0x1d1] ss:$2 sm:$0x3f] }
 0x3b8   : > { %4264 = vst.msk [vmem:[#allocation2 + $0x1e8] sm:$0xff] %vm386_vm3, %v4215_v3  ;;  %v4216_v46 = vmax.f32 %v4057_v32, 0.0  ;;  %v4510_v51 = vmax.f32 %v4496_v57, %v4500_v45  ;;  %v22794_v57 = vld [vmem:[#allocation36_spill] sm:$0xff] }
 0x3b9   : > { %v3829_v55 = vpop.f32.mrb[128].mxu0 }
 0x3ba   : > { %4265 = vst.msk [vmem:[#allocation2 + $0x1f0] sm:$0xff] %vm386_vm3, %v4216_v46  ;;  %v3830_v34 = vadd.f32 %v3829_v55, %v3598_v5  ;;  %v3831_v4 = vpop.f32.mrb[129].mxu0  ;;  %v22792_v46 = vld [vmem:[#allocation10_spill] sm:$0xff] }
 0x3bb   : > { %v3832_v2 = vpop.f32.mrb[130].mxu0  ;;  %v3625_v55 = vadd.f32 %v19755_v56, %v22792_v46 }
 0x3bc   : > { %v4062_v26 = vadd.f32 %v19469_v11, %v3830_v34  ;;  %v3833_v43 = vadd.f32 %v3832_v2, %v3601_v31  ;;  %v3834_v7 = vpop.f32.mrb[131].mxu0  ;;  %v22793_v34 = vld [vmem:[#allocation35_spill] sm:$0xff] }
 0x3be   : > { %v4217_v37 = vmax.f32 %v4062_v26, 0.0  ;;  %v4065_v49 = vadd.f32 %v19471_v22, %v3833_v43  ;;  %v3609_v22 = vadd.f32 %v19755_v56, %v19332_v14 }
 0x3bf   : > { %v4502_v6 = vld [vmem:[#allocation2 + $0x1dc] ss:$2 sm:$0xff]  ;;  %v4506_v25 = vld [vmem:[#allocation2 + $0x1dd] ss:$2 sm:$0xff] }
 0x3c0   : > { %v4511_v9 = vmax.f32 %v4502_v6, %v4506_v25  ;;  %4266 = vst.msk [vmem:[#allocation2 + $0x1f8] sm:$0xff] %vm386_vm3, %v4217_v37  ;;  %v4218_v48 = vmax.f32 %v4065_v49, 0.0  ;;  %v22795_v49 = vld [vmem:[#allocation11_spill] sm:$0xff] }
 0x3c1   : > { %v4504_v50 = vld [vmem:[#allocation2 + $0x1ec] ss:$2 sm:$0x3f]  ;;  %v4508_v11 = vld [vmem:[#allocation2 + $0x1ed] ss:$2 sm:$0x3f]  ;;  %v3630_v6 = vadd.f32 %v19755_v56, %v22795_v49 }
 0x3c2   : > { %v4513_v23 = vmax.f32 %v4509_v59, %v4511_v9  ;;  %v4512_v62 = vmax.f32 %v4504_v50, %v4508_v11  ;;  %4267 = vst.msk [vmem:[#allocation2 + $0x200] sm:$0xff] %vm386_vm3, %v4218_v48  ;;  %v3837_v47 = vpop.f32.mrb[132].mxu0  ;;  %v22796_v50 = vld [vmem:[#allocation12_spill] sm:$0xff] }
 0x3c3   : > { %v3838_v15 = vadd.f32 %v3837_v47, %v3606_v13  ;;  %v3839_v10 = vpop.f32.mrb[133].mxu0  ;;  %v3633_v11 = vadd.f32 %v19755_v56, %v22796_v50 }
 0x3c4   : > { %4515 = vst.msk [vmem:[#allocation3 + $0x70] sm:$0xff] %vm386_vm3, %v4513_v23  ;;  %v4514_v29 = vmax.f32 %v4510_v51, %v4512_v62  ;;  %v3840_v8 = vpop.f32.mrb[134].mxu0 }
 0x3c5   : > { %v4070_v17 = vadd.f32 %v19474_v40, %v3838_v15  ;;  %v3841_v12 = vadd.f32 %v3840_v8, %v3609_v22  ;;  %v3842_v61 = vpop.f32.mrb[135].mxu0  ;;  %v22797_v8 = vld [vmem:[#allocation37_spill] sm:$0xff] }
 0x3c6   : > { %4516 = vst.msk [vmem:[#allocation3 + $0x78] sm:$0x3f] %vm4323_vm4, %v4514_v29 }
 0x3c7   : > { %v4219_v1 = vmax.f32 %v4070_v17, 0.0  ;;  %v4073_v21 = vadd.f32 %v19476_v39, %v3841_v12 }
 0x3c9   : > { %4268 = vst.msk [vmem:[#allocation2 + $0x208] sm:$0xff] %vm386_vm3, %v4219_v1  ;;  %v4220_v14 = vmax.f32 %v4073_v21, 0.0  ;;  %v3845_v41 = vpop.f32.mrb[136].mxu0  ;;  %v4518_v7 = vld [vmem:[#allocation2 + $0x1f8] ss:$2 sm:$0xff] }
 0x3ca   : > { %v3846_v0 = vadd.f32 %v3845_v41, %v3614_v24  ;;  %v3847_v60 = vpop.f32.mrb[137].mxu0  ;;  %v4522_v20 = vld [vmem:[#allocation2 + $0x1f9] ss:$2 sm:$0xff] }
 0x3cb   : > { %4269 = vst.msk [vmem:[#allocation2 + $0x210] sm:$0xff] %vm386_vm3, %v4220_v14  ;;  %v3848_v40 = vpop.f32.mrb[138].mxu0  ;;  %v4683_v30 = vld [vmem:[#allocation3 + $0x69] sm:$0xff]  ;;  %v4533_v51 = vmax.f32 %v4518_v7, %v4522_v20  ;;  %v22798_v14 = vld [vmem:[#allocation38_spill] sm:$0xff] }
 0x3cc   : > { %v4078_v52 = vadd.f32 %v22789_v38, %v3846_v0  ;;  %v3849_v39 = vadd.f32 %v3848_v40, %v3617_v63  ;;  %v3850_v53 = vpop.f32.mrb[139].mxu0  ;;  %v4694_v44 = vpack.c.bf16 %v4683_v30, %v4682_v19  ;;  %v22799_v60 = vld [vmem:[#allocation13_spill] sm:$0xff] }
 0x3cd   : > { %v3638_v40 = vadd.f32 %v19755_v56, %v22799_v60  ;;  %v4684_v46 = vld [vmem:[#allocation3 + $0x71] sm:$0xff] }
 0x3ce   : > { %v4221_v16 = vmax.f32 %v4078_v52, 0.0  ;;  %v4081_v36 = vadd.f32 %v22790_v28, %v3849_v39  ;;  %15635 = vmatmul.mubr.msk.bf16.gmra.mrb[212].mxu0 %vm386_vm3, %v4694_v44  ;;  %v22800_v39 = vld [vmem:[#allocation14_spill] sm:$0xff] }
 0x3cf   : > { %15638 = vmatprep.mubr.msk.bf16.mxu0 %vm18440_vm2, %v22787_v33  ;;  %v3641_v53 = vadd.f32 %v19755_v56, %v22800_v39  ;;  %v5206_v39 = vld [vmem:[#allocation3 + $0x3] sm:$0xff] }
 0x3d0   : > { %4270 = vst.msk [vmem:[#allocation2 + $0x218] sm:$0xff] %vm386_vm3, %v4221_v16  ;;  %v4222_v3 = vmax.f32 %v4081_v36, 0.0 }
 0x3d1   : > { %v3853_v32 = vpop.f32.mrb[140].mxu0 }
 0x3d2   : > { %4271 = vst.msk [vmem:[#allocation2 + $0x220] sm:$0xff] %vm386_vm3, %v4222_v3  ;;  %v3854_v5 = vadd.f32 %v3853_v32, %v3622_v54  ;;  %v3855_v31 = vpop.f32.mrb[141].mxu0  ;;  %v4520_v1 = vld [vmem:[#allocation2 + $0x208] ss:$2 sm:$0x3f] }
 0x3d3   : > { %v3856_v2 = vpop.f32.mrb[142].mxu0  ;;  %v4524_v21 = vld [vmem:[#allocation2 + $0x209] ss:$2 sm:$0x3f] }
 0x3d4   : > { %v4086_v4 = vadd.f32 %v22793_v34, %v3854_v5  ;;  %v3857_v58 = vadd.f32 %v3856_v2, %v3625_v55  ;;  %v3858_v26 = vpop.f32.mrb[143].mxu0  ;;  %v4534_v19 = vmax.f32 %v4520_v1, %v4524_v21  ;;  %v4651_v5 = vld [vmem:[#allocation3 + $0x70] sm:$0xff] }
 0x3d6   : > { %v4223_v43 = vmax.f32 %v4086_v4, 0.0  ;;  %v4089_v45 = vadd.f32 %v22794_v57, %v3857_v58  ;;  %v22802_v4 = vld [vmem:[#allocation40_spill] sm:$0xff] }
 0x3d7   : > { %v19893_v37 = vpop.f32.mrb[188].mxu1 }
 0x3d8   : > { %4272 = vst.msk [vmem:[#allocation2 + $0x228] sm:$0xff] %vm386_vm3, %v4223_v43  ;;  %v15654_v25 = vpop.f32.mrb[189].mxu1  ;;  %v4224_v48 = vmax.f32 %v4089_v45, 0.0  ;;  %v22803_v43 = vld [vmem:[#allocation15_spill] sm:$0xff]  ;;  %v22804_v45 = vld [vmem:[#allocation16_spill] sm:$0xff] }
 0x3d9   : > { %v4526_v59 = vld [vmem:[#allocation2 + $0x214] ss:$2 sm:$0xff]  ;;  %v4530_v9 = vld [vmem:[#allocation2 + $0x215] ss:$2 sm:$0xff]  ;;  %v3861_v13 = vpop.f32.mrb[144].mxu0  ;;  %v19900_v47 = vpop.f32.mrb[190].mxu1  ;;  %v3646_v7 = vadd.f32 %v19755_v56, %v22803_v43  ;;  %v3649_v49 = vadd.f32 %v19755_v56, %v22804_v45 }
 0x3da   : > { %v4535_v23 = vmax.f32 %v4526_v59, %v4530_v9  ;;  %v3862_v62 = vadd.f32 %v3861_v13, %v3630_v6  ;;  %v3863_v22 = vpop.f32.mrb[145].mxu0  ;;  %4273 = vst.msk [vmem:[#allocation2 + $0x230] sm:$0xff] %vm386_vm3, %v4224_v48  ;;  %v15655_v15 = vpop.f32.mrb[191].mxu1  ;;  %v22805_v13 = vld [vmem:[#allocation41_spill] sm:$0xff]  ;;  %v22812_v45 = vld [vmem:[#allocation20_spill] sm:$0xff] }
 0x3db   : > { %v3864_v10 = vpop.f32.mrb[146].mxu0 }
 0x3dc   : > { %v4537_v29 = vmax.f32 %v4533_v51, %v4535_v23  ;;  %v4094_v17 = vadd.f32 %v22797_v8, %v3862_v62  ;;  %v3865_v12 = vadd.f32 %v3864_v10, %v3633_v11  ;;  %v3866_v61 = vpop.f32.mrb[147].mxu0  ;;  %v22806_v62 = vld [vmem:[#allocation42_spill] sm:$0xff]  ;;  %v22807_v10 = vld [vmem:[#allocation17_spill] sm:$0xff] }
 0x3dd   : > { %v22808_v61 = vld [vmem:[#allocation18_spill] sm:$0xff] }
 0x3de   : > { %4539 = vst.msk [vmem:[#allocation3 + $0x7e] sm:$0xff] %vm386_vm3, %v4537_v29  ;;  %v4225_v24 = vmax.f32 %v4094_v17, 0.0  ;;  %v4097_v41 = vadd.f32 %v22798_v14, %v3865_v12  ;;  %v3654_v29 = vadd.f32 %v19755_v56, %v22807_v10  ;;  %v3657_v1 = vadd.f32 %v19755_v56, %v22808_v61  ;;  %v22814_v10 = vld [vmem:[#allocation46_spill] sm:$0xff] }
 0x3df   : > { %v4528_v63 = vld [vmem:[#allocation2 + $0x224] ss:$2 sm:$0x3f]  ;;  %v4532_v0 = vld [vmem:[#allocation2 + $0x225] ss:$2 sm:$0x3f] }
 0x3e0   : > { %v4536_v30 = vmax.f32 %v4528_v63, %v4532_v0  ;;  %4274 = vst.msk [vmem:[#allocation2 + $0x238] sm:$0xff] %vm386_vm3, %v4225_v24  ;;  %v4226_v38 = vmax.f32 %v4097_v41, 0.0  ;;  %v5207_v0 = vld [vmem:[#allocation3 + $0xb] sm:$0xff] }
 0x3e1   : > { %v3869_v52 = vpop.f32.mrb[148].mxu0 }
 0x3e2   : > { %v4538_v44 = vmax.f32 %v4534_v19, %v4536_v30  ;;  %4275 = vst.msk [vmem:[#allocation2 + $0x240] sm:$0xff] %vm386_vm3, %v4226_v38  ;;  %v3870_v16 = vadd.f32 %v3869_v52, %v3638_v40  ;;  %v3871_v28 = vpop.f32.mrb[149].mxu0  ;;  %v22809_v40 = vld [vmem:[#allocation43_spill] sm:$0xff] }
 0x3e3   : > { %v3872_v36 = vpop.f32.mrb[150].mxu0 }
 0x3e4   : > { %4540 = vst.msk [vmem:[#allocation3 + $0x86] sm:$0x3f] %vm4323_vm4, %v4538_v44  ;;  %v4102_v54 = vadd.f32 %v22801_v18, %v3870_v16  ;;  %v3873_v3 = vadd.f32 %v3872_v36, %v3641_v53  ;;  %v3874_v32 = vpop.f32.mrb[151].mxu0  ;;  %v18151_v16 = vld [vmem:[%s22725_s3 + $0x78] sm:$0xff]  }
 0x3e5   : > { %v4685_v55 = vld [vmem:[#allocation3 + $0x79] sm:$0xff]  ;;  %v22810_v18 = vld [vmem:[#allocation44_spill] sm:$0xff] }
 0x3e6   : > { %v4652_v31 = vld [vmem:[#allocation3 + $0x78] sm:$0xff]  ;;  %v4227_v34 = vmax.f32 %v4102_v54, 0.0  ;;  %v4105_v2 = vadd.f32 %v22802_v4, %v3873_v3  ;;  %v4695_v58 = vpack.c.bf16 %v4685_v55, %v4684_v46  ;;  %v5224_v3 = vpack.c.bf16 %v5207_v0, %v5206_v39  ;;  %v22811_v4 = vld [vmem:[#allocation19_spill] sm:$0xff] }
 0x3e7   : > { %v4662_v26 = vpack.c.bf16 %v4652_v31, %v4651_v5  ;;  %v4542_v60 = vld [vmem:[#allocation2 + $0x230] ss:$2 sm:$0xff]  ;;  %v4546_v53 = vld [vmem:[#allocation2 + $0x231] ss:$2 sm:$0xff] }
 0x3e8   : > { %4276 = vst.msk [vmem:[#allocation2 + $0x248] sm:$0xff] %vm386_vm3, %v4227_v34  ;;  %v4228_v20 = vmax.f32 %v4105_v2, 0.0  ;;  %15639 = vmatmul.mubr.msk.bf16.gmra.mrb[216].mxu0 %vm386_vm3, %v4695_v58  ;;  %v4557_v46 = vmax.f32 %v4542_v60, %v4546_v53  ;;  %v18152_v34 = vld [vmem:[%s22725_s3 + $0x80] sm:$0xff]   ;;  %v3662_v2 = vadd.f32 %v19755_v56, %v22811_v4 }
 0x3e9   : > { %15681 = vmatmul.mubr.msk.bf16.gmra.mrb[216].mxu1 %vm386_vm3, %v4662_v26  ;;  %v3877_v57 = vpop.f32.mrb[152].mxu0  ;;  %15642 = vmatprep.mubr.msk.bf16.mxu0 %vm18440_vm2, %v22787_v33 }
 0x3ea   : > { %15684 = vmatprep.mubr.msk.bf16.mxu1 %vm18440_vm2, %v22787_v33  ;;  %4277 = vst.msk [vmem:[#allocation2 + $0x250] sm:$0xff] %vm386_vm3, %v4228_v20  ;;  %v3878_v6 = vadd.f32 %v3877_v57, %v3646_v7  ;;  %v3879_v25 = vpop.f32.mrb[153].mxu0 }
 0x3eb   : > { %v3880_v59 = vpop.f32.mrb[154].mxu0  ;;  %v4653_v9 = vld [vmem:[#allocation3 + $0x80] sm:$0xff]  ;;  %v4654_v48 = vld [vmem:[#allocation3 + $0x88] sm:$0xf] }
 0x3ec   : > { %v4110_v50 = vadd.f32 %v22805_v13, %v3878_v6  ;;  %v3881_v11 = vadd.f32 %v3880_v59, %v3649_v49  ;;  %v3882_v51 = vpop.f32.mrb[155].mxu0  ;;  %v4663_v15 = vpack.c.bf16 %v4654_v48, %v4653_v9  ;;  %v3665_v49 = vadd.f32 %v19755_v56, %v22812_v45  ;;  %v5209_v59 = vld [vmem:[#allocation3 + $0x1b] sm:$0xff]  ;;  %v22813_v13 = vld [vmem:[#allocation45_spill] sm:$0xff] }
 0x3ed   : > { %v4686_v60 = vld [vmem:[#allocation3 + $0x81] sm:$0xff] }
 0x3ee   : > { %v4229_v23 = vmax.f32 %v4110_v50, 0.0  ;;  %v4113_v22 = vadd.f32 %v22806_v62, %v3881_v11  ;;  %v18153_v62 = vld [vmem:[%s22725_s3 + $0x88] sm:$0xff]  }
 0x3ef   : > { %v4544_v44 = vld [vmem:[#allocation2 + $0x240] ss:$2 sm:$0x3f]  ;;  %v4548_v28 = vld [vmem:[#allocation2 + $0x241] ss:$2 sm:$0x3f] }
 0x3f0   : > { %4278 = vst.msk [vmem:[#allocation2 + $0x258] sm:$0xff] %vm386_vm3, %v4229_v23  ;;  %v4230_v8 = vmax.f32 %v4113_v22, 0.0  ;;  %v4558_v43 = vmax.f32 %v4544_v44, %v4548_v28  ;;  %v5208_v23 = vld [vmem:[#allocation3 + $0x13] sm:$0xff]  ;;  %v5210_v44 = vld [vmem:[#allocation3 + $0x23] sm:$0xff] }
 0x3f1   : > { %15685 = vmatmul.mubr.msk.bf16.gmra.mrb[220].mxu1 %vm386_vm3, %v4663_v15  ;;  %v3885_v17 = vpop.f32.mrb[156].mxu0  ;;  %v19933_v12 = vpop.f32.mrb[192].mxu1  ;;  %v5225_v22 = vpack.c.bf16 %v5209_v59, %v5208_v23  ;;  %v22818_v28 = vld [vmem:[#allocation48_spill] sm:$0xff]  ;;  %v22823_v23 = vld [vmem:[#allocation25_spill] sm:$0xff] }
 0x3f2   : > { %15736 = vmatprep.mubr.msk.bf16.mxu1 %vm18440_vm2, %v22787_v33  ;;  %4279 = vst.msk [vmem:[#allocation2 + $0x260] sm:$0xff] %vm386_vm3, %v4230_v8  ;;  %v3886_v21 = vadd.f32 %v3885_v17, %v3654_v29  ;;  %v3887_v24 = vpop.f32.mrb[157].mxu0  ;;  %v15658_v14 = vpop.f32.mrb[193].mxu1  ;;  %v22815_v8 = vld [vmem:[#allocation21_spill] sm:$0xff] }
 0x3f3   : > { %v3888_v41 = vpop.f32.mrb[158].mxu0  ;;  %v19940_v63 = vpop.f32.mrb[194].mxu1  ;;  %v3670_v17 = vadd.f32 %v19755_v56, %v22815_v8 }
 0x3f4   : > { %v4118_v19 = vadd.f32 %v22809_v40, %v3886_v21  ;;  %v3889_v30 = vadd.f32 %v3888_v41, %v3657_v1  ;;  %v15659_v38 = vpop.f32.mrb[195].mxu1  ;;  %v3890_v52 = vpop.f32.mrb[159].mxu0  ;;  %v22816_v21 = vld [vmem:[#allocation22_spill] sm:$0xff] }
 0x3f5   : > { %v3673_v24 = vadd.f32 %v19755_v56, %v22816_v21 }
 0x3f6   : > { %v4231_v36 = vmax.f32 %v4118_v19, 0.0  ;;  %v4121_v54 = vadd.f32 %v22810_v18, %v3889_v30  ;;  %v5211_v19 = vld [vmem:[#allocation3 + $0x2b] sm:$0xff]  ;;  %v22817_v30 = vld [vmem:[#allocation47_spill] sm:$0xff] }
 0x3f7   : > { %v4550_v32 = vld [vmem:[#allocation2 + $0x24c] ss:$2 sm:$0xff]  ;;  %v4554_v5 = vld [vmem:[#allocation2 + $0x24d] ss:$2 sm:$0xff]  ;;  %v5226_v18 = vpack.c.bf16 %v5211_v19, %v5210_v44  ;;  %v5006_v19 = vld [vmem:[#allocation3 + $0x12] sm:$0xff] }
 0x3f8   : > { %v4559_v55 = vmax.f32 %v4550_v32, %v4554_v5  ;;  %4280 = vst.msk [vmem:[#allocation2 + $0x268] sm:$0xff] %vm386_vm3, %v4231_v36  ;;  %v4232_v31 = vmax.f32 %v4121_v54, 0.0  ;;  %v22819_v54 = vld [vmem:[#allocation23_spill] sm:$0xff] }
 0x3f9   : > { %15737 = vmatmul.mubr.msk.bf16.vlgmr.msra.gmra.mrb[224].mxu1 %vm386_vm3, %v5224_v3  ;;  %v4552_v58 = vld [vmem:[#allocation2 + $0x25c] ss:$2 sm:$0x3f]  ;;  %v4556_v26 = vld [vmem:[#allocation2 + $0x25d] ss:$2 sm:$0x3f]  ;;  %v3678_v3 = vadd.f32 %v19755_v56, %v22819_v54 }
 0x3fa   : > { %15740 = vmatprep.mubr.msk.bf16.mxu1 %vm18440_vm2, %v22787_v33  ;;  %15815 = vmatpush3.bf16.msra.mxu1 %v18151_v16  ;;  %v4561_v7 = vmax.f32 %v4557_v46, %v4559_v55  ;;  %v4560_v20 = vmax.f32 %v4552_v58, %v4556_v26  ;;  %4281 = vst.msk [vmem:[#allocation2 + $0x270] sm:$0xff] %vm386_vm3, %v4232_v31  ;;  %v3893_v57 = vpop.f32.mrb[160].mxu0  ;;  %v5005_v46 = vld [vmem:[#allocation3 + $0xa] sm:$0xff]  ;;  %v5213_v58 = vld [vmem:[#allocation3 + $0x3b] sm:$0xff] }
 0x3fb   : > { %15816 = vmatprep.subr.bf16.mxu1 %v22787_v33  ;;  %v3894_v6 = vadd.f32 %v3893_v57, %v3662_v2  ;;  %v3895_v25 = vpop.f32.mrb[161].mxu0  ;;  %v22820_v31 = vld [vmem:[#allocation24_spill] sm:$0xff]  ;;  %v18154_v26 = vld [vmem:[%s22725_s3 + $0x60] sm:$0xff]  }
 0x3fc   : > { %4563 = vst.msk [vmem:[#allocation3 + $0x8c] sm:$0xff] %vm386_vm3, %v4561_v7  ;;  %v4562_v9 = vmax.f32 %v4558_v43, %v4560_v20  ;;  %v3896_v48 = vpop.f32.mrb[162].mxu0  ;;  %v5004_v2 = vld [vmem:[#allocation3 + $0x2] sm:$0xff]  ;;  %v22821_v43 = vld [vmem:[#allocation49_spill] sm:$0xff] }
 0x3fd   : > { %v4126_v50 = vadd.f32 %v22813_v13, %v3894_v6  ;;  %v3897_v11 = vadd.f32 %v3896_v48, %v3665_v49  ;;  %v3898_v51 = vpop.f32.mrb[163].mxu0  ;;  %v5022_v57 = vpack.c.bf16 %v5005_v46, %v5004_v2  ;;  %v5212_v6 = vld [vmem:[#allocation3 + $0x33] sm:$0xff] }
 0x3fe   : > { %15817 = vmatpush3.bf16.msra.mxu1 %v18152_v34  ;;  %4564 = vst.msk [vmem:[#allocation3 + $0x94] sm:$0x3f] %vm4323_vm4, %v4562_v9  ;;  %v3681_v34 = vadd.f32 %v19755_v56, %v22820_v31  ;;  %v5227_v59 = vpack.c.bf16 %v5213_v58, %v5212_v6  ;;  %v22822_v13 = vld [vmem:[#allocation50_spill] sm:$0xff] }
 0x3ff   : > { %15818 = vmatprep.subr.bf16.mxu1 %v22787_v33  ;;  %v4233_v15 = vmax.f32 %v4126_v50, 0.0  ;;  %v4129_v29 = vadd.f32 %v22814_v10, %v3897_v11  ;;  %v18155_v51 = vld [vmem:[%s22725_s3 + $0x68] sm:$0xff]  }
 0x401   : > { %15741 = vmatmul.mubr.msk.bf16.gmra.mrb[228].mxu1 %vm386_vm3, %v5225_v22  ;;  %4282 = vst.msk [vmem:[#allocation2 + $0x278] sm:$0xff] %vm386_vm3, %v4233_v15  ;;  %v4234_v61 = vmax.f32 %v4129_v29, 0.0  ;;  %v3901_v1 = vpop.f32.mrb[164].mxu0  ;;  %v4566_v9 = vld [vmem:[#allocation2 + $0x268] ss:$2 sm:$0xff] }
 0x402   : > { %15744 = vmatprep.mubr.msk.bf16.mxu1 %vm18440_vm2, %v22787_v33  ;;  %15819 = vmatpush3.bf16.msra.mxu1 %v18153_v62  ;;  %v3902_v14 = vadd.f32 %v3901_v1, %v3670_v17  ;;  %v3903_v41 = vpop.f32.mrb[165].mxu0  ;;  %v4570_v48 = vld [vmem:[#allocation2 + $0x269] ss:$2 sm:$0xff]  ;;  %v3686_v62 = vadd.f32 %v19755_v56, %v22823_v23 }
 0x403   : > { %15898 = vmatprep.subr.bf16.mxu1 %v22787_v33  ;;  %4283 = vst.msk [vmem:[#allocation2 + $0x280] sm:$0xff] %vm386_vm3, %v4234_v61  ;;  %v3904_v0 = vpop.f32.mrb[166].mxu0  ;;  %v4687_v40 = vld [vmem:[#allocation3 + $0x89] sm:$0xf]  ;;  %v5007_v15 = vld [vmem:[#allocation3 + $0x1a] sm:$0xff]  ;;  %v4581_v21 = vmax.f32 %v4566_v9, %v4570_v48  ;;  %v22829_v48 = vld [vmem:[#allocation53_spill] sm:$0xff] }
 0x404   : > { %v4134_v38 = vadd.f32 %v22817_v30, %v3902_v14  ;;  %v3905_v52 = vadd.f32 %v3904_v0, %v3673_v24  ;;  %v4696_v39 = vpack.c.bf16 %v4687_v40, %v4686_v60  ;;  %v3906_v53 = vpop.f32.mrb[167].mxu0  ;;  %v22824_v61 = vld [vmem:[#allocation26_spill] sm:$0xff]  ;;  %v5215_v30 = vld [vmem:[#allocation3 + $0x4b] sm:$0xff] }
 0x405   : > { %v3689_v1 = vadd.f32 %v19755_v56, %v22824_v61  ;;  %v5217_v9 = vld [vmem:[#allocation3 + $0x5b] sm:$0xff] }
 0x406   : > { %v4235_v16 = vmax.f32 %v4134_v38, 0.0  ;;  %v4137_v36 = vadd.f32 %v22818_v28, %v3905_v52  ;;  %15643 = vmatmul.mubr.msk.bf16.gmra.mrb[220].mxu0 %vm386_vm3, %v4696_v39  ;;  %v18156_v38 = vld [vmem:[%s22725_s3 + $0x70] sm:$0xff]  }
 0x407   : > { %15694 = vmatprep.mubr.msk.bf16.mxu0 %vm18440_vm2, %v22787_v33  ;;  %v22825_v39 = vld [vmem:[#allocation51_spill] sm:$0xff] }
 0x408   : > { %4284 = vst.msk [vmem:[#allocation2 + $0x288] sm:$0xff] %vm386_vm3, %v4235_v16  ;;  %v4236_v32 = vmax.f32 %v4137_v36, 0.0  ;;  %v20021_v16 = vpack.c.bf16 %v5007_v15, %v5006_v19  ;;  %v5214_v36 = vld [vmem:[#allocation3 + $0x43] sm:$0xff]  ;;  %v22830_v15 = vld [vmem:[#allocation54_spill] sm:$0xff] }
 0x409   : > { %15745 = vmatmul.mubr.msk.bf16.gmra.mrb[232].mxu1 %vm386_vm3, %v5226_v18  ;;  %v3909_v5 = vpop.f32.mrb[168].mxu0  ;;  %v5228_v46 = vpack.c.bf16 %v5215_v30, %v5214_v36  ;;  %v5010_v19 = vld [vmem:[#allocation3 + $0x32] sm:$0xff] }
 0x40a   : > { %15748 = vmatprep.mubr.msk.bf16.mxu1 %vm18440_vm2, %v22787_v33  ;;  %4285 = vst.msk [vmem:[#allocation2 + $0x290] sm:$0xff] %vm386_vm3, %v4236_v32  ;;  %v3910_v55 = vadd.f32 %v3909_v5, %v3678_v3  ;;  %v3911_v4 = vpop.f32.mrb[169].mxu0  ;;  %v4568_v18 = vld [vmem:[#allocation2 + $0x278] ss:$2 sm:$0x3f] }
 0x40b   : > { %v3912_v20 = vpop.f32.mrb[170].mxu0  ;;  %v4572_v54 = vld [vmem:[#allocation2 + $0x279] ss:$2 sm:$0x3f] }
 0x40c   : > { %v4142_v7 = vadd.f32 %v22821_v43, %v3910_v55  ;;  %v3913_v45 = vadd.f32 %v3912_v20, %v3681_v34  ;;  %v3914_v49 = vpop.f32.mrb[171].mxu0  ;;  %v22826_v32 = vld [vmem:[#allocation52_spill] sm:$0xff]  ;;  %v22827_v34 = vld [vmem:[#allocation27_spill] sm:$0xff]  ;;  %v4582_v2 = vmax.f32 %v4568_v18, %v4572_v54 }
 0x40d   : > { %v3694_v4 = vadd.f32 %v19755_v56, %v22827_v34  ;;  %v22828_v20 = vld [vmem:[#allocation28_spill] sm:$0xff] }
 0x40e   : > { %v4237_v25 = vmax.f32 %v4142_v7, 0.0  ;;  %15695 = vmatmul.mubr.msk.bf16.vlgmr.msra.gmra.mrb[224].mxu0 %vm386_vm3, %v5022_v57  ;;  %v4145_v50 = vadd.f32 %v22822_v13, %v3913_v45  ;;  %v5009_v7 = vld [vmem:[#allocation3 + $0x2a] sm:$0xff]  ;;  %v3697_v57 = vadd.f32 %v19755_v56, %v22828_v20 }
 0x40f   : > { %v19998_v11 = vpop.f32.mrb[196].mxu1  ;;  %15698 = vmatprep.mubr.msk.bf16.mxu0 %vm18440_vm2, %v22787_v33  ;;  %15773 = vmatpush3.bf16.msra.mxu0 %v18154_v26  ;;  %v5219_v30 = vld [vmem:[#allocation3 + $0x6b] sm:$0xff] }
 0x410   : > { %4286 = vst.msk [vmem:[#allocation2 + $0x298] sm:$0xff] %vm386_vm3, %v4237_v25  ;;  %v15662_v22 = vpop.f32.mrb[197].mxu1  ;;  %15774 = vmatprep.subr.bf16.mxu0 %v22787_v33  ;;  %v4238_v8 = vmax.f32 %v4145_v50, 0.0  ;;  %v22834_v18 = vld [vmem:[#allocation56_spill] sm:$0xff] }
 0x411   : > { %15749 = vmatmul.mubr.msk.bf16.gmra.mrb[236].mxu1 %vm386_vm3, %v5227_v59  ;;  %v4574_v10 = vld [vmem:[#allocation2 + $0x284] ss:$2 sm:$0xff]  ;;  %v4578_v29 = vld [vmem:[#allocation2 + $0x285] ss:$2 sm:$0xff]  ;;  %v3917_v17 = vpop.f32.mrb[172].mxu0  ;;  %v20014_v41 = vpop.f32.mrb[198].mxu1 }
 0x412   : > { %15752 = vmatprep.mubr.msk.bf16.mxu1 %vm18440_vm2, %v22787_v33  ;;  %v4583_v24 = vmax.f32 %v4574_v10, %v4578_v29  ;;  %v3918_v14 = vadd.f32 %v3917_v17, %v3686_v62  ;;  %v3919_v0 = vpop.f32.mrb[173].mxu0  ;;  %4287 = vst.msk [vmem:[#allocation2 + $0x2a0] sm:$0xff] %vm386_vm3, %v4238_v8  ;;  %v15663_v60 = vpop.f32.mrb[199].mxu1  ;;  %v5008_v59 = vld [vmem:[#allocation3 + $0x22] sm:$0xff]  ;;  %v5216_v62 = vld [vmem:[#allocation3 + $0x53] sm:$0xff]  ;;  %v5013_v34 = vld [vmem:[#allocation3 + $0x4a] sm:$0xff] }
 0x413   : > { %v3920_v40 = vpop.f32.mrb[174].mxu0  ;;  %15775 = vmatpush3.bf16.msra.mxu0 %v18155_v51  ;;  %v20042_v51 = vpack.c.bf16 %v5009_v7, %v5008_v59  ;;  %v5229_v10 = vpack.c.bf16 %v5217_v9, %v5216_v62  ;;  %v18371_v29 = vld [vmem:[%s22724_s2] ss:$0 sm:$0xff]  ;;  %v5220_v62 = vld [vmem:[#allocation3 + $0x73] sm:$0xff] }
 0x414   : > { %v4585_v52 = vmax.f32 %v4581_v21, %v4583_v24  ;;  %v4150_v53 = vadd.f32 %v22825_v39, %v3918_v14  ;;  %v3921_v44 = vadd.f32 %v3920_v40, %v3689_v1  ;;  %v3922_v28 = vpop.f32.mrb[175].mxu0  ;;  %15776 = vmatprep.subr.bf16.mxu0 %v22787_v33  ;;  %v22831_v8 = vld [vmem:[#allocation29_spill] sm:$0xff]  ;;  %v5011_v21 = vld [vmem:[#allocation3 + $0x3a] sm:$0xff] }
 0x415   : > { %v3702_v17 = vadd.f32 %v18371_v29, %v22831_v8  ;;  %v22832_v24 = vld [vmem:[#allocation30_spill] sm:$0xff]  ;;  %v5218_v28 = vld [vmem:[#allocation3 + $0x63] sm:$0xff] }
 0x416   : > { %4587 = vst.msk [vmem:[#allocation3 + $0x9a] sm:$0xff] %vm386_vm3, %v4585_v52  ;;  %v4239_v3 = vmax.f32 %v4150_v53, 0.0  ;;  %v4153_v5 = vadd.f32 %v22826_v32, %v3921_v44  ;;  %15699 = vmatmul.mubr.msk.bf16.gmra.mrb[228].mxu0 %vm386_vm3, %v20021_v16  ;;  %v3705_v14 = vadd.f32 %v18371_v29, %v22832_v24  ;;  %v20060_v53 = vpack.c.bf16 %v5011_v21, %v5010_v19  ;;  %v22835_v32 = vld [vmem:[#allocation31_spill] sm:$0xff] }
 0x417   : > { %v4576_v55 = vld [vmem:[#allocation2 + $0x294] ss:$2 sm:$0x3f]  ;;  %v4580_v31 = vld [vmem:[#allocation2 + $0x295] ss:$2 sm:$0x3f]  ;;  %15702 = vmatprep.mubr.msk.bf16.mxu0 %vm18440_vm2, %v22787_v33  ;;  %15777 = vmatpush3.bf16.msra.mxu0 %v18156_v38 }
 0x418   : > { %v4584_v58 = vmax.f32 %v4576_v55, %v4580_v31  ;;  %4288 = vst.msk [vmem:[#allocation2 + $0x2a8] sm:$0xff] %vm386_vm3, %v4239_v3  ;;  %v4240_v26 = vmax.f32 %v4153_v5, 0.0  ;;  %15856 = vmatprep.subr.bf16.mxu0 %v22787_v33  ;;  %v22833_v38 = vld [vmem:[#allocation55_spill] sm:$0xff]  ;;  %v5230_v3 = vpack.c.bf16 %v5219_v30, %v5218_v28  ;;  %v3710_v5 = vadd.f32 %v18371_v29, %v22835_v32 }
 0x419   : > { %15753 = vmatmul.mubr.msk.bf16.gmra.mrb[240].mxu1 %vm386_vm3, %v5228_v46  ;;  %v3925_v43 = vpop.f32.mrb[176].mxu0  ;;  %v5015_v24 = vld [vmem:[#allocation3 + $0x5a] sm:$0xff]  ;;  %v5222_v32 = vld [vmem:[#allocation3 + $0x83] sm:$0xff] }
 0x41a   : > { %15756 = vmatprep.mubr.msk.bf16.mxu1 %vm18440_vm2, %v22787_v33  ;;  %v4586_v45 = vmax.f32 %v4582_v2, %v4584_v58  ;;  %4289 = vst.msk [vmem:[#allocation2 + $0x2b0] sm:$0xff] %vm386_vm3, %v4240_v26  ;;  %v3926_v49 = vadd.f32 %v3925_v43, %v3694_v4  ;;  %v3927_v6 = vpop.f32.mrb[177].mxu0  ;;  %v22836_v4 = vld [vmem:[#allocation32_spill] sm:$0xff] }
 0x41b   : > { %v3928_v25 = vpop.f32.mrb[178].mxu0  ;;  %v3713_v2 = vadd.f32 %v18371_v29, %v22836_v4  ;;  %v22837_v6 = vld [vmem:[#allocation57_spill] sm:$0xff] }
 0x41c   : > { %4588 = vst.msk [vmem:[#allocation3 + $0xa2] sm:$0x3f] %vm4323_vm4, %v4586_v45  ;;  %v4158_v13 = vadd.f32 %v22829_v48, %v3926_v49  ;;  %v3929_v50 = vadd.f32 %v3928_v25, %v3697_v57  ;;  %v3930_v23 = vpop.f32.mrb[179].mxu0  ;;  %v5012_v57 = vld [vmem:[#allocation3 + $0x42] sm:$0xff] }
 0x41d   : > { %v5221_v45 = vld [vmem:[#allocation3 + $0x7b] sm:$0xff]  ;;  %v20079_v48 = vpack.c.bf16 %v5013_v34, %v5012_v57 }
 0x41e   : > { %v4241_v22 = vmax.f32 %v4158_v13, 0.0  ;;  %v4161_v56 = vadd.f32 %v22830_v15, %v3929_v50  ;;  %15703 = vmatmul.mubr.msk.bf16.gmra.mrb[232].mxu0 %vm386_vm3, %v20042_v51  ;;  %v5231_v29 = vpack.c.bf16 %v5221_v45, %v5220_v62  ;;  %v5016_v57 = vld [vmem:[#allocation3 + $0x62] sm:$0xff]  ;;  %v5611_v45 = vld [vmem:[#allocation3 + $0x16] sm:$0xff] }
 0x41f   : > { %15706 = vmatprep.mubr.msk.bf16.mxu0 %vm18440_vm2, %v22787_v33  ;;  %v4590_v49 = vld [vmem:[#allocation2 + $0x2a0] ss:$2 sm:$0xff]  ;;  %v4594_v50 = vld [vmem:[#allocation2 + $0x2a1] ss:$2 sm:$0xff] }
 0x420   : > { %4290 = vst.msk [vmem:[#allocation2 + $0x2b8] sm:$0xff] %vm386_vm3, %v4241_v22  ;;  %v4242_v61 = vmax.f32 %v4161_v56, 0.0  ;;  %v22838_v56 = vld [vmem:[#allocation58_spill] sm:$0xff] }
 0x421   : > { %15757 = vmatmul.mubr.msk.bf16.gmra.mrb[244].mxu1 %vm386_vm3, %v5229_v10  ;;  %v3933_v1 = vpop.f32.mrb[180].mxu0 }
 0x422   : > { %15760 = vmatprep.mubr.msk.bf16.mxu1 %vm18440_vm2, %v22787_v33  ;;  %4291 = vst.msk [vmem:[#allocation2 + $0x2c0] sm:$0xff] %vm386_vm3, %v4242_v61  ;;  %v3934_v0 = vadd.f32 %v3933_v1, %v3702_v17  ;;  %v3935_v60 = vpop.f32.mrb[181].mxu0  ;;  %v4605_v61 = vmax.f32 %v4590_v49, %v4594_v50  ;;  %v5019_v50 = vld [vmem:[#allocation3 + $0x7a] sm:$0xff] }
 0x423   : > { %v3936_v40 = vpop.f32.mrb[182].mxu0 }
 0x424   : > { %v4166_v52 = vadd.f32 %v22833_v38, %v3934_v0  ;;  %v3937_v39 = vadd.f32 %v3936_v40, %v3705_v14  ;;  %v3938_v44 = vpop.f32.mrb[183].mxu0 }
 0x425   : > { %v5223_v44 = vld [vmem:[#allocation3 + $0x8b] sm:$0xf] }
 0x426   : > { %v4243_v36 = vmax.f32 %v4166_v52, 0.0  ;;  %v4169_v54 = vadd.f32 %v22834_v18, %v3937_v39  ;;  %15707 = vmatmul.mubr.msk.bf16.gmra.mrb[236].mxu0 %vm386_vm3, %v20060_v53  ;;  %v5014_v39 = vld [vmem:[#allocation3 + $0x52] sm:$0xff] }
 0x427   : > { %15710 = vmatprep.mubr.msk.bf16.mxu0 %vm18440_vm2, %v22787_v33  ;;  %v4592_v23 = vld [vmem:[#allocation2 + $0x2b0] ss:$2 sm:$0x3f]  ;;  %v4596_v22 = vld [vmem:[#allocation2 + $0x2b1] ss:$2 sm:$0x3f]  ;;  %v20095_v18 = vpack.c.bf16 %v5015_v24, %v5014_v39 }
 0x428   : > { %4292 = vst.msk [vmem:[#allocation2 + $0x2c8] sm:$0xff] %vm386_vm3, %v4243_v36  ;;  %v4244_v46 = vmax.f32 %v4169_v54, 0.0  ;;  %v4606_v60 = vmax.f32 %v4592_v23, %v4596_v22  ;;  %v18158_v23 = vld [vmem:[%s22725_s3 + $0xb0] sm:$0xff]   ;;  %v5021_v24 = vld [vmem:[#allocation3 + $0x8a] sm:$0xf] }
 0x429   : > { %15761 = vmatmul.mubr.msk.bf16.gmra.mrb[248].mxu1 %vm386_vm3, %v5230_v3  ;;  %v3941_v55 = vpop.f32.mrb[184].mxu0  ;;  %v20070_v31 = vpop.f32.mrb[200].mxu1 }
 0x42a   : > { %15764 = vmatprep.mubr.msk.bf16.mxu1 %vm18440_vm2, %v22787_v33  ;;  %4293 = vst.msk [vmem:[#allocation2 + $0x2d0] sm:$0xff] %vm386_vm3, %v4244_v46  ;;  %v3942_v58 = vadd.f32 %v3941_v55, %v3710_v5  ;;  %v3943_v26 = vpop.f32.mrb[185].mxu0  ;;  %v15666_v43 = vpop.f32.mrb[201].mxu1  ;;  %v4622_v5 = vld [vmem:[#allocation2 + $0x2f4] ss:$2 sm:$0xff] }
 0x42b   : > { %v3944_v7 = vpop.f32.mrb[186].mxu0  ;;  %v20076_v20 = vpop.f32.mrb[202].mxu1  ;;  %v4626_v46 = vld [vmem:[#allocation2 + $0x2f5] ss:$2 sm:$0xff] }
 0x42c   : > { %v4174_v25 = vadd.f32 %v22837_v6, %v3942_v58  ;;  %v3945_v59 = vadd.f32 %v3944_v7, %v3713_v2  ;;  %v15667_v9 = vpop.f32.mrb[203].mxu1  ;;  %v3946_v13 = vpop.f32.mrb[187].mxu0  ;;  %v4631_v2 = vmax.f32 %v4622_v5, %v4626_v46 }
 0x42d   : > { %v5610_v9 = vld [vmem:[#allocation3 + $0xe] sm:$0xff]  ;;  %v18157_v13 = vld [vmem:[%s22725_s3 + $0xa8] sm:$0xff]  }
 0x42e   : > { %v4245_v15 = vmax.f32 %v4174_v25, 0.0  ;;  %v4177_v10 = vadd.f32 %v22838_v56, %v3945_v59  ;;  %15711 = vmatmul.mubr.msk.bf16.gmra.mrb[240].mxu0 %vm386_vm3, %v20079_v48  ;;  %v5018_v56 = vld [vmem:[#allocation3 + $0x72] sm:$0xff] }
 0x42f   : > { %v4598_v8 = vld [vmem:[#allocation2 + $0x2bc] ss:$2 sm:$0xff]  ;;  %v4602_v17 = vld [vmem:[#allocation2 + $0x2bd] ss:$2 sm:$0xff]  ;;  %15714 = vmatprep.mubr.msk.bf16.mxu0 %vm18440_vm2, %v22787_v33 }
 0x430   : > { %v4607_v1 = vmax.f32 %v4598_v8, %v4602_v17  ;;  %4294 = vst.msk [vmem:[#allocation2 + $0x2d8] sm:$0xff] %vm386_vm3, %v4245_v15  ;;  %v4246_v21 = vmax.f32 %v4177_v10, 0.0  ;;  %v5613_v10 = vld [vmem:[#allocation3 + $0x26] sm:$0xff]  ;;  %v20137_v17 = vpack.c.bf16 %v5019_v50, %v5018_v56  ;;  %v5620_v56 = vld [vmem:[#allocation3 + $0x5e] sm:$0xff] }
 0x431   : > { %15765 = vmatmul.mubr.msk.bf16.gmra.mrb[252].mxu1 %vm386_vm3, %v5231_v29  ;;  %v4600_v14 = vld [vmem:[#allocation2 + $0x2cc] ss:$2 sm:$0x3f]  ;;  %v4604_v0 = vld [vmem:[#allocation2 + $0x2cd] ss:$2 sm:$0x3f] }
 0x432   : > { %15768 = vmatprep.mubr.msk.bf16.mxu1 %vm18440_vm2, %v22787_v33  ;;  %v4609_v40 = vmax.f32 %v4605_v61, %v4607_v1  ;;  %v4608_v19 = vmax.f32 %v4600_v14, %v4604_v0  ;;  %4295 = vst.msk [vmem:[#allocation2 + $0x2e0] sm:$0xff] %vm386_vm3, %v4246_v21  ;;  %v4783_v30 = vpop.f32.mrb[188].mxu0  ;;  %v5612_v61 = vld [vmem:[#allocation3 + $0x1e] sm:$0xff]  ;;  %v18159_v1 = vld [vmem:[%s22725_s3 + $0xb8] sm:$0xff]  }
 0x433   : > { %v20092_v38 = vadd.f32 %v19893_v37, %v4783_v30  ;;  %v15612_v52 = vpop.f32.mrb[189].mxu0  ;;  %v5232_v37 = vpack.c.bf16 %v5223_v44, %v5222_v32  ;;  %v20154_v30 = vld [vmem:[#allocation3 + $0x82] sm:$0xff]  ;;  %v5413_v50 = vld [vmem:[#allocation3 + $0x2c] sm:$0xff] }
 0x434   : > { %4611 = vst.msk [vmem:[#allocation3 + $0xa8] sm:$0xff] %vm386_vm3, %v4609_v40  ;;  %v4610_v28 = vmax.f32 %v4606_v60, %v4608_v19  ;;  %v4786_v36 = vpop.f32.mrb[190].mxu0  ;;  %v5615_v52 = vld [vmem:[#allocation3 + $0x36] sm:$0xff] }
 0x435   : > { %v20098_v54 = vadd.f32 %v19900_v47, %v4786_v36  ;;  %v15613_v3 = vpop.f32.mrb[191].mxu0  ;;  %v5017_v47 = vld [vmem:[#allocation3 + $0x6a] sm:$0xff]  ;;  %v5030_v36 = vpack.c.bf16 %v5021_v24, %v20154_v30  ;;  %v5415_v24 = vld [vmem:[#allocation3 + $0x3c] sm:$0xff] }
 0x436   : > { %4612 = vst.msk [vmem:[#allocation3 + $0xb0] sm:$0x3f] %vm4323_vm4, %v4610_v28  ;;  %15715 = vmatmul.mubr.msk.bf16.gmra.mrb[244].mxu0 %vm386_vm3, %v20095_v18  ;;  %v20114_v59 = vpack.c.bf16 %v5017_v47, %v5016_v57  ;;  %v5614_v3 = vld [vmem:[#allocation3 + $0x2e] sm:$0xff] }
 0x437   : > { %15718 = vmatprep.mubr.msk.bf16.mxu0 %vm18440_vm2, %v22787_v33  ;;  %v18161_v57 = vld [vmem:[%s22725_s3 + $0x98] sm:$0xff]  }
 0x439   : > { %15769 = vmatmul.mubr.msk.bf16.gmra.mrb[0].mxu1 %vm386_vm3, %v5232_v37  ;;  %v4614_v55 = vld [vmem:[#allocation2 + $0x2d8] ss:$2 sm:$0xff]  ;;  %v4618_v34 = vld [vmem:[#allocation2 + $0x2d9] ss:$2 sm:$0xff]  ;;  %v4791_v4 = vpop.f32.mrb[192].mxu0 }
 0x43a   : > { %15820 = vmatprep.mubr.msk.bf16.mxu1 %vm18440_vm2, %v22787_v33  ;;  %v4629_v58 = vmax.f32 %v4614_v55, %v4618_v34  ;;  %v20109_v26 = vadd.f32 %v19933_v12, %v4791_v4  ;;  %v15616_v43 = vpop.f32.mrb[193].mxu0  ;;  %v5628_v12 = vpack.c.bf16 %v5611_v45, %v5610_v9  ;;  %v5409_v37 = vld [vmem:[#allocation3 + $0xc] sm:$0xff]  ;;  %v5408_v55 = vld [vmem:[#allocation3 + $0x4] sm:$0xff]  ;;  %v5410_v45 = vld [vmem:[#allocation3 + $0x14] sm:$0xff] }
 0x43b   : > { %v4794_v7 = vpop.f32.mrb[194].mxu0  ;;  %v5617_v34 = vld [vmem:[#allocation3 + $0x46] sm:$0xff]  ;;  %v5616_v43 = vld [vmem:[#allocation3 + $0x3e] sm:$0xff] }
 0x43c   : > { %v4633_v49 = vmax.f32 %v4629_v58, %v4631_v2  ;;  %v20112_v6 = vadd.f32 %v19940_v63, %v4794_v7  ;;  %v15617_v25 = vpop.f32.mrb[195].mxu0  ;;  %v18160_v4 = vld [vmem:[%s22725_s3 + $0x90] sm:$0xff]   ;;  %v5426_v58 = vpack.c.bf16 %v5409_v37, %v5408_v55  ;;  %v5631_v7 = vpack.c.bf16 %v5617_v34, %v5616_v43 }
 0x43d   : > { %v18162_v25 = vld [vmem:[%s22725_s3 + $0xa0] sm:$0xff]   ;;  %v18372_v9 = vld [vmem:[#allocation3 + $0x1c] sm:$0xff]  ;;  %v5625_v37 = vld [vmem:[#allocation3 + $0x86] sm:$0xff] }
 0x43e   : > { %4635 = vst.msk [vmem:[#allocation3 + $0xb6] sm:$0xff] %vm386_vm3, %v4633_v49  ;;  %15719 = vmatmul.mubr.msk.bf16.gmra.mrb[248].mxu0 %vm386_vm3, %v20114_v59  ;;  %v5619_v49 = vld [vmem:[#allocation3 + $0x56] sm:$0xff] }
 0x43f   : > { %15722 = vmatprep.mubr.msk.bf16.mxu0 %vm18440_vm2, %v22787_v33  ;;  %v5419_v34 = vld [vmem:[#allocation3 + $0x5c] sm:$0xff] }
 0x441   : > { %15821 = vmatmul.mubr.msk.bf16.vlgmr.msra.gmra.mrb[4].mxu1 %vm386_vm3, %v5628_v12  ;;  %v4799_v63 = vpop.f32.mrb[196].mxu0  ;;  %v5618_v12 = vld [vmem:[#allocation3 + $0x4e] sm:$0xff] }
 0x442   : > { %15824 = vmatprep.mubr.msk.bf16.mxu1 %vm18440_vm2, %v22787_v33  ;;  %15899 = vmatpush3.bf16.msra.mxu1 %v18157_v13  ;;  %v20131_v62 = vadd.f32 %v19998_v11, %v4799_v63  ;;  %v15620_v22 = vpop.f32.mrb[197].mxu0  ;;  %v5629_v11 = vpack.c.bf16 %v5613_v10, %v5612_v61  ;;  %v5427_v13 = vpack.c.bf16 %v18372_v9, %v5410_v45  ;;  %v5420_v45 = vld [vmem:[#allocation3 + $0x64] sm:$0xff]  ;;  %v6014_v9 = vld [vmem:[#allocation3 + $0x10] sm:$0xff] }
 0x443   : > { %15900 = vmatprep.subr.bf16.mxu1 %v22787_v33  ;;  %v4802_v15 = vpop.f32.mrb[198].mxu0  ;;  %v5632_v63 = vpack.c.bf16 %v5619_v49, %v5618_v12  ;;  %v18373_v22 = vld [vmem:[#allocation3 + $0x24] sm:$0xff]  ;;  %v6015_v49 = vld [vmem:[#allocation3 + $0x18] sm:$0xff] }
 0x444   : > { %v20135_v29 = vadd.f32 %v20014_v41, %v4802_v15  ;;  %v15621_v8 = vpop.f32.mrb[199].mxu0  ;;  %v5428_v15 = vpack.c.bf16 %v5413_v50, %v18373_v22  ;;  %v6032_v12 = vpack.c.bf16 %v6015_v49, %v6014_v9  ;;  %v18164_v50 = vld [vmem:[%s22725_s3 + $0xe0] sm:$0xff]   ;;  %v18168_v49 = vld [vmem:[%s22725_s3 + $0xd0] sm:$0xff]  }
 0x446   : > { %15901 = vmatpush3.bf16.msra.mxu1 %v18158_v23  ;;  %15723 = vmatmul.mubr.msk.bf16.gmra.mrb[252].mxu0 %vm386_vm3, %v20137_v17  ;;  %v5621_v23 = vld [vmem:[#allocation3 + $0x66] sm:$0xff] }
 0x447   : > { %15902 = vmatprep.subr.bf16.mxu1 %v22787_v33  ;;  %15726 = vmatprep.mubr.msk.bf16.mxu0 %vm18440_vm2, %v22787_v33  ;;  %v5633_v10 = vpack.c.bf16 %v5621_v23, %v5620_v56  ;;  %v6017_v56 = vld [vmem:[#allocation3 + $0x28] sm:$0xff] }
 0x449   : > { %15825 = vmatmul.mubr.msk.bf16.gmra.mrb[8].mxu1 %vm386_vm3, %v5629_v11  ;;  %v4807_v41 = vpop.f32.mrb[200].mxu0  ;;  %v4965_v21 = vpop.f32.mrb[204].mxu1 }
 0x44a   : > { %15828 = vmatprep.mubr.msk.bf16.mxu1 %vm18440_vm2, %v22787_v33  ;;  %15903 = vmatpush3.bf16.msra.mxu1 %v18159_v1  ;;  %v20151_v14 = vadd.f32 %v20070_v31, %v4807_v41  ;;  %v15624_v0 = vpop.f32.mrb[201].mxu0  ;;  %v15670_v60 = vpop.f32.mrb[205].mxu1  ;;  %v5630_v31 = vpack.c.bf16 %v5615_v52, %v5614_v3  ;;  %v20204_v52 = vld [vmem:[#allocation3 + $0x34] sm:$0xff] }
 0x44b   : > { %15982 = vmatprep.subr.bf16.mxu1 %v22787_v33  ;;  %v4810_v40 = vpop.f32.mrb[202].mxu0  ;;  %v4968_v19 = vpop.f32.mrb[206].mxu1 }
 0x44c   : > { %v20157_v39 = vadd.f32 %v20076_v20, %v4810_v40  ;;  %v15625_v44 = vpop.f32.mrb[203].mxu0  ;;  %v15671_v28 = vpop.f32.mrb[207].mxu1 }
 0x44d   : > { %v5623_v44 = vld [vmem:[#allocation3 + $0x76] sm:$0xff]  ;;  %v5429_v28 = vpack.c.bf16 %v5415_v24, %v20204_v52  ;;  %v5425_v24 = vld [vmem:[#allocation3 + $0x8c] sm:$0xf] }
 0x44e   : > { %15727 = vmatmul.mubr.msk.bf16.gmra.mrb[0].mxu0 %vm386_vm3, %v5030_v36  ;;  %v5622_v36 = vld [vmem:[#allocation3 + $0x6e] sm:$0xff] }
 0x44f   : > { %15778 = vmatprep.mubr.msk.bf16.mxu0 %vm18440_vm2, %v22787_v33  ;;  %v5634_v3 = vpack.c.bf16 %v5623_v44, %v5622_v36  ;;  %v6018_v44 = vld [vmem:[#allocation3 + $0x30] sm:$0xff] }
 0x450   : > { %v5813_v36 = vld [vmem:[#allocation3 + $0x17] sm:$0xff] }
 0x451   : > { %15829 = vmatmul.mubr.msk.bf16.gmra.mrb[12].mxu1 %vm386_vm3, %v5630_v31  ;;  %v4815_v32 = vpop.f32.mrb[204].mxu0  ;;  %v5417_v31 = vld [vmem:[#allocation3 + $0x4c] sm:$0xff] }
 0x452   : > { %15832 = vmatprep.mubr.msk.bf16.mxu1 %vm18440_vm2, %v22787_v33  ;;  %v20166_v20 = vadd.f32 %v4965_v21, %v4815_v32  ;;  %v15628_v5 = vpop.f32.mrb[205].mxu0  ;;  %v20213_v32 = vld [vmem:[#allocation3 + $0x44] sm:$0xff] }
 0x453   : > { %v4818_v46 = vpop.f32.mrb[206].mxu0  ;;  %v5430_v5 = vpack.c.bf16 %v5417_v31, %v20213_v32  ;;  %v6021_v31 = vld [vmem:[#allocation3 + $0x48] sm:$0xff] }
 0x454   : > { %v20171_v47 = vadd.f32 %v4968_v19, %v4818_v46  ;;  %v15629_v2 = vpop.f32.mrb[207].mxu0  ;;  %v5624_v46 = vld [vmem:[#allocation3 + $0x7e] sm:$0xff] }
 0x455   : > { %v5635_v55 = vpack.c.bf16 %v5625_v37, %v5624_v46  ;;  %v5626_v2 = vld [vmem:[#allocation3 + $0x8e] sm:$0xff]  ;;  %v6020_v46 = vld [vmem:[#allocation3 + $0x40] sm:$0xff] }
 0x456   : > { %15779 = vmatmul.mubr.msk.bf16.vlgmr.msra.gmra.mrb[4].mxu0 %vm386_vm3, %v5426_v58  ;;  %v5627_v58 = vld [vmem:[#allocation3 + $0x96] sm:$0xf] }
 0x457   : > { %15782 = vmatprep.mubr.msk.bf16.mxu0 %vm18440_vm2, %v22787_v33  ;;  %15857 = vmatpush3.bf16.msra.mxu0 %v18160_v4  ;;  %v5418_v4 = vld [vmem:[#allocation3 + $0x54] sm:$0xff] }
 0x458   : > { %15858 = vmatprep.subr.bf16.mxu0 %v22787_v33  ;;  %v5431_v43 = vpack.c.bf16 %v5419_v34, %v5418_v4  ;;  %v18166_v37 = vld [vmem:[%s22725_s3 + $0xc0] sm:$0xff]   ;;  %v18167_v34 = vld [vmem:[%s22725_s3 + $0xc8] sm:$0xff]  }
 0x459   : > { %15833 = vmatmul.mubr.msk.bf16.gmra.mrb[16].mxu1 %vm386_vm3, %v5631_v7  ;;  %v5636_v7 = vpack.c.bf16 %v5627_v58, %v5626_v2  ;;  %v5815_v2 = vld [vmem:[#allocation3 + $0x27] sm:$0xff] }
 0x45a   : > { %15836 = vmatprep.mubr.msk.bf16.mxu1 %vm18440_vm2, %v22787_v33 }
 0x45b   : > { %15859 = vmatpush3.bf16.msra.mxu0 %v18161_v57  ;;  %v5421_v57 = vld [vmem:[#allocation3 + $0x6c] sm:$0xff] }
 0x45c   : > { %15860 = vmatprep.subr.bf16.mxu0 %v22787_v33 }
 0x45e   : > { %15783 = vmatmul.mubr.msk.bf16.gmra.mrb[8].mxu0 %vm386_vm3, %v5427_v13  ;;  %v18163_v13 = vld [vmem:[%s22725_s3 + $0xd8] sm:$0xff]  }
 0x45f   : > { %15786 = vmatprep.mubr.msk.bf16.mxu0 %vm18440_vm2, %v22787_v33  ;;  %15861 = vmatpush3.bf16.msra.mxu0 %v18162_v25  ;;  %v5432_v25 = vpack.c.bf16 %v5421_v57, %v5420_v45  ;;  %v5814_v57 = vld [vmem:[#allocation3 + $0x1f] sm:$0xff] }
 0x460   : > { %15940 = vmatprep.subr.bf16.mxu0 %v22787_v33  ;;  %v6023_v45 = vld [vmem:[#allocation3 + $0x58] sm:$0xff] }
 0x461   : > { %15837 = vmatmul.mubr.msk.bf16.gmra.mrb[20].mxu1 %vm386_vm3, %v5632_v63  ;;  %v5423_v63 = vld [vmem:[#allocation3 + $0x7c] sm:$0xff] }
 0x462   : > { %15840 = vmatprep.mubr.msk.bf16.mxu1 %vm18440_vm2, %v22787_v33 }
 0x466   : > { %15787 = vmatmul.mubr.msk.bf16.gmra.mrb[12].mxu0 %vm386_vm3, %v5428_v15  ;;  %v5422_v15 = vld [vmem:[#allocation3 + $0x74] sm:$0xff] }
 0x467   : > { %v4823_v8 = vpop.f32.mrb[208].mxu0  ;;  %15790 = vmatprep.mubr.msk.bf16.mxu0 %vm18440_vm2, %v22787_v33 }
 0x468   : > { %v4973_v61 = vpop.f32.mrb[208].mxu1  ;;  %v15632_v1 = vpop.f32.mrb[209].mxu0 }
 0x469   : > { %15841 = vmatmul.mubr.msk.bf16.gmra.mrb[24].mxu1 %vm386_vm3, %v5633_v10  ;;  %v20198_v11 = vadd.f32 %v4973_v61, %v4823_v8  ;;  %v15674_v41 = vpop.f32.mrb[209].mxu1  ;;  %v4826_v21 = vpop.f32.mrb[210].mxu0  ;;  %v5433_v8 = vpack.c.bf16 %v5423_v63, %v5422_v15  ;;  %v6016_v1 = vld [vmem:[#allocation3 + $0x20] sm:$0xff] }
 0x46a   : > { %15844 = vmatprep.mubr.msk.bf16.mxu1 %vm18440_vm2, %v22787_v33  ;;  %v4976_v0 = vpop.f32.mrb[210].mxu1  ;;  %v15633_v60 = vpop.f32.mrb[211].mxu0  ;;  %v18165_v41 = vld [vmem:[%s22725_s3 + $0xe8] sm:$0xff]  }
 0x46b   : > { %v20202_v40 = vadd.f32 %v4976_v0, %v4826_v21  ;;  %v15675_v19 = vpop.f32.mrb[211].mxu1  ;;  %v6033_v21 = vpack.c.bf16 %v6017_v56, %v6016_v1  ;;  %v5424_v0 = vld [vmem:[#allocation3 + $0x84] sm:$0xff]  ;;  %v6019_v60 = vld [vmem:[#allocation3 + $0x38] sm:$0xff] }
 0x46c   : > { %v5434_v19 = vpack.c.bf16 %v5425_v24, %v5424_v0  ;;  %v6024_v56 = vld [vmem:[#allocation3 + $0x60] sm:$0xff]  ;;  %v6027_v1 = vld [vmem:[#allocation3 + $0x78] sm:$0xff] }
 0x46d   : > { %v5821_v0 = vld [vmem:[#allocation3 + $0x57] sm:$0xff] }
 0x46e   : > { %15791 = vmatmul.mubr.msk.bf16.gmra.mrb[16].mxu0 %vm386_vm3, %v5429_v28  ;;  %v6034_v28 = vpack.c.bf16 %v6019_v60, %v6018_v44  ;;  %v5820_v44 = vld [vmem:[#allocation3 + $0x4f] sm:$0xff] }
 0x46f   : > { %15794 = vmatprep.mubr.msk.bf16.mxu0 %vm18440_vm2, %v22787_v33 }
 0x471   : > { %15845 = vmatmul.mubr.msk.bf16.gmra.mrb[28].mxu1 %vm386_vm3, %v5634_v3  ;;  %v5812_v3 = vld [vmem:[#allocation3 + $0xf] sm:$0xff] }
 0x472   : > { %15848 = vmatprep.mubr.msk.bf16.mxu1 %vm18440_vm2, %v22787_v33 }
 0x476   : > { %15795 = vmatmul.mubr.msk.bf16.gmra.mrb[20].mxu0 %vm386_vm3, %v5430_v5  ;;  %v5830_v5 = vpack.c.bf16 %v5813_v36, %v5812_v3 }
 0x477   : > { %15798 = vmatprep.mubr.msk.bf16.mxu0 %vm18440_vm2, %v22787_v33 }
 0x479   : > { %15849 = vmatmul.mubr.msk.bf16.gmra.mrb[32].mxu1 %vm386_vm3, %v5635_v55  ;;  %v6035_v55 = vpack.c.bf16 %v6021_v31, %v6020_v46 }
 0x47a   : > { %15852 = vmatprep.mubr.msk.bf16.mxu1 %vm18440_vm2, %v22787_v33 }
 0x47e   : > { %15799 = vmatmul.mubr.msk.bf16.gmra.mrb[24].mxu0 %vm386_vm3, %v5431_v43 }
 0x47f   : > { %15802 = vmatprep.mubr.msk.bf16.mxu0 %vm18440_vm2, %v22787_v33 }
 0x481   : > { %15853 = vmatmul.mubr.msk.bf16.gmra.mrb[36].mxu1 %vm386_vm3, %v5636_v7 }
 0x482   : > { %15904 = vmatprep.mubr.msk.bf16.mxu1 %vm18440_vm2, %v22787_v33 }
 0x486   : > { %15803 = vmatmul.mubr.msk.bf16.gmra.mrb[28].mxu0 %vm386_vm3, %v5432_v25 }
 0x487   : > { %15806 = vmatprep.mubr.msk.bf16.mxu0 %vm18440_vm2, %v22787_v33 }
 0x489   : > { %15905 = vmatmul.mubr.msk.bf16.vlgmr.msra.gmra.mrb[40].mxu1 %vm386_vm3, %v6032_v12  ;;  %v4981_v23 = vpop.f32.mrb[212].mxu1  ;;  %v6022_v12 = vld [vmem:[#allocation3 + $0x50] sm:$0xff] }
 0x48a   : > { %15908 = vmatprep.mubr.msk.bf16.mxu1 %vm18440_vm2, %v22787_v33  ;;  %15983 = vmatpush3.bf16.msra.mxu1 %v18163_v13  ;;  %v15678_v22 = vpop.f32.mrb[213].mxu1  ;;  %v5831_v13 = vpack.c.bf16 %v5815_v2, %v5814_v57  ;;  %v6036_v63 = vpack.c.bf16 %v6023_v45, %v6022_v12  ;;  %v5822_v45 = vld [vmem:[#allocation3 + $0x5f] sm:$0xff] }
 0x48b   : > { %15984 = vmatprep.subr.bf16.mxu1 %v22787_v33  ;;  %v4984_v10 = vpop.f32.mrb[214].mxu1  ;;  %v6025_v22 = vld [vmem:[#allocation3 + $0x68] sm:$0xff] }
 0x48c   : > { %v15679_v61 = vpop.f32.mrb[215].mxu1 }
 0x48d   : > { %v5818_v61 = vld [vmem:[#allocation3 + $0x3f] sm:$0xff] }
 0x48e   : > { %15985 = vmatpush3.bf16.msra.mxu1 %v18164_v50  ;;  %15807 = vmatmul.mubr.msk.bf16.gmra.mrb[32].mxu0 %vm386_vm3, %v5433_v8  ;;  %v5817_v50 = vld [vmem:[#allocation3 + $0x37] sm:$0xff]  ;;  %v5819_v8 = vld [vmem:[#allocation3 + $0x47] sm:$0xff] }
 0x48f   : > { %15986 = vmatprep.subr.bf16.mxu1 %v22787_v33  ;;  %15810 = vmatprep.mubr.msk.bf16.mxu0 %vm18440_vm2, %v22787_v33 }
 0x491   : > { %15909 = vmatmul.mubr.msk.bf16.gmra.mrb[44].mxu1 %vm386_vm3, %v6033_v21  ;;  %v6026_v21 = vld [vmem:[#allocation3 + $0x70] sm:$0xff] }
 0x492   : > { %15912 = vmatprep.mubr.msk.bf16.mxu1 %vm18440_vm2, %v22787_v33  ;;  %15987 = vmatpush3.bf16.msra.mxu1 %v18165_v41  ;;  %v5833_v41 = vpack.c.bf16 %v5819_v8, %v5818_v61  ;;  %v6038_v24 = vpack.c.bf16 %v6027_v1, %v6026_v21  ;;  %v18169_v1 = vld [vmem:[%s22725_s3 + $0x108] sm:$0xff]   ;;  %v5827_v21 = vld [vmem:[#allocation3 + $0x87] sm:$0xff] }
 0x493   : > { %16066 = vmatprep.subr.bf16.mxu1 %v22787_v33 }
 0x496   : > { %15811 = vmatmul.mubr.msk.bf16.gmra.mrb[36].mxu0 %vm386_vm3, %v5434_v19 }
 0x497   : > { %15862 = vmatprep.mubr.msk.bf16.mxu0 %vm18440_vm2, %v22787_v33 }
 0x499   : > { %15913 = vmatmul.mubr.msk.bf16.gmra.mrb[48].mxu1 %vm386_vm3, %v6034_v28  ;;  %v6029_v28 = vld [vmem:[#allocation3 + $0x88] sm:$0xff] }
 0x49a   : > { %15916 = vmatprep.mubr.msk.bf16.mxu1 %vm18440_vm2, %v22787_v33 }
 0x49e   : > { %15863 = vmatmul.mubr.msk.bf16.vlgmr.msra.gmra.mrb[40].mxu0 %vm386_vm3, %v5830_v5 }
 0x49f   : > { %15866 = vmatprep.mubr.msk.bf16.mxu0 %vm18440_vm2, %v22787_v33  ;;  %15941 = vmatpush3.bf16.msra.mxu0 %v18166_v37  ;;  %v5834_v37 = vpack.c.bf16 %v5821_v0, %v5820_v44 }
 0x4a0   : > { %15942 = vmatprep.subr.bf16.mxu0 %v22787_v33 }
 0x4a1   : > { %15917 = vmatmul.mubr.msk.bf16.gmra.mrb[52].mxu1 %vm386_vm3, %v6035_v55  ;;  %v4831_v4 = vpop.f32.mrb[212].mxu0  ;;  %v6028_v55 = vld [vmem:[#allocation3 + $0x80] sm:$0xff] }
 0x4a2   : > { %15920 = vmatprep.mubr.msk.bf16.mxu1 %vm18440_vm2, %v22787_v33  ;;  %v20271_v58 = vadd.f32 %v4981_v23, %v4831_v4  ;;  %v15636_v43 = vpop.f32.mrb[213].mxu0  ;;  %v5816_v23 = vld [vmem:[#allocation3 + $0x2f] sm:$0xff] }
 0x4a3   : > { %v4834_v7 = vpop.f32.mrb[214].mxu0  ;;  %15943 = vmatpush3.bf16.msra.mxu0 %v18167_v34  ;;  %v5832_v15 = vpack.c.bf16 %v5817_v50, %v5816_v23  ;;  %v6039_v43 = vpack.c.bf16 %v6029_v28, %v6028_v55 }
 0x4a4   : > { %v20276_v25 = vadd.f32 %v4984_v10, %v4834_v7  ;;  %v15637_v9 = vpop.f32.mrb[215].mxu0  ;;  %15944 = vmatprep.subr.bf16.mxu0 %v22787_v33  ;;  %v6037_v10 = vpack.c.bf16 %v6025_v22, %v6024_v56  ;;  %v5823_v7 = vld [vmem:[#allocation3 + $0x67] sm:$0xff]  ;;  %v5825_v22 = vld [vmem:[#allocation3 + $0x77] sm:$0xff]  ;;  %v5824_v56 = vld [vmem:[#allocation3 + $0x6f] sm:$0xff] }
 0x4a5   : > { %v5836_v8 = vpack.c.bf16 %v5825_v22, %v5824_v56  ;;  %v18172_v22 = vld [vmem:[%s22725_s3 + $0xf0] sm:$0xff]  }
 0x4a6   : > { %15867 = vmatmul.mubr.msk.bf16.gmra.mrb[44].mxu0 %vm386_vm3, %v5831_v13  ;;  %v5835_v13 = vpack.c.bf16 %v5823_v7, %v5822_v45 }
 0x4a7   : > { %15870 = vmatprep.mubr.msk.bf16.mxu0 %vm18440_vm2, %v22787_v33  ;;  %15945 = vmatpush3.bf16.msra.mxu0 %v18168_v49  ;;  %v6031_v49 = vld [vmem:[#allocation3 + $0x98] sm:$0xf] }
 0x4a8   : > { %16024 = vmatprep.subr.bf16.mxu0 %v22787_v33 }
 0x4a9   : > { %15921 = vmatmul.mubr.msk.bf16.gmra.mrb[56].mxu1 %vm386_vm3, %v6036_v63  ;;  %v6030_v63 = vld [vmem:[#allocation3 + $0x90] sm:$0xff] }
 0x4aa   : > { %15924 = vmatprep.mubr.msk.bf16.mxu1 %vm18440_vm2, %v22787_v33  ;;  %v6040_v23 = vpack.c.bf16 %v6031_v49, %v6030_v63 }
 0x4ae   : > { %15871 = vmatmul.mubr.msk.bf16.gmra.mrb[48].mxu0 %vm386_vm3, %v5832_v15 }
 0x4af   : > { %15874 = vmatprep.mubr.msk.bf16.mxu0 %vm18440_vm2, %v22787_v33 }
 0x4b1   : > { %15925 = vmatmul.mubr.msk.bf16.gmra.mrb[60].mxu1 %vm386_vm3, %v6037_v10 }
 0x4b2   : > { %15928 = vmatprep.mubr.msk.bf16.mxu1 %vm18440_vm2, %v22787_v33 }
 0x4b6   : > { %15875 = vmatmul.mubr.msk.bf16.gmra.mrb[52].mxu0 %vm386_vm3, %v5833_v41 }
 0x4b7   : > { %15878 = vmatprep.mubr.msk.bf16.mxu0 %vm18440_vm2, %v22787_v33 }
 0x4b9   : > { %15929 = vmatmul.mubr.msk.bf16.gmra.mrb[64].mxu1 %vm386_vm3, %v6038_v24  ;;  %v18170_v24 = vld [vmem:[%s22725_s3 + $0x110] sm:$0xff]  }
 0x4ba   : > { %15932 = vmatprep.mubr.msk.bf16.mxu1 %vm18440_vm2, %v22787_v33 }
 0x4bb   : > { %v4839_v60 = vpop.f32.mrb[216].mxu0 }
 0x4bc   : > { %v4989_v19 = vpop.f32.mrb[216].mxu1  ;;  %v15640_v3 = vpop.f32.mrb[217].mxu0 }
 0x4bd   : > { %v20298_v36 = vadd.f32 %v4989_v19, %v4839_v60  ;;  %v15682_v31 = vpop.f32.mrb[217].mxu1  ;;  %v4842_v5 = vpop.f32.mrb[218].mxu0  ;;  %v5826_v60 = vld [vmem:[#allocation3 + $0x7f] sm:$0xff] }
 0x4be   : > { %v4992_v46 = vpop.f32.mrb[218].mxu1  ;;  %v15641_v4 = vpop.f32.mrb[219].mxu0  ;;  %15879 = vmatmul.mubr.msk.bf16.gmra.mrb[56].mxu0 %vm386_vm3, %v5834_v37  ;;  %v5837_v44 = vpack.c.bf16 %v5827_v21, %v5826_v60  ;;  %v5829_v37 = vld [vmem:[#allocation3 + $0x97] sm:$0xf] }
 0x4bf   : > { %v20300_v34 = vadd.f32 %v4992_v46, %v4842_v5  ;;  %v15683_v2 = vpop.f32.mrb[219].mxu1  ;;  %15882 = vmatprep.mubr.msk.bf16.mxu0 %vm18440_vm2, %v22787_v33 }
 0x4c0   : > { %v5828_v2 = vld [vmem:[#allocation3 + $0x8f] sm:$0xff] }
 0x4c1   : > { %15933 = vmatmul.mubr.msk.bf16.gmra.mrb[68].mxu1 %vm386_vm3, %v6039_v43  ;;  %v5838_v45 = vpack.c.bf16 %v5829_v37, %v5828_v2 }
 0x4c2   : > { %15936 = vmatprep.mubr.msk.bf16.mxu1 %vm18440_vm2, %v22787_v33 }
 0x4c4   : > { %v4997_v57 = vpop.f32.mrb[220].mxu1 }
 0x4c5   : > { %v15686_v9 = vpop.f32.mrb[221].mxu1 }
 0x4c6   : > { %v5000_v12 = vpop.f32.mrb[222].mxu1  ;;  %15883 = vmatmul.mubr.msk.bf16.gmra.mrb[60].mxu0 %vm386_vm3, %v5835_v13  ;;  %v6217_v9 = vld [vmem:[#allocation3 + $0x19] sm:$0xff] }
 0x4c7   : > { %v15687_v50 = vpop.f32.mrb[223].mxu1  ;;  %15886 = vmatprep.mubr.msk.bf16.mxu0 %vm18440_vm2, %v22787_v33 }
 0x4c9   : > { %15937 = vmatmul.mubr.msk.bf16.gmra.mrb[72].mxu1 %vm386_vm3, %v6040_v23  ;;  %v6216_v23 = vld [vmem:[#allocation3 + $0x11] sm:$0xff] }
 0x4ca   : > { %15988 = vmatprep.mubr.msk.bf16.mxu1 %vm18440_vm2, %v22787_v33 }
 0x4cc   : > { %v5319_v15 = vpop.f32.mrb[224].mxu1 }
 0x4cd   : > { %v15738_v10 = vpop.f32.mrb[225].mxu1 }
 0x4ce   : > { %v5322_v61 = vpop.f32.mrb[226].mxu1  ;;  %15887 = vmatmul.mubr.msk.bf16.gmra.mrb[64].mxu0 %vm386_vm3, %v5836_v8  ;;  %v6234_v8 = vpack.c.bf16 %v6217_v9, %v6216_v23 }
 0x4cf   : > { %v15739_v41 = vpop.f32.mrb[227].mxu1  ;;  %15890 = vmatprep.mubr.msk.bf16.mxu0 %vm18440_vm2, %v22787_v33 }
 0x4d1   : > { %15989 = vmatmul.mubr.msk.bf16.vlgmr.msra.gmra.mrb[76].mxu1 %vm386_vm3, %v20021_v16  ;;  %v18171_v16 = vld [vmem:[%s22725_s3 + $0x118] sm:$0xff]  }
 0x4d2   : > { %15992 = vmatprep.mubr.msk.bf16.mxu1 %vm18440_vm2, %v22787_v33  ;;  %16067 = vmatpush3.bf16.msra.mxu1 %v18169_v1 }
 0x4d3   : > { %16068 = vmatprep.subr.bf16.mxu1 %v22787_v33 }
 0x4d4   : > { %v20328_v0 = vpop.f32.mrb[228].mxu1 }
 0x4d5   : > { %v15742_v19 = vpop.f32.mrb[229].mxu1 }
 0x4d6   : > { %v20330_v28 = vpop.f32.mrb[230].mxu1  ;;  %16069 = vmatpush3.bf16.msra.mxu1 %v18170_v24  ;;  %15891 = vmatmul.mubr.msk.bf16.gmra.mrb[68].mxu0 %vm386_vm3, %v5837_v44  ;;  %v6219_v24 = vld [vmem:[#allocation3 + $0x29] sm:$0xff] }
 0x4d7   : > { %v15743_v3 = vpop.f32.mrb[231].mxu1  ;;  %16070 = vmatprep.subr.bf16.mxu1 %v22787_v33  ;;  %15894 = vmatprep.mubr.msk.bf16.mxu0 %vm18440_vm2, %v22787_v33 }
 0x4d8   : > { %v18174_v3 = vld [vmem:[%s22725_s3 + $0x100] sm:$0xff]  }
 0x4d9   : > { %15993 = vmatmul.mubr.msk.bf16.gmra.mrb[80].mxu1 %vm386_vm3, %v20042_v51  ;;  %v4847_v31 = vpop.f32.mrb[220].mxu0 }
 0x4da   : > { %15996 = vmatprep.mubr.msk.bf16.mxu1 %vm18440_vm2, %v22787_v33  ;;  %16071 = vmatpush3.bf16.msra.mxu1 %v18171_v16  ;;  %v20343_v5 = vadd.f32 %v4997_v57, %v4847_v31  ;;  %v15644_v46 = vpop.f32.mrb[221].mxu0  ;;  %v6218_v16 = vld [vmem:[#allocation3 + $0x21] sm:$0xff] }
 0x4db   : > { %16150 = vmatprep.subr.bf16.mxu1 %v22787_v33  ;;  %v4850_v55 = vpop.f32.mrb[222].mxu0  ;;  %v6235_v46 = vpack.c.bf16 %v6219_v24, %v6218_v16 }
 0x4dc   : > { %v20346_v4 = vpop.f32.mrb[232].mxu1  ;;  %v15645_v43 = vpop.f32.mrb[223].mxu0 }
 0x4dd   : > { %v15746_v7 = vpop.f32.mrb[233].mxu1 }
 0x4de   : > { %v20348_v49 = vpop.f32.mrb[234].mxu1  ;;  %15895 = vmatmul.mubr.msk.bf16.gmra.mrb[72].mxu0 %vm386_vm3, %v5838_v45 }
 0x4df   : > { %v15747_v51 = vpop.f32.mrb[235].mxu1  ;;  %15946 = vmatprep.mubr.msk.bf16.mxu0 %vm18440_vm2, %v22787_v33 }
 0x4e1   : > { %15997 = vmatmul.mubr.msk.bf16.gmra.mrb[84].mxu1 %vm386_vm3, %v20060_v53  ;;  %v5117_v57 = vpop.f32.mrb[224].mxu0 }
 0x4e2   : > { %16000 = vmatprep.mubr.msk.bf16.mxu1 %vm18440_vm2, %v22787_v33  ;;  %v5188_v13 = vadd.f32 %v5117_v57, %v20092_v38  ;;  %v15696_v12 = vpop.f32.mrb[225].mxu0  ;;  %v6220_v57 = vld [vmem:[#allocation3 + $0x31] sm:$0xff] }
 0x4e3   : > { %v5120_v63 = vpop.f32.mrb[226].mxu0 }
 0x4e4   : > { %v20358_v50 = vpop.f32.mrb[236].mxu1  ;;  %v5189_v56 = vadd.f32 %v5120_v63, %v20098_v54  ;;  %v15697_v10 = vpop.f32.mrb[227].mxu0  ;;  %v20364_v1 = vadd.f32 %v5319_v15, %v5188_v13  ;;  %v18173_v54 = vld [vmem:[%s22725_s3 + $0xf8] sm:$0xff]  }
 0x4e5   : > { %v15750_v53 = vpop.f32.mrb[237].mxu1 }
 0x4e6   : > { %v20366_v41 = vpop.f32.mrb[238].mxu1  ;;  %15947 = vmatmul.mubr.msk.bf16.vlgmr.msra.gmra.mrb[76].mxu0 %vm386_vm3, %v6234_v8  ;;  %v20369_v38 = vadd.f32 %v5322_v61, %v5189_v56  ;;  %v6223_v56 = vld [vmem:[#allocation3 + $0x49] sm:$0xff] }
 0x4e7   : > { %v15751_v21 = vpop.f32.mrb[239].mxu1  ;;  %15950 = vmatprep.mubr.msk.bf16.mxu0 %vm18440_vm2, %v22787_v33  ;;  %16025 = vmatpush3.bf16.msra.mxu0 %v18172_v22 }
 0x4e8   : > { %16026 = vmatprep.subr.bf16.mxu0 %v22787_v33  ;;  %v6222_v21 = vld [vmem:[#allocation3 + $0x41] sm:$0xff] }
 0x4e9   : > { %16001 = vmatmul.mubr.msk.bf16.gmra.mrb[100].mxu1 %vm386_vm3, %v20079_v48  ;;  %v5125_v15 = vpop.f32.mrb[228].mxu0  ;;  %v6237_v24 = vpack.c.bf16 %v6223_v56, %v6222_v21 }
 0x4ea   : > { %16004 = vmatprep.mubr.msk.bf16.mxu1 %vm18440_vm2, %v22787_v33  ;;  %v5190_v61 = vadd.f32 %v5125_v15, %v20109_v26  ;;  %v15700_v60 = vpop.f32.mrb[229].mxu0 }
 0x4eb   : > { %v5128_v19 = vpop.f32.mrb[230].mxu0  ;;  %16027 = vmatpush3.bf16.msra.mxu0 %v18173_v54 }
 0x4ec   : > { %v20382_v44 = vpop.f32.mrb[240].mxu1  ;;  %v5191_v48 = vadd.f32 %v5128_v19, %v20112_v6  ;;  %v15701_v31 = vpop.f32.mrb[231].mxu0  ;;  %16028 = vmatprep.subr.bf16.mxu0 %v22787_v33  ;;  %v20390_v55 = vadd.f32 %v20328_v0, %v5190_v61  ;;  %v6221_v0 = vld [vmem:[#allocation3 + $0x39] sm:$0xff] }
 0x4ed   : > { %v15754_v37 = vpop.f32.mrb[241].mxu1  ;;  %v6236_v63 = vpack.c.bf16 %v6221_v0, %v6220_v57  ;;  %v6225_v19 = vld [vmem:[#allocation3 + $0x59] sm:$0xff]  ;;  %v6224_v31 = vld [vmem:[#allocation3 + $0x51] sm:$0xff] }
 0x4ee   : > { %v20392_v26 = vpop.f32.mrb[242].mxu1  ;;  %15951 = vmatmul.mubr.msk.bf16.gmra.mrb[80].mxu0 %vm386_vm3, %v6235_v46  ;;  %v20396_v43 = vadd.f32 %v20330_v28, %v5191_v48 }
 0x4ef   : > { %v15755_v2 = vpop.f32.mrb[243].mxu1  ;;  %15954 = vmatprep.mubr.msk.bf16.mxu0 %vm18440_vm2, %v22787_v33  ;;  %16029 = vmatpush3.bf16.msra.mxu0 %v18174_v3 }
 0x4f0   : > { %16108 = vmatprep.subr.bf16.mxu0 %v22787_v33 }
 0x4f1   : > { %16005 = vmatmul.mubr.msk.bf16.gmra.mrb[104].mxu1 %vm386_vm3, %v20095_v18  ;;  %v5133_v6 = vpop.f32.mrb[232].mxu0 }
 0x4f2   : > { %16008 = vmatprep.mubr.msk.bf16.mxu1 %vm18440_vm2, %v22787_v33  ;;  %v5192_v7 = vadd.f32 %v5133_v6, %v20131_v62  ;;  %v15704_v45 = vpop.f32.mrb[233].mxu0  ;;  %v6238_v6 = vpack.c.bf16 %v6225_v19, %v6224_v31 }
 0x4f3   : > { %v5136_v51 = vpop.f32.mrb[234].mxu0 }
 0x4f4   : > { %v20406_v28 = vpop.f32.mrb[244].mxu1  ;;  %v5193_v9 = vadd.f32 %v5136_v51, %v20135_v29  ;;  %v15705_v13 = vpop.f32.mrb[235].mxu0  ;;  %v20410_v18 = vadd.f32 %v20346_v4, %v5192_v7  ;;  %v6227_v51 = vld [vmem:[#allocation3 + $0x69] sm:$0xff] }
 0x4f5   : > { %v15758_v12 = vpop.f32.mrb[245].mxu1 }
 0x4f6   : > { %v20412_v23 = vpop.f32.mrb[246].mxu1  ;;  %15955 = vmatmul.mubr.msk.bf16.gmra.mrb[84].mxu0 %vm386_vm3, %v6236_v63  ;;  %v20416_v62 = vadd.f32 %v20348_v49, %v5193_v9  ;;  %v6435_v12 = vld [vmem:[#allocation3 + $0x9a] sm:$0xf] }
 0x4f7   : > { %v15759_v22 = vpop.f32.mrb[247].mxu1  ;;  %15958 = vmatprep.mubr.msk.bf16.mxu0 %vm18440_vm2, %v22787_v33 }
 0x4f9   : > { %16009 = vmatmul.mubr.msk.bf16.gmra.mrb[108].mxu1 %vm386_vm3, %v20114_v59  ;;  %v5141_v29 = vpop.f32.mrb[236].mxu0 }
 0x4fa   : > { %16012 = vmatprep.mubr.msk.bf16.mxu1 %vm18440_vm2, %v22787_v33  ;;  %v5194_v4 = vadd.f32 %v5141_v29, %v20151_v14  ;;  %v15708_v10 = vpop.f32.mrb[237].mxu0 }
 0x4fb   : > { %v5144_v53 = vpop.f32.mrb[238].mxu0  ;;  %v6434_v10 = vld [vmem:[#allocation3 + $0x92] sm:$0xff] }
 0x4fc   : > { %v20425_v8 = vpop.f32.mrb[248].mxu1  ;;  %v5195_v49 = vadd.f32 %v5144_v53, %v20157_v39  ;;  %v15709_v54 = vpop.f32.mrb[239].mxu0  ;;  %v20429_v61 = vadd.f32 %v20358_v50, %v5194_v4 }
 0x4fd   : > { %v15762_v15 = vpop.f32.mrb[249].mxu1 }
 0x4fe   : > { %v20431_v59 = vpop.f32.mrb[250].mxu1  ;;  %15959 = vmatmul.mubr.msk.bf16.gmra.mrb[88].mxu0 %vm386_vm3, %v6237_v24  ;;  %v20435_v14 = vadd.f32 %v20366_v41, %v5195_v49  ;;  %v6433_v41 = vld [vmem:[#allocation3 + $0x8a] sm:$0xff]  ;;  %v6229_v49 = vld [vmem:[#allocation3 + $0x79] sm:$0xff] }
 0x4ff   : > { %v15763_v60 = vpop.f32.mrb[251].mxu1  ;;  %15962 = vmatprep.mubr.msk.bf16.mxu0 %vm18440_vm2, %v22787_v33 }
 0x500   : > { %v6228_v60 = vld [vmem:[#allocation3 + $0x71] sm:$0xff] }
 0x501   : > { %16013 = vmatmul.mubr.msk.bf16.gmra.mrb[112].mxu1 %vm386_vm3, %v20137_v17  ;;  %v5149_v39 = vpop.f32.mrb[240].mxu0 }
 0x502   : > { %16016 = vmatprep.mubr.msk.bf16.mxu1 %vm18440_vm2, %v22787_v33  ;;  %v5196_v50 = vadd.f32 %v5149_v39, %v20166_v20  ;;  %v15712_v16 = vpop.f32.mrb[241].mxu0  ;;  %v6443_v20 = vpack.c.bf16 %v6433_v41, %v20154_v30  ;;  %v6226_v30 = vld [vmem:[#allocation3 + $0x61] sm:$0xff] }
 0x503   : > { %v5152_v3 = vpop.f32.mrb[242].mxu0  ;;  %v6239_v29 = vpack.c.bf16 %v6227_v51, %v6226_v30  ;;  %v6823_v39 = vld [vmem:[#allocation3 + $0x25] sm:$0xff]  ;;  %v6240_v16 = vpack.c.bf16 %v6229_v49, %v6228_v60  ;;  %v6822_v41 = vld [vmem:[#allocation3 + $0x1d] sm:$0xff] }
 0x504   : > { %v20444_v48 = vpop.f32.mrb[252].mxu1  ;;  %v5197_v37 = vadd.f32 %v5152_v3, %v20171_v47  ;;  %v15713_v46 = vpop.f32.mrb[243].mxu0  ;;  %v20448_v17 = vadd.f32 %v20382_v44, %v5196_v50  ;;  %v6230_v51 = vld [vmem:[#allocation3 + $0x81] sm:$0xff] }
 0x505   : > { %v15766_v2 = vpop.f32.mrb[253].mxu1  ;;  %v6840_v46 = vpack.c.bf16 %v6823_v39, %v6822_v41 }
 0x506   : > { %v20450_v0 = vpop.f32.mrb[254].mxu1  ;;  %15963 = vmatmul.mubr.msk.bf16.gmra.mrb[92].mxu0 %vm386_vm3, %v6238_v6  ;;  %v20455_v45 = vadd.f32 %v20392_v26, %v5197_v37  ;;  %v18176_v6 = vld [vmem:[%s22725_s3 + $0x140] sm:$0xff]  }
 0x507   : > { %v15767_v7 = vpop.f32.mrb[255].mxu1  ;;  %15966 = vmatprep.mubr.msk.bf16.mxu0 %vm18440_vm2, %v22787_v33 }
 0x509   : > { %16017 = vmatmul.mubr.msk.bf16.gmra.mrb[116].mxu1 %vm386_vm3, %v6443_v20  ;;  %v5157_v47 = vpop.f32.mrb[244].mxu0 }
 0x50a   : > { %16020 = vmatprep.mubr.msk.bf16.mxu1 %vm18440_vm2, %v22787_v33  ;;  %v5198_v44 = vadd.f32 %v5157_v47, %v20198_v11  ;;  %v15716_v57 = vpop.f32.mrb[245].mxu0  ;;  %v6444_v11 = vpack.c.bf16 %v6435_v12, %v6434_v10  ;;  %v6233_v10 = vld [vmem:[#allocation3 + $0x99] sm:$0xf] }
 0x50b   : > { %v5160_v9 = vpop.f32.mrb[246].mxu0 }
 0x50c   : > { %v20463_v13 = vpop.f32.mrb[0].mxu1  ;;  %v5199_v26 = vadd.f32 %v5160_v9, %v20202_v40  ;;  %v15717_v63 = vpop.f32.mrb[247].mxu0  ;;  %v20467_v56 = vadd.f32 %v20406_v28, %v5198_v44  ;;  %v6825_v44 = vld [vmem:[#allocation3 + $0x35] sm:$0xff] }
 0x50d   : > { %v15770_v22 = vpop.f32.mrb[1].mxu1 }
 0x50e   : > { %v5386_v4 = vpop.f32.mrb[2].mxu1  ;;  %15967 = vmatmul.mubr.msk.bf16.gmra.mrb[96].mxu0 %vm386_vm3, %v6239_v29  ;;  %v20471_v21 = vadd.f32 %v20412_v23, %v5199_v26  ;;  %v6824_v22 = vld [vmem:[#allocation3 + $0x2d] sm:$0xff] }
 0x50f   : > { %v15771_v53 = vpop.f32.mrb[3].mxu1  ;;  %15970 = vmatprep.mubr.msk.bf16.mxu0 %vm18440_vm2, %v22787_v33  ;;  %v6841_v4 = vpack.c.bf16 %v6825_v44, %v6824_v22 }
 0x511   : > { %16021 = vmatmul.mubr.msk.bf16.gmra.mrb[120].mxu1 %vm386_vm3, %v6444_v11  ;;  %v5165_v40 = vpop.f32.mrb[248].mxu0 }
 0x512   : > { %16072 = vmatprep.mubr.msk.bf16.mxu1 %vm18440_vm2, %v22787_v33  ;;  %v5200_v28 = vadd.f32 %v5165_v40, %v20271_v58  ;;  %v15720_v54 = vpop.f32.mrb[249].mxu0  ;;  %v18175_v58 = vld [vmem:[%s22725_s3 + $0x138] sm:$0xff]  }
 0x513   : > { %v5168_v15 = vpop.f32.mrb[250].mxu0 }
 0x514   : > { %v20479_v24 = vpop.f32.mrb[4].mxu1  ;;  %v5201_v23 = vadd.f32 %v5168_v15, %v20276_v25  ;;  %v15721_v19 = vpop.f32.mrb[251].mxu0  ;;  %v20483_v3 = vadd.f32 %v20425_v8, %v5200_v28  ;;  %v6231_v8 = vld [vmem:[#allocation3 + $0x89] sm:$0xff] }
 0x515   : > { %v15822_v50 = vpop.f32.mrb[5].mxu1  ;;  %v6241_v12 = vpack.c.bf16 %v6231_v8, %v6230_v51  ;;  %v6827_v28 = vld [vmem:[#allocation3 + $0x45] sm:$0xff]  ;;  %v6826_v19 = vld [vmem:[#allocation3 + $0x3d] sm:$0xff]  ;;  %v6828_v51 = vld [vmem:[#allocation3 + $0x4d] sm:$0xff] }
 0x516   : > { %v20485_v31 = vpop.f32.mrb[6].mxu1  ;;  %15971 = vmatmul.mubr.msk.bf16.gmra.mrb[100].mxu0 %vm386_vm3, %v6240_v16  ;;  %v20492_v2 = vadd.f32 %v20431_v59, %v5201_v23 }
 0x517   : > { %v15823_v37 = vpop.f32.mrb[7].mxu1  ;;  %15974 = vmatprep.mubr.msk.bf16.mxu0 %vm18440_vm2, %v22787_v33 }
 0x519   : > { %16073 = vmatmul.mubr.msk.bf16.vlgmr.msra.gmra.mrb[124].mxu1 %vm386_vm3, %v6840_v46  ;;  %v5173_v25 = vpop.f32.mrb[252].mxu0  ;;  %v6829_v46 = vld [vmem:[#allocation3 + $0x55] sm:$0xff] }
 0x51a   : > { %16076 = vmatprep.mubr.msk.bf16.mxu1 %vm18440_vm2, %v22787_v33  ;;  %16151 = vmatpush3.bf16.msra.mxu1 %v18175_v58  ;;  %v5202_v7 = vadd.f32 %v5173_v25, %v20298_v36  ;;  %v15724_v20 = vpop.f32.mrb[253].mxu0  ;;  %v18177_v36 = vld [vmem:[%s22725_s3 + $0x148] sm:$0xff]   ;;  %v18178_v25 = vld [vmem:[%s22725_s3 + $0x120] sm:$0xff]   ;;  %v6843_v44 = vpack.c.bf16 %v6829_v46, %v6828_v51 }
 0x51b   : > { %16152 = vmatprep.subr.bf16.mxu1 %v22787_v33  ;;  %v5176_v59 = vpop.f32.mrb[254].mxu0 }
 0x51c   : > { %v20504_v47 = vpop.f32.mrb[8].mxu1  ;;  %v5203_v57 = vadd.f32 %v5176_v59, %v20300_v34  ;;  %v15725_v9 = vpop.f32.mrb[255].mxu0  ;;  %v20508_v26 = vadd.f32 %v20444_v48, %v5202_v7 }
 0x51d   : > { %v15826_v30 = vpop.f32.mrb[9].mxu1  ;;  %v6622_v9 = vld [vmem:[#allocation3 + $0x2c] sm:$0xff] }
 0x51e   : > { %v20510_v63 = vpop.f32.mrb[10].mxu1  ;;  %16153 = vmatpush3.bf16.msra.mxu1 %v18176_v6  ;;  %15975 = vmatmul.mubr.msk.bf16.gmra.mrb[104].mxu0 %vm386_vm3, %v6241_v12  ;;  %v20518_v34 = vadd.f32 %v20450_v0, %v5203_v57  ;;  %v6232_v0 = vld [vmem:[#allocation3 + $0x91] sm:$0xff]  ;;  %v6831_v30 = vld [vmem:[#allocation3 + $0x65] sm:$0xff] }
 0x51f   : > { %v15827_v29 = vpop.f32.mrb[11].mxu1  ;;  %16154 = vmatprep.subr.bf16.mxu1 %v22787_v33  ;;  %15978 = vmatprep.mubr.msk.bf16.mxu0 %vm18440_vm2, %v22787_v33  ;;  %v6242_v60 = vpack.c.bf16 %v6233_v10, %v6232_v0  ;;  %v18180_v12 = vld [vmem:[%s22725_s3 + $0x130] sm:$0xff]  }
 0x520   : > { %v6830_v10 = vld [vmem:[#allocation3 + $0x5d] sm:$0xff] }
 0x521   : > { %16077 = vmatmul.mubr.msk.bf16.gmra.mrb[128].mxu1 %vm386_vm3, %v6841_v4  ;;  %v5181_v48 = vpop.f32.mrb[0].mxu0  ;;  %v6639_v4 = vpack.c.bf16 %v20204_v52, %v6622_v9  ;;  %v6629_v9 = vld [vmem:[#allocation3 + $0x64] sm:$0xff] }
 0x522   : > { %16080 = vmatprep.mubr.msk.bf16.mxu1 %vm18440_vm2, %v22787_v33  ;;  %16155 = vmatpush3.bf16.msra.mxu1 %v18177_v36  ;;  %v5204_v53 = vadd.f32 %v5181_v48, %v20343_v5  ;;  %v15728_v11 = vpop.f32.mrb[1].mxu0  ;;  %v6842_v5 = vpack.c.bf16 %v6827_v28, %v6826_v19 }
 0x523   : > { %16234 = vmatprep.subr.bf16.mxu1 %v22787_v33  ;;  %v5184_v40 = vpop.f32.mrb[2].mxu0  ;;  %v6844_v11 = vpack.c.bf16 %v6831_v30, %v6830_v10 }
 0x524   : > { %v20527_v49 = vpop.f32.mrb[12].mxu1  ;;  %v15729_v54 = vpop.f32.mrb[3].mxu0  ;;  %v20530_v39 = vadd.f32 %v20463_v13, %v5204_v53 }
 0x525   : > { %v15830_v15 = vpop.f32.mrb[13].mxu1  ;;  %v6833_v54 = vld [vmem:[#allocation3 + $0x75] sm:$0xff] }
 0x526   : > { %v20532_v23 = vpop.f32.mrb[14].mxu1  ;;  %15979 = vmatmul.mubr.msk.bf16.gmra.mrb[108].mxu0 %vm386_vm3, %v6242_v60 }
 0x527   : > { %v15831_v50 = vpop.f32.mrb[15].mxu1  ;;  %16030 = vmatprep.mubr.msk.bf16.mxu0 %vm18440_vm2, %v22787_v33 }
 0x529   : > { %16081 = vmatmul.mubr.msk.bf16.gmra.mrb[132].mxu1 %vm386_vm3, %v6842_v5  ;;  %v5521_v16 = vpop.f32.mrb[4].mxu0 }
 0x52a   : > { %16084 = vmatprep.mubr.msk.bf16.mxu1 %vm18440_vm2, %v22787_v33  ;;  %v5592_v41 = vadd.f32 %v5521_v16, %v20364_v1  ;;  %v15780_v13 = vpop.f32.mrb[5].mxu0 }
 0x52b   : > { %v5524_v58 = vpop.f32.mrb[6].mxu0 }
 0x52c   : > { %v20541_v37 = vpop.f32.mrb[16].mxu1  ;;  %v5593_v8 = vadd.f32 %v5524_v58, %v20369_v38  ;;  %v15781_v6 = vpop.f32.mrb[7].mxu0  ;;  %v20548_v20 = vadd.f32 %v20479_v24, %v5592_v41  ;;  %v18179_v38 = vld [vmem:[%s22725_s3 + $0x128] sm:$0xff]   ;;  %v6832_v41 = vld [vmem:[#allocation3 + $0x6d] sm:$0xff] }
 0x52d   : > { %v15834_v7 = vpop.f32.mrb[17].mxu1  ;;  %v6626_v6 = vld [vmem:[#allocation3 + $0x4c] sm:$0xff] }
 0x52e   : > { %v20550_v59 = vpop.f32.mrb[18].mxu1  ;;  %16031 = vmatmul.mubr.msk.bf16.vlgmr.msra.gmra.mrb[112].mxu0 %vm386_vm3, %v6638_v35  ;;  %v20557_v57 = vadd.f32 %v20485_v31, %v5593_v8  ;;  %v6835_v7 = vld [vmem:[#allocation3 + $0x85] sm:$0xff] }
 0x52f   : > { %v15835_v1 = vpop.f32.mrb[19].mxu1  ;;  %16034 = vmatprep.mubr.msk.bf16.mxu0 %vm18440_vm2, %v22787_v33  ;;  %16109 = vmatpush3.bf16.msra.mxu0 %v18178_v25 }
 0x530   : > { %16110 = vmatprep.subr.bf16.mxu0 %v22787_v33 }
 0x531   : > { %16085 = vmatmul.mubr.msk.bf16.gmra.mrb[136].mxu1 %vm386_vm3, %v6843_v44  ;;  %v5529_v24 = vpop.f32.mrb[8].mxu0 }
 0x532   : > { %16088 = vmatprep.mubr.msk.bf16.mxu1 %vm18440_vm2, %v22787_v33  ;;  %v5594_v42 = vadd.f32 %v5529_v24, %v20390_v55  ;;  %v15784_v27 = vpop.f32.mrb[9].mxu0 }
 0x533   : > { %v5532_v35 = vpop.f32.mrb[10].mxu0  ;;  %16111 = vmatpush3.bf16.msra.mxu0 %v18179_v38 }
 0x534   : > { %v20569_v31 = vpop.f32.mrb[20].mxu1  ;;  %v5595_v22 = vadd.f32 %v5532_v35, %v20396_v43  ;;  %v15785_v36 = vpop.f32.mrb[11].mxu0  ;;  %16112 = vmatprep.subr.bf16.mxu0 %v22787_v33  ;;  %v20578_v55 = vadd.f32 %v20504_v47, %v5594_v42  ;;  %v6834_v42 = vld [vmem:[#allocation3 + $0x7d] sm:$0xff] }
 0x535   : > { %v15838_v29 = vpop.f32.mrb[21].mxu1  ;;  %v6628_v36 = vld [vmem:[#allocation3 + $0x5c] sm:$0xff] }
 0x536   : > { %v20580_v48 = vpop.f32.mrb[22].mxu1  ;;  %16035 = vmatmul.mubr.msk.bf16.gmra.mrb[116].mxu0 %vm386_vm3, %v6639_v4  ;;  %v20584_v40 = vadd.f32 %v20510_v63, %v5595_v22  ;;  %v6624_v63 = vld [vmem:[#allocation3 + $0x3c] sm:$0xff] }
 0x537   : > { %v15839_v53 = vpop.f32.mrb[23].mxu1  ;;  %16038 = vmatprep.mubr.msk.bf16.mxu0 %vm18440_vm2, %v22787_v33  ;;  %16113 = vmatpush3.bf16.msra.mxu0 %v18180_v12  ;;  %v6640_v50 = vpack.c.bf16 %v20213_v32, %v6624_v63  ;;  %v6627_v32 = vld [vmem:[#allocation3 + $0x54] sm:$0xff] }
 0x538   : > { %16192 = vmatprep.subr.bf16.mxu0 %v22787_v33  ;;  %v6641_v44 = vpack.c.bf16 %v6627_v32, %v6626_v6  ;;  %v6837_v29 = vld [vmem:[#allocation3 + $0x95] sm:$0xff]  ;;  %v6642_v53 = vpack.c.bf16 %v6629_v9, %v6628_v36  ;;  %v6633_v6 = vld [vmem:[#allocation3 + $0x84] sm:$0xff] }
 0x539   : > { %16089 = vmatmul.mubr.msk.bf16.gmra.mrb[140].mxu1 %vm386_vm3, %v6844_v11  ;;  %v5537_v52 = vpop.f32.mrb[12].mxu0  ;;  %v6631_v63 = vld [vmem:[#allocation3 + $0x74] sm:$0xff] }
 0x53a   : > { %16092 = vmatprep.mubr.msk.bf16.mxu1 %vm18440_vm2, %v22787_v33  ;;  %v5596_v43 = vadd.f32 %v5537_v52, %v20410_v18  ;;  %v15788_v47 = vpop.f32.mrb[13].mxu0  ;;  %v6845_v18 = vpack.c.bf16 %v6833_v54, %v6832_v41 }
 0x53b   : > { %v5540_v0 = vpop.f32.mrb[14].mxu0 }
 0x53c   : > { %v20593_v28 = vpop.f32.mrb[24].mxu1  ;;  %v5597_v15 = vadd.f32 %v5540_v0, %v20416_v62  ;;  %v15789_v60 = vpop.f32.mrb[15].mxu0  ;;  %v20598_v5 = vadd.f32 %v20527_v49, %v5596_v43  ;;  %v6836_v43 = vld [vmem:[#allocation3 + $0x8d] sm:$0xff] }
 0x53d   : > { %v15842_v19 = vpop.f32.mrb[25].mxu1 }
 0x53e   : > { %v20600_v16 = vpop.f32.mrb[26].mxu1  ;;  %16039 = vmatmul.mubr.msk.bf16.gmra.mrb[120].mxu0 %vm386_vm3, %v6640_v50  ;;  %v20604_v58 = vadd.f32 %v20532_v23, %v5597_v15  ;;  %v6630_v19 = vld [vmem:[#allocation3 + $0x6c] sm:$0xff]  ;;  %v6839_v50 = vld [vmem:[#allocation3 + $0xa5] sm:$0xf] }
 0x53f   : > { %v15843_v13 = vpop.f32.mrb[27].mxu1  ;;  %16042 = vmatprep.mubr.msk.bf16.mxu0 %vm18440_vm2, %v22787_v33 }
 0x541   : > { %16093 = vmatmul.mubr.msk.bf16.gmra.mrb[144].mxu1 %vm386_vm3, %v6845_v18  ;;  %v5545_v62 = vpop.f32.mrb[16].mxu0  ;;  %v6643_v18 = vpack.c.bf16 %v6631_v63, %v6630_v19 }
 0x542   : > { %16096 = vmatprep.mubr.msk.bf16.mxu1 %vm18440_vm2, %v22787_v33  ;;  %v5598_v49 = vadd.f32 %v5545_v62, %v20429_v61  ;;  %v15792_v46 = vpop.f32.mrb[17].mxu0  ;;  %v6846_v61 = vpack.c.bf16 %v6835_v7, %v6834_v42 }
 0x543   : > { %v5548_v25 = vpop.f32.mrb[18].mxu0 }
 0x544   : > { %v20612_v8 = vpop.f32.mrb[28].mxu1  ;;  %v5599_v23 = vadd.f32 %v5548_v25, %v20435_v14  ;;  %v15793_v51 = vpop.f32.mrb[19].mxu0  ;;  %v20616_v38 = vadd.f32 %v20541_v37, %v5598_v49  ;;  %v6838_v49 = vld [vmem:[#allocation3 + $0x9d] sm:$0xff] }
 0x545   : > { %v15846_v1 = vpop.f32.mrb[29].mxu1 }
 0x546   : > { %v20618_v24 = vpop.f32.mrb[30].mxu1  ;;  %16043 = vmatmul.mubr.msk.bf16.gmra.mrb[124].mxu0 %vm386_vm3, %v6641_v44  ;;  %v20622_v35 = vadd.f32 %v20550_v59, %v5599_v23  ;;  %v6632_v1 = vld [vmem:[#allocation3 + $0x7c] sm:$0xff]  ;;  %v7227_v44 = vld [vmem:[#allocation3 + $0x27] sm:$0xff] }
 0x547   : > { %v15847_v27 = vpop.f32.mrb[31].mxu1  ;;  %16046 = vmatprep.mubr.msk.bf16.mxu0 %vm18440_vm2, %v22787_v33 }
 0x549   : > { %16097 = vmatmul.mubr.msk.bf16.gmra.mrb[148].mxu1 %vm386_vm3, %v6846_v61  ;;  %v5553_v14 = vpop.f32.mrb[20].mxu0  ;;  %v6644_v61 = vpack.c.bf16 %v6633_v6, %v6632_v1 }
 0x54a   : > { %16100 = vmatprep.mubr.msk.bf16.mxu1 %vm18440_vm2, %v22787_v33  ;;  %v5600_v37 = vadd.f32 %v5553_v14, %v20448_v17  ;;  %v15796_v30 = vpop.f32.mrb[21].mxu0  ;;  %v6847_v17 = vpack.c.bf16 %v6837_v29, %v6836_v43  ;;  %v18182_v29 = vld [vmem:[%s22725_s3 + $0x170] sm:$0xff]   ;;  %v7229_v43 = vld [vmem:[#allocation3 + $0x37] sm:$0xff] }
 0x54b   : > { %v5556_v12 = vpop.f32.mrb[22].mxu0 }
 0x54c   : > { %v20630_v22 = vpop.f32.mrb[32].mxu1  ;;  %v5601_v59 = vadd.f32 %v5556_v12, %v20455_v45  ;;  %v15797_v4 = vpop.f32.mrb[23].mxu0  ;;  %v20634_v11 = vadd.f32 %v20569_v31, %v5600_v37  ;;  %v7226_v37 = vld [vmem:[#allocation3 + $0x1f] sm:$0xff] }
 0x54d   : > { %v15850_v10 = vpop.f32.mrb[33].mxu1  ;;  %v7244_v12 = vpack.c.bf16 %v7227_v44, %v7226_v37  ;;  %v7025_v44 = vld [vmem:[#allocation3 + $0x26] sm:$0xff]  ;;  %v7233_v37 = vld [vmem:[#allocation3 + $0x57] sm:$0xff] }
 0x54e   : > { %v20636_v52 = vpop.f32.mrb[34].mxu1  ;;  %16047 = vmatmul.mubr.msk.bf16.gmra.mrb[128].mxu0 %vm386_vm3, %v6642_v53  ;;  %v20640_v0 = vadd.f32 %v20580_v48, %v5601_v59  ;;  %v6634_v53 = vld [vmem:[#allocation3 + $0x8c] sm:$0xff] }
 0x54f   : > { %v15851_v47 = vpop.f32.mrb[35].mxu1  ;;  %16050 = vmatprep.mubr.msk.bf16.mxu0 %vm18440_vm2, %v22787_v33 }
 0x551   : > { %16101 = vmatmul.mubr.msk.bf16.gmra.mrb[152].mxu1 %vm386_vm3, %v6847_v17  ;;  %v5561_v45 = vpop.f32.mrb[24].mxu0 }
 0x552   : > { %16104 = vmatprep.mubr.msk.bf16.mxu1 %vm18440_vm2, %v22787_v33  ;;  %v5602_v31 = vadd.f32 %v5561_v45, %v20467_v56  ;;  %v15800_v54 = vpop.f32.mrb[25].mxu0  ;;  %v6848_v56 = vpack.c.bf16 %v6839_v50, %v6838_v49  ;;  %v7231_v49 = vld [vmem:[#allocation3 + $0x47] sm:$0xff] }
 0x553   : > { %v5564_v15 = vpop.f32.mrb[26].mxu0 }
 0x554   : > { %v20648_v60 = vpop.f32.mrb[36].mxu1  ;;  %v5603_v48 = vadd.f32 %v5564_v15, %v20471_v21  ;;  %v15801_v41 = vpop.f32.mrb[27].mxu0  ;;  %v20652_v62 = vadd.f32 %v20593_v28, %v5602_v31  ;;  %v7228_v15 = vld [vmem:[#allocation3 + $0x2f] sm:$0xff] }
 0x555   : > { %v15854_v13 = vpop.f32.mrb[37].mxu1  ;;  %v7245_v50 = vpack.c.bf16 %v7229_v43, %v7228_v15  ;;  %v6637_v41 = vld [vmem:[#allocation3 + $0xa4] sm:$0xf]  ;;  %v7027_v43 = vld [vmem:[#allocation3 + $0x36] sm:$0xff] }
 0x556   : > { %v5790_v32 = vpop.f32.mrb[38].mxu1  ;;  %16051 = vmatmul.mubr.msk.bf16.gmra.mrb[132].mxu0 %vm386_vm3, %v6643_v18  ;;  %v20656_v25 = vadd.f32 %v20600_v16, %v5603_v48  ;;  %v6636_v48 = vld [vmem:[#allocation3 + $0x9c] sm:$0xff]  ;;  %v7235_v15 = vld [vmem:[#allocation3 + $0x67] sm:$0xff] }
 0x557   : > { %v15855_v46 = vpop.f32.mrb[39].mxu1  ;;  %16054 = vmatprep.mubr.msk.bf16.mxu0 %vm18440_vm2, %v22787_v33 }
 0x559   : > { %16105 = vmatmul.mubr.msk.bf16.gmra.mrb[156].mxu1 %vm386_vm3, %v6848_v56  ;;  %v5569_v21 = vpop.f32.mrb[28].mxu0 }
 0x55a   : > { %16156 = vmatprep.mubr.msk.bf16.mxu1 %vm18440_vm2, %v22787_v33  ;;  %v5604_v28 = vadd.f32 %v5569_v21, %v20483_v3  ;;  %v15804_v7 = vpop.f32.mrb[29].mxu0  ;;  %v18181_v3 = vld [vmem:[%s22725_s3 + $0x168] sm:$0xff]   ;;  %v6646_v21 = vpack.c.bf16 %v6637_v41, %v6636_v48 }
 0x55b   : > { %v5572_v23 = vpop.f32.mrb[30].mxu0  ;;  %v7230_v7 = vld [vmem:[#allocation3 + $0x3f] sm:$0xff] }
 0x55c   : > { %v20664_v51 = vpop.f32.mrb[40].mxu1  ;;  %v5605_v16 = vadd.f32 %v5572_v23, %v20492_v2  ;;  %v15805_v42 = vpop.f32.mrb[31].mxu0  ;;  %v20668_v14 = vadd.f32 %v20612_v8, %v5604_v28  ;;  %v6635_v8 = vld [vmem:[#allocation3 + $0x94] sm:$0xff] }
 0x55d   : > { %v15906_v27 = vpop.f32.mrb[41].mxu1  ;;  %v6645_v63 = vpack.c.bf16 %v6635_v8, %v6634_v53 }
 0x55e   : > { %v20670_v9 = vpop.f32.mrb[42].mxu1  ;;  %16055 = vmatmul.mubr.msk.bf16.gmra.mrb[136].mxu0 %vm386_vm3, %v6644_v61  ;;  %v20677_v36 = vadd.f32 %v20618_v24, %v5605_v16  ;;  %v7024_v61 = vld [vmem:[#allocation3 + $0x1e] sm:$0xff] }
 0x55f   : > { %v15907_v30 = vpop.f32.mrb[43].mxu1  ;;  %16058 = vmatprep.mubr.msk.bf16.mxu0 %vm18440_vm2, %v22787_v33  ;;  %v7042_v8 = vpack.c.bf16 %v7025_v44, %v7024_v61  ;;  %v7236_v61 = vld [vmem:[#allocation3 + $0x6f] sm:$0xff] }
 0x561   : > { %16157 = vmatmul.mubr.msk.bf16.vlgmr.msra.gmra.mrb[160].mxu1 %vm386_vm3, %v7244_v12  ;;  %v5577_v2 = vpop.f32.mrb[32].mxu0 }
 0x562   : > { %16160 = vmatprep.mubr.msk.bf16.mxu1 %vm18440_vm2, %v22787_v33  ;;  %16235 = vmatpush3.bf16.msra.mxu1 %v18181_v3  ;;  %v5606_v59 = vadd.f32 %v5577_v2, %v20508_v26  ;;  %v15808_v4 = vpop.f32.mrb[33].mxu0  ;;  %v18183_v26 = vld [vmem:[%s22725_s3 + $0x178] sm:$0xff]   ;;  %v18184_v3 = vld [vmem:[%s22725_s3 + $0x150] sm:$0xff]  }
 0x563   : > { %16236 = vmatprep.subr.bf16.mxu1 %v22787_v33  ;;  %v5580_v24 = vpop.f32.mrb[34].mxu0 }
 0x564   : > { %v20689_v10 = vpop.f32.mrb[44].mxu1  ;;  %v5607_v47 = vadd.f32 %v5580_v24, %v20518_v34  ;;  %v15809_v17 = vpop.f32.mrb[35].mxu0  ;;  %v20693_v31 = vadd.f32 %v20630_v22, %v5606_v59 }
 0x565   : > { %v15910_v45 = vpop.f32.mrb[45].mxu1 }
 0x566   : > { %v20695_v54 = vpop.f32.mrb[46].mxu1  ;;  %16237 = vmatpush3.bf16.msra.mxu1 %v18182_v29  ;;  %16059 = vmatmul.mubr.msk.bf16.gmra.mrb[140].mxu0 %vm386_vm3, %v6645_v63  ;;  %v20703_v34 = vadd.f32 %v20636_v52, %v5607_v47  ;;  %v7026_v63 = vld [vmem:[#allocation3 + $0x2e] sm:$0xff] }
 0x567   : > { %v15911_v19 = vpop.f32.mrb[47].mxu1  ;;  %16238 = vmatprep.subr.bf16.mxu1 %v22787_v33  ;;  %16062 = vmatprep.mubr.msk.bf16.mxu0 %vm18440_vm2, %v22787_v33  ;;  %v7043_v48 = vpack.c.bf16 %v7027_v43, %v7026_v63 }
 0x569   : > { %16161 = vmatmul.mubr.msk.bf16.gmra.mrb[164].mxu1 %vm386_vm3, %v7245_v50  ;;  %v5585_v22 = vpop.f32.mrb[36].mxu0 }
 0x56a   : > { %16164 = vmatprep.mubr.msk.bf16.mxu1 %vm18440_vm2, %v22787_v33  ;;  %16239 = vmatpush3.bf16.msra.mxu1 %v18183_v26  ;;  %v5608_v13 = vadd.f32 %v5585_v22, %v20530_v39  ;;  %v15812_v18 = vpop.f32.mrb[37].mxu0  ;;  %v7246_v39 = vpack.c.bf16 %v7231_v49, %v7230_v7  ;;  %v18186_v26 = vld [vmem:[%s22725_s3 + $0x160] sm:$0xff]  }
 0x56b   : > { %16318 = vmatprep.subr.bf16.mxu1 %v22787_v33  ;;  %v5588_v32 = vpop.f32.mrb[38].mxu0 }
 0x56c   : > { %v20712_v52 = vpop.f32.mrb[48].mxu1  ;;  %v15813_v46 = vpop.f32.mrb[39].mxu0  ;;  %v20715_v6 = vadd.f32 %v20648_v60, %v5608_v13  ;;  %v7234_v13 = vld [vmem:[#allocation3 + $0x5f] sm:$0xff] }
 0x56d   : > { %v15914_v56 = vpop.f32.mrb[49].mxu1  ;;  %v7248_v32 = vpack.c.bf16 %v7235_v15, %v7234_v13  ;;  %v7033_v15 = vld [vmem:[#allocation3 + $0x66] sm:$0xff] }
 0x56e   : > { %v20717_v28 = vpop.f32.mrb[50].mxu1  ;;  %16063 = vmatmul.mubr.msk.bf16.gmra.mrb[144].mxu0 %vm386_vm3, %v6646_v21 }
 0x56f   : > { %v15915_v23 = vpop.f32.mrb[51].mxu1  ;;  %16114 = vmatprep.mubr.msk.bf16.mxu0 %vm18440_vm2, %v22787_v33 }
 0x570   : > { %v7237_v23 = vld [vmem:[#allocation3 + $0x77] sm:$0xff] }
 0x571   : > { %16165 = vmatmul.mubr.msk.bf16.gmra.mrb[168].mxu1 %vm386_vm3, %v7246_v39  ;;  %v5925_v1 = vpop.f32.mrb[40].mxu0 }
 0x572   : > { %16168 = vmatprep.mubr.msk.bf16.mxu1 %vm18440_vm2, %v22787_v33  ;;  %v5996_v60 = vadd.f32 %v5925_v1, %v20548_v20  ;;  %v15864_v16 = vpop.f32.mrb[41].mxu0  ;;  %v7232_v20 = vld [vmem:[#allocation3 + $0x4f] sm:$0xff] }
 0x573   : > { %v5928_v42 = vpop.f32.mrb[42].mxu0  ;;  %v7247_v24 = vpack.c.bf16 %v7233_v37, %v7232_v20  ;;  %v7030_v20 = vld [vmem:[#allocation3 + $0x4e] sm:$0xff] }
 0x574   : > { %v20726_v27 = vpop.f32.mrb[52].mxu1  ;;  %v5997_v30 = vadd.f32 %v5928_v42, %v20557_v57  ;;  %v15865_v12 = vpop.f32.mrb[43].mxu0  ;;  %v20733_v29 = vadd.f32 %v20664_v51, %v5996_v60  ;;  %v18185_v57 = vld [vmem:[%s22725_s3 + $0x158] sm:$0xff]  }
 0x575   : > { %v15918_v2 = vpop.f32.mrb[53].mxu1 }
 0x576   : > { %v20735_v59 = vpop.f32.mrb[54].mxu1  ;;  %16115 = vmatmul.mubr.msk.bf16.vlgmr.msra.gmra.mrb[148].mxu0 %vm386_vm3, %v7042_v8  ;;  %v20739_v53 = vadd.f32 %v20670_v9, %v5997_v30  ;;  %v7031_v30 = vld [vmem:[#allocation3 + $0x56] sm:$0xff] }
 0x577   : > { %v15919_v4 = vpop.f32.mrb[55].mxu1  ;;  %16118 = vmatprep.mubr.msk.bf16.mxu0 %vm18440_vm2, %v22787_v33  ;;  %16193 = vmatpush3.bf16.msra.mxu0 %v18184_v3 }
 0x578   : > { %16194 = vmatprep.subr.bf16.mxu0 %v22787_v33  ;;  %v7239_v4 = vld [vmem:[#allocation3 + $0x87] sm:$0xff] }
 0x579   : > { %16169 = vmatmul.mubr.msk.bf16.gmra.mrb[172].mxu1 %vm386_vm3, %v7247_v24  ;;  %v5933_v51 = vpop.f32.mrb[44].mxu0 }
 0x57a   : > { %16172 = vmatprep.mubr.msk.bf16.mxu1 %vm18440_vm2, %v22787_v33  ;;  %v5998_v9 = vadd.f32 %v5933_v51, %v20578_v55  ;;  %v15868_v47 = vpop.f32.mrb[45].mxu0  ;;  %v7045_v51 = vpack.c.bf16 %v7031_v30, %v7030_v20  ;;  %v7037_v20 = vld [vmem:[#allocation3 + $0x86] sm:$0xff] }
 0x57b   : > { %v5936_v17 = vpop.f32.mrb[46].mxu0  ;;  %16195 = vmatpush3.bf16.msra.mxu0 %v18185_v57  ;;  %v7238_v47 = vld [vmem:[#allocation3 + $0x7f] sm:$0xff] }
 0x57c   : > { %v20751_v45 = vpop.f32.mrb[56].mxu1  ;;  %v5999_v19 = vadd.f32 %v5936_v17, %v20584_v40  ;;  %v15869_v50 = vpop.f32.mrb[47].mxu0  ;;  %16196 = vmatprep.subr.bf16.mxu0 %v22787_v33  ;;  %v20759_v55 = vadd.f32 %v20689_v10, %v5998_v9  ;;  %v7029_v10 = vld [vmem:[#allocation3 + $0x46] sm:$0xff] }
 0x57d   : > { %v15922_v22 = vpop.f32.mrb[57].mxu1 }
 0x57e   : > { %v20761_v41 = vpop.f32.mrb[58].mxu1  ;;  %16119 = vmatmul.mubr.msk.bf16.gmra.mrb[152].mxu0 %vm386_vm3, %v7043_v48  ;;  %v20765_v49 = vadd.f32 %v20695_v54, %v5999_v19  ;;  %v7028_v54 = vld [vmem:[#allocation3 + $0x3e] sm:$0xff] }
 0x57f   : > { %v15923_v18 = vpop.f32.mrb[59].mxu1  ;;  %16122 = vmatprep.mubr.msk.bf16.mxu0 %vm18440_vm2, %v22787_v33  ;;  %16197 = vmatpush3.bf16.msra.mxu0 %v18186_v26  ;;  %v7044_v60 = vpack.c.bf16 %v7029_v10, %v7028_v54  ;;  %v7032_v22 = vld [vmem:[#allocation3 + $0x5e] sm:$0xff]  ;;  %v7035_v54 = vld [vmem:[#allocation3 + $0x76] sm:$0xff] }
 0x580   : > { %16276 = vmatprep.subr.bf16.mxu0 %v22787_v33  ;;  %v7241_v48 = vld [vmem:[#allocation3 + $0x97] sm:$0xff] }
 0x581   : > { %16173 = vmatmul.mubr.msk.bf16.gmra.mrb[176].mxu1 %vm386_vm3, %v7248_v32  ;;  %v5941_v40 = vpop.f32.mrb[48].mxu0  ;;  %v7046_v32 = vpack.c.bf16 %v7033_v15, %v7032_v22 }
 0x582   : > { %16176 = vmatprep.mubr.msk.bf16.mxu1 %vm18440_vm2, %v22787_v33  ;;  %v6000_v46 = vadd.f32 %v5941_v40, %v20598_v5  ;;  %v15872_v56 = vpop.f32.mrb[49].mxu0  ;;  %v7249_v5 = vpack.c.bf16 %v7237_v23, %v7236_v61 }
 0x583   : > { %v5944_v21 = vpop.f32.mrb[50].mxu0 }
 0x584   : > { %v20774_v7 = vpop.f32.mrb[60].mxu1  ;;  %v6001_v39 = vadd.f32 %v5944_v21, %v20604_v58  ;;  %v15873_v1 = vpop.f32.mrb[51].mxu0  ;;  %v20778_v16 = vadd.f32 %v20712_v52, %v6000_v46  ;;  %v7240_v46 = vld [vmem:[#allocation3 + $0x8f] sm:$0xff] }
 0x585   : > { %v15926_v44 = vpop.f32.mrb[61].mxu1 }
 0x586   : > { %v20780_v42 = vpop.f32.mrb[62].mxu1  ;;  %16123 = vmatmul.mubr.msk.bf16.gmra.mrb[156].mxu0 %vm386_vm3, %v7044_v60  ;;  %v20784_v3 = vadd.f32 %v20717_v28, %v6001_v39  ;;  %v7034_v44 = vld [vmem:[#allocation3 + $0x6e] sm:$0xff]  ;;  %v7243_v60 = vld [vmem:[#allocation3 + $0xa7] sm:$0xf] }
 0x587   : > { %v15927_v37 = vpop.f32.mrb[63].mxu1  ;;  %16126 = vmatprep.mubr.msk.bf16.mxu0 %vm18440_vm2, %v22787_v33 }
 0x589   : > { %16177 = vmatmul.mubr.msk.bf16.gmra.mrb[180].mxu1 %vm386_vm3, %v7249_v5  ;;  %v5949_v58 = vpop.f32.mrb[52].mxu0  ;;  %v7047_v5 = vpack.c.bf16 %v7035_v54, %v7034_v44 }
 0x58a   : > { %16180 = vmatprep.mubr.msk.bf16.mxu1 %vm18440_vm2, %v22787_v33  ;;  %v6002_v52 = vadd.f32 %v5949_v58, %v20616_v38  ;;  %v15876_v12 = vpop.f32.mrb[53].mxu0  ;;  %v7250_v38 = vpack.c.bf16 %v7239_v4, %v7238_v47 }
 0x58b   : > { %v5952_v2 = vpop.f32.mrb[54].mxu0 }
 0x58c   : > { %v20792_v8 = vpop.f32.mrb[64].mxu1  ;;  %v6003_v28 = vadd.f32 %v5952_v2, %v20622_v35  ;;  %v15877_v24 = vpop.f32.mrb[55].mxu0  ;;  %v20796_v43 = vadd.f32 %v20726_v27, %v6002_v52  ;;  %v7242_v52 = vld [vmem:[#allocation3 + $0x9f] sm:$0xff] }
 0x58d   : > { %v15930_v57 = vpop.f32.mrb[65].mxu1 }
 0x58e   : > { %v20798_v9 = vpop.f32.mrb[66].mxu1  ;;  %16127 = vmatmul.mubr.msk.bf16.gmra.mrb[160].mxu0 %vm386_vm3, %v7045_v51  ;;  %v20802_v63 = vadd.f32 %v20735_v59, %v6003_v28  ;;  %v7036_v57 = vld [vmem:[#allocation3 + $0x7e] sm:$0xff]  ;;  %v7631_v51 = vld [vmem:[#allocation3 + $0x32] sm:$0xff] }
 0x58f   : > { %v15931_v17 = vpop.f32.mrb[67].mxu1  ;;  %16130 = vmatprep.mubr.msk.bf16.mxu0 %vm18440_vm2, %v22787_v33 }
 0x591   : > { %16181 = vmatmul.mubr.msk.bf16.gmra.mrb[184].mxu1 %vm386_vm3, %v7250_v38  ;;  %v5957_v35 = vpop.f32.mrb[56].mxu0  ;;  %v7048_v38 = vpack.c.bf16 %v7037_v20, %v7036_v57 }
 0x592   : > { %16184 = vmatprep.mubr.msk.bf16.mxu1 %vm18440_vm2, %v22787_v33  ;;  %v6004_v27 = vadd.f32 %v5957_v35, %v20634_v11  ;;  %v15880_v26 = vpop.f32.mrb[57].mxu0  ;;  %v7251_v11 = vpack.c.bf16 %v7241_v48, %v7240_v46  ;;  %v18188_v48 = vld [vmem:[%s22725_s3 + $0x1a0] sm:$0xff]   ;;  %v7633_v46 = vld [vmem:[#allocation3 + $0x42] sm:$0xff] }
 0x593   : > { %v5960_v19 = vpop.f32.mrb[58].mxu0 }
 0x594   : > { %v20810_v50 = vpop.f32.mrb[68].mxu1  ;;  %v6005_v59 = vadd.f32 %v5960_v19, %v20640_v0  ;;  %v15881_v13 = vpop.f32.mrb[59].mxu0  ;;  %v20814_v40 = vadd.f32 %v20751_v45, %v6004_v27  ;;  %v7630_v27 = vld [vmem:[#allocation3 + $0x2a] sm:$0xff] }
 0x595   : > { %v15934_v18 = vpop.f32.mrb[69].mxu1  ;;  %v7648_v19 = vpack.c.bf16 %v7631_v51, %v7630_v27  ;;  %v7429_v51 = vld [vmem:[#allocation3 + $0x28] sm:$0xff] }
 0x596   : > { %v20816_v10 = vpop.f32.mrb[70].mxu1  ;;  %16131 = vmatmul.mubr.msk.bf16.gmra.mrb[164].mxu0 %vm386_vm3, %v7046_v32  ;;  %v20820_v21 = vadd.f32 %v20761_v41, %v6005_v59  ;;  %v7038_v32 = vld [vmem:[#allocation3 + $0x8e] sm:$0xff]  ;;  %v7637_v27 = vld [vmem:[#allocation3 + $0x62] sm:$0xff] }
 0x597   : > { %v15935_v56 = vpop.f32.mrb[71].mxu1  ;;  %16134 = vmatprep.mubr.msk.bf16.mxu0 %vm18440_vm2, %v22787_v33 }
 0x599   : > { %16185 = vmatmul.mubr.msk.bf16.gmra.mrb[88].mxu1 %vm386_vm3, %v7251_v11  ;;  %v5965_v0 = vpop.f32.mrb[60].mxu0 }
 0x59a   : > { %16188 = vmatprep.mubr.msk.bf16.mxu1 %vm18440_vm2, %v22787_v33  ;;  %v6006_v45 = vadd.f32 %v5965_v0, %v20652_v62  ;;  %v15884_v23 = vpop.f32.mrb[61].mxu0  ;;  %v7252_v62 = vpack.c.bf16 %v7243_v60, %v7242_v52  ;;  %v7635_v52 = vld [vmem:[#allocation3 + $0x52] sm:$0xff] }
 0x59b   : > { %v5968_v39 = vpop.f32.mrb[62].mxu0 }
 0x59c   : > { %v20828_v1 = vpop.f32.mrb[72].mxu1  ;;  %v6007_v41 = vadd.f32 %v5968_v39, %v20656_v25  ;;  %v15885_v61 = vpop.f32.mrb[63].mxu0  ;;  %v20832_v58 = vadd.f32 %v20774_v7, %v6006_v45  ;;  %v7632_v39 = vld [vmem:[#allocation3 + $0x3a] sm:$0xff] }
 0x59d   : > { %v15938_v37 = vpop.f32.mrb[73].mxu1  ;;  %v7649_v60 = vpack.c.bf16 %v7633_v46, %v7632_v39  ;;  %v7431_v46 = vld [vmem:[#allocation3 + $0x38] sm:$0xff] }
 0x59e   : > { %v6194_v30 = vpop.f32.mrb[74].mxu1  ;;  %16135 = vmatmul.mubr.msk.bf16.gmra.mrb[168].mxu0 %vm386_vm3, %v7047_v5  ;;  %v20836_v2 = vadd.f32 %v20780_v42, %v6007_v41  ;;  %v7041_v41 = vld [vmem:[#allocation3 + $0xa6] sm:$0xf]  ;;  %v7639_v39 = vld [vmem:[#allocation3 + $0x72] sm:$0xff] }
 0x59f   : > { %v15939_v12 = vpop.f32.mrb[75].mxu1  ;;  %16138 = vmatprep.mubr.msk.bf16.mxu0 %vm18440_vm2, %v22787_v33 }
 0x5a1   : > { %16189 = vmatmul.mubr.msk.bf16.gmra.mrb[92].mxu1 %vm386_vm3, %v7252_v62  ;;  %v5973_v25 = vpop.f32.mrb[64].mxu0 }
 0x5a2   : > { %16240 = vmatprep.mubr.msk.bf16.mxu1 %vm18440_vm2, %v22787_v33  ;;  %v6008_v7 = vadd.f32 %v5973_v25, %v20668_v14  ;;  %v15888_v4 = vpop.f32.mrb[65].mxu0  ;;  %v18187_v14 = vld [vmem:[%s22725_s3 + $0x198] sm:$0xff]  }
 0x5a3   : > { %v5976_v28 = vpop.f32.mrb[66].mxu0  ;;  %v7634_v4 = vld [vmem:[#allocation3 + $0x4a] sm:$0xff] }
 0x5a4   : > { %v20844_v24 = vpop.f32.mrb[76].mxu1  ;;  %v6009_v42 = vadd.f32 %v5976_v28, %v20677_v36  ;;  %v15889_v47 = vpop.f32.mrb[67].mxu0  ;;  %v20848_v35 = vadd.f32 %v20792_v8, %v6008_v7  ;;  %v7039_v8 = vld [vmem:[#allocation3 + $0x96] sm:$0xff] }
 0x5a5   : > { %v15990_v17 = vpop.f32.mrb[77].mxu1  ;;  %v7049_v54 = vpack.c.bf16 %v7039_v8, %v7038_v32 }
 0x5a6   : > { %v20850_v15 = vpop.f32.mrb[78].mxu1  ;;  %16139 = vmatmul.mubr.msk.bf16.gmra.mrb[172].mxu0 %vm386_vm3, %v7048_v38  ;;  %v20857_v22 = vadd.f32 %v20798_v9, %v6009_v42  ;;  %v7428_v38 = vld [vmem:[#allocation3 + $0x20] sm:$0xff] }
 0x5a7   : > { %v15991_v26 = vpop.f32.mrb[79].mxu1  ;;  %16142 = vmatprep.mubr.msk.bf16.mxu0 %vm18440_vm2, %v22787_v33  ;;  %v7446_v8 = vpack.c.bf16 %v7429_v51, %v7428_v38  ;;  %v7640_v38 = vld [vmem:[#allocation3 + $0x7a] sm:$0xff] }
 0x5a9   : > { %16241 = vmatmul.mubr.msk.bf16.vlgmr.msra.gmra.mrb[96].mxu1 %vm386_vm3, %v7648_v19  ;;  %v5981_v36 = vpop.f32.mrb[68].mxu0 }
 0x5aa   : > { %16244 = vmatprep.mubr.msk.bf16.mxu1 %vm18440_vm2, %v22787_v33  ;;  %16319 = vmatpush3.bf16.msra.mxu1 %v18187_v14  ;;  %v6010_v59 = vadd.f32 %v5981_v36, %v20693_v31  ;;  %v15892_v13 = vpop.f32.mrb[69].mxu0  ;;  %v18189_v31 = vld [vmem:[%s22725_s3 + $0x1a8] sm:$0xff]   ;;  %v18190_v14 = vld [vmem:[%s22725_s3 + $0x180] sm:$0xff]  }
 0x5ab   : > { %16320 = vmatprep.subr.bf16.mxu1 %v22787_v33  ;;  %v5984_v9 = vpop.f32.mrb[70].mxu0 }
 0x5ac   : > { %v20869_v18 = vpop.f32.mrb[80].mxu1  ;;  %v6011_v56 = vadd.f32 %v5984_v9, %v20703_v34  ;;  %v15893_v11 = vpop.f32.mrb[71].mxu0  ;;  %v20873_v45 = vadd.f32 %v20810_v50, %v6010_v59 }
 0x5ad   : > { %v15994_v0 = vpop.f32.mrb[81].mxu1 }
 0x5ae   : > { %v20875_v23 = vpop.f32.mrb[82].mxu1  ;;  %16321 = vmatpush3.bf16.msra.mxu1 %v18188_v48  ;;  %16143 = vmatmul.mubr.msk.bf16.gmra.mrb[176].mxu0 %vm386_vm3, %v7049_v54  ;;  %v20883_v34 = vadd.f32 %v20816_v10, %v6011_v56  ;;  %v7040_v10 = vld [vmem:[#allocation3 + $0x9e] sm:$0xff]  ;;  %v7430_v54 = vld [vmem:[#allocation3 + $0x30] sm:$0xff] }
 0x5af   : > { %v15995_v44 = vpop.f32.mrb[83].mxu1  ;;  %16322 = vmatprep.subr.bf16.mxu1 %v22787_v33  ;;  %16146 = vmatprep.mubr.msk.bf16.mxu0 %vm18440_vm2, %v22787_v33  ;;  %v7050_v25 = vpack.c.bf16 %v7041_v41, %v7040_v10  ;;  %v7447_v41 = vpack.c.bf16 %v7431_v46, %v7430_v54 }
 0x5b1   : > { %16245 = vmatmul.mubr.msk.bf16.gmra.mrb[188].mxu1 %vm386_vm3, %v7649_v60  ;;  %v5989_v50 = vpop.f32.mrb[72].mxu0 }
 0x5b2   : > { %16248 = vmatprep.mubr.msk.bf16.mxu1 %vm18440_vm2, %v22787_v33  ;;  %16323 = vmatpush3.bf16.msra.mxu1 %v18189_v31  ;;  %v6012_v61 = vadd.f32 %v5989_v50, %v20715_v6  ;;  %v15896_v37 = vpop.f32.mrb[73].mxu0  ;;  %v7650_v6 = vpack.c.bf16 %v7635_v52, %v7634_v4  ;;  %v18192_v31 = vld [vmem:[%s22725_s3 + $0x190] sm:$0xff]  }
 0x5b3   : > { %16402 = vmatprep.subr.bf16.mxu1 %v22787_v33  ;;  %v5992_v5 = vpop.f32.mrb[74].mxu0  ;;  %v7638_v37 = vld [vmem:[#allocation3 + $0x6a] sm:$0xff] }
 0x5b4   : > { %v20892_v30 = vpop.f32.mrb[84].mxu1  ;;  %v15897_v12 = vpop.f32.mrb[75].mxu0  ;;  %v20895_v20 = vadd.f32 %v20828_v1, %v6012_v61  ;;  %v7652_v10 = vpack.c.bf16 %v7639_v39, %v7638_v37  ;;  %v7437_v39 = vld [vmem:[#allocation3 + $0x68] sm:$0xff] }
 0x5b5   : > { %v15998_v62 = vpop.f32.mrb[85].mxu1 }
 0x5b6   : > { %v20897_v7 = vpop.f32.mrb[86].mxu1  ;;  %16147 = vmatmul.mubr.msk.bf16.gmra.mrb[180].mxu0 %vm386_vm3, %v7050_v25 }
 0x5b7   : > { %v15999_v28 = vpop.f32.mrb[87].mxu1  ;;  %16198 = vmatprep.mubr.msk.bf16.mxu0 %vm18440_vm2, %v22787_v33 }
 0x5b8   : > { %v7641_v28 = vld [vmem:[#allocation3 + $0x82] sm:$0xff] }
 0x5b9   : > { %16249 = vmatmul.mubr.msk.bf16.gmra.mrb[192].mxu1 %vm386_vm3, %v7650_v6  ;;  %v6329_v57 = vpop.f32.mrb[76].mxu0 }
 0x5ba   : > { %16252 = vmatprep.mubr.msk.bf16.mxu1 %vm18440_vm2, %v22787_v33  ;;  %v6400_v1 = vadd.f32 %v6329_v57, %v20733_v29  ;;  %v15948_v42 = vpop.f32.mrb[77].mxu0  ;;  %v7636_v29 = vld [vmem:[#allocation3 + $0x5a] sm:$0xff] }
 0x5bb   : > { %v6332_v47 = vpop.f32.mrb[78].mxu0  ;;  %v7651_v9 = vpack.c.bf16 %v7637_v27, %v7636_v29  ;;  %v7434_v29 = vld [vmem:[#allocation3 + $0x50] sm:$0xff] }
 0x5bc   : > { %v20906_v17 = vpop.f32.mrb[100].mxu1  ;;  %v6401_v26 = vadd.f32 %v6332_v47, %v20739_v53  ;;  %v15949_v19 = vpop.f32.mrb[79].mxu0  ;;  %v20913_v48 = vadd.f32 %v20844_v24, %v6400_v1  ;;  %v18191_v53 = vld [vmem:[%s22725_s3 + $0x188] sm:$0xff]  }
 0x5bd   : > { %v16002_v36 = vpop.f32.mrb[101].mxu1 }
 0x5be   : > { %v20915_v59 = vpop.f32.mrb[102].mxu1  ;;  %16199 = vmatmul.mubr.msk.bf16.vlgmr.msra.gmra.mrb[184].mxu0 %vm386_vm3, %v7446_v8  ;;  %v20919_v32 = vadd.f32 %v20850_v15, %v6401_v26  ;;  %v7435_v26 = vld [vmem:[#allocation3 + $0x58] sm:$0xff] }
 0x5bf   : > { %v16003_v13 = vpop.f32.mrb[103].mxu1  ;;  %16202 = vmatprep.mubr.msk.bf16.mxu0 %vm18440_vm2, %v22787_v33  ;;  %16277 = vmatpush3.bf16.msra.mxu0 %v18190_v14 }
 0x5c0   : > { %16278 = vmatprep.subr.bf16.mxu0 %v22787_v33  ;;  %v7643_v13 = vld [vmem:[#allocation3 + $0x92] sm:$0xff] }
 0x5c1   : > { %16253 = vmatmul.mubr.msk.bf16.gmra.mrb[196].mxu1 %vm386_vm3, %v7651_v9  ;;  %v6337_v24 = vpop.f32.mrb[80].mxu0 }
 0x5c2   : > { %16256 = vmatprep.mubr.msk.bf16.mxu1 %vm18440_vm2, %v22787_v33  ;;  %v6402_v15 = vadd.f32 %v6337_v24, %v20759_v55  ;;  %v15952_v56 = vpop.f32.mrb[81].mxu0  ;;  %v7449_v24 = vpack.c.bf16 %v7435_v26, %v7434_v29  ;;  %v7441_v29 = vld [vmem:[#allocation3 + $0x88] sm:$0xff] }
 0x5c3   : > { %v6340_v11 = vpop.f32.mrb[82].mxu0  ;;  %16279 = vmatpush3.bf16.msra.mxu0 %v18191_v53  ;;  %v7642_v56 = vld [vmem:[#allocation3 + $0x8a] sm:$0xff] }
 0x5c4   : > { %v20931_v0 = vpop.f32.mrb[104].mxu1  ;;  %v6403_v44 = vadd.f32 %v6340_v11, %v20765_v49  ;;  %v15953_v60 = vpop.f32.mrb[83].mxu0  ;;  %16280 = vmatprep.subr.bf16.mxu0 %v22787_v33  ;;  %v20939_v55 = vadd.f32 %v20869_v18, %v6402_v15  ;;  %v7433_v18 = vld [vmem:[#allocation3 + $0x48] sm:$0xff] }
 0x5c5   : > { %v16006_v50 = vpop.f32.mrb[105].mxu1 }
 0x5c6   : > { %v20941_v61 = vpop.f32.mrb[106].mxu1  ;;  %16203 = vmatmul.mubr.msk.bf16.gmra.mrb[188].mxu0 %vm386_vm3, %v7447_v41  ;;  %v20945_v52 = vadd.f32 %v20875_v23, %v6403_v44  ;;  %v7432_v23 = vld [vmem:[#allocation3 + $0x40] sm:$0xff] }
 0x5c7   : > { %v16007_v5 = vpop.f32.mrb[107].mxu1  ;;  %16206 = vmatprep.mubr.msk.bf16.mxu0 %vm18440_vm2, %v22787_v33  ;;  %16281 = vmatpush3.bf16.msra.mxu0 %v18192_v31  ;;  %v7448_v1 = vpack.c.bf16 %v7433_v18, %v7432_v23  ;;  %v7436_v50 = vld [vmem:[#allocation3 + $0x60] sm:$0xff]  ;;  %v7439_v23 = vld [vmem:[#allocation3 + $0x78] sm:$0xff] }
 0x5c8   : > { %16360 = vmatprep.subr.bf16.mxu0 %v22787_v33  ;;  %v7645_v41 = vld [vmem:[#allocation3 + $0xa2] sm:$0xff] }
 0x5c9   : > { %16257 = vmatmul.mubr.msk.bf16.gmra.mrb[200].mxu1 %vm386_vm3, %v7652_v10  ;;  %v6345_v49 = vpop.f32.mrb[84].mxu0  ;;  %v7450_v10 = vpack.c.bf16 %v7437_v39, %v7436_v50 }
 0x5ca   : > { %16260 = vmatprep.mubr.msk.bf16.mxu1 %vm18440_vm2, %v22787_v33  ;;  %v6404_v12 = vadd.f32 %v6345_v49, %v20778_v16  ;;  %v15956_v62 = vpop.f32.mrb[85].mxu0  ;;  %v7653_v16 = vpack.c.bf16 %v7641_v28, %v7640_v38 }
 0x5cb   : > { %v6348_v25 = vpop.f32.mrb[86].mxu0 }
 0x5cc   : > { %v20954_v4 = vpop.f32.mrb[108].mxu1  ;;  %v6405_v6 = vadd.f32 %v6348_v25, %v20784_v3  ;;  %v15957_v57 = vpop.f32.mrb[87].mxu0  ;;  %v20958_v42 = vadd.f32 %v20892_v30, %v6404_v12  ;;  %v7644_v12 = vld [vmem:[#allocation3 + $0x9a] sm:$0xff] }
 0x5cd   : > { %v16010_v51 = vpop.f32.mrb[109].mxu1 }
 0x5ce   : > { %v20960_v47 = vpop.f32.mrb[110].mxu1  ;;  %16207 = vmatmul.mubr.msk.bf16.gmra.mrb[192].mxu0 %vm386_vm3, %v7448_v1  ;;  %v20964_v14 = vadd.f32 %v20897_v7, %v6405_v6  ;;  %v7438_v51 = vld [vmem:[#allocation3 + $0x70] sm:$0xff] }
 0x5cf   : > { %v16011_v27 = vpop.f32.mrb[111].mxu1  ;;  %16210 = vmatprep.mubr.msk.bf16.mxu0 %vm18440_vm2, %v22787_v33  ;;  %v7646_v1 = vld [vmem:[#allocation3 + $0xaa] sm:$0xff] }
 0x5d1   : > { %16261 = vmatmul.mubr.msk.bf16.gmra.mrb[204].mxu1 %vm386_vm3, %v7653_v16  ;;  %v6353_v3 = vpop.f32.mrb[88].mxu0 }
 0x5d2   : > { %16264 = vmatprep.mubr.msk.bf16.mxu1 %vm18440_vm2, %v22787_v33  ;;  %v6406_v30 = vadd.f32 %v6353_v3, %v20796_v43  ;;  %v15960_v19 = vpop.f32.mrb[89].mxu0  ;;  %v7654_v43 = vpack.c.bf16 %v7643_v13, %v7642_v56  ;;  %v7451_v3 = vpack.c.bf16 %v7439_v23, %v7438_v51 }
 0x5d3   : > { %v6356_v36 = vpop.f32.mrb[90].mxu0 }
 0x5d4   : > { %v20972_v8 = vpop.f32.mrb[112].mxu1  ;;  %v6407_v7 = vadd.f32 %v6356_v36, %v20802_v63  ;;  %v15961_v9 = vpop.f32.mrb[91].mxu0  ;;  %v20976_v46 = vadd.f32 %v20906_v17, %v6406_v30 }
 0x5d5   : > { %v16014_v53 = vpop.f32.mrb[113].mxu1 }
 0x5d6   : > { %v20978_v15 = vpop.f32.mrb[114].mxu1  ;;  %16211 = vmatmul.mubr.msk.bf16.gmra.mrb[196].mxu0 %vm386_vm3, %v7449_v24  ;;  %v20982_v54 = vadd.f32 %v20915_v59, %v6407_v7  ;;  %v7440_v53 = vld [vmem:[#allocation3 + $0x80] sm:$0xff]  ;;  %v8035_v24 = vld [vmem:[#allocation3 + $0x34] sm:$0xff] }
 0x5d7   : > { %v16015_v11 = vpop.f32.mrb[115].mxu1  ;;  %16214 = vmatprep.mubr.msk.bf16.mxu0 %vm18440_vm2, %v22787_v33 }
 0x5d9   : > { %16265 = vmatmul.mubr.msk.bf16.gmra.mrb[208].mxu1 %vm386_vm3, %v7654_v43  ;;  %v6361_v63 = vpop.f32.mrb[92].mxu0  ;;  %v7452_v43 = vpack.c.bf16 %v7441_v29, %v7440_v53 }
 0x5da   : > { %16268 = vmatprep.mubr.msk.bf16.mxu1 %vm18440_vm2, %v22787_v33  ;;  %v6408_v17 = vadd.f32 %v6361_v63, %v20814_v40  ;;  %v15964_v31 = vpop.f32.mrb[93].mxu0  ;;  %v7655_v40 = vpack.c.bf16 %v7645_v41, %v7644_v12  ;;  %v18194_v41 = vld [vmem:[%s22725_s3 + $0x1d0] sm:$0xff]  }
 0x5db   : > { %v6364_v44 = vpop.f32.mrb[94].mxu0  ;;  %v8037_v12 = vld [vmem:[#allocation3 + $0x44] sm:$0xff] }
 0x5dc   : > { %v20990_v60 = vpop.f32.mrb[116].mxu1  ;;  %v6409_v59 = vadd.f32 %v6364_v44, %v20820_v21  ;;  %v15965_v37 = vpop.f32.mrb[95].mxu0  ;;  %v20994_v49 = vadd.f32 %v20931_v0, %v6408_v17  ;;  %v8034_v17 = vld [vmem:[#allocation3 + $0x2c] sm:$0xff] }
 0x5dd   : > { %v16018_v5 = vpop.f32.mrb[117].mxu1  ;;  %v8052_v44 = vpack.c.bf16 %v8035_v24, %v8034_v17  ;;  %v7833_v24 = vld [vmem:[#allocation3 + $0x33] sm:$0xff]  ;;  %v8041_v17 = vld [vmem:[#allocation3 + $0x64] sm:$0xff] }
 0x5de   : > { %v20996_v18 = vpop.f32.mrb[118].mxu1  ;;  %16215 = vmatmul.mubr.msk.bf16.gmra.mrb[200].mxu0 %vm386_vm3, %v7450_v10  ;;  %v21000_v25 = vadd.f32 %v20941_v61, %v6409_v59  ;;  %v7647_v61 = vld [vmem:[#allocation3 + $0xb2] sm:$0xf] }
 0x5df   : > { %v16019_v62 = vpop.f32.mrb[119].mxu1  ;;  %16218 = vmatprep.mubr.msk.bf16.mxu0 %vm18440_vm2, %v22787_v33  ;;  %v7442_v10 = vld [vmem:[#allocation3 + $0x90] sm:$0xff] }
 0x5e1   : > { %16269 = vmatmul.mubr.msk.bf16.gmra.mrb[212].mxu1 %vm386_vm3, %v7655_v40  ;;  %v6369_v21 = vpop.f32.mrb[96].mxu0 }
 0x5e2   : > { %16272 = vmatprep.mubr.msk.bf16.mxu1 %vm18440_vm2, %v22787_v33  ;;  %v6410_v0 = vadd.f32 %v6369_v21, %v20832_v58  ;;  %v15968_v28 = vpop.f32.mrb[97].mxu0  ;;  %v7656_v58 = vpack.c.bf16 %v7647_v61, %v7646_v1  ;;  %v7445_v61 = vld [vmem:[#allocation3 + $0xa8] sm:$0xf] }
 0x5e3   : > { %v6372_v6 = vpop.f32.mrb[98].mxu0 }
 0x5e4   : > { %v21008_v57 = vpop.f32.mrb[120].mxu1  ;;  %v6411_v38 = vadd.f32 %v6372_v6, %v20836_v2  ;;  %v15969_v27 = vpop.f32.mrb[99].mxu0  ;;  %v21012_v26 = vadd.f32 %v20954_v4, %v6410_v0  ;;  %v8036_v6 = vld [vmem:[#allocation3 + $0x3c] sm:$0xff] }
 0x5e5   : > { %v16022_v16 = vpop.f32.mrb[121].mxu1  ;;  %v8053_v1 = vpack.c.bf16 %v8037_v12, %v8036_v6  ;;  %v7835_v12 = vld [vmem:[#allocation3 + $0x43] sm:$0xff]  ;;  %v8043_v6 = vld [vmem:[#allocation3 + $0x74] sm:$0xff] }
 0x5e6   : > { %v6598_v30 = vpop.f32.mrb[122].mxu1  ;;  %16219 = vmatmul.mubr.msk.bf16.gmra.mrb[204].mxu0 %vm386_vm3, %v7451_v3  ;;  %v21016_v36 = vadd.f32 %v20960_v47, %v6411_v38 }
 0x5e7   : > { %v16023_v19 = vpop.f32.mrb[123].mxu1  ;;  %16222 = vmatprep.mubr.msk.bf16.mxu0 %vm18440_vm2, %v22787_v33  ;;  %v8039_v30 = vld [vmem:[#allocation3 + $0x54] sm:$0xff] }
 0x5e9   : > { %16273 = vmatmul.mubr.msk.bf16.gmra.mrb[216].mxu1 %vm386_vm3, %v7656_v58  ;;  %v6377_v2 = vpop.f32.mrb[100].mxu0 }
 0x5ea   : > { %16324 = vmatprep.mubr.msk.bf16.mxu1 %vm18440_vm2, %v22787_v33  ;;  %v6412_v4 = vadd.f32 %v6377_v2, %v20848_v35  ;;  %v15972_v13 = vpop.f32.mrb[101].mxu0  ;;  %v18193_v35 = vld [vmem:[%s22725_s3 + $0x1c8] sm:$0xff]  }
 0x5eb   : > { %v6380_v7 = vpop.f32.mrb[102].mxu0  ;;  %v8038_v13 = vld [vmem:[#allocation3 + $0x4c] sm:$0xff] }
 0x5ec   : > { %v21024_v9 = vpop.f32.mrb[124].mxu1  ;;  %v6413_v47 = vadd.f32 %v6380_v7, %v20857_v22  ;;  %v15973_v56 = vpop.f32.mrb[103].mxu0  ;;  %v21028_v63 = vadd.f32 %v20972_v8, %v6412_v4  ;;  %v7443_v8 = vld [vmem:[#allocation3 + $0x98] sm:$0xff] }
 0x5ed   : > { %v16074_v11 = vpop.f32.mrb[125].mxu1  ;;  %v7453_v23 = vpack.c.bf16 %v7443_v8, %v7442_v10 }
 0x5ee   : > { %v21030_v39 = vpop.f32.mrb[126].mxu1  ;;  %16223 = vmatmul.mubr.msk.bf16.gmra.mrb[208].mxu0 %vm386_vm3, %v7452_v43  ;;  %v21037_v50 = vadd.f32 %v20978_v15, %v6413_v47  ;;  %v7832_v43 = vld [vmem:[#allocation3 + $0x2b] sm:$0xff] }
 0x5ef   : > { %v16075_v31 = vpop.f32.mrb[127].mxu1  ;;  %16226 = vmatprep.mubr.msk.bf16.mxu0 %vm18440_vm2, %v22787_v33  ;;  %v7850_v8 = vpack.c.bf16 %v7833_v24, %v7832_v43  ;;  %v8044_v43 = vld [vmem:[#allocation3 + $0x7c] sm:$0xff] }
 0x5f1   : > { %16325 = vmatmul.mubr.msk.bf16.vlgmr.msra.gmra.mrb[220].mxu1 %vm386_vm3, %v8052_v44  ;;  %v6385_v22 = vpop.f32.mrb[104].mxu0 }
 0x5f2   : > { %16328 = vmatprep.mubr.msk.bf16.mxu1 %vm18440_vm2, %v22787_v33  ;;  %16403 = vmatpush3.bf16.msra.mxu1 %v18193_v35  ;;  %v6414_v59 = vadd.f32 %v6385_v22, %v20873_v45  ;;  %v15976_v37 = vpop.f32.mrb[105].mxu0  ;;  %v18195_v45 = vld [vmem:[%s22725_s3 + $0x1d8] sm:$0xff]   ;;  %v18196_v35 = vld [vmem:[%s22725_s3 + $0x1b0] sm:$0xff]  }
 0x5f3   : > { %16404 = vmatprep.subr.bf16.mxu1 %v22787_v33  ;;  %v6388_v15 = vpop.f32.mrb[106].mxu0 }
 0x5f4   : > { %v21049_v5 = vpop.f32.mrb[128].mxu1  ;;  %v6415_v62 = vadd.f32 %v6388_v15, %v20883_v34  ;;  %v15977_v40 = vpop.f32.mrb[107].mxu0  ;;  %v21053_v0 = vadd.f32 %v20990_v60, %v6414_v59 }
 0x5f5   : > { %v16078_v21 = vpop.f32.mrb[129].mxu1 }
 0x5f6   : > { %v21055_v28 = vpop.f32.mrb[130].mxu1  ;;  %16405 = vmatpush3.bf16.msra.mxu1 %v18194_v41  ;;  %16227 = vmatmul.mubr.msk.bf16.gmra.mrb[212].mxu0 %vm386_vm3, %v7453_v23  ;;  %v21063_v34 = vadd.f32 %v20996_v18, %v6415_v62  ;;  %v7444_v18 = vld [vmem:[#allocation3 + $0xa0] sm:$0xff] }
 0x5f7   : > { %v16079_v51 = vpop.f32.mrb[131].mxu1  ;;  %16406 = vmatprep.subr.bf16.mxu1 %v22787_v33  ;;  %16230 = vmatprep.mubr.msk.bf16.mxu0 %vm18440_vm2, %v22787_v33  ;;  %v7454_v2 = vpack.c.bf16 %v7445_v61, %v7444_v18  ;;  %v7834_v23 = vld [vmem:[#allocation3 + $0x3b] sm:$0xff] }
 0x5f8   : > { %v7851_v61 = vpack.c.bf16 %v7835_v12, %v7834_v23 }
 0x5f9   : > { %16329 = vmatmul.mubr.msk.bf16.gmra.mrb[224].mxu1 %vm386_vm3, %v8053_v1  ;;  %v6393_v60 = vpop.f32.mrb[108].mxu0 }
 0x5fa   : > { %16332 = vmatprep.mubr.msk.bf16.mxu1 %vm18440_vm2, %v22787_v33  ;;  %16407 = vmatpush3.bf16.msra.mxu1 %v18195_v45  ;;  %v6416_v38 = vadd.f32 %v6393_v60, %v20895_v20  ;;  %v15980_v27 = vpop.f32.mrb[109].mxu0  ;;  %v8054_v20 = vpack.c.bf16 %v8039_v30, %v8038_v13  ;;  %v18198_v45 = vld [vmem:[%s22725_s3 + $0x1c0] sm:$0xff]  }
 0x5fb   : > { %16486 = vmatprep.subr.bf16.mxu1 %v22787_v33  ;;  %v6396_v16 = vpop.f32.mrb[110].mxu0  ;;  %v8042_v27 = vld [vmem:[#allocation3 + $0x6c] sm:$0xff] }
 0x5fc   : > { %v21072_v3 = vpop.f32.mrb[132].mxu1  ;;  %v15981_v19 = vpop.f32.mrb[111].mxu0  ;;  %v21075_v29 = vadd.f32 %v21008_v57, %v6416_v38  ;;  %v8056_v18 = vpack.c.bf16 %v8043_v6, %v8042_v27  ;;  %v7841_v6 = vld [vmem:[#allocation3 + $0x73] sm:$0xff] }
 0x5fd   : > { %v16082_v58 = vpop.f32.mrb[133].mxu1 }
 0x5fe   : > { %v21077_v4 = vpop.f32.mrb[134].mxu1  ;;  %16231 = vmatmul.mubr.msk.bf16.gmra.mrb[216].mxu0 %vm386_vm3, %v7454_v2 }
 0x5ff   : > { %v16083_v7 = vpop.f32.mrb[135].mxu1  ;;  %16282 = vmatprep.mubr.msk.bf16.mxu0 %vm18440_vm2, %v22787_v33 }
 0x600   : > { %v8045_v7 = vld [vmem:[#allocation3 + $0x84] sm:$0xff] }
 0x601   : > { %16333 = vmatmul.mubr.msk.bf16.gmra.mrb[228].mxu1 %vm386_vm3, %v8054_v20  ;;  %v6733_v53 = vpop.f32.mrb[112].mxu0 }
 0x602   : > { %16336 = vmatprep.mubr.msk.bf16.mxu1 %vm18440_vm2, %v22787_v33  ;;  %v6804_v57 = vadd.f32 %v6733_v53, %v20913_v48  ;;  %v16032_v47 = vpop.f32.mrb[113].mxu0  ;;  %v8040_v48 = vld [vmem:[#allocation3 + $0x5c] sm:$0xff] }
 0x603   : > { %v6736_v56 = vpop.f32.mrb[114].mxu0  ;;  %v8055_v15 = vpack.c.bf16 %v8041_v17, %v8040_v48  ;;  %v7838_v48 = vld [vmem:[#allocation3 + $0x5b] sm:$0xff] }
 0x604   : > { %v21086_v11 = vpop.f32.mrb[136].mxu1  ;;  %v6805_v31 = vadd.f32 %v6736_v56, %v20919_v32  ;;  %v16033_v44 = vpop.f32.mrb[115].mxu0  ;;  %v21093_v41 = vadd.f32 %v21024_v9, %v6804_v57  ;;  %v18197_v32 = vld [vmem:[%s22725_s3 + $0x1b8] sm:$0xff]  }
 0x605   : > { %v16086_v22 = vpop.f32.mrb[137].mxu1 }
 0x606   : > { %v21095_v59 = vpop.f32.mrb[138].mxu1  ;;  %16283 = vmatmul.mubr.msk.bf16.vlgmr.msra.gmra.mrb[220].mxu0 %vm386_vm3, %v7850_v8  ;;  %v21099_v10 = vadd.f32 %v21030_v39, %v6805_v31  ;;  %v7839_v31 = vld [vmem:[#allocation3 + $0x63] sm:$0xff] }
 0x607   : > { %v16087_v37 = vpop.f32.mrb[139].mxu1  ;;  %16286 = vmatprep.mubr.msk.bf16.mxu0 %vm18440_vm2, %v22787_v33  ;;  %16361 = vmatpush3.bf16.msra.mxu0 %v18196_v35 }
 0x608   : > { %16362 = vmatprep.subr.bf16.mxu0 %v22787_v33  ;;  %v8047_v37 = vld [vmem:[#allocation3 + $0x94] sm:$0xff] }
 0x609   : > { %16337 = vmatmul.mubr.msk.bf16.gmra.mrb[232].mxu1 %vm386_vm3, %v8055_v15  ;;  %v6741_v9 = vpop.f32.mrb[116].mxu0 }
 0x60a   : > { %16340 = vmatprep.mubr.msk.bf16.mxu1 %vm18440_vm2, %v22787_v33  ;;  %v6806_v39 = vadd.f32 %v6741_v9, %v20939_v55  ;;  %v16036_v62 = vpop.f32.mrb[117].mxu0  ;;  %v7853_v9 = vpack.c.bf16 %v7839_v31, %v7838_v48  ;;  %v7845_v48 = vld [vmem:[#allocation3 + $0x93] sm:$0xff] }
 0x60b   : > { %v6744_v40 = vpop.f32.mrb[118].mxu0  ;;  %16363 = vmatpush3.bf16.msra.mxu0 %v18197_v32  ;;  %v8046_v62 = vld [vmem:[#allocation3 + $0x8c] sm:$0xff] }
 0x60c   : > { %v21111_v21 = vpop.f32.mrb[140].mxu1  ;;  %v6807_v51 = vadd.f32 %v6744_v40, %v20945_v52  ;;  %v16037_v1 = vpop.f32.mrb[119].mxu0  ;;  %16364 = vmatprep.subr.bf16.mxu0 %v22787_v33  ;;  %v21119_v55 = vadd.f32 %v21049_v5, %v6806_v39  ;;  %v7837_v5 = vld [vmem:[#allocation3 + $0x53] sm:$0xff] }
 0x60d   : > { %v16090_v60 = vpop.f32.mrb[141].mxu1 }
 0x60e   : > { %v21121_v38 = vpop.f32.mrb[142].mxu1  ;;  %16287 = vmatmul.mubr.msk.bf16.gmra.mrb[224].mxu0 %vm386_vm3, %v7851_v61  ;;  %v21125_v30 = vadd.f32 %v21055_v28, %v6807_v51  ;;  %v7836_v28 = vld [vmem:[#allocation3 + $0x4b] sm:$0xff] }
 0x60f   : > { %v16091_v16 = vpop.f32.mrb[143].mxu1  ;;  %16290 = vmatprep.mubr.msk.bf16.mxu0 %vm18440_vm2, %v22787_v33  ;;  %16365 = vmatpush3.bf16.msra.mxu0 %v18198_v45  ;;  %v7852_v57 = vpack.c.bf16 %v7837_v5, %v7836_v28  ;;  %v7840_v60 = vld [vmem:[#allocation3 + $0x6b] sm:$0xff]  ;;  %v7843_v28 = vld [vmem:[#allocation3 + $0x83] sm:$0xff] }
 0x610   : > { %16444 = vmatprep.subr.bf16.mxu0 %v22787_v33  ;;  %v8049_v61 = vld [vmem:[#allocation3 + $0xa4] sm:$0xff] }
 0x611   : > { %16341 = vmatmul.mubr.msk.bf16.gmra.mrb[236].mxu1 %vm386_vm3, %v8056_v18  ;;  %v6749_v52 = vpop.f32.mrb[120].mxu0  ;;  %v7854_v18 = vpack.c.bf16 %v7841_v6, %v7840_v60 }
 0x612   : > { %16344 = vmatprep.mubr.msk.bf16.mxu1 %vm18440_vm2, %v22787_v33  ;;  %v6808_v19 = vadd.f32 %v6749_v52, %v20958_v42  ;;  %v16040_v58 = vpop.f32.mrb[121].mxu0  ;;  %v8057_v42 = vpack.c.bf16 %v8045_v7, %v8044_v43 }
 0x613   : > { %v6752_v2 = vpop.f32.mrb[122].mxu0 }
 0x614   : > { %v21134_v13 = vpop.f32.mrb[144].mxu1  ;;  %v6809_v20 = vadd.f32 %v6752_v2, %v20964_v14  ;;  %v16041_v53 = vpop.f32.mrb[123].mxu0  ;;  %v21138_v47 = vadd.f32 %v21072_v3, %v6808_v19  ;;  %v8048_v19 = vld [vmem:[#allocation3 + $0x9c] sm:$0xff] }
 0x615   : > { %v16094_v24 = vpop.f32.mrb[145].mxu1 }
 0x616   : > { %v21140_v56 = vpop.f32.mrb[146].mxu1  ;;  %16291 = vmatmul.mubr.msk.bf16.gmra.mrb[228].mxu0 %vm386_vm3, %v7852_v57  ;;  %v21144_v35 = vadd.f32 %v21077_v4, %v6809_v20  ;;  %v7842_v24 = vld [vmem:[#allocation3 + $0x7b] sm:$0xff]  ;;  %v8051_v57 = vld [vmem:[#allocation3 + $0xb4] sm:$0xf] }
 0x617   : > { %v16095_v17 = vpop.f32.mrb[147].mxu1  ;;  %16294 = vmatprep.mubr.msk.bf16.mxu0 %vm18440_vm2, %v22787_v33 }
 0x619   : > { %16345 = vmatmul.mubr.msk.bf16.gmra.mrb[240].mxu1 %vm386_vm3, %v8057_v42  ;;  %v6757_v14 = vpop.f32.mrb[124].mxu0  ;;  %v7855_v42 = vpack.c.bf16 %v7843_v28, %v7842_v24 }
 0x61a   : > { %16348 = vmatprep.mubr.msk.bf16.mxu1 %vm18440_vm2, %v22787_v33  ;;  %v6810_v3 = vadd.f32 %v6757_v14, %v20976_v46  ;;  %v16044_v44 = vpop.f32.mrb[125].mxu0  ;;  %v8058_v46 = vpack.c.bf16 %v8047_v37, %v8046_v62 }
 0x61b   : > { %v6760_v22 = vpop.f32.mrb[126].mxu0 }
 0x61c   : > { %v21152_v8 = vpop.f32.mrb[148].mxu1  ;;  %v6811_v4 = vadd.f32 %v6760_v22, %v20982_v54  ;;  %v16045_v15 = vpop.f32.mrb[127].mxu0  ;;  %v21156_v12 = vadd.f32 %v21086_v11, %v6810_v3  ;;  %v8050_v3 = vld [vmem:[#allocation3 + $0xac] sm:$0xff] }
 0x61d   : > { %v16098_v32 = vpop.f32.mrb[149].mxu1 }
 0x61e   : > { %v21158_v39 = vpop.f32.mrb[150].mxu1  ;;  %16295 = vmatmul.mubr.msk.bf16.gmra.mrb[232].mxu0 %vm386_vm3, %v7853_v9  ;;  %v21162_v23 = vadd.f32 %v21095_v59, %v6811_v4  ;;  %v7844_v32 = vld [vmem:[#allocation3 + $0x8b] sm:$0xff]  ;;  %v8439_v9 = vld [vmem:[#allocation3 + $0x36] sm:$0xff] }
 0x61f   : > { %v16099_v40 = vpop.f32.mrb[151].mxu1  ;;  %16298 = vmatprep.mubr.msk.bf16.mxu0 %vm18440_vm2, %v22787_v33 }
 0x621   : > { %16349 = vmatmul.mubr.msk.bf16.gmra.mrb[244].mxu1 %vm386_vm3, %v8058_v46  ;;  %v6765_v54 = vpop.f32.mrb[128].mxu0  ;;  %v7856_v46 = vpack.c.bf16 %v7845_v48, %v7844_v32 }
 0x622   : > { %16352 = vmatprep.mubr.msk.bf16.mxu1 %vm18440_vm2, %v22787_v33  ;;  %v6812_v11 = vadd.f32 %v6765_v54, %v20994_v49  ;;  %v16048_v45 = vpop.f32.mrb[129].mxu0  ;;  %v8059_v49 = vpack.c.bf16 %v8049_v61, %v8048_v19  ;;  %v18200_v61 = vld [vmem:[%s22725_s3 + $0x200] sm:$0xff]   ;;  %v8441_v19 = vld [vmem:[#allocation3 + $0x46] sm:$0xff] }
 0x623   : > { %v6768_v51 = vpop.f32.mrb[130].mxu0 }
 0x624   : > { %v21170_v1 = vpop.f32.mrb[152].mxu1  ;;  %v6813_v59 = vadd.f32 %v6768_v51, %v21000_v25  ;;  %v16049_v27 = vpop.f32.mrb[131].mxu0  ;;  %v21174_v52 = vadd.f32 %v21111_v21, %v6812_v11  ;;  %v8438_v11 = vld [vmem:[#allocation3 + $0x2e] sm:$0xff] }
 0x625   : > { %v16102_v16 = vpop.f32.mrb[153].mxu1  ;;  %v8456_v51 = vpack.c.bf16 %v8439_v9, %v8438_v11  ;;  %v8237_v9 = vld [vmem:[#allocation3 + $0x35] sm:$0xff]  ;;  %v8445_v11 = vld [vmem:[#allocation3 + $0x66] sm:$0xff] }
 0x626   : > { %v21176_v5 = vpop.f32.mrb[154].mxu1  ;;  %16299 = vmatmul.mubr.msk.bf16.gmra.mrb[236].mxu0 %vm386_vm3, %v7854_v18  ;;  %v21180_v2 = vadd.f32 %v21121_v38, %v6813_v59  ;;  %v7846_v18 = vld [vmem:[#allocation3 + $0x9b] sm:$0xff] }
 0x627   : > { %v16103_v58 = vpop.f32.mrb[155].mxu1  ;;  %16302 = vmatprep.mubr.msk.bf16.mxu0 %vm18440_vm2, %v22787_v33 }
 0x629   : > { %16353 = vmatmul.mubr.msk.bf16.gmra.mrb[248].mxu1 %vm386_vm3, %v8059_v49  ;;  %v6773_v25 = vpop.f32.mrb[132].mxu0 }
 0x62a   : > { %16356 = vmatprep.mubr.msk.bf16.mxu1 %vm18440_vm2, %v22787_v33  ;;  %v6814_v21 = vadd.f32 %v6773_v25, %v21012_v26  ;;  %v16052_v7 = vpop.f32.mrb[133].mxu0  ;;  %v8060_v26 = vpack.c.bf16 %v8051_v57, %v8050_v3  ;;  %v8443_v3 = vld [vmem:[#allocation3 + $0x56] sm:$0xff] }
 0x62b   : > { %v6776_v20 = vpop.f32.mrb[134].mxu0 }
 0x62c   : > { %v21188_v53 = vpop.f32.mrb[156].mxu1  ;;  %v6815_v38 = vadd.f32 %v6776_v20, %v21016_v36  ;;  %v16053_v43 = vpop.f32.mrb[135].mxu0  ;;  %v21192_v14 = vadd.f32 %v21134_v13, %v6814_v21  ;;  %v8440_v20 = vld [vmem:[#allocation3 + $0x3e] sm:$0xff] }
 0x62d   : > { %v16106_v17 = vpop.f32.mrb[157].mxu1  ;;  %v8457_v57 = vpack.c.bf16 %v8441_v19, %v8440_v20  ;;  %v8239_v19 = vld [vmem:[#allocation3 + $0x45] sm:$0xff]  ;;  %v8447_v20 = vld [vmem:[#allocation3 + $0x76] sm:$0xff] }
 0x62e   : > { %v7002_v31 = vpop.f32.mrb[158].mxu1  ;;  %16303 = vmatmul.mubr.msk.bf16.gmra.mrb[240].mxu0 %vm386_vm3, %v7855_v42  ;;  %v21196_v22 = vadd.f32 %v21140_v56, %v6815_v38  ;;  %v7849_v38 = vld [vmem:[#allocation3 + $0xb3] sm:$0xf] }
 0x62f   : > { %v16107_v44 = vpop.f32.mrb[159].mxu1  ;;  %16306 = vmatprep.mubr.msk.bf16.mxu0 %vm18440_vm2, %v22787_v33 }
 0x631   : > { %16357 = vmatmul.mubr.msk.bf16.gmra.mrb[252].mxu1 %vm386_vm3, %v8060_v26  ;;  %v6781_v36 = vpop.f32.mrb[136].mxu0 }
 0x632   : > { %16408 = vmatprep.mubr.msk.bf16.mxu1 %vm18440_vm2, %v22787_v33  ;;  %v6816_v13 = vadd.f32 %v6781_v36, %v21028_v63  ;;  %v16056_v37 = vpop.f32.mrb[137].mxu0  ;;  %v18199_v63 = vld [vmem:[%s22725_s3 + $0x1f8] sm:$0xff]  }
 0x633   : > { %v6784_v4 = vpop.f32.mrb[138].mxu0  ;;  %v8442_v37 = vld [vmem:[#allocation3 + $0x4e] sm:$0xff] }
 0x634   : > { %v21204_v15 = vpop.f32.mrb[160].mxu1  ;;  %v6817_v56 = vadd.f32 %v6784_v4, %v21037_v50  ;;  %v16057_v62 = vpop.f32.mrb[139].mxu0  ;;  %v21208_v54 = vadd.f32 %v21152_v8, %v6816_v13  ;;  %v7847_v8 = vld [vmem:[#allocation3 + $0xa3] sm:$0xff] }
 0x635   : > { %v16158_v40 = vpop.f32.mrb[161].mxu1  ;;  %v7857_v28 = vpack.c.bf16 %v7847_v8, %v7846_v18 }
 0x636   : > { %v21210_v6 = vpop.f32.mrb[162].mxu1  ;;  %16307 = vmatmul.mubr.msk.bf16.gmra.mrb[244].mxu0 %vm386_vm3, %v7856_v46  ;;  %v21217_v60 = vadd.f32 %v21158_v39, %v6817_v56  ;;  %v8236_v46 = vld [vmem:[#allocation3 + $0x2d] sm:$0xff] }
 0x637   : > { %v16159_v45 = vpop.f32.mrb[163].mxu1  ;;  %16310 = vmatprep.mubr.msk.bf16.mxu0 %vm18440_vm2, %v22787_v33  ;;  %v8254_v8 = vpack.c.bf16 %v8237_v9, %v8236_v46  ;;  %v8448_v46 = vld [vmem:[#allocation3 + $0x7e] sm:$0xff] }
 0x639   : > { %16409 = vmatmul.mubr.msk.bf16.vlgmr.msra.gmra.mrb[0].mxu1 %vm386_vm3, %v8456_v51  ;;  %v6789_v50 = vpop.f32.mrb[140].mxu0 }
 0x63a   : > { %16412 = vmatprep.mubr.msk.bf16.mxu1 %vm18440_vm2, %v22787_v33  ;;  %16487 = vmatpush3.bf16.msra.mxu1 %v18199_v63  ;;  %v6818_v59 = vadd.f32 %v6789_v50, %v21053_v0  ;;  %v16060_v27 = vpop.f32.mrb[141].mxu0  ;;  %v18201_v0 = vld [vmem:[%s22725_s3 + $0x208] sm:$0xff]   ;;  %v18202_v63 = vld [vmem:[%s22725_s3 + $0x1e0] sm:$0xff]  }
 0x63b   : > { %16488 = vmatprep.subr.bf16.mxu1 %v22787_v33  ;;  %v6792_v39 = vpop.f32.mrb[142].mxu0 }
 0x63c   : > { %v21229_v16 = vpop.f32.mrb[164].mxu1  ;;  %v6819_v58 = vadd.f32 %v6792_v39, %v21063_v34  ;;  %v16061_v49 = vpop.f32.mrb[143].mxu0  ;;  %v21233_v21 = vadd.f32 %v21170_v1, %v6818_v59 }
 0x63d   : > { %v16162_v25 = vpop.f32.mrb[165].mxu1 }
 0x63e   : > { %v21235_v7 = vpop.f32.mrb[166].mxu1  ;;  %16489 = vmatpush3.bf16.msra.mxu1 %v18200_v61  ;;  %16311 = vmatmul.mubr.msk.bf16.gmra.mrb[248].mxu0 %vm386_vm3, %v7857_v28  ;;  %v21243_v34 = vadd.f32 %v21176_v5, %v6819_v58  ;;  %v7848_v5 = vld [vmem:[#allocation3 + $0xab] sm:$0xff]  ;;  %v8238_v28 = vld [vmem:[#allocation3 + $0x3d] sm:$0xff] }
 0x63f   : > { %v16163_v24 = vpop.f32.mrb[167].mxu1  ;;  %16490 = vmatprep.subr.bf16.mxu1 %v22787_v33  ;;  %16314 = vmatprep.mubr.msk.bf16.mxu0 %vm18440_vm2, %v22787_v33  ;;  %v7858_v36 = vpack.c.bf16 %v7849_v38, %v7848_v5  ;;  %v8255_v38 = vpack.c.bf16 %v8239_v19, %v8238_v28 }
 0x641   : > { %16413 = vmatmul.mubr.msk.bf16.gmra.mrb[4].mxu1 %vm386_vm3, %v8457_v57  ;;  %v6797_v1 = vpop.f32.mrb[144].mxu0 }
 0x642   : > { %16416 = vmatprep.mubr.msk.bf16.mxu1 %vm18440_vm2, %v22787_v33  ;;  %16491 = vmatpush3.bf16.msra.mxu1 %v18201_v0  ;;  %v6820_v43 = vadd.f32 %v6797_v1, %v21075_v29  ;;  %v16064_v17 = vpop.f32.mrb[145].mxu0  ;;  %v8458_v29 = vpack.c.bf16 %v8443_v3, %v8442_v37  ;;  %v18204_v0 = vld [vmem:[%s22725_s3 + $0x1f0] sm:$0xff]  }
 0x643   : > { %16570 = vmatprep.subr.bf16.mxu1 %v22787_v33  ;;  %v6800_v42 = vpop.f32.mrb[146].mxu0  ;;  %v8446_v17 = vld [vmem:[#allocation3 + $0x6e] sm:$0xff] }
 0x644   : > { %v21252_v31 = vpop.f32.mrb[168].mxu1  ;;  %v16065_v44 = vpop.f32.mrb[147].mxu0  ;;  %v21255_v48 = vadd.f32 %v21188_v53, %v6820_v43  ;;  %v8460_v5 = vpack.c.bf16 %v8447_v20, %v8446_v17  ;;  %v8245_v20 = vld [vmem:[#allocation3 + $0x75] sm:$0xff] }
 0x645   : > { %v16166_v26 = vpop.f32.mrb[169].mxu1 }
 0x646   : > { %v21257_v13 = vpop.f32.mrb[170].mxu1  ;;  %16315 = vmatmul.mubr.msk.bf16.gmra.mrb[252].mxu0 %vm386_vm3, %v7858_v36 }
 0x647   : > { %v16167_v4 = vpop.f32.mrb[171].mxu1  ;;  %16366 = vmatprep.mubr.msk.bf16.mxu0 %vm18440_vm2, %v22787_v33 }
 0x648   : > { %v8449_v4 = vld [vmem:[#allocation3 + $0x86] sm:$0xff] }
 0x649   : > { %16417 = vmatmul.mubr.msk.bf16.gmra.mrb[8].mxu1 %vm386_vm3, %v8458_v29  ;;  %v7137_v32 = vpop.f32.mrb[148].mxu0 }
 0x64a   : > { %16420 = vmatprep.mubr.msk.bf16.mxu1 %vm18440_vm2, %v22787_v33  ;;  %v7208_v53 = vadd.f32 %v7137_v32, %v21093_v41  ;;  %v16116_v56 = vpop.f32.mrb[149].mxu0  ;;  %v8444_v41 = vld [vmem:[#allocation3 + $0x5e] sm:$0xff] }
 0x64b   : > { %v7140_v62 = vpop.f32.mrb[150].mxu0  ;;  %v8459_v39 = vpack.c.bf16 %v8445_v11, %v8444_v41  ;;  %v8242_v41 = vld [vmem:[#allocation3 + $0x5d] sm:$0xff] }
 0x64c   : > { %v21266_v40 = vpop.f32.mrb[172].mxu1  ;;  %v7209_v45 = vadd.f32 %v7140_v62, %v21099_v10  ;;  %v16117_v51 = vpop.f32.mrb[151].mxu0  ;;  %v21273_v61 = vadd.f32 %v21204_v15, %v7208_v53  ;;  %v18203_v10 = vld [vmem:[%s22725_s3 + $0x1e8] sm:$0xff]  }
 0x64d   : > { %v16170_v50 = vpop.f32.mrb[173].mxu1 }
 0x64e   : > { %v21275_v59 = vpop.f32.mrb[174].mxu1  ;;  %16367 = vmatmul.mubr.msk.bf16.vlgmr.msra.gmra.mrb[0].mxu0 %vm386_vm3, %v8254_v8  ;;  %v21279_v18 = vadd.f32 %v21210_v6, %v7209_v45  ;;  %v8243_v45 = vld [vmem:[#allocation3 + $0x65] sm:$0xff] }
 0x64f   : > { %v16171_v27 = vpop.f32.mrb[175].mxu1  ;;  %16370 = vmatprep.mubr.msk.bf16.mxu0 %vm18440_vm2, %v22787_v33  ;;  %16445 = vmatpush3.bf16.msra.mxu0 %v18202_v63 }
 0x650   : > { %16446 = vmatprep.subr.bf16.mxu0 %v22787_v33  ;;  %v8451_v27 = vld [vmem:[#allocation3 + $0x96] sm:$0xff] }
 0x651   : > { %16421 = vmatmul.mubr.msk.bf16.gmra.mrb[12].mxu1 %vm386_vm3, %v8459_v39  ;;  %v7145_v15 = vpop.f32.mrb[152].mxu0 }
 0x652   : > { %16424 = vmatprep.mubr.msk.bf16.mxu1 %vm18440_vm2, %v22787_v33  ;;  %v7210_v6 = vadd.f32 %v7145_v15, %v21119_v55  ;;  %v16120_v58 = vpop.f32.mrb[153].mxu0  ;;  %v8257_v15 = vpack.c.bf16 %v8243_v45, %v8242_v41  ;;  %v8249_v41 = vld [vmem:[#allocation3 + $0x95] sm:$0xff] }
 0x653   : > { %v7148_v49 = vpop.f32.mrb[154].mxu0  ;;  %16447 = vmatpush3.bf16.msra.mxu0 %v18203_v10  ;;  %v8450_v58 = vld [vmem:[#allocation3 + $0x8e] sm:$0xff] }
 0x654   : > { %v21291_v25 = vpop.f32.mrb[176].mxu1  ;;  %v7211_v24 = vadd.f32 %v7148_v49, %v21125_v30  ;;  %v16121_v57 = vpop.f32.mrb[155].mxu0  ;;  %16448 = vmatprep.subr.bf16.mxu0 %v22787_v33  ;;  %v21299_v55 = vadd.f32 %v21229_v16, %v7210_v6  ;;  %v8241_v16 = vld [vmem:[#allocation3 + $0x55] sm:$0xff] }
 0x655   : > { %v16174_v1 = vpop.f32.mrb[177].mxu1 }
 0x656   : > { %v21301_v43 = vpop.f32.mrb[178].mxu1  ;;  %16371 = vmatmul.mubr.msk.bf16.gmra.mrb[4].mxu0 %vm386_vm3, %v8255_v38  ;;  %v21305_v3 = vadd.f32 %v21235_v7, %v7211_v24  ;;  %v8240_v7 = vld [vmem:[#allocation3 + $0x4d] sm:$0xff] }
 0x657   : > { %v16175_v42 = vpop.f32.mrb[179].mxu1  ;;  %16374 = vmatprep.mubr.msk.bf16.mxu0 %vm18440_vm2, %v22787_v33  ;;  %16449 = vmatpush3.bf16.msra.mxu0 %v18204_v0  ;;  %v8256_v53 = vpack.c.bf16 %v8241_v16, %v8240_v7  ;;  %v8244_v1 = vld [vmem:[#allocation3 + $0x6d] sm:$0xff]  ;;  %v8247_v7 = vld [vmem:[#allocation3 + $0x85] sm:$0xff] }
 0x658   : > { %16528 = vmatprep.subr.bf16.mxu0 %v22787_v33  ;;  %v8453_v38 = vld [vmem:[#allocation3 + $0xa6] sm:$0xff] }
 0x659   : > { %16425 = vmatmul.mubr.msk.bf16.gmra.mrb[16].mxu1 %vm386_vm3, %v8460_v5  ;;  %v7153_v30 = vpop.f32.mrb[156].mxu0  ;;  %v8258_v5 = vpack.c.bf16 %v8245_v20, %v8244_v1 }
 0x65a   : > { %16428 = vmatprep.mubr.msk.bf16.mxu1 %vm18440_vm2, %v22787_v33  ;;  %v7212_v44 = vadd.f32 %v7153_v30, %v21138_v47  ;;  %v16124_v26 = vpop.f32.mrb[157].mxu0  ;;  %v8461_v47 = vpack.c.bf16 %v8449_v4, %v8448_v46 }
 0x65b   : > { %v7156_v36 = vpop.f32.mrb[158].mxu0 }
 0x65c   : > { %v21314_v37 = vpop.f32.mrb[180].mxu1  ;;  %v7213_v29 = vadd.f32 %v7156_v36, %v21144_v35  ;;  %v16125_v32 = vpop.f32.mrb[159].mxu0  ;;  %v21318_v56 = vadd.f32 %v21252_v31, %v7212_v44  ;;  %v8452_v44 = vld [vmem:[#allocation3 + $0x9e] sm:$0xff] }
 0x65d   : > { %v16178_v9 = vpop.f32.mrb[181].mxu1 }
 0x65e   : > { %v21320_v62 = vpop.f32.mrb[182].mxu1  ;;  %16375 = vmatmul.mubr.msk.bf16.gmra.mrb[8].mxu0 %vm386_vm3, %v8256_v53  ;;  %v21324_v63 = vadd.f32 %v21257_v13, %v7213_v29  ;;  %v8246_v9 = vld [vmem:[#allocation3 + $0x7d] sm:$0xff]  ;;  %v8455_v53 = vld [vmem:[#allocation3 + $0xb6] sm:$0xf] }
 0x65f   : > { %v16179_v11 = vpop.f32.mrb[183].mxu1  ;;  %16378 = vmatprep.mubr.msk.bf16.mxu0 %vm18440_vm2, %v22787_v33 }
 0x661   : > { %16429 = vmatmul.mubr.msk.bf16.gmra.mrb[20].mxu1 %vm386_vm3, %v8461_v47  ;;  %v7161_v35 = vpop.f32.mrb[160].mxu0  ;;  %v8259_v47 = vpack.c.bf16 %v8247_v7, %v8246_v9 }
 0x662   : > { %16432 = vmatprep.mubr.msk.bf16.mxu1 %vm18440_vm2, %v22787_v33  ;;  %v7214_v31 = vadd.f32 %v7161_v35, %v21156_v12  ;;  %v16128_v51 = vpop.f32.mrb[161].mxu0  ;;  %v8462_v12 = vpack.c.bf16 %v8451_v27, %v8450_v58 }
 0x663   : > { %v7164_v50 = vpop.f32.mrb[162].mxu0 }
 0x664   : > { %v21332_v8 = vpop.f32.mrb[184].mxu1  ;;  %v7215_v13 = vadd.f32 %v7164_v50, %v21162_v23  ;;  %v16129_v39 = vpop.f32.mrb[163].mxu0  ;;  %v21336_v19 = vadd.f32 %v21266_v40, %v7214_v31  ;;  %v8454_v31 = vld [vmem:[#allocation3 + $0xae] sm:$0xff] }
 0x665   : > { %v16182_v10 = vpop.f32.mrb[185].mxu1 }
 0x666   : > { %v21338_v6 = vpop.f32.mrb[186].mxu1  ;;  %16379 = vmatmul.mubr.msk.bf16.gmra.mrb[12].mxu0 %vm386_vm3, %v8257_v15  ;;  %v21342_v28 = vadd.f32 %v21275_v59, %v7215_v13  ;;  %v8248_v10 = vld [vmem:[#allocation3 + $0x8d] sm:$0xff]  ;;  %v8843_v15 = vld [vmem:[#allocation3 + $0x41] sm:$0xff] }
 0x667   : > { %v16183_v49 = vpop.f32.mrb[187].mxu1  ;;  %16382 = vmatprep.mubr.msk.bf16.mxu0 %vm18440_vm2, %v22787_v33 }
 0x669   : > { %16433 = vmatmul.mubr.msk.bf16.gmra.mrb[24].mxu1 %vm386_vm3, %v8462_v12  ;;  %v7169_v23 = vpop.f32.mrb[164].mxu0  ;;  %v8260_v12 = vpack.c.bf16 %v8249_v41, %v8248_v10 }
 0x66a   : > { %16436 = vmatprep.mubr.msk.bf16.mxu1 %vm18440_vm2, %v22787_v33  ;;  %v7216_v40 = vadd.f32 %v7169_v23, %v21174_v52  ;;  %v16132_v0 = vpop.f32.mrb[165].mxu0  ;;  %v8463_v52 = vpack.c.bf16 %v8453_v38, %v8452_v44  ;;  %v18206_v38 = vld [vmem:[%s22725_s3 + $0x230] sm:$0xff]   ;;  %v8845_v44 = vld [vmem:[#allocation3 + $0x51] sm:$0xff] }
 0x66b   : > { %v7172_v24 = vpop.f32.mrb[166].mxu0 }
 0x66c   : > { %v21350_v57 = vpop.f32.mrb[88].mxu1  ;;  %v7217_v59 = vadd.f32 %v7172_v24, %v21180_v2  ;;  %v16133_v17 = vpop.f32.mrb[167].mxu0  ;;  %v21354_v30 = vadd.f32 %v21291_v25, %v7216_v40  ;;  %v8842_v40 = vld [vmem:[#allocation3 + $0x39] sm:$0xff] }
 0x66d   : > { %v16186_v42 = vpop.f32.mrb[89].mxu1  ;;  %v8860_v24 = vpack.c.bf16 %v8843_v15, %v8842_v40  ;;  %v8641_v15 = vld [vmem:[#allocation3 + $0x40] sm:$0xff]  ;;  %v8849_v40 = vld [vmem:[#allocation3 + $0x71] sm:$0xff] }
 0x66e   : > { %v21356_v16 = vpop.f32.mrb[90].mxu1  ;;  %16383 = vmatmul.mubr.msk.bf16.gmra.mrb[16].mxu0 %vm386_vm3, %v8258_v5  ;;  %v21360_v36 = vadd.f32 %v21301_v43, %v7217_v59  ;;  %v8250_v5 = vld [vmem:[#allocation3 + $0x9d] sm:$0xff] }
 0x66f   : > { %v16187_v26 = vpop.f32.mrb[91].mxu1  ;;  %16386 = vmatprep.mubr.msk.bf16.mxu0 %vm18440_vm2, %v22787_v33 }
 0x671   : > { %16437 = vmatmul.mubr.msk.bf16.gmra.mrb[28].mxu1 %vm386_vm3, %v8463_v52  ;;  %v7177_v2 = vpop.f32.mrb[168].mxu0 }
 0x672   : > { %16440 = vmatprep.mubr.msk.bf16.mxu1 %vm18440_vm2, %v22787_v33  ;;  %v7218_v25 = vadd.f32 %v7177_v2, %v21192_v14  ;;  %v16136_v4 = vpop.f32.mrb[169].mxu0  ;;  %v8464_v14 = vpack.c.bf16 %v8455_v53, %v8454_v31  ;;  %v8252_v31 = vld [vmem:[#allocation3 + $0xad] sm:$0xff] }
 0x673   : > { %v7180_v29 = vpop.f32.mrb[170].mxu0 }
 0x674   : > { %v21368_v32 = vpop.f32.mrb[92].mxu1  ;;  %v7219_v43 = vadd.f32 %v7180_v29, %v21196_v22  ;;  %v16137_v46 = vpop.f32.mrb[171].mxu0  ;;  %v21372_v35 = vadd.f32 %v21314_v37, %v7218_v25  ;;  %v8844_v29 = vld [vmem:[#allocation3 + $0x49] sm:$0xff] }
 0x675   : > { %v16190_v11 = vpop.f32.mrb[93].mxu1  ;;  %v8861_v53 = vpack.c.bf16 %v8845_v44, %v8844_v29  ;;  %v8643_v44 = vld [vmem:[#allocation3 + $0x50] sm:$0xff]  ;;  %v8851_v29 = vld [vmem:[#allocation3 + $0x81] sm:$0xff] }
 0x676   : > { %v7406_v45 = vpop.f32.mrb[94].mxu1  ;;  %16387 = vmatmul.mubr.msk.bf16.gmra.mrb[20].mxu0 %vm386_vm3, %v8259_v47  ;;  %v21376_v50 = vadd.f32 %v21320_v62, %v7219_v43  ;;  %v8253_v43 = vld [vmem:[#allocation3 + $0xb5] sm:$0xf] }
 0x677   : > { %v16191_v51 = vpop.f32.mrb[95].mxu1  ;;  %16390 = vmatprep.mubr.msk.bf16.mxu0 %vm18440_vm2, %v22787_v33 }
 0x679   : > { %16441 = vmatmul.mubr.msk.bf16.gmra.mrb[32].mxu1 %vm386_vm3, %v8464_v14  ;;  %v7185_v22 = vpop.f32.mrb[172].mxu0 }
 0x67a   : > { %16492 = vmatprep.mubr.msk.bf16.mxu1 %vm18440_vm2, %v22787_v33  ;;  %v7220_v37 = vadd.f32 %v7185_v22, %v21208_v54  ;;  %v16140_v27 = vpop.f32.mrb[173].mxu0  ;;  %v18205_v54 = vld [vmem:[%s22725_s3 + $0x228] sm:$0xff]   ;;  %v8262_v22 = vpack.c.bf16 %v8253_v43, %v8252_v31 }
 0x67b   : > { %v7188_v13 = vpop.f32.mrb[174].mxu0  ;;  %v8846_v27 = vld [vmem:[#allocation3 + $0x59] sm:$0xff] }
 0x67c   : > { %v21384_v39 = vpop.f32.mrb[96].mxu1  ;;  %v7221_v62 = vadd.f32 %v7188_v13, %v21217_v60  ;;  %v16141_v58 = vpop.f32.mrb[175].mxu0  ;;  %v21388_v23 = vadd.f32 %v21332_v8, %v7220_v37  ;;  %v8251_v8 = vld [vmem:[#allocation3 + $0xa5] sm:$0xff] }
 0x67d   : > { %v16242_v49 = vpop.f32.mrb[97].mxu1  ;;  %v8261_v7 = vpack.c.bf16 %v8251_v8, %v8250_v5 }
 0x67e   : > { %v21390_v20 = vpop.f32.mrb[98].mxu1  ;;  %16391 = vmatmul.mubr.msk.bf16.gmra.mrb[24].mxu0 %vm386_vm3, %v8260_v12  ;;  %v21397_v1 = vadd.f32 %v21338_v6, %v7221_v62  ;;  %v8640_v12 = vld [vmem:[#allocation3 + $0x38] sm:$0xff] }
 0x67f   : > { %v16243_v0 = vpop.f32.mrb[99].mxu1  ;;  %16394 = vmatprep.mubr.msk.bf16.mxu0 %vm18440_vm2, %v22787_v33  ;;  %v8658_v8 = vpack.c.bf16 %v8641_v15, %v8640_v12  ;;  %v8852_v12 = vld [vmem:[#allocation3 + $0x89] sm:$0xff] }
 0x681   : > { %16493 = vmatmul.mubr.msk.bf16.vlgmr.msra.gmra.mrb[36].mxu1 %vm386_vm3, %v8860_v24  ;;  %v7193_v60 = vpop.f32.mrb[176].mxu0 }
 0x682   : > { %16496 = vmatprep.mubr.msk.bf16.mxu1 %vm18440_vm2, %v22787_v33  ;;  %16571 = vmatpush3.bf16.msra.mxu1 %v18205_v54  ;;  %v7222_v59 = vadd.f32 %v7193_v60, %v21233_v21  ;;  %v16144_v17 = vpop.f32.mrb[177].mxu0  ;;  %v18207_v21 = vld [vmem:[%s22725_s3 + $0x238] sm:$0xff]   ;;  %v18208_v54 = vld [vmem:[%s22725_s3 + $0x210] sm:$0xff]  }
 0x683   : > { %16572 = vmatprep.subr.bf16.mxu1 %v22787_v33  ;;  %v7196_v6 = vpop.f32.mrb[178].mxu0 }
 0x684   : > { %v21409_v42 = vpop.f32.mrb[188].mxu1  ;;  %v7223_v26 = vadd.f32 %v7196_v6, %v21243_v34  ;;  %v16145_v52 = vpop.f32.mrb[179].mxu0  ;;  %v21413_v25 = vadd.f32 %v21350_v57, %v7222_v59 }
 0x685   : > { %v16246_v2 = vpop.f32.mrb[189].mxu1 }
 0x686   : > { %v21415_v4 = vpop.f32.mrb[190].mxu1  ;;  %16573 = vmatpush3.bf16.msra.mxu1 %v18206_v38  ;;  %16395 = vmatmul.mubr.msk.bf16.gmra.mrb[28].mxu0 %vm386_vm3, %v8261_v7  ;;  %v21423_v34 = vadd.f32 %v21356_v16, %v7223_v26  ;;  %v8847_v16 = vld [vmem:[#allocation3 + $0x61] sm:$0xff] }
 0x687   : > { %v16247_v9 = vpop.f32.mrb[191].mxu1  ;;  %16574 = vmatprep.subr.bf16.mxu1 %v22787_v33  ;;  %16398 = vmatprep.mubr.msk.bf16.mxu0 %vm18440_vm2, %v22787_v33  ;;  %v8862_v10 = vpack.c.bf16 %v8847_v16, %v8846_v27  ;;  %v8642_v7 = vld [vmem:[#allocation3 + $0x48] sm:$0xff] }
 0x688   : > { %v8659_v43 = vpack.c.bf16 %v8643_v44, %v8642_v7 }
 0x689   : > { %16497 = vmatmul.mubr.msk.bf16.gmra.mrb[40].mxu1 %vm386_vm3, %v8861_v53  ;;  %v7201_v57 = vpop.f32.mrb[180].mxu0 }
 0x68a   : > { %16500 = vmatprep.mubr.msk.bf16.mxu1 %vm18440_vm2, %v22787_v33  ;;  %16575 = vmatpush3.bf16.msra.mxu1 %v18207_v21  ;;  %v7224_v46 = vadd.f32 %v7201_v57, %v21255_v48  ;;  %v16148_v11 = vpop.f32.mrb[181].mxu0  ;;  %v18210_v21 = vld [vmem:[%s22725_s3 + $0x220] sm:$0xff]  }
 0x68b   : > { %v7204_v47 = vpop.f32.mrb[182].mxu0  ;;  %v8850_v11 = vld [vmem:[#allocation3 + $0x79] sm:$0xff] }
 0x68c   : > { %v21431_v45 = vpop.f32.mrb[192].mxu1  ;;  %v16149_v51 = vpop.f32.mrb[183].mxu0  ;;  %v21434_v41 = vadd.f32 %v21368_v32, %v7224_v46  ;;  %v8864_v31 = vpack.c.bf16 %v8851_v29, %v8850_v11  ;;  %v8649_v29 = vld [vmem:[#allocation3 + $0x80] sm:$0xff] }
 0x68d   : > { %v16250_v14 = vpop.f32.mrb[193].mxu1 }
 0x68e   : > { %v21436_v37 = vpop.f32.mrb[194].mxu1  ;;  %16399 = vmatmul.mubr.msk.bf16.gmra.mrb[32].mxu0 %vm386_vm3, %v8262_v22 }
 0x68f   : > { %v16251_v13 = vpop.f32.mrb[195].mxu1  ;;  %16450 = vmatprep.mubr.msk.bf16.mxu0 %vm18440_vm2, %v22787_v33 }
 0x690   : > { %v8853_v13 = vld [vmem:[#allocation3 + $0x91] sm:$0xff] }
 0x691   : > { %16501 = vmatmul.mubr.msk.bf16.gmra.mrb[44].mxu1 %vm386_vm3, %v8862_v10  ;;  %v7541_v48 = vpop.f32.mrb[184].mxu0 }
 0x692   : > { %16504 = vmatprep.mubr.msk.bf16.mxu1 %vm18440_vm2, %v22787_v33  ;;  %v7612_v32 = vadd.f32 %v7541_v48, %v21273_v61  ;;  %v16200_v62 = vpop.f32.mrb[185].mxu0  ;;  %v8848_v61 = vld [vmem:[#allocation3 + $0x69] sm:$0xff] }
 0x693   : > { %v7544_v58 = vpop.f32.mrb[186].mxu0  ;;  %v8863_v6 = vpack.c.bf16 %v8849_v40, %v8848_v61  ;;  %v8646_v61 = vld [vmem:[#allocation3 + $0x68] sm:$0xff] }
 0x694   : > { %v21445_v49 = vpop.f32.mrb[196].mxu1  ;;  %v7613_v0 = vadd.f32 %v7544_v58, %v21279_v18  ;;  %v16201_v24 = vpop.f32.mrb[187].mxu0  ;;  %v21452_v38 = vadd.f32 %v21384_v39, %v7612_v32  ;;  %v18209_v18 = vld [vmem:[%s22725_s3 + $0x218] sm:$0xff]  }
 0x695   : > { %v16254_v60 = vpop.f32.mrb[197].mxu1 }
 0x696   : > { %v21454_v59 = vpop.f32.mrb[198].mxu1  ;;  %16451 = vmatmul.mubr.msk.bf16.vlgmr.msra.gmra.mrb[36].mxu0 %vm386_vm3, %v8658_v8  ;;  %v21458_v5 = vadd.f32 %v21390_v20, %v7613_v0  ;;  %v8647_v0 = vld [vmem:[#allocation3 + $0x70] sm:$0xff] }
 0x697   : > { %v16255_v17 = vpop.f32.mrb[199].mxu1  ;;  %16454 = vmatprep.mubr.msk.bf16.mxu0 %vm18440_vm2, %v22787_v33  ;;  %16529 = vmatpush3.bf16.msra.mxu0 %v18208_v54 }
 0x698   : > { %16530 = vmatprep.subr.bf16.mxu0 %v22787_v33  ;;  %v8855_v17 = vld [vmem:[#allocation3 + $0xa1] sm:$0xff] }
 0x699   : > { %16505 = vmatmul.mubr.msk.bf16.gmra.mrb[48].mxu1 %vm386_vm3, %v8863_v6  ;;  %v7549_v39 = vpop.f32.mrb[188].mxu0 }
 0x69a   : > { %16508 = vmatprep.mubr.msk.bf16.mxu1 %vm18440_vm2, %v22787_v33  ;;  %v7614_v20 = vadd.f32 %v7549_v39, %v21299_v55  ;;  %v16204_v26 = vpop.f32.mrb[189].mxu0  ;;  %v8661_v39 = vpack.c.bf16 %v8647_v0, %v8646_v61  ;;  %v8653_v61 = vld [vmem:[#allocation3 + $0xa0] sm:$0xff] }
 0x69b   : > { %v7552_v52 = vpop.f32.mrb[190].mxu0  ;;  %16531 = vmatpush3.bf16.msra.mxu0 %v18209_v18  ;;  %v8854_v26 = vld [vmem:[#allocation3 + $0x99] sm:$0xff] }
 0x69c   : > { %v21470_v2 = vpop.f32.mrb[200].mxu1  ;;  %v7615_v9 = vadd.f32 %v7552_v52, %v21305_v3  ;;  %v16205_v53 = vpop.f32.mrb[191].mxu0  ;;  %16532 = vmatprep.subr.bf16.mxu0 %v22787_v33  ;;  %v21478_v55 = vadd.f32 %v21409_v42, %v7614_v20  ;;  %v8645_v42 = vld [vmem:[#allocation3 + $0x60] sm:$0xff] }
 0x69d   : > { %v16258_v57 = vpop.f32.mrb[201].mxu1 }
 0x69e   : > { %v21480_v46 = vpop.f32.mrb[202].mxu1  ;;  %16455 = vmatmul.mubr.msk.bf16.gmra.mrb[40].mxu0 %vm386_vm3, %v8659_v43  ;;  %v21484_v16 = vadd.f32 %v21415_v4, %v7615_v9  ;;  %v8644_v4 = vld [vmem:[#allocation3 + $0x58] sm:$0xff] }
 0x69f   : > { %v16259_v47 = vpop.f32.mrb[203].mxu1  ;;  %16458 = vmatprep.mubr.msk.bf16.mxu0 %vm18440_vm2, %v22787_v33  ;;  %16533 = vmatpush3.bf16.msra.mxu0 %v18210_v21  ;;  %v8660_v32 = vpack.c.bf16 %v8645_v42, %v8644_v4  ;;  %v8648_v57 = vld [vmem:[#allocation3 + $0x78] sm:$0xff]  ;;  %v8651_v4 = vld [vmem:[#allocation3 + $0x90] sm:$0xff] }
 0x6a0   : > { %16612 = vmatprep.subr.bf16.mxu0 %v22787_v33  ;;  %v8857_v43 = vld [vmem:[#allocation3 + $0xb1] sm:$0xff] }
 0x6a1   : > { %16509 = vmatmul.mubr.msk.bf16.gmra.mrb[52].mxu1 %vm386_vm3, %v8864_v31  ;;  %v7557_v3 = vpop.f32.mrb[192].mxu0  ;;  %v8662_v31 = vpack.c.bf16 %v8649_v29, %v8648_v57  ;;  %v8655_v57 = vld [vmem:[#allocation3 + $0xb0] sm:$0xff] }
 0x6a2   : > { %16512 = vmatprep.mubr.msk.bf16.mxu1 %vm18440_vm2, %v22787_v33  ;;  %v7616_v51 = vadd.f32 %v7557_v3, %v21318_v56  ;;  %v16208_v14 = vpop.f32.mrb[193].mxu0  ;;  %v8865_v56 = vpack.c.bf16 %v8853_v13, %v8852_v12 }
 0x6a3   : > { %v7560_v22 = vpop.f32.mrb[194].mxu0 }
 0x6a4   : > { %v21493_v27 = vpop.f32.mrb[204].mxu1  ;;  %v7617_v10 = vadd.f32 %v7560_v22, %v21324_v63  ;;  %v16209_v48 = vpop.f32.mrb[195].mxu0  ;;  %v21497_v62 = vadd.f32 %v21431_v45, %v7616_v51  ;;  %v8856_v51 = vld [vmem:[#allocation3 + $0xa9] sm:$0xff] }
 0x6a5   : > { %v16262_v15 = vpop.f32.mrb[205].mxu1 }
 0x6a6   : > { %v21499_v58 = vpop.f32.mrb[206].mxu1  ;;  %16459 = vmatmul.mubr.msk.bf16.gmra.mrb[44].mxu0 %vm386_vm3, %v8660_v32  ;;  %v21503_v54 = vadd.f32 %v21436_v37, %v7617_v10  ;;  %v8650_v15 = vld [vmem:[#allocation3 + $0x88] sm:$0xff]  ;;  %v8858_v32 = vld [vmem:[#allocation3 + $0xb9] sm:$0xff] }
 0x6a7   : > { %v16263_v40 = vpop.f32.mrb[207].mxu1  ;;  %16462 = vmatprep.mubr.msk.bf16.mxu0 %vm18440_vm2, %v22787_v33 }
 0x6a9   : > { %16513 = vmatmul.mubr.msk.bf16.gmra.mrb[56].mxu1 %vm386_vm3, %v8865_v56  ;;  %v7565_v63 = vpop.f32.mrb[196].mxu0  ;;  %v8663_v56 = vpack.c.bf16 %v8651_v4, %v8650_v15  ;;  %v8656_v15 = vld [vmem:[#allocation3 + $0xb8] sm:$0xff] }
 0x6aa   : > { %16516 = vmatprep.mubr.msk.bf16.mxu1 %vm18440_vm2, %v22787_v33  ;;  %v7618_v45 = vadd.f32 %v7565_v63, %v21336_v19  ;;  %v16212_v24 = vpop.f32.mrb[197].mxu0  ;;  %v8866_v19 = vpack.c.bf16 %v8855_v17, %v8854_v26 }
 0x6ab   : > { %v7568_v60 = vpop.f32.mrb[198].mxu0 }
 0x6ac   : > { %v21511_v8 = vpop.f32.mrb[208].mxu1  ;;  %v7619_v37 = vadd.f32 %v7568_v60, %v21342_v28  ;;  %v16213_v6 = vpop.f32.mrb[199].mxu0  ;;  %v21515_v44 = vadd.f32 %v21445_v49, %v7618_v45  ;;  %v8859_v45 = vld [vmem:[#allocation3 + $0xc1] sm:$0xf] }
 0x6ad   : > { %v16266_v18 = vpop.f32.mrb[209].mxu1 }
 0x6ae   : > { %v21517_v20 = vpop.f32.mrb[210].mxu1  ;;  %16463 = vmatmul.mubr.msk.bf16.gmra.mrb[48].mxu0 %vm386_vm3, %v8661_v39  ;;  %v21521_v7 = vadd.f32 %v21454_v59, %v7619_v37  ;;  %v8652_v18 = vld [vmem:[#allocation3 + $0x98] sm:$0xff]  ;;  %v9247_v39 = vld [vmem:[#allocation3 + $0x43] sm:$0xff] }
 0x6af   : > { %v16267_v52 = vpop.f32.mrb[211].mxu1  ;;  %16466 = vmatprep.mubr.msk.bf16.mxu0 %vm18440_vm2, %v22787_v33 }
 0x6b1   : > { %16517 = vmatmul.mubr.msk.bf16.gmra.mrb[60].mxu1 %vm386_vm3, %v8866_v19  ;;  %v7573_v28 = vpop.f32.mrb[200].mxu0  ;;  %v8664_v19 = vpack.c.bf16 %v8653_v61, %v8652_v18 }
 0x6b2   : > { %16520 = vmatprep.mubr.msk.bf16.mxu1 %vm18440_vm2, %v22787_v33  ;;  %v7620_v49 = vadd.f32 %v7573_v28, %v21354_v30  ;;  %v16216_v21 = vpop.f32.mrb[201].mxu0  ;;  %v8867_v30 = vpack.c.bf16 %v8857_v43, %v8856_v51 }
 0x6b3   : > { %v7576_v9 = vpop.f32.mrb[202].mxu0 }
 0x6b4   : > { %v21529_v53 = vpop.f32.mrb[212].mxu1  ;;  %v7621_v59 = vadd.f32 %v7576_v9, %v21360_v36  ;;  %v16217_v11 = vpop.f32.mrb[203].mxu0  ;;  %v21533_v3 = vadd.f32 %v21470_v2, %v7620_v49  ;;  %v9246_v49 = vld [vmem:[#allocation3 + $0x3b] sm:$0xff] }
 0x6b5   : > { %v16270_v47 = vpop.f32.mrb[213].mxu1 }
 0x6b6   : > { %v21535_v42 = vpop.f32.mrb[214].mxu1  ;;  %16467 = vmatmul.mubr.msk.bf16.gmra.mrb[52].mxu0 %vm386_vm3, %v8662_v31  ;;  %v21539_v22 = vadd.f32 %v21480_v46, %v7621_v59  ;;  %v8654_v47 = vld [vmem:[#allocation3 + $0xa8] sm:$0xff]  ;;  %v9249_v31 = vld [vmem:[#allocation3 + $0x53] sm:$0xff] }
 0x6b7   : > { %v16271_v14 = vpop.f32.mrb[215].mxu1  ;;  %16470 = vmatprep.mubr.msk.bf16.mxu0 %vm18440_vm2, %v22787_v33 }
 0x6b9   : > { %16521 = vmatmul.mubr.msk.bf16.gmra.mrb[64].mxu1 %vm386_vm3, %v8867_v30  ;;  %v7581_v36 = vpop.f32.mrb[204].mxu0  ;;  %v8665_v30 = vpack.c.bf16 %v8655_v57, %v8654_v47  ;;  %v9047_v47 = vld [vmem:[#allocation3 + $0x52] sm:$0xff] }
 0x6ba   : > { %16524 = vmatprep.mubr.msk.bf16.mxu1 %vm18440_vm2, %v22787_v33  ;;  %v7622_v2 = vadd.f32 %v7581_v36, %v21372_v35  ;;  %v16220_v13 = vpop.f32.mrb[205].mxu0  ;;  %v8868_v35 = vpack.c.bf16 %v8859_v45, %v8858_v32 }
 0x6bb   : > { %v7584_v10 = vpop.f32.mrb[206].mxu0 }
 0x6bc   : > { %v21547_v48 = vpop.f32.mrb[216].mxu1  ;;  %v7623_v46 = vadd.f32 %v7584_v10, %v21376_v50  ;;  %v16221_v12 = vpop.f32.mrb[207].mxu0  ;;  %v21551_v63 = vadd.f32 %v21493_v27, %v7622_v2  ;;  %v9248_v2 = vld [vmem:[#allocation3 + $0x4b] sm:$0xff] }
 0x6bd   : > { %v16274_v40 = vpop.f32.mrb[217].mxu1 }
 0x6be   : > { %v7810_v0 = vpop.f32.mrb[218].mxu1  ;;  %16471 = vmatmul.mubr.msk.bf16.gmra.mrb[56].mxu0 %vm386_vm3, %v8663_v56  ;;  %v21555_v60 = vadd.f32 %v21499_v58, %v7623_v46  ;;  %v8657_v40 = vld [vmem:[#allocation3 + $0xc0] sm:$0xf] }
 0x6bf   : > { %v16275_v24 = vpop.f32.mrb[219].mxu1  ;;  %16474 = vmatprep.mubr.msk.bf16.mxu0 %vm18440_vm2, %v22787_v33  ;;  %v9251_v56 = vld [vmem:[#allocation3 + $0x63] sm:$0xff]  ;;  %v8666_v45 = vpack.c.bf16 %v8657_v40, %v8656_v15 }
 0x6c1   : > { %16525 = vmatmul.mubr.msk.bf16.gmra.mrb[68].mxu1 %vm386_vm3, %v8868_v35  ;;  %v7589_v50 = vpop.f32.mrb[208].mxu0 }
 0x6c2   : > { %16576 = vmatprep.mubr.msk.bf16.mxu1 %vm18440_vm2, %v22787_v33  ;;  %v7624_v27 = vadd.f32 %v7589_v50, %v21388_v23  ;;  %v16224_v17 = vpop.f32.mrb[209].mxu0  ;;  %v9264_v23 = vpack.c.bf16 %v9247_v39, %v9246_v49  ;;  %v9250_v50 = vld [vmem:[#allocation3 + $0x5b] sm:$0xff] }
 0x6c3   : > { %v7592_v37 = vpop.f32.mrb[210].mxu0  ;;  %v9045_v17 = vld [vmem:[#allocation3 + $0x42] sm:$0xff] }
 0x6c4   : > { %v21563_v6 = vpop.f32.mrb[220].mxu1  ;;  %v7625_v58 = vadd.f32 %v7592_v37, %v21397_v1  ;;  %v16225_v26 = vpop.f32.mrb[211].mxu0  ;;  %v21567_v28 = vadd.f32 %v21511_v8, %v7624_v27  ;;  %v9266_v27 = vpack.c.bf16 %v9251_v56, %v9250_v50 }
 0x6c5   : > { %v16326_v52 = vpop.f32.mrb[221].mxu1  ;;  %v9253_v26 = vld [vmem:[#allocation3 + $0x73] sm:$0xff] }
 0x6c6   : > { %v21569_v29 = vpop.f32.mrb[222].mxu1  ;;  %16475 = vmatmul.mubr.msk.bf16.gmra.mrb[60].mxu0 %vm386_vm3, %v8664_v19  ;;  %v21573_v9 = vadd.f32 %v21517_v20, %v7625_v58  ;;  %v9044_v58 = vld [vmem:[#allocation3 + $0x3a] sm:$0xff]  ;;  %v18211_v52 = vld [vmem:[%s22725_s3 + $0x240] sm:$0xff]  }
 0x6c7   : > { %v16327_v21 = vpop.f32.mrb[223].mxu1  ;;  %16478 = vmatprep.mubr.msk.bf16.mxu0 %vm18440_vm2, %v22787_v33 }
 0x6c9   : > { %16577 = vmatmul.mubr.msk.bf16.vlgmr.msra.gmra.mrb[72].mxu1 %vm386_vm3, %v9264_v23  ;;  %v7597_v1 = vpop.f32.mrb[212].mxu0  ;;  %v9062_v23 = vpack.c.bf16 %v9045_v17, %v9044_v58  ;;  %v9256_v58 = vld [vmem:[#allocation3 + $0x8b] sm:$0xff] }
 0x6ca   : > { %16580 = vmatprep.mubr.msk.bf16.mxu1 %vm18440_vm2, %v22787_v33  ;;  %v7626_v8 = vadd.f32 %v7597_v1, %v21413_v25  ;;  %v16228_v43 = vpop.f32.mrb[213].mxu0  ;;  %v9265_v25 = vpack.c.bf16 %v9249_v31, %v9248_v2  ;;  %v18213_v2 = vld [vmem:[%s22725_s3 + $0x250] sm:$0xff]  }
 0x6cb   : > { %v7600_v59 = vpop.f32.mrb[214].mxu0 }
 0x6cc   : > { %v21581_v11 = vpop.f32.mrb[224].mxu1  ;;  %v7627_v20 = vadd.f32 %v7600_v59, %v21423_v34  ;;  %v16229_v51 = vpop.f32.mrb[215].mxu0  ;;  %v21585_v36 = vadd.f32 %v21529_v53, %v7626_v8 }
 0x6cd   : > { %v16330_v14 = vpop.f32.mrb[225].mxu1 }
 0x6ce   : > { %v21587_v4 = vpop.f32.mrb[226].mxu1  ;;  %16479 = vmatmul.mubr.msk.bf16.gmra.mrb[64].mxu0 %vm386_vm3, %v8665_v30  ;;  %v21591_v10 = vadd.f32 %v21535_v42, %v7627_v20  ;;  %v9046_v14 = vld [vmem:[#allocation3 + $0x4a] sm:$0xff] }
 0x6cf   : > { %v16331_v13 = vpop.f32.mrb[227].mxu1  ;;  %16482 = vmatprep.mubr.msk.bf16.mxu0 %vm18440_vm2, %v22787_v33  ;;  %v9255_v30 = vld [vmem:[#allocation3 + $0x83] sm:$0xff]  ;;  %v9063_v15 = vpack.c.bf16 %v9047_v47, %v9046_v14 }
 0x6d1   : > { %16581 = vmatmul.mubr.msk.bf16.gmra.mrb[76].mxu1 %vm386_vm3, %v9265_v25  ;;  %v7605_v34 = vpop.f32.mrb[216].mxu0 }
 0x6d2   : > { %16584 = vmatprep.mubr.msk.bf16.mxu1 %vm18440_vm2, %v22787_v33  ;;  %v7628_v53 = vadd.f32 %v7605_v34, %v21434_v41  ;;  %v16232_v32 = vpop.f32.mrb[217].mxu0 }
 0x6d3   : > { %v7608_v46 = vpop.f32.mrb[218].mxu0  ;;  %v9254_v32 = vld [vmem:[#allocation3 + $0x7b] sm:$0xff] }
 0x6d4   : > { %v21599_v12 = vpop.f32.mrb[228].mxu1  ;;  %v16233_v42 = vpop.f32.mrb[219].mxu0  ;;  %v21602_v24 = vadd.f32 %v21547_v48, %v7628_v53  ;;  %v9268_v40 = vpack.c.bf16 %v9255_v30, %v9254_v32  ;;  %v9053_v30 = vld [vmem:[#allocation3 + $0x82] sm:$0xff] }
 0x6d5   : > { %v16334_v0 = vpop.f32.mrb[229].mxu1  ;;  %v9049_v42 = vld [vmem:[#allocation3 + $0x62] sm:$0xff] }
 0x6d6   : > { %v21604_v35 = vpop.f32.mrb[230].mxu1  ;;  %16483 = vmatmul.mubr.msk.bf16.gmra.mrb[68].mxu0 %vm386_vm3, %v8666_v45 }
 0x6d7   : > { %v16335_v61 = vpop.f32.mrb[231].mxu1  ;;  %16534 = vmatprep.mubr.msk.bf16.mxu0 %vm18440_vm2, %v22787_v33 }
 0x6d8   : > { %v9048_v61 = vld [vmem:[#allocation3 + $0x5a] sm:$0xff] }
 0x6d9   : > { %16585 = vmatmul.mubr.msk.bf16.gmra.mrb[80].mxu1 %vm386_vm3, %v9266_v27  ;;  %v7945_v41 = vpop.f32.mrb[220].mxu0 }
 0x6da   : > { %16588 = vmatprep.mubr.msk.bf16.mxu1 %vm18440_vm2, %v22787_v33  ;;  %v8016_v48 = vadd.f32 %v7945_v41, %v21452_v38  ;;  %v16284_v37 = vpop.f32.mrb[221].mxu0  ;;  %v9252_v38 = vld [vmem:[#allocation3 + $0x6b] sm:$0xff] }
 0x6db   : > { %v7948_v18 = vpop.f32.mrb[222].mxu0  ;;  %v9267_v43 = vpack.c.bf16 %v9253_v26, %v9252_v38  ;;  %v9050_v38 = vld [vmem:[#allocation3 + $0x6a] sm:$0xff] }
 0x6dc   : > { %v21613_v39 = vpop.f32.mrb[232].mxu1  ;;  %v8017_v19 = vadd.f32 %v7948_v18, %v21458_v5  ;;  %v16285_v49 = vpop.f32.mrb[223].mxu0  ;;  %v21620_v1 = vadd.f32 %v21563_v6, %v8016_v48  ;;  %v18212_v5 = vld [vmem:[%s22725_s3 + $0x248] sm:$0xff]   ;;  %v9064_v48 = vpack.c.bf16 %v9049_v42, %v9048_v61 }
 0x6dd   : > { %v16338_v21 = vpop.f32.mrb[233].mxu1  ;;  %v9055_v61 = vld [vmem:[#allocation3 + $0x92] sm:$0xff] }
 0x6de   : > { %v21622_v57 = vpop.f32.mrb[234].mxu1  ;;  %16535 = vmatmul.mubr.msk.bf16.vlgmr.msra.gmra.mrb[72].mxu0 %vm386_vm3, %v9062_v23  ;;  %v21626_v59 = vadd.f32 %v21569_v29, %v8017_v19  ;;  %v9051_v19 = vld [vmem:[#allocation3 + $0x72] sm:$0xff] }
 0x6df   : > { %v16339_v8 = vpop.f32.mrb[235].mxu1  ;;  %16538 = vmatprep.mubr.msk.bf16.mxu0 %vm18440_vm2, %v22787_v33  ;;  %16613 = vmatpush3.bf16.msra.mxu0 %v18211_v52 }
 0x6e0   : > { %16614 = vmatprep.subr.bf16.mxu0 %v22787_v33  ;;  %v9259_v8 = vld [vmem:[#allocation3 + $0xa3] sm:$0xff] }
 0x6e1   : > { %16589 = vmatmul.mubr.msk.bf16.gmra.mrb[84].mxu1 %vm386_vm3, %v9267_v43  ;;  %v7953_v6 = vpop.f32.mrb[224].mxu0 }
 0x6e2   : > { %16592 = vmatprep.mubr.msk.bf16.mxu1 %vm18440_vm2, %v22787_v33  ;;  %v8018_v29 = vadd.f32 %v7953_v6, %v21478_v55  ;;  %v16288_v31 = vpop.f32.mrb[225].mxu0  ;;  %v9065_v6 = vpack.c.bf16 %v9051_v19, %v9050_v38  ;;  %v9057_v38 = vld [vmem:[#allocation3 + $0xa2] sm:$0xff] }
 0x6e3   : > { %v7956_v20 = vpop.f32.mrb[226].mxu0  ;;  %16615 = vmatpush3.bf16.msra.mxu0 %v18212_v5  ;;  %v9258_v31 = vld [vmem:[#allocation3 + $0x9b] sm:$0xff] }
 0x6e4   : > { %v21638_v51 = vpop.f32.mrb[236].mxu1  ;;  %v8019_v13 = vadd.f32 %v7956_v20, %v21484_v16  ;;  %v16289_v25 = vpop.f32.mrb[227].mxu0  ;;  %16616 = vmatprep.subr.bf16.mxu0 %v22787_v33  ;;  %v21646_v55 = vadd.f32 %v21581_v11, %v8018_v29 }
 0x6e5   : > { %v16342_v34 = vpop.f32.mrb[237].mxu1 }
 0x6e6   : > { %v21648_v53 = vpop.f32.mrb[238].mxu1  ;;  %16539 = vmatmul.mubr.msk.bf16.gmra.mrb[76].mxu0 %vm386_vm3, %v9063_v15  ;;  %v21652_v56 = vadd.f32 %v21587_v4, %v8019_v13  ;;  %v9257_v4 = vld [vmem:[#allocation3 + $0x93] sm:$0xff] }
 0x6e7   : > { %v16343_v46 = vpop.f32.mrb[239].mxu1  ;;  %16542 = vmatprep.mubr.msk.bf16.mxu0 %vm18440_vm2, %v22787_v33  ;;  %16617 = vmatpush3.bf16.msra.mxu0 %v18213_v2  ;;  %v9052_v34 = vld [vmem:[#allocation3 + $0x7a] sm:$0xff] }
 0x6e8   : > { %v9261_v15 = vld [vmem:[#allocation3 + $0xb3] sm:$0xff] }
 0x6e9   : > { %16593 = vmatmul.mubr.msk.bf16.gmra.mrb[100].mxu1 %vm386_vm3, %v9268_v40  ;;  %v7961_v16 = vpop.f32.mrb[228].mxu0  ;;  %v9066_v40 = vpack.c.bf16 %v9053_v30, %v9052_v34 }
 0x6ea   : > { %16596 = vmatprep.mubr.msk.bf16.mxu1 %vm18440_vm2, %v22787_v33  ;;  %v8020_v11 = vadd.f32 %v7961_v16, %v21497_v62  ;;  %v16292_v0 = vpop.f32.mrb[229].mxu0  ;;  %v9269_v62 = vpack.c.bf16 %v9257_v4, %v9256_v58 }
 0x6eb   : > { %v7964_v45 = vpop.f32.mrb[230].mxu0 }
 0x6ec   : > { %v21660_v50 = vpop.f32.mrb[240].mxu1  ;;  %v8021_v27 = vadd.f32 %v7964_v45, %v21503_v54  ;;  %v16293_v41 = vpop.f32.mrb[231].mxu0  ;;  %v21664_v37 = vadd.f32 %v21599_v12, %v8020_v11  ;;  %v9260_v11 = vld [vmem:[#allocation3 + $0xab] sm:$0xff] }
 0x6ed   : > { %v16346_v17 = vpop.f32.mrb[241].mxu1 }
 0x6ee   : > { %v21666_v18 = vpop.f32.mrb[242].mxu1  ;;  %16543 = vmatmul.mubr.msk.bf16.gmra.mrb[80].mxu0 %vm386_vm3, %v9064_v48  ;;  %v21670_v52 = vadd.f32 %v21604_v35, %v8021_v27  ;;  %v9054_v17 = vld [vmem:[#allocation3 + $0x8a] sm:$0xff]  ;;  %v9262_v48 = vld [vmem:[#allocation3 + $0xbb] sm:$0xff] }
 0x6ef   : > { %v16347_v26 = vpop.f32.mrb[243].mxu1  ;;  %16546 = vmatprep.mubr.msk.bf16.mxu0 %vm18440_vm2, %v22787_v33 }
 0x6f1   : > { %16597 = vmatmul.mubr.msk.bf16.gmra.mrb[104].mxu1 %vm386_vm3, %v9269_v62  ;;  %v7969_v54 = vpop.f32.mrb[232].mxu0  ;;  %v9067_v62 = vpack.c.bf16 %v9055_v61, %v9054_v17 }
 0x6f2   : > { %16600 = vmatprep.mubr.msk.bf16.mxu1 %vm18440_vm2, %v22787_v33  ;;  %v8022_v12 = vadd.f32 %v7969_v54, %v21515_v44  ;;  %v16296_v49 = vpop.f32.mrb[233].mxu0  ;;  %v9270_v44 = vpack.c.bf16 %v9259_v8, %v9258_v31 }
 0x6f3   : > { %v7972_v21 = vpop.f32.mrb[234].mxu0 }
 0x6f4   : > { %v21678_v23 = vpop.f32.mrb[244].mxu1  ;;  %v8023_v35 = vadd.f32 %v7972_v21, %v21521_v7  ;;  %v16297_v43 = vpop.f32.mrb[235].mxu0  ;;  %v21682_v47 = vadd.f32 %v21613_v39, %v8022_v12  ;;  %v9263_v12 = vld [vmem:[#allocation3 + $0xc3] sm:$0xf] }
 0x6f5   : > { %v16350_v5 = vpop.f32.mrb[245].mxu1  ;;  %v9272_v21 = vpack.c.bf16 %v9263_v12, %v9262_v48 }
 0x6f6   : > { %v21684_v29 = vpop.f32.mrb[246].mxu1  ;;  %16547 = vmatmul.mubr.msk.bf16.gmra.mrb[84].mxu0 %vm386_vm3, %v9065_v6  ;;  %v21688_v14 = vadd.f32 %v21622_v57, %v8023_v35  ;;  %v9056_v5 = vld [vmem:[#allocation3 + $0x9a] sm:$0xff] }
 0x6f7   : > { %v16351_v20 = vpop.f32.mrb[247].mxu1  ;;  %16550 = vmatprep.mubr.msk.bf16.mxu0 %vm18440_vm2, %v22787_v33 }
 0x6f9   : > { %16601 = vmatmul.mubr.msk.bf16.gmra.mrb[108].mxu1 %vm386_vm3, %v9270_v44  ;;  %v7977_v7 = vpop.f32.mrb[236].mxu0  ;;  %v9068_v44 = vpack.c.bf16 %v9057_v38, %v9056_v5 }
 0x6fa   : > { %16604 = vmatprep.mubr.msk.bf16.mxu1 %vm18440_vm2, %v22787_v33  ;;  %v8024_v39 = vadd.f32 %v7977_v7, %v21533_v3  ;;  %v16300_v2 = vpop.f32.mrb[237].mxu0  ;;  %v9271_v3 = vpack.c.bf16 %v9261_v15, %v9260_v11 }
 0x6fb   : > { %v7980_v13 = vpop.f32.mrb[238].mxu0  ;;  %v9059_v2 = vld [vmem:[#allocation3 + $0xb2] sm:$0xff] }
 0x6fc   : > { %v21696_v25 = vpop.f32.mrb[248].mxu1  ;;  %v8025_v57 = vadd.f32 %v7980_v13, %v21539_v22  ;;  %v16301_v32 = vpop.f32.mrb[239].mxu0  ;;  %v21700_v16 = vadd.f32 %v21638_v51, %v8024_v39 }
 0x6fd   : > { %v16354_v46 = vpop.f32.mrb[249].mxu1 }
 0x6fe   : > { %v8206_v42 = vpop.f32.mrb[250].mxu1  ;;  %16551 = vmatmul.mubr.msk.bf16.gmra.mrb[88].mxu0 %vm386_vm3, %v9066_v40  ;;  %v21704_v45 = vadd.f32 %v21648_v53, %v8025_v57  ;;  %v9058_v57 = vld [vmem:[#allocation3 + $0xaa] sm:$0xff] }
 0x6ff   : > { %v16355_v0 = vpop.f32.mrb[251].mxu1  ;;  %16554 = vmatprep.mubr.msk.bf16.mxu0 %vm18440_vm2, %v22787_v33  ;;  %v9069_v40 = vpack.c.bf16 %v9059_v2, %v9058_v57 }
 0x701   : > { %16605 = vmatmul.mubr.msk.bf16.gmra.mrb[112].mxu1 %vm386_vm3, %v9271_v3  ;;  %v7985_v22 = vpop.f32.mrb[240].mxu0 }
 0x702   : > { %16608 = vmatprep.mubr.msk.bf16.mxu1 %vm18440_vm2, %v22787_v33  ;;  %v8026_v51 = vadd.f32 %v7985_v22, %v21551_v63  ;;  %v16304_v4 = vpop.f32.mrb[241].mxu0  ;;  %v9060_v22 = vld [vmem:[#allocation3 + $0xba] sm:$0xff] }
 0x703   : > { %v7988_v27 = vpop.f32.mrb[242].mxu0 }
 0x704   : > { %v8211_v41 = vpop.f32.mrb[252].mxu1  ;;  %v8027_v53 = vadd.f32 %v7988_v27, %v21555_v60  ;;  %v16305_v58 = vpop.f32.mrb[243].mxu0  ;;  %v21714_v54 = vadd.f32 %v21660_v50, %v8026_v51  ;;  %v9061_v27 = vld [vmem:[#allocation3 + $0xc2] sm:$0xf] }
 0x705   : > { %v16358_v26 = vpop.f32.mrb[253].mxu1  ;;  %v9070_v48 = vpack.c.bf16 %v9061_v27, %v9060_v22 }
 0x706   : > { %v8214_v19 = vpop.f32.mrb[254].mxu1  ;;  %16555 = vmatmul.mubr.msk.bf16.gmra.mrb[92].mxu0 %vm386_vm3, %v9067_v62  ;;  %v21718_v63 = vadd.f32 %v21666_v18, %v8027_v53  ;;  %v9449_v62 = vld [vmem:[#allocation3 + $0x44] sm:$0xff] }
 0x707   : > { %v16359_v49 = vpop.f32.mrb[255].mxu1  ;;  %16558 = vmatprep.mubr.msk.bf16.mxu0 %vm18440_vm2, %v22787_v33 }
 0x709   : > { %16609 = vmatmul.mubr.msk.bf16.gmra.mrb[116].mxu1 %vm386_vm3, %v9272_v21  ;;  %v7993_v60 = vpop.f32.mrb[244].mxu0  ;;  %v9448_v21 = vld [vmem:[#allocation3 + $0x3c] sm:$0xff] }
 0x70a   : > { %v8028_v8 = vadd.f32 %v7993_v60, %v21567_v28  ;;  %v16308_v50 = vpop.f32.mrb[245].mxu0 }
 0x70b   : > { %v7996_v35 = vpop.f32.mrb[246].mxu0 }
 0x70c   : > { %v8551_v43 = vpop.f32.mrb[0].mxu1  ;;  %v8029_v6 = vadd.f32 %v7996_v35, %v21573_v9  ;;  %v16309_v31 = vpop.f32.mrb[247].mxu0  ;;  %v21726_v18 = vadd.f32 %v21678_v23, %v8028_v8  ;;  %v9466_v8 = vpack.c.bf16 %v9449_v62, %v9448_v21  ;;  %v9454_v62 = vld [vmem:[#allocation3 + $0x6c] sm:$0xff] }
 0x70d   : > { %v16410_v20 = vpop.f32.mrb[1].mxu1  ;;  %v9451_v31 = vld [vmem:[#allocation3 + $0x54] sm:$0xff] }
 0x70e   : > { %v8554_v7 = vpop.f32.mrb[2].mxu1  ;;  %16559 = vmatmul.mubr.msk.bf16.gmra.mrb[96].mxu0 %vm386_vm3, %v9068_v44  ;;  %v21730_v39 = vadd.f32 %v21684_v29, %v8029_v6 }
 0x70f   : > { %v16411_v30 = vpop.f32.mrb[3].mxu1  ;;  %16562 = vmatprep.mubr.msk.bf16.mxu0 %vm18440_vm2, %v22787_v33 }
 0x711   : > { %v8001_v28 = vpop.f32.mrb[248].mxu0 }
 0x712   : > { %v8030_v9 = vadd.f32 %v8001_v28, %v21585_v36  ;;  %v16312_v13 = vpop.f32.mrb[249].mxu0  ;;  %v9450_v28 = vld [vmem:[#allocation3 + $0x4c] sm:$0xff] }
 0x713   : > { %v8004_v34 = vpop.f32.mrb[250].mxu0  ;;  %v9467_v13 = vpack.c.bf16 %v9451_v31, %v9450_v28  ;;  %v9456_v31 = vld [vmem:[#allocation3 + $0x7c] sm:$0xff] }
 0x714   : > { %v8559_v15 = vpop.f32.mrb[4].mxu1  ;;  %v8031_v23 = vadd.f32 %v8004_v34, %v21591_v10  ;;  %v16313_v32 = vpop.f32.mrb[251].mxu0  ;;  %v21737_v11 = vadd.f32 %v21696_v25, %v8030_v9 }
 0x715   : > { %v16414_v46 = vpop.f32.mrb[5].mxu1  ;;  %v9453_v32 = vld [vmem:[#allocation3 + $0x64] sm:$0xff] }
 0x716   : > { %v8562_v29 = vpop.f32.mrb[6].mxu1  ;;  %16563 = vmatmul.mubr.msk.bf16.gmra.mrb[100].mxu0 %vm386_vm3, %v9069_v40  ;;  %v21740_v3 = vadd.f32 %v8206_v42, %v8031_v23 }
 0x717   : > { %v16415_v0 = vpop.f32.mrb[7].mxu1  ;;  %16566 = vmatprep.mubr.msk.bf16.mxu0 %vm18440_vm2, %v22787_v33 }
 0x719   : > { %v8009_v36 = vpop.f32.mrb[252].mxu0 }
 0x71a   : > { %v8032_v61 = vadd.f32 %v8009_v36, %v21602_v24  ;;  %v16316_v10 = vpop.f32.mrb[253].mxu0  ;;  %v9452_v36 = vld [vmem:[#allocation3 + $0x5c] sm:$0xff] }
 0x71b   : > { %v8012_v51 = vpop.f32.mrb[254].mxu0  ;;  %v9468_v10 = vpack.c.bf16 %v9453_v32, %v9452_v36  ;;  %v9458_v32 = vld [vmem:[#allocation3 + $0x8c] sm:$0xff] }
 0x71c   : > { %v8567_v4 = vpop.f32.mrb[8].mxu1  ;;  %v16317_v17 = vpop.f32.mrb[255].mxu0  ;;  %v21745_v53 = vadd.f32 %v8211_v41, %v8032_v61 }
 0x71d   : > { %v16418_v25 = vpop.f32.mrb[9].mxu1 }
 0x71e   : > { %v8570_v58 = vpop.f32.mrb[10].mxu1  ;;  %16567 = vmatmul.mubr.msk.bf16.gmra.mrb[104].mxu0 %vm386_vm3, %v9070_v48  ;;  %v9455_v25 = vld [vmem:[#allocation3 + $0x74] sm:$0xff] }
 0x71f   : > { %v16419_v26 = vpop.f32.mrb[11].mxu1  ;;  %16618 = vmatprep.mubr.msk.bf16.mxu0 %vm18440_vm2, %v22787_v33 }
 0x721   : > { %v8349_v42 = vpop.f32.mrb[0].mxu0 }
 0x722   : > { %v8420_v24 = vadd.f32 %v8349_v42, %v21620_v1  ;;  %v16368_v19 = vpop.f32.mrb[1].mxu0 }
 0x723   : > { %v8352_v12 = vpop.f32.mrb[2].mxu0 }
 0x724   : > { %v8575_v49 = vpop.f32.mrb[12].mxu1  ;;  %v8421_v60 = vadd.f32 %v8352_v12, %v21626_v59  ;;  %v16369_v38 = vpop.f32.mrb[3].mxu0  ;;  %v21752_v50 = vadd.f32 %v8551_v43, %v8420_v24  ;;  %v9469_v12 = vpack.c.bf16 %v9455_v25, %v9454_v62  ;;  %v9460_v25 = vld [vmem:[#allocation3 + $0x9c] sm:$0xff] }
 0x725   : > { %v16422_v41 = vpop.f32.mrb[13].mxu1 }
 0x726   : > { %v8578_v35 = vpop.f32.mrb[14].mxu1  ;;  %16619 = vmatmul.mubr.msk.bf16.vlgmr.msra.gmra.mrb[108].mxu0 %vm386_vm3, %v9466_v8  ;;  %v21755_v6 = vadd.f32 %v8554_v7, %v8421_v60  ;;  %v9457_v41 = vld [vmem:[#allocation3 + $0x84] sm:$0xff] }
 0x727   : > { %v16423_v5 = vpop.f32.mrb[15].mxu1  ;;  %16622 = vmatprep.mubr.msk.bf16.mxu0 %vm18440_vm2, %v22787_v33 }
 0x729   : > { %v8357_v1 = vpop.f32.mrb[4].mxu0 }
 0x72a   : > { %v8422_v20 = vadd.f32 %v8357_v1, %v21646_v55  ;;  %v16372_v44 = vpop.f32.mrb[5].mxu0 }
 0x72b   : > { %v8360_v59 = vpop.f32.mrb[6].mxu0 }
 0x72c   : > { %v8583_v30 = vpop.f32.mrb[16].mxu1  ;;  %v8423_v43 = vadd.f32 %v8360_v59, %v21652_v56  ;;  %v16373_v2 = vpop.f32.mrb[7].mxu0  ;;  %v21761_v34 = vadd.f32 %v8559_v15, %v8422_v20  ;;  %v9470_v59 = vpack.c.bf16 %v9457_v41, %v9456_v31  ;;  %v9462_v41 = vld [vmem:[#allocation3 + $0xac] sm:$0xff] }
 0x72d   : > { %v16426_v9 = vpop.f32.mrb[17].mxu1 }
 0x72e   : > { %v8586_v7 = vpop.f32.mrb[18].mxu1  ;;  %16623 = vmatmul.mubr.msk.bf16.gmra.mrb[112].mxu0 %vm386_vm3, %v9467_v13  ;;  %v21764_v23 = vadd.f32 %v8562_v29, %v8423_v43  ;;  %v9459_v9 = vld [vmem:[#allocation3 + $0x94] sm:$0xff] }
 0x72f   : > { %v16427_v57 = vpop.f32.mrb[19].mxu1  ;;  %16626 = vmatprep.mubr.msk.bf16.mxu0 %vm18440_vm2, %v22787_v33 }
 0x731   : > { %v8365_v55 = vpop.f32.mrb[8].mxu0 }
 0x732   : > { %v8424_v46 = vadd.f32 %v8365_v55, %v21664_v37  ;;  %v16376_v40 = vpop.f32.mrb[9].mxu0 }
 0x733   : > { %v8368_v56 = vpop.f32.mrb[10].mxu0 }
 0x734   : > { %v8591_v0 = vpop.f32.mrb[20].mxu1  ;;  %v8425_v15 = vadd.f32 %v8368_v56, %v21670_v52  ;;  %v16377_v22 = vpop.f32.mrb[11].mxu0  ;;  %v21770_v51 = vadd.f32 %v8567_v4, %v8424_v46  ;;  %v9471_v56 = vpack.c.bf16 %v9459_v9, %v9458_v32 }
 0x735   : > { %v16430_v61 = vpop.f32.mrb[21].mxu1 }
 0x736   : > { %v8594_v29 = vpop.f32.mrb[22].mxu1  ;;  %16627 = vmatmul.mubr.msk.bf16.gmra.mrb[116].mxu0 %vm386_vm3, %v9468_v10  ;;  %v21773_v17 = vadd.f32 %v8570_v58, %v8425_v15  ;;  %v9461_v61 = vld [vmem:[#allocation3 + $0xa4] sm:$0xff] }
 0x737   : > { %v16431_v27 = vpop.f32.mrb[23].mxu1  ;;  %16630 = vmatprep.mubr.msk.bf16.mxu0 %vm18440_vm2, %v22787_v33 }
 0x739   : > { %v8373_v37 = vpop.f32.mrb[12].mxu0 }
 0x73a   : > { %v8426_v48 = vadd.f32 %v8373_v37, %v21682_v47  ;;  %v16380_v26 = vpop.f32.mrb[13].mxu0 }
 0x73b   : > { %v8376_v52 = vpop.f32.mrb[14].mxu0 }
 0x73c   : > { %v8599_v42 = vpop.f32.mrb[24].mxu1  ;;  %v8427_v4 = vadd.f32 %v8376_v52, %v21688_v14  ;;  %v16381_v24 = vpop.f32.mrb[15].mxu0  ;;  %v21779_v21 = vadd.f32 %v8575_v49, %v8426_v48  ;;  %v9472_v52 = vpack.c.bf16 %v9461_v61, %v9460_v25 }
 0x73d   : > { %v16434_v19 = vpop.f32.mrb[25].mxu1 }
 0x73e   : > { %v8602_v58 = vpop.f32.mrb[26].mxu1  ;;  %16631 = vmatmul.mubr.msk.bf16.gmra.mrb[120].mxu0 %vm386_vm3, %v9469_v12  ;;  %v21782_v38 = vadd.f32 %v8578_v35, %v8427_v4  ;;  %v9463_v19 = vld [vmem:[#allocation3 + $0xb4] sm:$0xff] }
 0x73f   : > { %v16435_v60 = vpop.f32.mrb[27].mxu1  ;;  %16634 = vmatprep.mubr.msk.bf16.mxu0 %vm18440_vm2, %v22787_v33 }
 0x741   : > { %v8381_v47 = vpop.f32.mrb[16].mxu0 }
 0x742   : > { %v8428_v8 = vadd.f32 %v8381_v47, %v21700_v16  ;;  %v16384_v5 = vpop.f32.mrb[17].mxu0 }
 0x743   : > { %v8384_v14 = vpop.f32.mrb[18].mxu0 }
 0x744   : > { %v8607_v1 = vpop.f32.mrb[28].mxu1  ;;  %v8429_v49 = vadd.f32 %v8384_v14, %v21704_v45  ;;  %v16385_v20 = vpop.f32.mrb[19].mxu0  ;;  %v21788_v28 = vadd.f32 %v8583_v30, %v8428_v8  ;;  %v9473_v14 = vpack.c.bf16 %v9463_v19, %v9462_v41 }
 0x745   : > { %v16438_v44 = vpop.f32.mrb[29].mxu1 }
 0x746   : > { %v8610_v35 = vpop.f32.mrb[30].mxu1  ;;  %16635 = vmatmul.mubr.msk.bf16.gmra.mrb[124].mxu0 %vm386_vm3, %v9470_v59  ;;  %v21791_v2 = vadd.f32 %v8586_v7, %v8429_v49  ;;  %v9464_v44 = vld [vmem:[#allocation3 + $0xbc] sm:$0xff]  ;;  %v9465_v59 = vld [vmem:[#allocation3 + $0xc4] sm:$0xf] }
 0x747   : > { %v16439_v43 = vpop.f32.mrb[31].mxu1  ;;  %16638 = vmatprep.mubr.msk.bf16.mxu0 %vm18440_vm2, %v22787_v33 }
 0x749   : > { %v8389_v16 = vpop.f32.mrb[20].mxu0 }
 0x74a   : > { %v8430_v13 = vadd.f32 %v8389_v16, %v21714_v54  ;;  %v16388_v57 = vpop.f32.mrb[21].mxu0 }
 0x74b   : > { %v8392_v45 = vpop.f32.mrb[22].mxu0  ;;  %v9474_v57 = vpack.c.bf16 %v9465_v59, %v9464_v44 }
 0x74c   : > { %v8615_v55 = vpop.f32.mrb[32].mxu1  ;;  %v8431_v30 = vadd.f32 %v8392_v45, %v21718_v63  ;;  %v16389_v46 = vpop.f32.mrb[23].mxu0  ;;  %v21797_v36 = vadd.f32 %v8591_v0, %v8430_v13 }
 0x74d   : > { %v16442_v40 = vpop.f32.mrb[33].mxu1 }
 0x74e   : > { %v8618_v7 = vpop.f32.mrb[34].mxu1  ;;  %16639 = vmatmul.mubr.msk.bf16.gmra.mrb[128].mxu0 %vm386_vm3, %v9471_v56  ;;  %v21800_v22 = vadd.f32 %v8594_v29, %v8431_v30 }
 0x74f   : > { %v16443_v15 = vpop.f32.mrb[35].mxu1  ;;  %16642 = vmatprep.mubr.msk.bf16.mxu0 %vm18440_vm2, %v22787_v33 }
 0x751   : > { %v8397_v54 = vpop.f32.mrb[24].mxu0 }
 0x752   : > { %v8432_v10 = vadd.f32 %v8397_v54, %v21726_v18  ;;  %v16392_v27 = vpop.f32.mrb[25].mxu0 }
 0x753   : > { %v8400_v63 = vpop.f32.mrb[26].mxu0 }
 0x754   : > { %v8955_v37 = vpop.f32.mrb[36].mxu1  ;;  %v8433_v0 = vadd.f32 %v8400_v63, %v21730_v39  ;;  %v16393_v48 = vpop.f32.mrb[27].mxu0  ;;  %v21806_v62 = vadd.f32 %v8599_v42, %v8432_v10 }
 0x755   : > { %v16494_v26 = vpop.f32.mrb[37].mxu1 }
 0x756   : > { %v8958_v29 = vpop.f32.mrb[38].mxu1  ;;  %16643 = vmatmul.mubr.msk.bf16.gmra.mrb[132].mxu0 %vm386_vm3, %v9472_v52  ;;  %v21809_v24 = vadd.f32 %v8602_v58, %v8433_v0 }
 0x757   : > { %v16495_v4 = vpop.f32.mrb[39].mxu1  ;;  %16646 = vmatprep.mubr.msk.bf16.mxu0 %vm18440_vm2, %v22787_v33 }
 0x759   : > { %v8405_v18 = vpop.f32.mrb[28].mxu0 }
 0x75a   : > { %v8434_v12 = vadd.f32 %v8405_v18, %v21737_v11  ;;  %v16396_v60 = vpop.f32.mrb[29].mxu0 }
 0x75b   : > { %v8408_v39 = vpop.f32.mrb[30].mxu0 }
 0x75c   : > { %v8963_v47 = vpop.f32.mrb[40].mxu1  ;;  %v8435_v42 = vadd.f32 %v8408_v39, %v21740_v3  ;;  %v16397_v8 = vpop.f32.mrb[31].mxu0  ;;  %v21815_v31 = vadd.f32 %v8607_v1, %v8434_v12 }
 0x75d   : > { %v16498_v5 = vpop.f32.mrb[41].mxu1 }
 0x75e   : > { %v8966_v58 = vpop.f32.mrb[42].mxu1  ;;  %16647 = vmatmul.mubr.msk.bf16.gmra.mrb[136].mxu0 %vm386_vm3, %v9473_v14  ;;  %v21818_v20 = vadd.f32 %v8610_v35, %v8435_v42 }
 0x75f   : > { %v16499_v49 = vpop.f32.mrb[43].mxu1  ;;  %16650 = vmatprep.mubr.msk.bf16.mxu0 %vm18440_vm2, %v22787_v33 }
 0x761   : > { %v8413_v11 = vpop.f32.mrb[32].mxu0 }
 0x762   : > { %v8436_v43 = vadd.f32 %v8413_v11, %v21745_v53  ;;  %v16400_v3 = vpop.f32.mrb[33].mxu0 }
 0x763   : > { %v8416_v16 = vpop.f32.mrb[34].mxu0 }
 0x764   : > { %v8971_v9 = vpop.f32.mrb[44].mxu1  ;;  %v16401_v13 = vpop.f32.mrb[35].mxu0  ;;  %v21823_v45 = vadd.f32 %v8615_v55, %v8436_v43 }
 0x765   : > { %v16502_v1 = vpop.f32.mrb[45].mxu1 }
 0x766   : > { %v8974_v32 = vpop.f32.mrb[46].mxu1  ;;  %16651 = vmatmul.mubr.msk.bf16.gmra.mrb[140].mxu0 %vm386_vm3, %v9474_v57 }
 0x767   : > { %v16503_v30 = vpop.f32.mrb[47].mxu1 }
 0x769   : > { %v8753_v35 = vpop.f32.mrb[36].mxu0 }
 0x76a   : > { %v8824_v46 = vadd.f32 %v8753_v35, %v21752_v50  ;;  %v16452_v40 = vpop.f32.mrb[37].mxu0 }
 0x76b   : > { %v8756_v56 = vpop.f32.mrb[38].mxu0 }
 0x76c   : > { %v8979_v7 = vpop.f32.mrb[48].mxu1  ;;  %v8825_v53 = vadd.f32 %v8756_v56, %v21755_v6  ;;  %v16453_v15 = vpop.f32.mrb[39].mxu0  ;;  %v21828_v61 = vadd.f32 %v8955_v37, %v8824_v46 }
 0x76d   : > { %v16506_v54 = vpop.f32.mrb[49].mxu1 }
 0x76e   : > { %v8982_v10 = vpop.f32.mrb[50].mxu1  ;;  %v21830_v55 = vadd.f32 %v8958_v29, %v8825_v53 }
 0x76f   : > { %v16507_v27 = vpop.f32.mrb[51].mxu1 }
 0x771   : > { %v8761_v63 = vpop.f32.mrb[40].mxu0 }
 0x772   : > { %v8826_v25 = vadd.f32 %v8761_v63, %v21761_v34  ;;  %v16456_v0 = vpop.f32.mrb[41].mxu0 }
 0x773   : > { %v8764_v48 = vpop.f32.mrb[42].mxu0 }
 0x774   : > { %v8987_v26 = vpop.f32.mrb[52].mxu1  ;;  %v8827_v50 = vadd.f32 %v8764_v48, %v21764_v23  ;;  %v16457_v52 = vpop.f32.mrb[43].mxu0  ;;  %v21834_v18 = vadd.f32 %v8963_v47, %v8826_v25 }
 0x775   : > { %v16510_v4 = vpop.f32.mrb[53].mxu1 }
 0x776   : > { %v8990_v6 = vpop.f32.mrb[54].mxu1  ;;  %v21836_v37 = vadd.f32 %v8966_v58, %v8827_v50 }
 0x777   : > { %v16511_v19 = vpop.f32.mrb[55].mxu1 }
 0x779   : > { %v8769_v12 = vpop.f32.mrb[44].mxu0 }
 0x77a   : > { %v8828_v29 = vadd.f32 %v8769_v12, %v21770_v51  ;;  %v16460_v60 = vpop.f32.mrb[45].mxu0 }
 0x77b   : > { %v8772_v39 = vpop.f32.mrb[46].mxu0 }
 0x77c   : > { %v8995_v41 = vpop.f32.mrb[56].mxu1  ;;  %v8829_v34 = vadd.f32 %v8772_v39, %v21773_v17  ;;  %v16461_v42 = vpop.f32.mrb[47].mxu0  ;;  %v21840_v5 = vadd.f32 %v8971_v9, %v8828_v29 }
 0x77d   : > { %v16514_v8 = vpop.f32.mrb[57].mxu1 }
 0x77e   : > { %v8998_v23 = vpop.f32.mrb[58].mxu1  ;;  %v21842_v47 = vadd.f32 %v8974_v32, %v8829_v34 }
 0x77f   : > { %v16515_v14 = vpop.f32.mrb[59].mxu1 }
 0x781   : > { %v8777_v49 = vpop.f32.mrb[48].mxu0 }
 0x782   : > { %v8830_v58 = vadd.f32 %v8777_v49, %v21779_v21  ;;  %v16464_v11 = vpop.f32.mrb[49].mxu0 }
 0x783   : > { %v8780_v44 = vpop.f32.mrb[50].mxu0 }
 0x784   : > { %v9003_v59 = vpop.f32.mrb[60].mxu1  ;;  %v8831_v51 = vadd.f32 %v8780_v44, %v21782_v38  ;;  %v16465_v43 = vpop.f32.mrb[51].mxu0  ;;  %v21846_v16 = vadd.f32 %v8979_v7, %v8830_v58 }
 0x785   : > { %v16518_v3 = vpop.f32.mrb[61].mxu1 }
 0x786   : > { %v9006_v17 = vpop.f32.mrb[62].mxu1  ;;  %v21848_v9 = vadd.f32 %v8982_v10, %v8831_v51 }
 0x787   : > { %v16519_v13 = vpop.f32.mrb[63].mxu1 }
 0x789   : > { %v8785_v1 = vpop.f32.mrb[52].mxu0 }
 0x78a   : > { %v8832_v57 = vadd.f32 %v8785_v1, %v21788_v28  ;;  %v16468_v32 = vpop.f32.mrb[53].mxu0 }
 0x78b   : > { %v8788_v30 = vpop.f32.mrb[54].mxu0 }
 0x78c   : > { %v9011_v35 = vpop.f32.mrb[64].mxu1  ;;  %v8833_v21 = vadd.f32 %v8788_v30, %v21791_v2  ;;  %v16469_v46 = vpop.f32.mrb[55].mxu0  ;;  %v21852_v56 = vadd.f32 %v8987_v26, %v8832_v57 }
 0x78d   : > { %v16522_v40 = vpop.f32.mrb[65].mxu1 }
 0x78e   : > { %v9014_v38 = vpop.f32.mrb[66].mxu1  ;;  %v21854_v7 = vadd.f32 %v8990_v6, %v8833_v21 }
 0x78f   : > { %v16523_v53 = vpop.f32.mrb[67].mxu1 }
 0x791   : > { %v8793_v15 = vpop.f32.mrb[56].mxu0 }
 0x792   : > { %v8834_v54 = vadd.f32 %v8793_v15, %v21797_v36  ;;  %v16472_v10 = vpop.f32.mrb[57].mxu0 }
 0x793   : > { %v8796_v27 = vpop.f32.mrb[58].mxu0 }
 0x794   : > { %v9019_v63 = vpop.f32.mrb[68].mxu1  ;;  %v8835_v28 = vadd.f32 %v8796_v27, %v21800_v22  ;;  %v16473_v25 = vpop.f32.mrb[59].mxu0  ;;  %v21858_v48 = vadd.f32 %v8995_v41, %v8834_v54 }
 0x795   : > { %v16526_v0 = vpop.f32.mrb[69].mxu1 }
 0x796   : > { %v9022_v2 = vpop.f32.mrb[70].mxu1  ;;  %v21860_v26 = vadd.f32 %v8998_v23, %v8835_v28 }
 0x797   : > { %v16527_v50 = vpop.f32.mrb[71].mxu1 }
 0x799   : > { %v8801_v52 = vpop.f32.mrb[60].mxu0 }
 0x79a   : > { %v8836_v4 = vadd.f32 %v8801_v52, %v21806_v62  ;;  %v16476_v6 = vpop.f32.mrb[61].mxu0 }
 0x79b   : > { %v8804_v19 = vpop.f32.mrb[62].mxu0 }
 0x79c   : > { %v9359_v12 = vpop.f32.mrb[72].mxu1  ;;  %v8837_v36 = vadd.f32 %v8804_v19, %v21809_v24  ;;  %v16477_v29 = vpop.f32.mrb[63].mxu0  ;;  %v21864_v39 = vadd.f32 %v9003_v59, %v8836_v4 }
 0x79d   : > { %v16578_v60 = vpop.f32.mrb[73].mxu1 }
 0x79e   : > { %v9362_v22 = vpop.f32.mrb[74].mxu1  ;;  %v21866_v41 = vadd.f32 %v9006_v17, %v8837_v36 }
 0x79f   : > { %v16579_v34 = vpop.f32.mrb[75].mxu1 }
 0x7a1   : > { %v8809_v42 = vpop.f32.mrb[64].mxu0 }
 0x7a2   : > { %v8838_v8 = vadd.f32 %v8809_v42, %v21815_v31  ;;  %v16480_v23 = vpop.f32.mrb[65].mxu0 }
 0x7a3   : > { %v8812_v14 = vpop.f32.mrb[66].mxu0 }
 0x7a4   : > { %v9367_v49 = vpop.f32.mrb[76].mxu1  ;;  %v8839_v62 = vadd.f32 %v8812_v14, %v21818_v20  ;;  %v16481_v58 = vpop.f32.mrb[67].mxu0  ;;  %v21870_v44 = vadd.f32 %v9011_v35, %v8838_v8 }
 0x7a5   : > { %v16582_v11 = vpop.f32.mrb[77].mxu1 }
 0x7a6   : > { %v9370_v24 = vpop.f32.mrb[78].mxu1  ;;  %v21872_v59 = vadd.f32 %v9014_v38, %v8839_v62 }
 0x7a7   : > { %v16583_v51 = vpop.f32.mrb[79].mxu1 }
 0x7a9   : > { %v8817_v43 = vpop.f32.mrb[68].mxu0 }
 0x7aa   : > { %v8840_v3 = vadd.f32 %v8817_v43, %v21823_v45  ;;  %v16484_v17 = vpop.f32.mrb[69].mxu0 }
 0x7ab   : > { %v8820_v13 = vpop.f32.mrb[70].mxu0 }
 0x7ac   : > { %v9375_v1 = vpop.f32.mrb[80].mxu1  ;;  %v16485_v31 = vpop.f32.mrb[71].mxu0  ;;  %v21875_v32 = vadd.f32 %v9019_v63, %v8840_v3 }
 0x7ad   : > { %v16586_v57 = vpop.f32.mrb[81].mxu1 }
 0x7ae   : > { %v9378_v30 = vpop.f32.mrb[82].mxu1 }
 0x7af   : > { %v16587_v20 = vpop.f32.mrb[83].mxu1 }
 0x7b1   : > { %v9157_v21 = vpop.f32.mrb[72].mxu0 }
 0x7b2   : > { %v9228_v35 = vadd.f32 %v9157_v21, %v21828_v61  ;;  %v16536_v46 = vpop.f32.mrb[73].mxu0 }
 0x7b3   : > { %v9160_v40 = vpop.f32.mrb[74].mxu0 }
 0x7b4   : > { %v9383_v53 = vpop.f32.mrb[84].mxu1  ;;  %v9229_v38 = vadd.f32 %v9160_v40, %v21830_v55  ;;  %v16537_v15 = vpop.f32.mrb[75].mxu0  ;;  %v21879_v45 = vadd.f32 %v9359_v12, %v9228_v35 }
 0x7b5   : > { %v16590_v54 = vpop.f32.mrb[85].mxu1 }
 0x7b6   : > { %v9386_v10 = vpop.f32.mrb[86].mxu1  ;;  %v21881_v28 = vadd.f32 %v9362_v22, %v9229_v38 }
 0x7b7   : > { %v16591_v27 = vpop.f32.mrb[87].mxu1 }
 0x7b9   : > { %v9165_v63 = vpop.f32.mrb[76].mxu0 }
 0x7ba   : > { %v9230_v25 = vadd.f32 %v9165_v63, %v21834_v18  ;;  %v16540_v0 = vpop.f32.mrb[77].mxu0 }
 0x7bb   : > { %v9168_v2 = vpop.f32.mrb[78].mxu0 }
 0x7bc   : > { %v9391_v50 = vpop.f32.mrb[100].mxu1  ;;  %v9231_v61 = vadd.f32 %v9168_v2, %v21836_v37  ;;  %v16541_v52 = vpop.f32.mrb[79].mxu0  ;;  %v21885_v6 = vadd.f32 %v9367_v49, %v9230_v25 }
 0x7bd   : > { %v16594_v4 = vpop.f32.mrb[101].mxu1 }
 0x7be   : > { %v9394_v55 = vpop.f32.mrb[102].mxu1  ;;  %v21887_v12 = vadd.f32 %v9370_v24, %v9231_v61 }
 0x7bf   : > { %v16595_v19 = vpop.f32.mrb[103].mxu1 }
 0x7c1   : > { %v9173_v36 = vpop.f32.mrb[80].mxu0 }
 0x7c2   : > { %v9232_v29 = vadd.f32 %v9173_v36, %v21840_v5  ;;  %v16544_v60 = vpop.f32.mrb[81].mxu0 }
 0x7c3   : > { %v9176_v22 = vpop.f32.mrb[82].mxu0 }
 0x7c4   : > { %v9399_v34 = vpop.f32.mrb[104].mxu1  ;;  %v9233_v18 = vadd.f32 %v9176_v22, %v21842_v47  ;;  %v16545_v42 = vpop.f32.mrb[83].mxu0  ;;  %v21891_v23 = vadd.f32 %v9375_v1, %v9232_v29 }
 0x7c5   : > { %v16598_v8 = vpop.f32.mrb[105].mxu1 }
 0x7c6   : > { %v9402_v37 = vpop.f32.mrb[106].mxu1  ;;  %v21893_v49 = vadd.f32 %v9378_v30, %v9233_v18 }
 0x7c7   : > { %v16599_v14 = vpop.f32.mrb[107].mxu1 }
 0x7c9   : > { %v9181_v62 = vpop.f32.mrb[84].mxu0 }
 0x7ca   : > { %v9234_v58 = vadd.f32 %v9181_v62, %v21846_v16  ;;  %v16548_v11 = vpop.f32.mrb[85].mxu0 }
 0x7cb   : > { %v9184_v24 = vpop.f32.mrb[86].mxu0 }
 0x7cc   : > { %v9407_v51 = vpop.f32.mrb[108].mxu1  ;;  %v9235_v5 = vadd.f32 %v9184_v24, %v21848_v9  ;;  %v16549_v43 = vpop.f32.mrb[87].mxu0  ;;  %v21897_v17 = vadd.f32 %v9383_v53, %v9234_v58 }
 0x7cd   : > { %v16602_v3 = vpop.f32.mrb[109].mxu1 }
 0x7ce   : > { %v9410_v47 = vpop.f32.mrb[110].mxu1  ;;  %v21899_v1 = vadd.f32 %v9386_v10, %v9235_v5 }
 0x7cf   : > { %v16603_v13 = vpop.f32.mrb[111].mxu1 }
 0x7d1   : > { %v9189_v31 = vpop.f32.mrb[88].mxu0 }
 0x7d2   : > { %v9236_v57 = vadd.f32 %v9189_v31, %v21852_v56  ;;  %v16552_v30 = vpop.f32.mrb[89].mxu0 }
 0x7d3   : > { %v9192_v20 = vpop.f32.mrb[90].mxu0 }
 0x7d4   : > { %v9415_v21 = vpop.f32.mrb[112].mxu1  ;;  %v9237_v16 = vadd.f32 %v9192_v20, %v21854_v7  ;;  %v16553_v35 = vpop.f32.mrb[91].mxu0  ;;  %v21903_v40 = vadd.f32 %v9391_v50, %v9236_v57 }
 0x7d5   : > { %v16606_v46 = vpop.f32.mrb[113].mxu1 }
 0x7d6   : > { %v9418_v9 = vpop.f32.mrb[114].mxu1  ;;  %v21905_v53 = vadd.f32 %v9394_v55, %v9237_v16 }
 0x7d7   : > { %v16607_v38 = vpop.f32.mrb[115].mxu1 }
 0x7d9   : > { %v9197_v15 = vpop.f32.mrb[92].mxu0 }
 0x7da   : > { %v9238_v54 = vadd.f32 %v9197_v15, %v21858_v48  ;;  %v16556_v10 = vpop.f32.mrb[93].mxu0 }
 0x7db   : > { %v9200_v27 = vpop.f32.mrb[94].mxu0 }
 0x7dc   : > { %v9423_v63 = vpop.f32.mrb[116].mxu1  ;;  %v9239_v56 = vadd.f32 %v9200_v27, %v21860_v26  ;;  %v16557_v25 = vpop.f32.mrb[95].mxu0  ;;  %v21909_v2 = vadd.f32 %v9399_v34, %v9238_v54 }
 0x7dd   : > { %v16610_v0 = vpop.f32.mrb[117].mxu1 }
 0x7de   : > { %v9426_v7 = vpop.f32.mrb[118].mxu1  ;;  %v21911_v50 = vadd.f32 %v9402_v37, %v9239_v56 }
 0x7df   : > { %v16611_v61 = vpop.f32.mrb[119].mxu1 }
 0x7e1   : > { %v9205_v52 = vpop.f32.mrb[96].mxu0 }
 0x7e2   : > { %v9240_v4 = vadd.f32 %v9205_v52, %v21864_v39  ;;  %v16560_v55 = vpop.f32.mrb[97].mxu0 }
 0x7e3   : > { %v9208_v19 = vpop.f32.mrb[98].mxu0 }
 0x7e4   : > { %v9241_v48 = vadd.f32 %v9208_v19, %v21866_v41  ;;  %v16561_v36 = vpop.f32.mrb[99].mxu0  ;;  %v21915_v29 = vadd.f32 %v9407_v51, %v9240_v4 }
 0x7e6   : > { %v21917_v60 = vadd.f32 %v9410_v47, %v9241_v48 }
 0x7e9   : > { %v9213_v26 = vpop.f32.mrb[100].mxu0 }
 0x7ea   : > { %v9242_v22 = vadd.f32 %v9213_v26, %v21870_v44  ;;  %v16564_v34 = vpop.f32.mrb[101].mxu0  ;;  %v21931_v44 = vld [vmem:[%s22726_s4] ss:$0 sm:$0xff] }
 0x7eb   : > { %v9216_v18 = vpop.f32.mrb[102].mxu0 }
 0x7ec   : > { %v9243_v42 = vadd.f32 %v9216_v18, %v21872_v59  ;;  %v16565_v8 = vpop.f32.mrb[103].mxu0  ;;  %v21921_v37 = vadd.f32 %v9415_v21, %v9242_v22 }
 0x7ee   : > { %v21923_v39 = vadd.f32 %v9418_v9, %v9243_v42 }
 0x7f1   : > { %v9221_v14 = vpop.f32.mrb[104].mxu0 }
 0x7f2   : > { %v9244_v41 = vadd.f32 %v9221_v14, %v21875_v32  ;;  %v16568_v62 = vpop.f32.mrb[105].mxu0 }
 0x7f3   : > { %v9224_v58 = vpop.f32.mrb[106].mxu0 }
 0x7f4   : > { %v16569_v11 = vpop.f32.mrb[107].mxu0  ;;  %v21926_v24 = vadd.f32 %v9423_v63, %v9244_v41 }
 0x7f9   : > { %v9561_v51 = vpop.f32.mrb[108].mxu0 }
 0x7fa   : > { %v9632_v59 = vadd.f32 %v9561_v51, %v21879_v45  ;;  %v16620_v5 = vpop.f32.mrb[109].mxu0 }
 0x7fb   : > { %v9564_v43 = vpop.f32.mrb[110].mxu0 }
 0x7fc   : > { %v9657_v3 = vadd.f32 %v21931_v44, %v9632_v59  ;;  %v9633_v47 = vadd.f32 %v9564_v43, %v21881_v28  ;;  %v16621_v32 = vpop.f32.mrb[111].mxu0 }
 0x7fe   : > { %v9675_v13 = vmax.f32 %v9657_v3, 0.0  ;;  %v9658_v31 = vadd.f32 %v21931_v44, %v9633_v47 }
 0x800   : > { %9693 = vst [vmem:[#allocation4] sm:$0xff] %v9675_v13  ;;  %v9676_v57 = vmax.f32 %v9658_v31, 0.0 }
 0x801   : > { %v9569_v30 = vpop.f32.mrb[112].mxu0 }
 0x802   : > { %9694 = vst [vmem:[#allocation4 + $0x8] sm:$0xff] %v9676_v57  ;;  %v9634_v20 = vadd.f32 %v9569_v30, %v21885_v6  ;;  %v16624_v21 = vpop.f32.mrb[113].mxu0 }
 0x803   : > { %v9572_v16 = vpop.f32.mrb[114].mxu0 }
 0x804   : > { %v9659_v45 = vadd.f32 %v21931_v44, %v9634_v20  ;;  %v9635_v35 = vadd.f32 %v9572_v16, %v21887_v12  ;;  %v16625_v46 = vpop.f32.mrb[115].mxu0 }
 0x806   : > { %v9677_v9 = vmax.f32 %v9659_v45, 0.0  ;;  %v9660_v28 = vadd.f32 %v21931_v44, %v9635_v35 }
 0x808   : > { %9695 = vst [vmem:[#allocation4 + $0x10] sm:$0xff] %v9677_v9  ;;  %v9678_v38 = vmax.f32 %v9660_v28, 0.0 }
 0x809   : > { %v9577_v15 = vpop.f32.mrb[116].mxu0  ;;  %v9711_v27 = vld [vmem:[#allocation4] ss:$2 sm:$0x1f] }
 0x80a   : > { %9696 = vst [vmem:[#allocation4 + $0x18] sm:$0xff] %v9678_v38  ;;  %v9636_v54 = vadd.f32 %v9577_v15, %v21891_v23  ;;  %v16628_v10 = vpop.f32.mrb[117].mxu0  ;;  %v9713_v6 = vld [vmem:[#allocation4 + $0x1] ss:$2 sm:$0x1f] }
 0x80b   : > { %v9580_v63 = vpop.f32.mrb[118].mxu0  ;;  %v9718_v52 = vmax.f32 %v9711_v27, %v9713_v6 }
 0x80c   : > { %v9661_v56 = vadd.f32 %v21931_v44, %v9636_v54  ;;  %v9637_v25 = vadd.f32 %v9580_v63, %v21893_v49  ;;  %v16629_v0 = vpop.f32.mrb[119].mxu0 }
 0x80e   : > { %v9662_v61 = vadd.f32 %v21931_v44, %v9637_v25  ;;  %v9679_v55 = vmax.f32 %v9661_v56, 0.0 }
 0x80f   : > { %v9715_v12 = vld [vmem:[#allocation4 + $0xe] ss:$2 sm:$0x1f]  ;;  %v9717_v7 = vld [vmem:[#allocation4 + $0xf] ss:$2 sm:$0x1f] }
 0x810   : > { %v9719_v4 = vmax.f32 %v9715_v12, %v9717_v7  ;;  %v9680_v19 = vmax.f32 %v9662_v61, 0.0  ;;  %9697 = vst [vmem:[#allocation4 + $0x20] sm:$0xff] %v9679_v55 }
 0x811   : > { %v9585_v48 = vpop.f32.mrb[120].mxu0 }
 0x812   : > { %v9720_v36 = vmax.f32 %v9718_v52, %v9719_v4  ;;  %v9638_v23 = vadd.f32 %v9585_v48, %v21897_v17  ;;  %v16632_v26 = vpop.f32.mrb[121].mxu0  ;;  %9698 = vst [vmem:[#allocation4 + $0x28] sm:$0xff] %v9680_v19 }
 0x813   : > { %v9588_v22 = vpop.f32.mrb[122].mxu0 }
 0x814   : > { %9721 = vst [vmem:[#allocation5] sm:$0x1f] %v9720_v36  ;;  %v9663_v49 = vadd.f32 %v21931_v44, %v9638_v23  ;;  %v9639_v34 = vadd.f32 %v9588_v22, %v21899_v1  ;;  %v16633_v18 = vpop.f32.mrb[123].mxu0 }
 0x816   : > { %v9681_v42 = vmax.f32 %v9663_v49, 0.0  ;;  %v9664_v8 = vadd.f32 %v21931_v44, %v9639_v34 }
 0x817   : > { %v9723_v17 = vld [vmem:[#allocation4 + $0x1c] ss:$2 sm:$0x1f]  ;;  %v9725_v51 = vld [vmem:[#allocation4 + $0x1d] ss:$2 sm:$0x1f] }
 0x818   : > { %9699 = vst [vmem:[#allocation4 + $0x30] sm:$0xff] %v9681_v42  ;;  %v9682_v14 = vmax.f32 %v9664_v8, 0.0  ;;  %v9730_v32 = vmax.f32 %v9723_v17, %v9725_v51 }
 0x819   : > { %v9593_v41 = vpop.f32.mrb[124].mxu0 }
 0x81a   : > { %9700 = vst [vmem:[#allocation4 + $0x38] sm:$0xff] %v9682_v14  ;;  %v9640_v62 = vadd.f32 %v9593_v41, %v21903_v40  ;;  %v16636_v58 = vpop.f32.mrb[125].mxu0 }
 0x81b   : > { %v9596_v11 = vpop.f32.mrb[126].mxu0 }
 0x81c   : > { %v9665_v59 = vadd.f32 %v21931_v44, %v9640_v62  ;;  %v9641_v5 = vadd.f32 %v9596_v11, %v21905_v53  ;;  %v16637_v43 = vpop.f32.mrb[127].mxu0 }
 0x81e   : > { %v9666_v47 = vadd.f32 %v21931_v44, %v9641_v5  ;;  %v9683_v31 = vmax.f32 %v9665_v59, 0.0 }
 0x81f   : > { %v9727_v1 = vld [vmem:[#allocation4 + $0x2a] ss:$2 sm:$0x1f]  ;;  %v9729_v3 = vld [vmem:[#allocation4 + $0x2b] ss:$2 sm:$0x1f] }
 0x820   : > { %v9731_v13 = vmax.f32 %v9727_v1, %v9729_v3  ;;  %v9684_v57 = vmax.f32 %v9666_v47, 0.0  ;;  %9701 = vst [vmem:[#allocation4 + $0x40] sm:$0xff] %v9683_v31 }
 0x821   : > { %v9601_v30 = vpop.f32.mrb[128].mxu0 }
 0x822   : > { %v9732_v20 = vmax.f32 %v9730_v32, %v9731_v13  ;;  %v9642_v40 = vadd.f32 %v9601_v30, %v21909_v2  ;;  %v16640_v21 = vpop.f32.mrb[129].mxu0  ;;  %9702 = vst [vmem:[#allocation4 + $0x48] sm:$0xff] %v9684_v57  ;;  %v18214_v57 = vld [vmem:[%s22727_s5 + $0x3c] sm:$0xff]  }
 0x823   : > { %v9604_v16 = vpop.f32.mrb[130].mxu0  ;;  %16658 = vmatprep.mubr.msk.bf16.mxu1 %vm9852_vm5, %v18214_v57  ;;  %v18254_v57 = vld [vmem:[%s22727_s5 + $0x12c] sm:$0xff]  }
 0x824   : > { %9733 = vst [vmem:[#allocation5 + $0x5] sm:$0x1f] %v9732_v20  ;;  %v9667_v53 = vadd.f32 %v21931_v44, %v9642_v40  ;;  %v9643_v45 = vadd.f32 %v9604_v16, %v21911_v50  ;;  %v16641_v35 = vpop.f32.mrb[131].mxu0  ;;  %v18456_v16 = vmov 65535  }
 0x826   : > { %v9685_v46 = vmax.f32 %v9667_v53, 0.0  ;;  %v9668_v9 = vadd.f32 %v21931_v44, %v9643_v45  ;;  %v9878_v53 = vsel %vm1560_vm0, 4294967295, %v18456_v16  ;;  %v18257_v16 = vld [vmem:[%s22727_s5 + $0x144] sm:$0xff]  }
 0x827   : > { %v9735_v38 = vld [vmem:[#allocation4 + $0x38] ss:$2 sm:$0x1f]  ;;  %v9737_v15 = vld [vmem:[#allocation4 + $0x39] ss:$2 sm:$0x1f] }
 0x828   : > { %9703 = vst [vmem:[#allocation4 + $0x50] sm:$0xff] %v9685_v46  ;;  %v9686_v28 = vmax.f32 %v9668_v9, 0.0  ;;  %v9742_v2 = vmax.f32 %v9735_v38, %v9737_v15  ;;  %v21989_v45 = vsel %vm9877_vm6, %v9878_v53, 0  ;;  %v18215_v9 = vld [vmem:[%s22727_s5 + $0x44] sm:$0xff]   ;;  %v18217_v15 = vld [vmem:[%s22727_s5 + $0x54] sm:$0xff]  }
 0x829   : > { %v9739_v54 = vld [vmem:[#allocation4 + $0x46] ss:$2 sm:$0x1f]  ;;  %v9741_v10 = vld [vmem:[#allocation4 + $0x47] ss:$2 sm:$0x1f] }
 0x82a   : > { %9704 = vst [vmem:[#allocation4 + $0x58] sm:$0xff] %v9686_v28  ;;  %v9743_v27 = vmax.f32 %v9739_v54, %v9741_v10  ;;  %v9609_v63 = vpop.f32.mrb[132].mxu0  ;;  %v18216_v28 = vld [vmem:[%s22727_s5 + $0x4c] sm:$0xff]   ;;  %v18218_v10 = vld [vmem:[%s22727_s5 + $0x5c] sm:$0xff]  }
 0x82b   : > { %v9644_v6 = vadd.f32 %v9609_v63, %v21915_v29  ;;  %v16644_v56 = vpop.f32.mrb[133].mxu0  ;;  %v9770_v1 = vld [vmem:[#allocation5] sm:$0xff] }
 0x82c   : > { %v9744_v25 = vmax.f32 %v9742_v2, %v9743_v27  ;;  %v9612_v0 = vpop.f32.mrb[134].mxu0  ;;  %v18219_v2 = vld [vmem:[%s22727_s5 + $0x64] sm:$0xff]   ;;  %v18220_v27 = vld [vmem:[%s22727_s5 + $0x6c] sm:$0xff]   ;;  %v18221_v63 = vld [vmem:[%s22727_s5 + $0x74] ss:$0 sps:$4 sm:$0xff]  }
 0x82d   : > { %v9669_v50 = vadd.f32 %v21931_v44, %v9644_v6  ;;  %v9645_v12 = vadd.f32 %v9612_v0, %v21917_v60  ;;  %v16645_v7 = vpop.f32.mrb[135].mxu0  ;;  %v18222_v6 = vld [vmem:[%s22727_s5] sm:$0xff]   ;;  %v18223_v56 = vld [vmem:[%s22727_s5 + $0x8] sm:$0xff]   ;;  %v18224_v0 = vld [vmem:[%s22727_s5 + $0x10] sm:$0xff]  }
 0x82e   : > { %9745 = vst [vmem:[#allocation5 + $0xa] sm:$0x1f] %v9744_v25 }
 0x82f   : > { %v9687_v61 = vmax.f32 %v9669_v50, 0.0  ;;  %v9670_v52 = vadd.f32 %v21931_v44, %v9645_v12  ;;  %v18225_v12 = vld [vmem:[%s22727_s5 + $0x18] sm:$0xff]  }
 0x831   : > { %9705 = vst [vmem:[#allocation4 + $0x60] sm:$0xff] %v9687_v61  ;;  %v9688_v4 = vmax.f32 %v9670_v52, 0.0  ;;  %v9617_v55 = vpop.f32.mrb[136].mxu0  ;;  %v9747_v49 = vld [vmem:[#allocation4 + $0x54] ss:$2 sm:$0x1f] }
 0x832   : > { %v9646_v19 = vadd.f32 %v9617_v55, %v21921_v37  ;;  %v16648_v48 = vpop.f32.mrb[137].mxu0  ;;  %v9749_v34 = vld [vmem:[#allocation4 + $0x55] ss:$2 sm:$0x1f]  ;;  %v18226_v61 = vld [vmem:[%s22727_s5 + $0x20] sm:$0xff]   ;;  %v18227_v52 = vld [vmem:[%s22727_s5 + $0x28] sm:$0xff]  }
 0x833   : > { %9706 = vst [vmem:[#allocation4 + $0x68] sm:$0xff] %v9688_v4  ;;  %v9620_v29 = vpop.f32.mrb[138].mxu0  ;;  %v9754_v62 = vmax.f32 %v9747_v49, %v9749_v34  ;;  %v18228_v4 = vld [vmem:[%s22727_s5 + $0x30] sm:$0xff]   ;;  %v18229_v55 = vld [vmem:[%s22727_s5 + $0x38] ss:$0 sps:$4 sm:$0xff]   ;;  %v18231_v48 = vld [vmem:[%s22727_s5 + $0x80] sm:$0xff]  }
 0x834   : > { %v9671_v36 = vadd.f32 %v21931_v44, %v9646_v19  ;;  %v9647_v23 = vadd.f32 %v9620_v29, %v21923_v39  ;;  %v16649_v26 = vpop.f32.mrb[139].mxu0  ;;  %v18230_v19 = vld [vmem:[%s22727_s5 + $0x78] sm:$0xff]   ;;  %v18235_v49 = vld [vmem:[%s22727_s5 + $0xa0] sm:$0xff]   ;;  %v18236_v34 = vld [vmem:[%s22727_s5 + $0xa8] sm:$0xff]  }
 0x835   : > { %v18233_v26 = vld [vmem:[%s22727_s5 + $0x90] sm:$0xff]  }
 0x836   : > { %v9689_v22 = vmax.f32 %v9671_v36, 0.0  ;;  %v9672_v60 = vadd.f32 %v21931_v44, %v9647_v23  ;;  %v18232_v36 = vld [vmem:[%s22727_s5 + $0x88] sm:$0xff]  }
 0x838   : > { %9707 = vst [vmem:[#allocation4 + $0x70] sm:$0xff] %v9689_v22  ;;  %v9690_v18 = vmax.f32 %v9672_v60, 0.0  ;;  %v18234_v60 = vld [vmem:[%s22727_s5 + $0x98] sm:$0xff]  }
 0x839   : > { %v9625_v42 = vpop.f32.mrb[140].mxu0 }
 0x83a   : > { %v9648_v8 = vadd.f32 %v9625_v42, %v21926_v24  ;;  %v16652_v14 = vpop.f32.mrb[141].mxu0  ;;  %v9751_v37 = vld [vmem:[#allocation4 + $0x62] ss:$2 sm:$0x1f]  ;;  %9708 = vst [vmem:[#allocation4 + $0x78] sm:$0xff] %v9690_v18  ;;  %v18238_v42 = vld [vmem:[%s22727_s5 + $0xb4] sm:$0xff]  }
 0x83b   : > { %v9753_v41 = vld [vmem:[#allocation4 + $0x63] ss:$2 sm:$0x1f]  ;;  %v9628_v39 = vpop.f32.mrb[142].mxu0  ;;  %v18237_v18 = vld [vmem:[%s22727_s5 + $0xb0] ss:$0 sps:$4 sm:$0xff]  }
 0x83c   : > { %v9755_v58 = vmax.f32 %v9751_v37, %v9753_v41  ;;  %v9673_v17 = vadd.f32 %v21931_v44, %v9648_v8  ;;  %v16653_v11 = vpop.f32.mrb[143].mxu0  ;;  %v18239_v8 = vld [vmem:[%s22727_s5 + $0xbc] sm:$0xff]   ;;  %v18240_v37 = vld [vmem:[%s22727_s5 + $0xc4] sm:$0xff]  }
 0x83d   : > { %v18243_v39 = vld [vmem:[%s22727_s5 + $0xdc] sm:$0xff]   ;;  %v18244_v11 = vld [vmem:[%s22727_s5 + $0xe4] sm:$0xff]  }
 0x83e   : > { %v9756_v51 = vmax.f32 %v9754_v62, %v9755_v58  ;;  %v9691_v59 = vmax.f32 %v9673_v17, 0.0  ;;  %v18241_v62 = vld [vmem:[%s22727_s5 + $0xcc] sm:$0xff]   ;;  %v18242_v17 = vld [vmem:[%s22727_s5 + $0xd4] sm:$0xff]  }
 0x840   : > { %9757 = vst [vmem:[#allocation5 + $0xf] sm:$0x1f] %v9756_v51  ;;  %9709 = vst [vmem:[#allocation4 + $0x80] sm:$0xff] %v9691_v59  ;;  %v18245_v51 = vld [vmem:[%s22727_s5 + $0xec] ss:$0 sps:$4 sm:$0xff]   ;;  %v18246_v59 = vld [vmem:[%s22727_s5 + $0xf0] sm:$0xff]  }
 0x841   : > { %v9759_v5 = vld [vmem:[#allocation4 + $0x70] ss:$2 sm:$0x1f]  ;;  %v9761_v43 = vld [vmem:[#allocation4 + $0x71] ss:$2 sm:$0x1f] }
 0x842   : > { %v9766_v13 = vmax.f32 %v9759_v5, %v9761_v43  ;;  %v18247_v5 = vld [vmem:[%s22727_s5 + $0xf8] sm:$0xff]  }
 0x847   : > { %v9771_v3 = vld [vmem:[#allocation5 + $0x8] sm:$0xff] }
 0x848   : > { %v9763_v47 = vld [vmem:[#allocation4 + $0x7e] ss:$2 sm:$0x1f]  ;;  %v21967_v24 = vpack.c.bf16 %v9771_v3, %v9770_v1  ;;  %v9765_v32 = vld [vmem:[#allocation4 + $0x7f] ss:$2 sm:$0x1f] }
 0x849   : > { %v9767_v31 = vmax.f32 %v9763_v47, %v9765_v32  ;;  %v18248_v1 = vld [vmem:[%s22727_s5 + $0x100] sm:$0xff]   ;;  %v18249_v47 = vld [vmem:[%s22727_s5 + $0x108] sm:$0xff]   ;;  %v18250_v32 = vld [vmem:[%s22727_s5 + $0x110] sm:$0xff]  }
 0x84a   : > { %10194 = vrot.lane.b32.xlu1 %v21967_v24, %s18441_s16  ;;  %9847 = vrot.lane.b32.xlu0 %v21967_v24, %s18442_s24 }
 0x84b   : > { %v9768_v44 = vmax.f32 %v9766_v13, %v9767_v31  ;;  %v18251_v13 = vld [vmem:[%s22727_s5 + $0x118] sm:$0xff]   ;;  %v18252_v31 = vld [vmem:[%s22727_s5 + $0x120] sm:$0xff]  }
 0x84d   : > { %9769 = vst [vmem:[#allocation5 + $0x14] sm:$0x1f] %v9768_v44  ;;  %v18253_v44 = vld [vmem:[%s22727_s5 + $0x128] ss:$0 sps:$4 sm:$0xff]  }
 0x854   : > { %v9772_v30 = vld [vmem:[#allocation5 + $0x10] sm:$0xff]  ;;  %v9773_v20 = vld [vmem:[#allocation5 + $0x18] sm:$0xff] }
 0x855   : > { %v9775_v40 = vpack.c.bf16 %v9773_v20, %v9772_v30  ;;  %v18255_v30 = vld [vmem:[%s22727_s5 + $0x134] sm:$0xff]  }
 0x857   : > { %10196 = vrot.lane.b32.xlu1 %v9775_v40, %s18441_s16  ;;  %9849 = vrot.lane.b32.xlu0 %v9775_v40, %s18442_s24  ;;  %s18449_s16 = smov 56   ;;  %s18450_s24 = smov 48   ;;  %v10042_v38 = vand.u32 %v21989_v45, %v9775_v40 }
 0x85b   : > { %10393 = vrot.lane.b32.xlu1 %v9775_v40, %s18443_s30  ;;  %10391 = vrot.lane.b32.xlu0 %v21967_v24, %s18443_s30  ;;  %s18453_s30 = smov 24  }
 0x85f   : > { %10590 = vrot.lane.b32.xlu1 %v9775_v40, %s18444_s12  ;;  %10588 = vrot.lane.b32.xlu0 %v21967_v24, %s18444_s12  ;;  %s18454_s12 = smov 16  }
 0x863   : > { %10787 = vrot.lane.b32.xlu1 %v9775_v40, %s18445_s14  ;;  %10785 = vrot.lane.b32.xlu0 %v21967_v24, %s18445_s14  ;;  %s18455_s14 = smov 8  }
 0x867   : > { %10984 = vrot.lane.b32.xlu1 %v9775_v40, %s18446_s13  ;;  %10982 = vrot.lane.b32.xlu0 %v21967_v24, %s18446_s13  ;;  %s377_s13 = sand.u32 1, %s18428_s18  }
 0x86b   : > { %11181 = vrot.lane.b32.xlu1 %v9775_v40, %s18447_s15  ;;  %11179 = vrot.lane.b32.xlu0 %v21967_v24, %s18447_s15  ;;  %s13498_s15 = sshll.u32 %s377_s13, 3 }
 0x86f   : > { %11378 = vrot.lane.b32.xlu1 %v9775_v40, %s18448_s22  ;;  %11376 = vrot.lane.b32.xlu0 %v21967_v24, %s18448_s22  ;;  %s13422_s22 = scalar_lea.sflag [#allocation7], %s377_s13 }
 0x873   : > { %11575 = vrot.lane.b32.xlu1 %v9775_v40, %s18449_s16  ;;  %11573 = vrot.lane.b32.xlu0 %v21967_v24, %s18449_s16 }
 0x877   : > { %11772 = vrot.lane.b32.xlu1 %v9775_v40, %s18450_s24  ;;  %11770 = vrot.lane.b32.xlu0 %v21967_v24, %s18450_s24  ;;  %s14827_s24 = sshll.u32 %s18539_s21, 7 }
 0x87b   : > { %11969 = vrot.lane.b32.xlu1 %v9775_v40, %s18451_s25  ;;  %11967 = vrot.lane.b32.xlu0 %v21967_v24, %s18451_s25  ;;  %s379_s25 = scalar_lea.vmem [#allocation6], %s13498_s15  ;;  %s18457_s15 = smov [#allocation6]  }
 0x87c   : > { %s18378_s16 = sshll.u32 %s18457_s15, 4  ;;  %s18379_s16 = int_to_ptr.vmem [resolvable:$false] %s18378_s16 }
 0x87f   : > { %12166 = vrot.lane.b32.xlu1 %v9775_v40, %s18452_s29  ;;  %12164 = vrot.lane.b32.xlu0 %v21967_v24, %s18452_s29  ;;  %s13435_s29 = sshll.u32 %s379_s25, 4  ;;  %s22682_s29 = int_to_ptr.vmem [resolvable:$true] %s13435_s29 }
 0x880   : > { %s18374_s21 = scalar_lea.vmem %s22682_s29, 128  ;;  %p18381_p0 = scmp.lt.s32.totalorder %s22682_s29, %s18379_s16 }
 0x881   : > { %p18375_p11 = scmp.ne.s32.totalorder %s22682_s29, %s18374_s21 }
 0x883   : > { %12363 = vrot.lane.b32.xlu1 %v9775_v40, %s18453_s30  ;;  %12361 = vrot.lane.b32.xlu0 %v21967_v24, %s18453_s30  ;;  %p18376_p12 = pnand %p18375_p11, %p18556_p5  ;;  %s18380_s30 = scalar_lea.vmem %s18379_s16, 256 }
 0x884   : > { %p18382_p1 = scmp.lt.s32.totalorder %s18380_s30, %s18374_s21 }
 0x885   : > { %p18377_p13 = pneg %p18376_p12 }
 0x886   : > { %p18383_p2 = por %p18382_p1, %p18381_p0 }
 0x887   : > { %12560 = vrot.lane.b32.xlu1 %v9775_v40, %s18454_s12  ;;  %12558 = vrot.lane.b32.xlu0 %v21967_v24, %s18454_s12 }
 0x888   : > { %p18384_p3 = pnand %p18383_p2, %p18377_p13 }
 0x88b   : > { %12757 = vrot.lane.b32.xlu1 %v9775_v40, %s18455_s14  ;;  %12755 = vrot.lane.b32.xlu0 %v21967_v24, %s18455_s14  ;;  %v18256_v40 = vld [vmem:[%s22727_s5 + $0x13c] sm:$0xff]   ;;  %s22680_s14 = scalar_lea.hbm %s22733_s11, %s14827_s24 }
 0x8bc   : > { %v9848_v21 = vpop.permute.xlu0 %9847  ;;  %v10195_v54 = vpop.permute.xlu1 %10194 }
 0x8bd   : > { %16654 = vmatprep.subr.bf16.mxu1 %v9848_v21 }
 0x8be   : > { %16655 = vmatpush3.bf16.msra.mxu1 %v9848_v21 }
 0x8c9   : > { %v9850_v35 = vpop.permute.xlu0 %9849  ;;  %v10197_v25 = vpop.permute.xlu1 %10196 }
 0x8ca   : > { %v9881_v46 = vand.u32 %v21989_v45, %v9850_v35  ;;  %v10224_v50 = vand.u32 %v10197_v25, %v21989_v45  ;;  %v18258_v35 = vld [vmem:[%s22727_s5 + $0x14c] sm:$0xff]   ;;  %v18268_v25 = vld [vmem:[%s22727_s5 + $0x198] sm:$0xff]  }
 0x8cc   : > { %16656 = vmatprep.subr.bf16.mxu1 %v9881_v46 }
 0x8cd   : > { %16657 = vmatpush3.bf16.msra.mxu1 %v9881_v46  ;;  %v10392_v7 = vpop.permute.xlu0 %10391  ;;  %v10394_v29 = vpop.permute.xlu1 %10393  ;;  %v18259_v46 = vld [vmem:[%s22727_s5 + $0x154] sm:$0xff]  }
 0x8ce   : > { %16674 = vmatprep.subr.bf16.mxu1 %v21967_v24  ;;  %v10421_v23 = vand.u32 %v10394_v29, %v21989_v45  ;;  %v18275_v29 = vld [vmem:[%s22727_s5 + $0x1cc] sm:$0xff]  }
 0x8d0   : > { %16659 = vmatmul.mubr.msk.bf16.vlgmr.msra.gmra.mrb[120].mxu1 %vm9852_vm5, %v18215_v9  ;;  %v18260_v9 = vld [vmem:[%s22727_s5 + $0x15c] sm:$0xff]  }
 0x8d1   : > { %16675 = vmatpush3.bf16.msra.mxu1 %v21967_v24  ;;  %16662 = vmatprep.mubr.msk.bf16.mxu1 %vm9852_vm5, %v18216_v28  ;;  %v10589_v22 = vpop.permute.xlu0 %10588  ;;  %v10591_v14 = vpop.permute.xlu1 %10590  ;;  %v18261_v28 = vld [vmem:[%s22727_s5 + $0x164] ss:$0 sps:$4 sm:$0xff]  }
 0x8d2   : > { %16676 = vmatprep.subr.bf16.mxu1 %v10042_v38  ;;  %v10618_v41 = vand.u32 %v10591_v14, %v21989_v45  ;;  %v18281_v14 = vld [vmem:[%s22727_s5 + $0x1f8] sm:$0xff]  }
 0x8d5   : > { %16677 = vmatpush3.bf16.msra.mxu1 %v10042_v38  ;;  %v10786_v58 = vpop.permute.xlu0 %10785  ;;  %v10788_v43 = vpop.permute.xlu1 %10787  ;;  %v18262_v38 = vld [vmem:[%s22727_s5 + $0x168] sm:$0xff]  }
 0x8d6   : > { %16694 = vmatprep.subr.bf16.mxu1 %v10195_v54  ;;  %v10815_v3 = vand.u32 %v10788_v43, %v21989_v45 }
 0x8d8   : > { %16663 = vmatmul.mubr.msk.bf16.gmra.mrb[124].mxu1 %vm9852_vm5, %v18217_v15  ;;  %v18263_v15 = vld [vmem:[%s22727_s5 + $0x170] sm:$0xff]  }
 0x8d9   : > { %16666 = vmatprep.mubr.msk.bf16.mxu1 %vm9852_vm5, %v18218_v10  ;;  %v10983_v24 = vpop.permute.xlu0 %10982  ;;  %v10985_v20 = vpop.permute.xlu1 %10984  ;;  %v18264_v10 = vld [vmem:[%s22727_s5 + $0x178] sm:$0xff]  }
 0x8da   : > { %v11012_v21 = vand.u32 %v10985_v20, %v21989_v45 }
 0x8dd   : > { %v11180_v53 = vpop.permute.xlu0 %11179 }
 0x8e0   : > { %16667 = vmatmul.mubr.msk.bf16.gmra.mrb[128].mxu1 %vm9852_vm5, %v18219_v2 }
 0x8e1   : > { %16670 = vmatprep.mubr.msk.bf16.mxu1 %vm9852_vm5, %v18220_v27  ;;  %v18265_v27 = vld [vmem:[%s22727_s5 + $0x180] sm:$0xff]  }
 0x8e8   : > { %16671 = vmatmul.mubr.msk.bf16.gmra.mrb[132].mxu1 %vm9852_vm5, %v18221_v63  ;;  %v11377_v63 = vpop.permute.xlu0 %11376 }
 0x8e9   : > { %16678 = vmatprep.mubr.msk.bf16.mxu1 %vm9852_vm5, %v18222_v6  ;;  %v18266_v6 = vld [vmem:[%s22727_s5 + $0x188] sm:$0xff]  }
 0x8f0   : > { %16679 = vmatmul.mubr.msk.bf16.vlgmr.msra.gmra.mrb[120].mxu1 %vm9852_vm5, %v18223_v56  ;;  %v18267_v56 = vld [vmem:[%s22727_s5 + $0x190] sm:$0xff]  }
 0x8f1   : > { %16695 = vmatpush3.bf16.msra.mxu1 %v10195_v54  ;;  %16682 = vmatprep.mubr.msk.bf16.mxu1 %vm9852_vm5, %v18224_v0  ;;  %v11182_v54 = vpop.permute.xlu1 %11181  ;;  %v18269_v0 = vld [vmem:[%s22727_s5 + $0x1a0] ss:$0 sps:$4 sm:$0xff]  }
 0x8f2   : > { %16696 = vmatprep.subr.bf16.mxu1 %v10224_v50  ;;  %v11209_v2 = vand.u32 %v11182_v54, %v21989_v45 }
 0x8f5   : > { %16697 = vmatpush3.bf16.msra.mxu1 %v10224_v50  ;;  %v18270_v50 = vld [vmem:[%s22727_s5 + $0x1a4] sm:$0xff]  }
 0x8f6   : > { %16714 = vmatprep.subr.bf16.mxu1 %v10392_v7 }
 0x8f8   : > { %16683 = vmatmul.mubr.msk.bf16.gmra.mrb[124].mxu1 %vm9852_vm5, %v18225_v12  ;;  %v18271_v12 = vld [vmem:[%s22727_s5 + $0x1ac] sm:$0xff]  }
 0x8f9   : > { %16686 = vmatprep.mubr.msk.bf16.mxu1 %vm9852_vm5, %v18226_v61  ;;  %v18272_v61 = vld [vmem:[%s22727_s5 + $0x1b4] sm:$0xff]  }
 0x900   : > { %16687 = vmatmul.mubr.msk.bf16.gmra.mrb[128].mxu1 %vm9852_vm5, %v18227_v52 }
 0x901   : > { %16690 = vmatprep.mubr.msk.bf16.mxu1 %vm9852_vm5, %v18228_v4  ;;  %v18273_v4 = vld [vmem:[%s22727_s5 + $0x1bc] sm:$0xff]  }
 0x908   : > { %16691 = vmatmul.mubr.msk.bf16.gmra.mrb[136].mxu1 %vm9852_vm5, %v18229_v55  ;;  %v11574_v55 = vpop.permute.xlu0 %11573 }
 0x909   : > { %16698 = vmatprep.mubr.msk.bf16.mxu1 %vm9852_vm5, %v18230_v19  ;;  %v18274_v19 = vld [vmem:[%s22727_s5 + $0x1c4] sm:$0xff]  }
 0x910   : > { %16699 = vmatmul.mubr.msk.bf16.vlgmr.msra.gmra.mrb[120].mxu1 %vm9852_vm5, %v18231_v48 }
 0x911   : > { %16715 = vmatpush3.bf16.msra.mxu1 %v10392_v7  ;;  %16702 = vmatprep.mubr.msk.bf16.mxu1 %vm9852_vm5, %v18232_v36  ;;  %v11379_v7 = vpop.permute.xlu1 %11378 }
 0x912   : > { %16716 = vmatprep.subr.bf16.mxu1 %v10421_v23  ;;  %v11406_v52 = vand.u32 %v11379_v7, %v21989_v45 }
 0x915   : > { %16717 = vmatpush3.bf16.msra.mxu1 %v10421_v23  ;;  %v18276_v23 = vld [vmem:[%s22727_s5 + $0x1d4] sm:$0xff]  }
 0x916   : > { %16734 = vmatprep.subr.bf16.mxu1 %v10589_v22 }
 0x918   : > { %16703 = vmatmul.mubr.msk.bf16.gmra.mrb[124].mxu1 %vm9852_vm5, %v18233_v26 }
 0x919   : > { %16706 = vmatprep.mubr.msk.bf16.mxu1 %vm9852_vm5, %v18234_v60  ;;  %v18277_v60 = vld [vmem:[%s22727_s5 + $0x1dc] ss:$0 sps:$4 sm:$0xff]  }
 0x920   : > { %16707 = vmatmul.mubr.msk.bf16.gmra.mrb[128].mxu1 %vm9852_vm5, %v18235_v49  ;;  %v18278_v49 = vld [vmem:[%s22727_s5 + $0x1e0] sm:$0xff]  }
 0x921   : > { %16710 = vmatprep.mubr.msk.bf16.mxu1 %vm9852_vm5, %v18236_v34  ;;  %v18279_v34 = vld [vmem:[%s22727_s5 + $0x1e8] sm:$0xff]  }
 0x928   : > { %16711 = vmatmul.mubr.msk.bf16.gmra.mrb[140].mxu1 %vm9852_vm5, %v18237_v18  ;;  %v11576_v18 = vpop.permute.xlu1 %11575 }
 0x929   : > { %16718 = vmatprep.mubr.msk.bf16.mxu1 %vm9852_vm5, %v18238_v42  ;;  %v18280_v42 = vld [vmem:[%s22727_s5 + $0x1f0] sm:$0xff]  }
 0x930   : > { %16719 = vmatmul.mubr.msk.bf16.vlgmr.msra.gmra.mrb[120].mxu1 %vm9852_vm5, %v18239_v8  ;;  %v11603_v8 = vand.u32 %v11576_v18, %v21989_v45 }
 0x931   : > { %16735 = vmatpush3.bf16.msra.mxu1 %v10589_v22  ;;  %16722 = vmatprep.mubr.msk.bf16.mxu1 %vm9852_vm5, %v18240_v37  ;;  %v11771_v37 = vpop.permute.xlu0 %11770 }
 0x932   : > { %16736 = vmatprep.subr.bf16.mxu1 %v10618_v41 }
 0x935   : > { %16737 = vmatpush3.bf16.msra.mxu1 %v10618_v41  ;;  %v18282_v41 = vld [vmem:[%s22727_s5 + $0x200] sm:$0xff]  }
 0x936   : > { %16754 = vmatprep.subr.bf16.mxu1 %v10786_v58 }
 0x938   : > { %16723 = vmatmul.mubr.msk.bf16.gmra.mrb[124].mxu1 %vm9852_vm5, %v18241_v62 }
 0x939   : > { %16726 = vmatprep.mubr.msk.bf16.mxu1 %vm9852_vm5, %v18242_v17 }
 0x940   : > { %16727 = vmatmul.mubr.msk.bf16.gmra.mrb[128].mxu1 %vm9852_vm5, %v18243_v39  ;;  %v18283_v39 = vld [vmem:[%s22727_s5 + $0x208] sm:$0xff]  }
 0x941   : > { %16730 = vmatprep.mubr.msk.bf16.mxu1 %vm9852_vm5, %v18244_v11 }
 0x948   : > { %16731 = vmatmul.mubr.msk.bf16.gmra.mrb[144].mxu1 %vm9852_vm5, %v18245_v51 }
 0x949   : > { %16738 = vmatprep.mubr.msk.bf16.mxu1 %vm9852_vm5, %v18246_v59  ;;  %v18284_v59 = vld [vmem:[%s22727_s5 + $0x210] sm:$0xff]  }
 0x950   : > { %16739 = vmatmul.mubr.msk.bf16.vlgmr.msra.gmra.mrb[120].mxu1 %vm9852_vm5, %v18247_v5 }
 0x951   : > { %16755 = vmatpush3.bf16.msra.mxu1 %v10786_v58  ;;  %16742 = vmatprep.mubr.msk.bf16.mxu1 %vm9852_vm5, %v18248_v1  ;;  %v18285_v1 = vld [vmem:[%s22727_s5 + $0x218] ss:$0 sps:$4 sm:$0xff]  }
 0x952   : > { %16756 = vmatprep.subr.bf16.mxu1 %v10815_v3 }
 0x955   : > { %16757 = vmatpush3.bf16.msra.mxu1 %v10815_v3  ;;  %v18286_v3 = vld [vmem:[%s22727_s5 + $0x21c] sm:$0xff]  }
 0x956   : > { %16774 = vmatprep.subr.bf16.mxu1 %v10983_v24 }
 0x958   : > { %16743 = vmatmul.mubr.msk.bf16.gmra.mrb[124].mxu1 %vm9852_vm5, %v18249_v47  ;;  %v18287_v47 = vld [vmem:[%s22727_s5 + $0x224] sm:$0xff]  }
 0x959   : > { %16746 = vmatprep.mubr.msk.bf16.mxu1 %vm9852_vm5, %v18250_v32  ;;  %v18288_v32 = vld [vmem:[%s22727_s5 + $0x22c] sm:$0xff]  }
 0x960   : > { %16747 = vmatmul.mubr.msk.bf16.gmra.mrb[128].mxu1 %vm9852_vm5, %v18251_v13 }
 0x961   : > { %16750 = vmatprep.mubr.msk.bf16.mxu1 %vm9852_vm5, %v18252_v31  ;;  %v18289_v31 = vld [vmem:[%s22727_s5 + $0x234] sm:$0xff]  }
 0x968   : > { %16751 = vmatmul.mubr.msk.bf16.gmra.mrb[148].mxu1 %vm9852_vm5, %v18253_v44  ;;  %v11968_v44 = vpop.permute.xlu0 %11967 }
 0x969   : > { %16758 = vmatprep.mubr.msk.bf16.mxu1 %vm9852_vm5, %v18254_v57  ;;  %v18290_v57 = vld [vmem:[%s22727_s5 + $0x23c] sm:$0xff]  }
 0x970   : > { %16759 = vmatmul.mubr.msk.bf16.vlgmr.msra.gmra.mrb[120].mxu1 %vm9852_vm5, %v18255_v30 }
 0x971   : > { %16775 = vmatpush3.bf16.msra.mxu1 %v10983_v24  ;;  %16762 = vmatprep.mubr.msk.bf16.mxu1 %vm9852_vm5, %v18256_v40  ;;  %v11773_v24 = vpop.permute.xlu1 %11772 }
 0x972   : > { %16776 = vmatprep.subr.bf16.mxu1 %v11012_v21  ;;  %v11800_v13 = vand.u32 %v11773_v24, %v21989_v45 }
 0x975   : > { %16777 = vmatpush3.bf16.msra.mxu1 %v11012_v21  ;;  %v18291_v21 = vld [vmem:[%s22727_s5 + $0x244] sm:$0xff]   ;;  %v11970_v54 = vpop.permute.xlu1 %11969 }
 0x976   : > { %16794 = vmatprep.subr.bf16.mxu1 %v11180_v53 }
 0x978   : > { %16763 = vmatmul.mubr.msk.bf16.gmra.mrb[124].mxu1 %vm9852_vm5, %v18257_v16 }
 0x979   : > { %16766 = vmatprep.mubr.msk.bf16.mxu1 %vm9852_vm5, %v18258_v35  ;;  %v18292_v35 = vld [vmem:[%s22727_s5 + $0x24c] sm:$0xff]  }
 0x980   : > { %16767 = vmatmul.mubr.msk.bf16.gmra.mrb[128].mxu1 %vm9852_vm5, %v18259_v46 }
 0x981   : > { %16770 = vmatprep.mubr.msk.bf16.mxu1 %vm9852_vm5, %v18260_v9 }
 0x988   : > { %16771 = vmatmul.mubr.msk.bf16.gmra.mrb[152].mxu1 %vm9852_vm5, %v18261_v28  ;;  %v18293_v28 = vld [vmem:[%s22727_s5 + $0x254] ss:$0 sps:$4 sm:$0xff]  }
 0x989   : > { %16778 = vmatprep.mubr.msk.bf16.mxu1 %vm9852_vm5, %v18262_v38  ;;  %v18294_v38 = vld [vmem:[%s22727_s5 + $0x258] sm:$0xff]  }
 0x990   : > { %16779 = vmatmul.mubr.msk.bf16.vlgmr.msra.gmra.mrb[120].mxu1 %vm9852_vm5, %v18263_v15  ;;  %v18295_v15 = vld [vmem:[%s22727_s5 + $0x260] sm:$0xff]  }
 0x991   : > { %16795 = vmatpush3.bf16.msra.mxu1 %v11180_v53  ;;  %16782 = vmatprep.mubr.msk.bf16.mxu1 %vm9852_vm5, %v18264_v10  ;;  %v18296_v10 = vld [vmem:[%s22727_s5 + $0x268] sm:$0xff]  }
 0x992   : > { %16796 = vmatprep.subr.bf16.mxu1 %v11209_v2 }
 0x995   : > { %16797 = vmatpush3.bf16.msra.mxu1 %v11209_v2  ;;  %v11997_v2 = vand.u32 %v11970_v54, %v21989_v45 }
 0x996   : > { %16814 = vmatprep.subr.bf16.mxu1 %v11377_v63 }
 0x998   : > { %16783 = vmatmul.mubr.msk.bf16.gmra.mrb[124].mxu1 %vm9852_vm5, %v18265_v27  ;;  %v18297_v27 = vld [vmem:[%s22727_s5 + $0x270] sm:$0xff]  }
 0x999   : > { %16786 = vmatprep.mubr.msk.bf16.mxu1 %vm9852_vm5, %v18266_v6  ;;  %v18298_v6 = vld [vmem:[%s22727_s5 + $0x278] sm:$0xff]  }
 0x9a0   : > { %16787 = vmatmul.mubr.msk.bf16.gmra.mrb[128].mxu1 %vm9852_vm5, %v18267_v56 }
 0x9a1   : > { %16790 = vmatprep.mubr.msk.bf16.mxu1 %vm9852_vm5, %v18268_v25 }
 0x9a8   : > { %16791 = vmatmul.mubr.msk.bf16.gmra.mrb[156].mxu1 %vm9852_vm5, %v18269_v0 }
 0x9a9   : > { %16798 = vmatprep.mubr.msk.bf16.mxu1 %vm9852_vm5, %v18270_v50  ;;  %v18299_v50 = vld [vmem:[%s22727_s5 + $0x280] sm:$0xff]  }
 0x9b0   : > { %16799 = vmatmul.mubr.msk.bf16.vlgmr.msra.gmra.mrb[120].mxu1 %vm9852_vm5, %v18271_v12 }
 0x9b1   : > { %16815 = vmatpush3.bf16.msra.mxu1 %v11377_v63  ;;  %16802 = vmatprep.mubr.msk.bf16.mxu1 %vm9852_vm5, %v18272_v61  ;;  %v12165_v63 = vpop.permute.xlu0 %12164  ;;  %v18300_v61 = vld [vmem:[%s22727_s5 + $0x288] sm:$0xff]  }
 0x9b2   : > { %16816 = vmatprep.subr.bf16.mxu1 %v11406_v52 }
 0x9b5   : > { %16817 = vmatpush3.bf16.msra.mxu1 %v11406_v52 }
 0x9b6   : > { %16834 = vmatprep.subr.bf16.mxu1 %v11574_v55 }
 0x9b8   : > { %16803 = vmatmul.mubr.msk.bf16.gmra.mrb[124].mxu1 %vm9852_vm5, %v18273_v4 }
 0x9b9   : > { %16806 = vmatprep.mubr.msk.bf16.mxu1 %vm9852_vm5, %v18274_v19  ;;  %v18302_v19 = vld [vmem:[%s22727_s5 + $0x294] sm:$0xff]  }
 0x9bb   : > { %v16672_v48 = vpop.f32.mrb[132].mxu1 }
 0x9bc   : > { %v9965_v36 = vpop.f32.mrb[133].mxu1 }
 0x9bd   : > { %v16673_v26 = vpop.f32.mrb[134].mxu1 }
 0x9be   : > { %v9968_v22 = vpop.f32.mrb[135].mxu1  ;;  %v18305_v26 = vld [vmem:[%s22727_s5 + $0x2ac] sm:$0xff]  }
 0x9c0   : > { %16807 = vmatmul.mubr.msk.bf16.gmra.mrb[128].mxu1 %vm9852_vm5, %v18275_v29  ;;  %v12167_v29 = vpop.permute.xlu1 %12166 }
 0x9c1   : > { %16810 = vmatprep.mubr.msk.bf16.mxu1 %vm9852_vm5, %v18276_v23  ;;  %v12194_v23 = vand.u32 %v12167_v29, %v21989_v45  ;;  %v12911_v29 = vld [vmem:[%s22728_s6 + $0x68] sm:$0xff] }
 0x9c8   : > { %16811 = vmatmul.mubr.msk.bf16.gmra.mrb[160].mxu1 %vm9852_vm5, %v18277_v60  ;;  %v18306_v60 = vld [vmem:[%s22727_s5 + $0x2b4] sm:$0xff]  }
 0x9c9   : > { %16818 = vmatprep.mubr.msk.bf16.mxu1 %vm9852_vm5, %v18278_v49 }
 0x9d0   : > { %16819 = vmatmul.mubr.msk.bf16.vlgmr.msra.gmra.mrb[120].mxu1 %vm9852_vm5, %v18279_v34 }
 0x9d1   : > { %16835 = vmatpush3.bf16.msra.mxu1 %v11574_v55  ;;  %16822 = vmatprep.mubr.msk.bf16.mxu1 %vm9852_vm5, %v18280_v42  ;;  %v18301_v55 = vld [vmem:[%s22727_s5 + $0x290] ss:$0 sps:$4 sm:$0xff]   ;;  %v18307_v42 = vld [vmem:[%s22727_s5 + $0x2bc] sm:$0xff]  }
 0x9d2   : > { %16836 = vmatprep.subr.bf16.mxu1 %v11603_v8 }
 0x9d5   : > { %16837 = vmatpush3.bf16.msra.mxu1 %v11603_v8 }
 0x9d6   : > { %16854 = vmatprep.subr.bf16.mxu1 %v11771_v37 }
 0x9d8   : > { %16823 = vmatmul.mubr.msk.bf16.gmra.mrb[124].mxu1 %vm9852_vm5, %v18281_v14 }
 0x9d9   : > { %16826 = vmatprep.mubr.msk.bf16.mxu1 %vm9852_vm5, %v18282_v41 }
 0x9db   : > { %v16692_v62 = vpop.f32.mrb[136].mxu1 }
 0x9dc   : > { %v10135_v58 = vadd.f32 %v16692_v62, %v16672_v48  ;;  %v10126_v17 = vpop.f32.mrb[137].mxu1  ;;  %v18303_v48 = vld [vmem:[%s22727_s5 + $0x29c] sm:$0xff]  }
 0x9dd   : > { %v10127_v11 = vadd.f32 %v10126_v17, %v9965_v36  ;;  %v16693_v51 = vpop.f32.mrb[138].mxu1  ;;  %v18304_v36 = vld [vmem:[%s22727_s5 + $0x2a4] sm:$0xff]   ;;  %v18310_v17 = vld [vmem:[%s22727_s5 + $0x2d0] sm:$0xff]  }
 0x9de   : > { %v10129_v5 = vpop.f32.mrb[139].mxu1  ;;  %v18312_v51 = vld [vmem:[%s22727_s5 + $0x2e0] sm:$0xff]  }
 0x9df   : > { %v10130_v43 = vadd.f32 %v10129_v5, %v9968_v22  ;;  %v12362_v22 = vpop.permute.xlu0 %12361  ;;  %v18313_v5 = vld [vmem:[%s22727_s5 + $0x2e8] sm:$0xff]  }
 0x9e0   : > { %16827 = vmatmul.mubr.msk.bf16.gmra.mrb[128].mxu1 %vm9852_vm5, %v18283_v39  ;;  %v18311_v39 = vld [vmem:[%s22727_s5 + $0x2d8] sm:$0xff]  }
 0x9e1   : > { %16830 = vmatprep.mubr.msk.bf16.mxu1 %vm9852_vm5, %v18284_v59 }
 0x9e8   : > { %16831 = vmatmul.mubr.msk.bf16.gmra.mrb[164].mxu1 %vm9852_vm5, %v18285_v1  ;;  %v18314_v1 = vld [vmem:[%s22727_s5 + $0x2f0] sm:$0xff]  }
 0x9e9   : > { %16838 = vmatprep.mubr.msk.bf16.mxu1 %vm9852_vm5, %v18286_v3 }
 0x9f0   : > { %16839 = vmatmul.mubr.msk.bf16.vlgmr.msra.gmra.mrb[120].mxu1 %vm9852_vm5, %v18287_v47 }
 0x9f1   : > { %16855 = vmatpush3.bf16.msra.mxu1 %v11771_v37  ;;  %16842 = vmatprep.mubr.msk.bf16.mxu1 %vm9852_vm5, %v18288_v32  ;;  %v18308_v37 = vld [vmem:[%s22727_s5 + $0x2c4] sm:$0xff]   ;;  %v18315_v32 = vld [vmem:[%s22727_s5 + $0x2f8] sm:$0xff]  }
 0x9f2   : > { %16856 = vmatprep.subr.bf16.mxu1 %v11800_v13 }
 0x9f5   : > { %16857 = vmatpush3.bf16.msra.mxu1 %v11800_v13 }
 0x9f6   : > { %16874 = vmatprep.subr.bf16.mxu1 %v11968_v44 }
 0x9f8   : > { %16843 = vmatmul.mubr.msk.bf16.gmra.mrb[124].mxu1 %vm9852_vm5, %v18289_v31 }
 0x9f9   : > { %16846 = vmatprep.mubr.msk.bf16.mxu1 %vm9852_vm5, %v18290_v57 }
 0x9fb   : > { %v16712_v30 = vpop.f32.mrb[140].mxu1 }
 0x9fc   : > { %v10336_v20 = vadd.f32 %v16712_v30, %v10135_v58  ;;  %v10308_v40 = vpop.f32.mrb[141].mxu1  ;;  %v18309_v58 = vld [vmem:[%s22727_s5 + $0x2cc] ss:$0 sps:$4 sm:$0xff]  }
 0x9fd   : > { %v10334_v16 = vadd.f32 %v10308_v40, %v10127_v11  ;;  %v16713_v53 = vpop.f32.mrb[142].mxu1  ;;  %v12364_v11 = vpop.permute.xlu1 %12363  ;;  %v12898_v40 = vld [vmem:[%s22728_s6] sm:$0xff] }
 0x9fe   : > { %v10311_v46 = vpop.f32.mrb[143].mxu1  ;;  %v12391_v59 = vand.u32 %v12364_v11, %v21989_v45  ;;  %12915 = vperm.xlu0 %17716, %v12898_v40   ;;  %v18317_v53 = vld [vmem:[%s22727_s5 + $0x308] ss:$0 sps:$4 sm:$0xff]   ;;  %v13045_v11 = vld [vmem:[%s22730_s8 + $0x40] sm:$0xff]  ;;  %v18336_v40 = vld [vmem:[%s22727_s5 + $0x394] sm:$0xff]  }
 0x9ff   : > { %v10335_v9 = vadd.f32 %v10311_v46, %v10130_v43  ;;  %v12559_v43 = vpop.permute.xlu0 %12558  ;;  %v12902_v46 = vld [vmem:[%s22728_s6 + $0x20] sm:$0xff] }
 0xa00   : > { %16847 = vmatmul.mubr.msk.bf16.gmra.mrb[128].mxu1 %vm9852_vm5, %v18291_v21  ;;  %v12900_v21 = vld [vmem:[%s22728_s6 + $0x10] sm:$0xff] }
 0xa01   : > { %16850 = vmatprep.mubr.msk.bf16.mxu1 %vm9852_vm5, %v18292_v35  ;;  %v18318_v35 = vld [vmem:[%s22727_s5 + $0x30c] sm:$0xff]   ;;  %v12561_v54 = vpop.permute.xlu1 %12560 }
 0xa08   : > { %16851 = vmatmul.mubr.msk.bf16.gmra.mrb[168].mxu1 %vm9852_vm5, %v18293_v28  ;;  %v12904_v28 = vld [vmem:[%s22728_s6 + $0x30] sm:$0xff] }
 0xa09   : > { %16858 = vmatprep.mubr.msk.bf16.mxu1 %vm9852_vm5, %v18294_v38  ;;  %v12905_v38 = vld [vmem:[%s22728_s6 + $0x38] sm:$0xff] }
 0xa10   : > { %16859 = vmatmul.mubr.msk.bf16.vlgmr.msra.gmra.mrb[120].mxu1 %vm9852_vm5, %v18295_v15  ;;  %v18319_v15 = vld [vmem:[%s22727_s5 + $0x314] sm:$0xff]  }
 0xa11   : > { %16875 = vmatpush3.bf16.msra.mxu1 %v11968_v44  ;;  %16862 = vmatprep.mubr.msk.bf16.mxu1 %vm9852_vm5, %v18296_v10  ;;  %v18316_v44 = vld [vmem:[%s22727_s5 + $0x300] sm:$0xff]  }
 0xa12   : > { %16876 = vmatprep.subr.bf16.mxu1 %v11997_v2  ;;  %v18320_v10 = vld [vmem:[%s22727_s5 + $0x31c] sm:$0xff]  }
 0xa15   : > { %16877 = vmatpush3.bf16.msra.mxu1 %v11997_v2  ;;  %v12906_v2 = vld [vmem:[%s22728_s6 + $0x40] sm:$0xff] }
 0xa16   : > { %16894 = vmatprep.subr.bf16.mxu1 %v12165_v63 }
 0xa18   : > { %16863 = vmatmul.mubr.msk.bf16.gmra.mrb[124].mxu1 %vm9852_vm5, %v18297_v27  ;;  %v12907_v27 = vld [vmem:[%s22728_s6 + $0x48] sm:$0xff] }
 0xa19   : > { %16866 = vmatprep.mubr.msk.bf16.mxu1 %vm9852_vm5, %v18298_v6  ;;  %v12908_v6 = vld [vmem:[%s22728_s6 + $0x50] sm:$0xff] }
 0xa1b   : > { %v16732_v56 = vpop.f32.mrb[144].mxu1 }
 0xa1c   : > { %v10533_v25 = vadd.f32 %v16732_v56, %v10336_v20  ;;  %v10505_v0 = vpop.f32.mrb[145].mxu1  ;;  %v12899_v20 = vld [vmem:[%s22728_s6 + $0x8] sm:$0xff]  ;;  %v12909_v56 = vld [vmem:[%s22728_s6 + $0x58] sm:$0xff] }
 0xa1d   : > { %v10531_v12 = vadd.f32 %v10505_v0, %v10334_v16  ;;  %v16733_v7 = vpop.f32.mrb[146].mxu1  ;;  %12920 = vperm.xlu1 %17717, %v12899_v20   ;;  %v12901_v16 = vld [vmem:[%s22728_s6 + $0x18] sm:$0xff]  ;;  %v12756_v0 = vpop.permute.xlu0 %12755  ;;  %v18335_v20 = vld [vmem:[%s22727_s5 + $0x38c] sm:$0xff]  }
 0xa1e   : > { %v10508_v52 = vpop.f32.mrb[147].mxu1  ;;  %12930 = vperm.xlu0 %17716, %v12901_v16   ;;  %v18338_v16 = vld [vmem:[%s22727_s5 + $0x3a4] sm:$0xff]  }
 0xa1f   : > { %v10532_v4 = vadd.f32 %v10508_v52, %v10335_v9  ;;  %v12903_v9 = vld [vmem:[%s22728_s6 + $0x28] sm:$0xff]  ;;  %v18323_v52 = vld [vmem:[%s22727_s5 + $0x334] sm:$0xff]  }
 0xa20   : > { %16867 = vmatmul.mubr.msk.bf16.gmra.mrb[128].mxu1 %vm9852_vm5, %v18299_v50  ;;  %v18322_v50 = vld [vmem:[%s22727_s5 + $0x32c] sm:$0xff]  }
 0xa21   : > { %16870 = vmatprep.mubr.msk.bf16.mxu1 %vm9852_vm5, %v18300_v61  ;;  %12925 = vperm.xlu1 %17717, %v12900_v21   ;;  %v18337_v21 = vld [vmem:[%s22727_s5 + $0x39c] sm:$0xff]  }
 0xa22   : > { %12940 = vperm.xlu0 %17716, %v12903_v9   ;;  %v18339_v9 = vld [vmem:[%s22727_s5 + $0x3ac] sm:$0xff]  }
 0xa25   : > { %12935 = vperm.xlu1 %17717, %v12902_v46  }
 0xa26   : > { %12950 = vperm.xlu0 %17716, %v12905_v38  }
 0xa28   : > { %16871 = vmatmul.mubr.msk.bf16.gmra.mrb[172].mxu1 %vm9852_vm5, %v18301_v55 }
 0xa29   : > { %16878 = vmatprep.mubr.msk.bf16.mxu1 %vm9852_vm5, %v18302_v19  ;;  %12945 = vperm.xlu1 %17717, %v12904_v28   ;;  %v18324_v19 = vld [vmem:[%s22727_s5 + $0x33c] sm:$0xff]  }
 0xa2a   : > { %12960 = vperm.xlu0 %17716, %v12907_v27  }
 0xa2d   : > { %12955 = vperm.xlu1 %17717, %v12906_v2   ;;  %v18341_v2 = vld [vmem:[%s22727_s5 + $0x3bc] ss:$0 sps:$4 sm:$0xff]  }
 0xa2e   : > { %12970 = vperm.xlu0 %17716, %v12909_v56  }
 0xa30   : > { %16879 = vmatmul.mubr.msk.bf16.vlgmr.msra.gmra.mrb[120].mxu1 %vm9852_vm5, %v18303_v48  ;;  %v12910_v48 = vld [vmem:[%s22728_s6 + $0x60] sm:$0xff] }
 0xa31   : > { %16895 = vmatpush3.bf16.msra.mxu1 %v12165_v63  ;;  %16882 = vmatprep.mubr.msk.bf16.mxu1 %vm9852_vm5, %v18304_v36  ;;  %v12588_v63 = vand.u32 %v12561_v54, %v21989_v45 }
 0xa32   : > { %16896 = vmatprep.subr.bf16.mxu1 %v12194_v23  ;;  %12965 = vperm.xlu1 %17717, %v12908_v6  }
 0xa33   : > { %12980 = vperm.xlu0 %17716, %v12911_v29  }
 0xa35   : > { %16897 = vmatpush3.bf16.msra.mxu1 %v12194_v23 }
 0xa36   : > { %16914 = vmatprep.subr.bf16.mxu1 %v12362_v22  ;;  %12975 = vperm.xlu1 %17717, %v12910_v48  }
 0xa38   : > { %16883 = vmatmul.mubr.msk.bf16.gmra.mrb[124].mxu1 %vm9852_vm5, %v18305_v26  ;;  %v12912_v26 = vld [vmem:[%s22728_s6 + $0x70] sm:$0xff] }
 0xa39   : > { %16886 = vmatprep.mubr.msk.bf16.mxu1 %vm9852_vm5, %v18306_v60  ;;  %v13038_v60 = vld [vmem:[%s22730_s8 + $0x8] sm:$0xff] }
 0xa3a   : > { %12985 = vperm.xlu1 %17717, %v12912_v26  }
 0xa3b   : > { %v16752_v49 = vpop.f32.mrb[148].mxu1 }
 0xa3c   : > { %v10730_v34 = vadd.f32 %v16752_v49, %v10533_v25  ;;  %v10702_v18 = vpop.f32.mrb[149].mxu1  ;;  %v18321_v25 = vld [vmem:[%s22727_s5 + $0x324] sm:$0xff]   ;;  %v13039_v49 = vld [vmem:[%s22730_s8 + $0x10] sm:$0xff] }
 0xa3d   : > { %v10728_v8 = vadd.f32 %v10702_v18, %v10531_v12  ;;  %v16753_v14 = vpop.f32.mrb[150].mxu1  ;;  %v18326_v18 = vld [vmem:[%s22727_s5 + $0x348] sm:$0xff]  }
 0xa3e   : > { %v10705_v41 = vpop.f32.mrb[151].mxu1  ;;  %13055 = vperm.xlu1 %17717, %v13038_v60   ;;  %v13042_v14 = vld [vmem:[%s22730_s8 + $0x28] sm:$0xff] }
 0xa3f   : > { %v10729_v62 = vadd.f32 %v10705_v41, %v10532_v4  ;;  %v18327_v41 = vld [vmem:[%s22727_s5 + $0x350] sm:$0xff]  }
 0xa40   : > { %16887 = vmatmul.mubr.msk.bf16.gmra.mrb[128].mxu1 %vm9852_vm5, %v18307_v42  ;;  %v13040_v42 = vld [vmem:[%s22730_s8 + $0x18] sm:$0xff] }
 0xa41   : > { %16890 = vmatprep.mubr.msk.bf16.mxu1 %vm9852_vm5, %v18308_v37  ;;  %v13043_v37 = vld [vmem:[%s22730_s8 + $0x30] sm:$0xff] }
 0xa42   : > { %13065 = vperm.xlu1 %17717, %v13040_v42  }
 0xa46   : > { %13075 = vperm.xlu1 %17717, %v13042_v14  }
 0xa48   : > { %16891 = vmatmul.mubr.msk.bf16.gmra.mrb[176].mxu1 %vm9852_vm5, %v18309_v58  ;;  %v18328_v58 = vld [vmem:[%s22727_s5 + $0x358] sm:$0xff]  }
 0xa49   : > { %16898 = vmatprep.mubr.msk.bf16.mxu1 %vm9852_vm5, %v18310_v17  ;;  %v13044_v17 = vld [vmem:[%s22730_s8 + $0x38] sm:$0xff] }
 0xa4a   : > { %13085 = vperm.xlu1 %17717, %v13044_v17  }
 0xa50   : > { %16899 = vmatmul.mubr.msk.bf16.vlgmr.msra.gmra.mrb[120].mxu1 %vm9852_vm5, %v18311_v39 }
 0xa51   : > { %16915 = vmatpush3.bf16.msra.mxu1 %v12362_v22  ;;  %16902 = vmatprep.mubr.msk.bf16.mxu1 %vm9852_vm5, %v18312_v51  ;;  %v13037_v22 = vld [vmem:[%s22730_s8] sm:$0xff]  ;;  %v13046_v51 = vld [vmem:[%s22730_s8 + $0x48] sm:$0xff] }
 0xa52   : > { %16916 = vmatprep.subr.bf16.mxu1 %v12391_v59  ;;  %13050 = vperm.xlu0 %17716, %v13037_v22  }
 0xa53   : > { %13095 = vperm.xlu1 %17717, %v13046_v51  }
 0xa55   : > { %16917 = vmatpush3.bf16.msra.mxu1 %v12391_v59  ;;  %v13047_v59 = vld [vmem:[%s22730_s8 + $0x50] sm:$0xf] }
 0xa56   : > { %16934 = vmatprep.subr.bf16.mxu1 %v12559_v43  ;;  %13060 = vperm.xlu0 %17716, %v13039_v49   ;;  %v18342_v49 = vld [vmem:[%s22729_s7] sm:$0xff]  }
 0xa57   : > { %16990 = vmatprep.mubr.msk.bf16.mxu0 %vm13131_vm7, %v18342_v49 }
 0xa58   : > { %16903 = vmatmul.mubr.msk.bf16.gmra.mrb[124].mxu1 %vm9852_vm5, %v18313_v5  ;;  %v18330_v5 = vld [vmem:[%s22727_s5 + $0x368] sm:$0xff]  }
 0xa59   : > { %16906 = vmatprep.mubr.msk.bf16.mxu1 %vm9852_vm5, %v18314_v1 }
 0xa5b   : > { %v16772_v3 = vpop.f32.mrb[152].mxu1 }
 0xa5c   : > { %v10927_v47 = vadd.f32 %v16772_v3, %v10730_v34  ;;  %v10899_v24 = vpop.f32.mrb[153].mxu1  ;;  %v18325_v34 = vld [vmem:[%s22727_s5 + $0x344] ss:$0 sps:$4 sm:$0xff]  }
 0xa5d   : > { %v10925_v13 = vadd.f32 %v10899_v24, %v10728_v8  ;;  %v16773_v31 = vpop.f32.mrb[154].mxu1  ;;  %v13041_v8 = vld [vmem:[%s22730_s8 + $0x20] sm:$0xff] }
 0xa5e   : > { %v10902_v57 = vpop.f32.mrb[155].mxu1  ;;  %13070 = vperm.xlu0 %17716, %v13041_v8  }
 0xa5f   : > { %v10926_v30 = vadd.f32 %v10902_v57, %v10729_v62  ;;  %v12758_v62 = vpop.permute.xlu1 %12757  ;;  %v18333_v57 = vld [vmem:[%s22727_s5 + $0x380] ss:$0 sps:$4 sm:$0xff]  }
 0xa60   : > { %16907 = vmatmul.mubr.msk.bf16.gmra.mrb[128].mxu1 %vm9852_vm5, %v18315_v32  ;;  %v12785_v39 = vand.u32 %v12758_v62, %v21989_v45  ;;  %v18329_v45 = vld [vmem:[%s22727_s5 + $0x360] sm:$0xff]  }
 0xa61   : > { %16910 = vmatprep.mubr.msk.bf16.mxu1 %vm9852_vm5, %v18316_v44 }
 0xa62   : > { %13080 = vperm.xlu0 %17716, %v13043_v37  }
 0xa66   : > { %13090 = vperm.xlu0 %17716, %v13045_v11  }
 0xa68   : > { %16911 = vmatmul.mubr.msk.bf16.gmra.mrb[180].mxu1 %vm9852_vm5, %v18317_v53 }
 0xa69   : > { %16918 = vmatprep.mubr.msk.bf16.mxu1 %vm9852_vm5, %v18318_v35 }
 0xa6a   : > { %13100 = vperm.xlu0 %17716, %v13047_v59  }
 0xa70   : > { %16919 = vmatmul.mubr.msk.bf16.vlgmr.msra.gmra.mrb[120].mxu1 %vm9852_vm5, %v18319_v15  ;;  %v18340_v15 = vld [vmem:[%s22727_s5 + $0x3b4] sm:$0xff]  }
 0xa71   : > { %16935 = vmatpush3.bf16.msra.mxu1 %v12559_v43  ;;  %16922 = vmatprep.mubr.msk.bf16.mxu1 %vm9852_vm5, %v18320_v10 }
 0xa72   : > { %16936 = vmatprep.subr.bf16.mxu1 %v12588_v63 }
 0xa75   : > { %16937 = vmatpush3.bf16.msra.mxu1 %v12588_v63 }
 0xa76   : > { %16954 = vmatprep.subr.bf16.mxu1 %v12756_v0 }
 0xa78   : > { %16923 = vmatmul.mubr.msk.bf16.gmra.mrb[124].mxu1 %vm9852_vm5, %v18321_v25 }
 0xa79   : > { %16926 = vmatprep.mubr.msk.bf16.mxu1 %vm9852_vm5, %v18322_v50 }
 0xa7b   : > { %v16792_v12 = vpop.f32.mrb[156].mxu1 }
 0xa7c   : > { %v11124_v7 = vadd.f32 %v16792_v12, %v10927_v47  ;;  %v11096_v61 = vpop.f32.mrb[157].mxu1  ;;  %v18331_v47 = vld [vmem:[%s22727_s5 + $0x370] sm:$0xff]  }
 0xa7d   : > { %v11122_v4 = vadd.f32 %v11096_v61, %v10925_v13  ;;  %v16793_v55 = vpop.f32.mrb[158].mxu1  ;;  %v18332_v13 = vld [vmem:[%s22727_s5 + $0x378] sm:$0xff]  }
 0xa7e   : > { %v11099_v36 = vpop.f32.mrb[159].mxu1 }
 0xa7f   : > { %v11123_v23 = vadd.f32 %v11099_v36, %v10926_v30  ;;  %v18334_v30 = vld [vmem:[%s22727_s5 + $0x384] sm:$0xff]  }
 0xa80   : > { %16927 = vmatmul.mubr.msk.bf16.gmra.mrb[128].mxu1 %vm9852_vm5, %v18323_v52 }
 0xa81   : > { %16930 = vmatprep.mubr.msk.bf16.mxu1 %vm9852_vm5, %v18324_v19 }
 0xa88   : > { %16931 = vmatmul.mubr.msk.bf16.gmra.mrb[184].mxu1 %vm9852_vm5, %v18325_v34 }
 0xa89   : > { %16938 = vmatprep.mubr.msk.bf16.mxu1 %vm9852_vm5, %v18326_v18 }
 0xa90   : > { %16939 = vmatmul.mubr.msk.bf16.vlgmr.msra.gmra.mrb[120].mxu1 %vm9852_vm5, %v18327_v41 }
 0xa91   : > { %16955 = vmatpush3.bf16.msra.mxu1 %v12756_v0  ;;  %16942 = vmatprep.mubr.msk.bf16.mxu1 %vm9852_vm5, %v18328_v58 }
 0xa92   : > { %16956 = vmatprep.subr.bf16.mxu1 %v12785_v39 }
 0xa95   : > { %16957 = vmatpush3.bf16.msra.mxu1 %v12785_v39 }
 0xa98   : > { %16943 = vmatmul.mubr.msk.bf16.gmra.mrb[124].mxu1 %vm9852_vm5, %v18329_v45 }
 0xa99   : > { %16946 = vmatprep.mubr.msk.bf16.mxu1 %vm9852_vm5, %v18330_v5  ;;  %v12916_v5 = vpop.permute.xlu0 %12915 }
 0xa9b   : > { %v16812_v43 = vpop.f32.mrb[160].mxu1 }
 0xa9c   : > { %v11321_v1 = vadd.f32 %v16812_v43, %v11124_v7  ;;  %v11293_v3 = vpop.f32.mrb[161].mxu1  ;;  %v12921_v59 = vpop.permute.xlu1 %12920 }
 0xa9d   : > { %v11319_v24 = vadd.f32 %v11293_v3, %v11122_v4  ;;  %v16813_v32 = vpop.f32.mrb[162].mxu1 }
 0xa9e   : > { %v11296_v31 = vpop.f32.mrb[163].mxu1 }
 0xa9f   : > { %v11320_v44 = vadd.f32 %v11296_v31, %v11123_v23 }
 0xaa0   : > { %16947 = vmatmul.mubr.msk.bf16.gmra.mrb[128].mxu1 %vm9852_vm5, %v18331_v47  ;;  %v12926_v43 = vpop.permute.xlu1 %12925 }
 0xaa1   : > { %16950 = vmatprep.mubr.msk.bf16.mxu1 %vm9852_vm5, %v18332_v13 }
 0xaa8   : > { %16951 = vmatmul.mubr.msk.bf16.gmra.mrb[88].mxu1 %vm9852_vm5, %v18333_v57  ;;  %v12936_v57 = vpop.permute.xlu1 %12935 }
 0xaa9   : > { %16958 = vmatprep.mubr.msk.bf16.mxu1 %vm9852_vm5, %v18334_v30 }
 0xab0   : > { %16959 = vmatmul.mubr.msk.bf16.vlgmr.msra.gmra.mrb[120].mxu1 %vm9852_vm5, %v18335_v20 }
 0xab1   : > { %16962 = vmatprep.mubr.msk.bf16.mxu1 %vm9852_vm5, %v18336_v40 }
 0xab8   : > { %16963 = vmatmul.mubr.msk.bf16.gmra.mrb[124].mxu1 %vm9852_vm5, %v18337_v21 }
 0xab9   : > { %16966 = vmatprep.mubr.msk.bf16.mxu1 %vm9852_vm5, %v18338_v16 }
 0xabb   : > { %v16832_v53 = vpop.f32.mrb[164].mxu1 }
 0xabc   : > { %v11518_v35 = vadd.f32 %v16832_v53, %v11321_v1  ;;  %v11490_v46 = vpop.f32.mrb[165].mxu1 }
 0xabd   : > { %v11516_v28 = vadd.f32 %v11490_v46, %v11319_v24  ;;  %v16833_v38 = vpop.f32.mrb[166].mxu1  ;;  %v12931_v24 = vpop.permute.xlu0 %12930 }
 0xabe   : > { %v11493_v54 = vpop.f32.mrb[167].mxu1 }
 0xabf   : > { %v11517_v10 = vadd.f32 %v11493_v54, %v11320_v44 }
 0xac0   : > { %16967 = vmatmul.mubr.msk.bf16.gmra.mrb[128].mxu1 %vm9852_vm5, %v18339_v9 }
 0xac1   : > { %16970 = vmatprep.mubr.msk.bf16.mxu1 %vm9852_vm5, %v18340_v15  ;;  %v12941_v30 = vpop.permute.xlu0 %12940 }
 0xac5   : > { %v12951_v54 = vpop.permute.xlu0 %12950 }
 0xac8   : > { %16971 = vmatmul.mubr.msk.bf16.gmra.mrb[92].mxu1 %vm9852_vm5, %v18341_v2 }
 0xadb   : > { %v16852_v27 = vpop.f32.mrb[168].mxu1 }
 0xadc   : > { %v11715_v63 = vadd.f32 %v16852_v27, %v11518_v35  ;;  %v11687_v6 = vpop.f32.mrb[169].mxu1  ;;  %v12946_v35 = vpop.permute.xlu1 %12945 }
 0xadd   : > { %v11713_v56 = vadd.f32 %v11687_v6, %v11516_v28  ;;  %v16853_v25 = vpop.f32.mrb[170].mxu1 }
 0xade   : > { %v11690_v0 = vpop.f32.mrb[171].mxu1 }
 0xadf   : > { %v11714_v50 = vadd.f32 %v11690_v0, %v11517_v10 }
 0xafb   : > { %v16872_v12 = vpop.f32.mrb[172].mxu1 }
 0xafc   : > { %v11912_v7 = vadd.f32 %v16872_v12, %v11715_v63  ;;  %v11884_v61 = vpop.f32.mrb[173].mxu1 }
 0xafd   : > { %v11910_v52 = vadd.f32 %v11884_v61, %v11713_v56  ;;  %v16873_v4 = vpop.f32.mrb[174].mxu1  ;;  %v12956_v56 = vpop.permute.xlu1 %12955 }
 0xafe   : > { %v11887_v55 = vpop.f32.mrb[175].mxu1 }
 0xaff   : > { %v11911_v19 = vadd.f32 %v11887_v55, %v11714_v50 }
 0xb1b   : > { %v16892_v48 = vpop.f32.mrb[176].mxu1 }
 0xb1c   : > { %v12109_v29 = vadd.f32 %v16892_v48, %v11912_v7  ;;  %v12081_v36 = vpop.f32.mrb[177].mxu1 }
 0xb1d   : > { %v12107_v23 = vadd.f32 %v12081_v36, %v11910_v52  ;;  %v16893_v26 = vpop.f32.mrb[178].mxu1  ;;  %v12961_v52 = vpop.permute.xlu0 %12960 }
 0xb1e   : > { %v12084_v22 = vpop.f32.mrb[179].mxu1  ;;  %v12966_v36 = vpop.permute.xlu1 %12965 }
 0xb1f   : > { %v12108_v60 = vadd.f32 %v12084_v22, %v11911_v19 }
 0xb3b   : > { %v16912_v34 = vpop.f32.mrb[180].mxu1 }
 0xb3c   : > { %v12306_v18 = vadd.f32 %v16912_v34, %v12109_v29  ;;  %v12278_v42 = vpop.f32.mrb[181].mxu1  ;;  %v12971_v34 = vpop.permute.xlu0 %12970 }
 0xb3d   : > { %v12304_v8 = vadd.f32 %v12278_v42, %v12107_v23  ;;  %v16913_v14 = vpop.f32.mrb[182].mxu1 }
 0xb3e   : > { %v12281_v37 = vpop.f32.mrb[183].mxu1 }
 0xb3f   : > { %v12305_v41 = vadd.f32 %v12281_v37, %v12108_v60 }
 0xb5b   : > { %v16932_v62 = vpop.f32.mrb[184].mxu1 }
 0xb5c   : > { %v12503_v58 = vadd.f32 %v16932_v62, %v12306_v18  ;;  %v12475_v17 = vpop.f32.mrb[185].mxu1 }
 0xb5d   : > { %v12501_v39 = vadd.f32 %v12475_v17, %v12304_v8  ;;  %v16933_v11 = vpop.f32.mrb[186].mxu1 }
 0xb5e   : > { %v12478_v51 = vpop.f32.mrb[187].mxu1 }
 0xb5f   : > { %v12502_v45 = vadd.f32 %v12478_v51, %v12305_v41  ;;  %v12976_v41 = vpop.permute.xlu1 %12975 }
 0xb7b   : > { %v16952_v1 = vpop.f32.mrb[88].mxu1 }
 0xb7c   : > { %v22599_v3 = vadd.f32 %v16952_v1, %v12503_v58  ;;  %v12672_v47 = vpop.f32.mrb[89].mxu1 }
 0xb7d   : > { %v22601_v32 = vadd.f32 %v12672_v47, %v12501_v39  ;;  %v16953_v13 = vpop.f32.mrb[90].mxu1  ;;  %v12986_v47 = vpop.permute.xlu1 %12985 }
 0xb7e   : > { %v12675_v31 = vpop.f32.mrb[91].mxu1 }
 0xb7f   : > { %v22603_v44 = vadd.f32 %v12675_v31, %v12502_v45 }
 0xb83   : > { %v16960_v20 = vpop.f32.mrb[120].mxu1 }
 0xb84   : > { %v12990_v40 = vadd.f32 %v16960_v20, %v12926_v43  ;;  %v12821_v21 = vpop.f32.mrb[121].mxu1 }
 0xb85   : > { %v12988_v16 = vadd.f32 %v12916_v5, %v12821_v21  ;;  %v16961_v53 = vpop.f32.mrb[122].mxu1 }
 0xb86   : > { %v12991_v46 = vadd.f32 %v16961_v53, %v12931_v24  ;;  %v12824_v9 = vpop.f32.mrb[123].mxu1  ;;  %v13005_v38 = vmax.f32 %v12990_v40, 0.0 }
 0xb87   : > { %v12989_v28 = vadd.f32 %v12921_v59, %v12824_v9  ;;  %v13003_v10 = vmax.f32 %v12988_v16, 0.0  ;;  %v18346_v9 = vld [vmem:[%s22729_s7 + $0x20] sm:$0xff]  }
 0xb88   : > { %v13006_v15 = vmax.f32 %v12991_v46, 0.0  ;;  %v18345_v46 = vld [vmem:[%s22729_s7 + $0x18] sm:$0xff]  }
 0xb89   : > { %v13004_v2 = vmax.f32 %v12989_v28, 0.0  ;;  %v18347_v28 = vld [vmem:[%s22729_s7 + $0x28] ss:$0 sps:$4 sm:$0x33]  }
 0xb8a   : > { %v13030_v27 = vpack.c.bf16 %v13006_v15, %v13005_v38  ;;  %v13056_v15 = vpop.permute.xlu1 %13055 }
 0xb8b   : > { %v13029_v63 = vpack.c.bf16 %v13004_v2, %v13003_v10  ;;  %v16964_v6 = vpop.f32.mrb[124].mxu1 }
 0xb8c   : > { %v12994_v25 = vadd.f32 %v16964_v6, %v12946_v35  ;;  %v12837_v0 = vpop.f32.mrb[125].mxu1  ;;  %v18343_v35 = vld [vmem:[%s22729_s7 + $0x8] sm:$0xff]  }
 0xb8d   : > { %v12992_v50 = vadd.f32 %v12936_v57, %v12837_v0  ;;  %v16965_v12 = vpop.f32.mrb[126].mxu1  ;;  %16974 = vmatprep.subr.bf16.mxu0 %v13029_v63 }
 0xb8e   : > { %v12995_v7 = vadd.f32 %v16965_v12, %v12951_v54  ;;  %v12840_v61 = vpop.f32.mrb[127].mxu1  ;;  %16975 = vmatpush3.bf16.msra.mxu0 %v13029_v63  ;;  %v13009_v55 = vmax.f32 %v12994_v25, 0.0  ;;  %v13066_v10 = vpop.permute.xlu1 %13065 }
 0xb8f   : > { %v12993_v4 = vadd.f32 %v12941_v30, %v12840_v61  ;;  %16976 = vmatprep.subr.bf16.mxu0 %v13030_v27  ;;  %v13007_v48 = vmax.f32 %v12992_v50, 0.0  ;;  %v12981_v30 = vpop.permute.xlu0 %12980 }
 0xb90   : > { %v13010_v19 = vmax.f32 %v12995_v7, 0.0 }
 0xb91   : > { %v13008_v29 = vmax.f32 %v12993_v4, 0.0 }
 0xb92   : > { %v13032_v23 = vpack.c.bf16 %v13010_v19, %v13009_v55  ;;  %16977 = vmatpush3.bf16.msra.mxu0 %v13030_v27  ;;  %v13076_v12 = vpop.permute.xlu1 %13075 }
 0xb93   : > { %v13031_v26 = vpack.c.bf16 %v13008_v29, %v13007_v48  ;;  %v16968_v22 = vpop.f32.mrb[128].mxu1  ;;  %v13051_v38 = vpop.permute.xlu0 %13050 }
 0xb94   : > { %v12998_v60 = vadd.f32 %v16968_v22, %v12966_v36  ;;  %v12853_v49 = vpop.f32.mrb[129].mxu1 }
 0xb95   : > { %v12996_v18 = vadd.f32 %v12956_v56, %v12853_v49  ;;  %v16969_v42 = vpop.f32.mrb[130].mxu1  ;;  %16978 = vmatprep.subr.bf16.mxu0 %v13031_v26 }
 0xb96   : > { %v12999_v8 = vadd.f32 %v16969_v42, %v12971_v34  ;;  %v12856_v14 = vpop.f32.mrb[131].mxu1  ;;  %16979 = vmatpush3.bf16.msra.mxu0 %v13031_v26  ;;  %v13013_v62 = vmax.f32 %v12998_v60, 0.0  ;;  %v13086_v22 = vpop.permute.xlu1 %13085 }
 0xb97   : > { %v12997_v37 = vadd.f32 %v12961_v52, %v12856_v14  ;;  %16980 = vmatprep.subr.bf16.mxu0 %v13032_v23  ;;  %v13011_v17 = vmax.f32 %v12996_v18, 0.0  ;;  %v13061_v54 = vpop.permute.xlu0 %13060 }
 0xb98   : > { %v13014_v58 = vmax.f32 %v12999_v8, 0.0 }
 0xb99   : > { %v13012_v39 = vmax.f32 %v12997_v37, 0.0 }
 0xb9a   : > { %v13034_v11 = vpack.c.bf16 %v13014_v58, %v13013_v62  ;;  %16981 = vmatpush3.bf16.msra.mxu0 %v13032_v23 }
 0xb9b   : > { %v13033_v51 = vpack.c.bf16 %v13012_v39, %v13011_v17  ;;  %v16972_v45 = vpop.f32.mrb[92].mxu1  ;;  %v13071_v6 = vpop.permute.xlu0 %13070 }
 0xb9c   : > { %v12897_v59 = vadd.f32 %v16972_v45, %v22599_v3  ;;  %v12869_v5 = vpop.f32.mrb[93].mxu1 }
 0xb9d   : > { %v12895_v43 = vadd.f32 %v12869_v5, %v22601_v32  ;;  %v16973_v1 = vpop.f32.mrb[94].mxu1  ;;  %16982 = vmatprep.subr.bf16.mxu0 %v13033_v51 }
 0xb9e   : > { %v12872_v24 = vpop.f32.mrb[95].mxu1  ;;  %16983 = vmatpush3.bf16.msra.mxu0 %v13033_v51  ;;  %v13002_v13 = vadd.f32 %v12986_v47, %v12897_v59 }
 0xb9f   : > { %v13000_v31 = vadd.f32 %v12976_v41, %v12895_v43  ;;  %v12896_v57 = vadd.f32 %v12872_v24, %v22603_v44  ;;  %16984 = vmatprep.subr.bf16.mxu0 %v13034_v11  ;;  %v18344_v44 = vld [vmem:[%s22729_s7 + $0x10] sm:$0xff]   ;;  %v13081_v48 = vpop.permute.xlu0 %13080  ;;  %v13096_v43 = vpop.permute.xlu1 %13095 }
 0xba0   : > { %v13017_v40 = vmax.f32 %v13002_v13, 0.0 }
 0xba1   : > { %v13001_v20 = vadd.f32 %v12981_v30, %v12896_v57  ;;  %v13015_v21 = vmax.f32 %v13000_v31, 0.0 }
 0xba2   : > { %16985 = vmatpush3.bf16.msra.mxu0 %v13034_v11  ;;  %v13036_v53 = vpack.c.bf16 %v13017_v40, %v13017_v40 }
 0xba3   : > { %v13016_v16 = vmax.f32 %v13001_v20, 0.0  ;;  %v13091_v11 = vpop.permute.xlu0 %13090 }
 0xba4   : > { %v13151_v32 = vsel %vm1560_vm0, %v13036_v53, 0 }
 0xba5   : > { %v13035_v3 = vpack.c.bf16 %v13016_v16, %v13015_v21  ;;  %v13244_v21 = vlaneseq }
 0xba7   : > { %16986 = vmatprep.subr.bf16.mxu0 %v13035_v3  ;;  %v13101_v20 = vpop.permute.xlu0 %13100 }
 0xba8   : > { %16987 = vmatpush3.bf16.msra.mxu0 %v13035_v3 }
 0xba9   : > { %17656 = vmatprep.subr.msk.bf16.mxu0 %vm1560_vm0, %v13036_v53  ;;  %v13245_v53 = vshrl.u32 %v13244_v21, 7 }
 0xbac   : > { %16989 = vmatpush3.bf16.msra.mxu0 %v13151_v32  ;;  %v13247_v32 = vand.u32 127, %v13244_v21 }
 0xbad   : > { %17002 = vmatprep.subr.bf16.mxu0 %v22787_v33 }
 0xbae   : > { %vm13248_vm9 = vcmp.eq.s32.totalorder %v13245_v53, %v13247_v32 }
 0xbaf   : > { %16991 = vmatmul.mubr.msk.bf16.vlgmr.msra.gmra.mrb[144].mxu0 %vm13131_vm7, %v18343_v35 }
 0xbb0   : > { %16994 = vmatprep.mubr.msk.bf16.mxu0 %vm13131_vm7, %v18344_v44 }
 0xbb7   : > { %16995 = vmatmul.mubr.msk.bf16.gmra.mrb[148].mxu0 %vm13131_vm7, %v18345_v46  ;;  %v14816_v46 = vsel %vm13248_vm9, 1.0, %v22787_v33 }
 0xbb8   : > { %16998 = vmatprep.mubr.msk.bf16.mxu0 %vm13131_vm7, %v18346_v9  ;;  %v13251_v9 = vpack.c.bf16 %v14816_v46, %v14816_v46 }
 0xbbf   : > { %16999 = vmatmul.mubr.msk.bf16.gmra.mrb[152].mxu0 %vm13131_vm7, %v18347_v28  ;;  %v18348_v28 = vld [vmem:[%s22731_s9] sm:$0xff]  }
 0xbc0   : > { %17014 = vmatprep.mubr.msk.bf16.mxu0 %vm18440_vm2, %v22787_v33 }
 0xc82   : > { %v16992_v2 = vpop.f32.mrb[144].mxu0 }
 0xc83   : > { %v13196_v27 = vadd.f32 %v16992_v2, %v13061_v54  ;;  %v13187_v63 = vpop.f32.mrb[145].mxu0  ;;  %v18351_v54 = vld [vmem:[%s22731_s9 + $0x18] sm:$0xff]   ;;  %v18353_v2 = vld [vmem:[%s22731_s9 + $0x28] ss:$0 sps:$4 sm:$0x33]  }
 0xc84   : > { %v13188_v56 = vadd.f32 %v13187_v63, %v13051_v38  ;;  %v16993_v25 = vpop.f32.mrb[146].mxu0  ;;  %v18349_v38 = vld [vmem:[%s22731_s9 + $0x8] sm:$0xff]  }
 0xc85   : > { %v13199_v0 = vadd.f32 %v16993_v25, %v13066_v10  ;;  %v13190_v50 = vpop.f32.mrb[147].mxu0  ;;  %v13235_v61 = vmax.f32 %v13196_v27, 0.0  ;;  %v18352_v10 = vld [vmem:[%s22731_s9 + $0x20] sm:$0xff]   ;;  %v13378_v27 = vsel %vm13376_vm10, %v18353_v2, 0 }
 0xc86   : > { %v13191_v7 = vadd.f32 %v13190_v50, %v13056_v15  ;;  %v13233_v4 = vmax.f32 %v13188_v56, 0.0  ;;  %v18350_v15 = vld [vmem:[%s22731_s9 + $0x10] sm:$0xff]  }
 0xc87   : > { %v13236_v52 = vmax.f32 %v13199_v0, 0.0 }
 0xc88   : > { %v13234_v55 = vmax.f32 %v13191_v7, 0.0 }
 0xc89   : > { %v13253_v19 = vpack.c.bf16 %v13236_v52, %v13235_v61 }
 0xc8a   : > { %v13252_v29 = vpack.c.bf16 %v13234_v55, %v13233_v4  ;;  %v16996_v36 = vpop.f32.mrb[148].mxu0 }
 0xc8b   : > { %v13212_v23 = vadd.f32 %v16996_v36, %v13081_v48  ;;  %v13203_v26 = vpop.f32.mrb[149].mxu0  ;;  %v13266_v5 = vsel %vm13258_vm8, %v13253_v19, 0 }
 0xc8c   : > { %v13204_v60 = vadd.f32 %v13203_v26, %v13071_v6  ;;  %v16997_v49 = vpop.f32.mrb[150].mxu0  ;;  %v13263_v34 = vsel %vm13258_vm8, %v13252_v29, 0 }
 0xc8d   : > { %v13215_v18 = vadd.f32 %v16997_v49, %v13086_v22  ;;  %v13206_v42 = vpop.f32.mrb[151].mxu0  ;;  %17003 = vmatpush3.bf16.xpose.msra.mxu0 %v13263_v34  ;;  %v13239_v14 = vmax.f32 %v13212_v23, 0.0 }
 0xc8e   : > { %v13207_v8 = vadd.f32 %v13206_v42, %v13076_v12  ;;  %17004 = vmatprep.subr.bf16.mxu0 %v22787_v33  ;;  %v13237_v41 = vmax.f32 %v13204_v60, 0.0 }
 0xc8f   : > { %v13240_v37 = vmax.f32 %v13215_v18, 0.0 }
 0xc90   : > { %v13238_v62 = vmax.f32 %v13207_v8, 0.0 }
 0xc91   : > { %v13255_v58 = vpack.c.bf16 %v13240_v37, %v13239_v14 }
 0xc92   : > { %v13254_v17 = vpack.c.bf16 %v13238_v62, %v13237_v41  ;;  %v17000_v39 = vpop.f32.mrb[152].mxu0 }
 0xc93   : > { %v13219_v51 = vpop.f32.mrb[153].mxu0  ;;  %v13272_v30 = vsel %vm13258_vm8, %v13255_v58, 0  ;;  %v13228_v40 = vadd.f32 %v17000_v39, %v13101_v20 }
 0xc94   : > { %v13220_v45 = vadd.f32 %v13219_v51, %v13091_v11  ;;  %v17001_v59 = vpop.f32.mrb[154].mxu0  ;;  %v13269_v57 = vsel %vm13258_vm8, %v13254_v17, 0 }
 0xc95   : > { %v13222_v1 = vpop.f32.mrb[155].mxu0  ;;  %17005 = vmatpush3.bf16.xpose.msra.mxu0 %v13266_v5  ;;  %v13243_v16 = vmax.f32 %v13228_v40, 0.0 }
 0xc96   : > { %v13223_v47 = vadd.f32 %v13222_v1, %v13096_v43  ;;  %17006 = vmatprep.subr.bf16.mxu0 %v22787_v33  ;;  %v13241_v24 = vmax.f32 %v13220_v45, 0.0 }
 0xc97   : > { %v13257_v35 = vpack.c.bf16 %v13243_v16, %v13243_v16 }
 0xc98   : > { %v13242_v13 = vmax.f32 %v13223_v47, 0.0 }
 0xc99   : > { %v13278_v44 = vsel %vm13258_vm8, %v13257_v35, 0 }
 0xc9a   : > { %v13256_v31 = vpack.c.bf16 %v13242_v13, %v13241_v24 }
 0xc9c   : > { %v13275_v3 = vsel %vm13258_vm8, %v13256_v31, 0 }
 0xc9d   : > { %17007 = vmatpush3.bf16.xpose.msra.mxu0 %v13269_v57 }
 0xc9e   : > { %17008 = vmatprep.subr.bf16.mxu0 %v22787_v33 }
 0xca5   : > { %17009 = vmatpush3.bf16.xpose.msra.mxu0 %v13272_v30 }
 0xca6   : > { %17010 = vmatprep.subr.bf16.mxu0 %v22787_v33 }
 0xcad   : > { %17011 = vmatpush3.bf16.xpose.msra.mxu0 %v13275_v3 }
 0xcae   : > { %17012 = vmatprep.subr.bf16.mxu0 %v22787_v33 }
 0xcb5   : > { %17013 = vmatpush3.bf16.xpose.msra.mxu0 %v13278_v44 }
 0xcb6   : > { %17018 = vmatprep.subr.bf16.mxu0 %v22787_v33 }
 0xcbc   : > { %17015 = vmatmul.mubr.msk.bf16.vlgmr.msra.gmra.mrb[156].mxu0 %vm13258_vm8, %v13251_v9 }
 0xcbd   : > { %17019 = vmatpush3.bf16.msra.mxu0 %v18348_v28  ;;  %17030 = vmatprep.mubr.msk.bf16.mxu0 %vm18440_vm2, %v22787_v33 }
 0xcbe   : > { %17020 = vmatprep.subr.bf16.mxu0 %v22787_v33 }
 0xcc1   : > { %17021 = vmatpush3.bf16.msra.mxu0 %v18349_v38 }
 0xcc2   : > { %17022 = vmatprep.subr.bf16.mxu0 %v22787_v33 }
 0xcc5   : > { %17023 = vmatpush3.bf16.msra.mxu0 %v18350_v15 }
 0xcc6   : > { %17024 = vmatprep.subr.bf16.mxu0 %v22787_v33 }
 0xcc9   : > { %17025 = vmatpush3.bf16.msra.mxu0 %v18351_v54 }
 0xcca   : > { %17026 = vmatprep.subr.bf16.mxu0 %v22787_v33 }
 0xccd   : > { %17027 = vmatpush3.bf16.msra.mxu0 %v18352_v10 }
 0xcce   : > { %17028 = vmatprep.subr.bf16.mxu0 %v22787_v33  ;;  %v14818_v33 = vld [vmem:[%s22732_s10] ss:$0 sm:$0xff] }
 0xcd1   : > { %17029 = vmatpush3.bf16.msra.mxu0 %v13378_v27 }
 0xd8f   : > { %v13314_v63 = vpop.f32.mrb[156].mxu0 }
 0xd90   : > { %v13320_v6 = vpack.c.bf16 %v13314_v63, %v13314_v63  ;;  %v17016_v56 = vpop.f32.mrb[157].mxu0 }
 0xd91   : > { %v13317_v25 = vpop.f32.mrb[158].mxu0 }
 0xd92   : > { %v17017_v0 = vpop.f32.mrb[159].mxu0  ;;  %17031 = vmatmul.mubr.msk.bf16.vlgmr.msra.gmra.mrb[160].mxu0 %vm13372_vm11, %v13320_v6 }
 0xe65   : > { %v13414_v50 = vpop.f32.mrb[160].mxu0 }
 0xe66   : > { %v13415_v12 = vadd.f32 %v14818_v33, %v13414_v50  ;;  %v17032_v7 = vpop.f32.mrb[161].mxu0 }
 0xe67   : > { %v13417_v61 = vpop.f32.mrb[162].mxu0 }
 0xe68   : > { %13420 = vst [vmem:[%s379_s25] sm:$0xff] %v13415_v12  ;;  %v17033_v52 = vpop.f32.mrb[163].mxu0 }
 0xe69   : > { %18387 = shalt.err (!%p18384_p3)
}
 0xe6a   : > { %s18388_s13 = scalar_lea.hbm %s22680_s14, 128  ;;  %s18392_s12 = scalar_lea.hbm %s22733_s11, 256 }
 0xe6b   : > { %p18389_p4 = scmp.ne.s32.totalorder %s22680_s14, %s18388_s13  ;;  %p18393_p9 = scmp.lt.u32.totalorder %s22680_s14, %s22733_s11 }
 0xe6c   : > { %p18394_p10 = scmp.lt.u32.totalorder %s18392_s12, %s18388_s13  ;;  %p18396_p12 = scmp.lt.u32.totalorder %s18388_s13, %s22680_s14 }
 0xe6d   : > { %p18390_p7 = pnand %p18389_p4, %p18556_p5 }
 0xe6e   : > { %p18395_p11 = por %p18394_p10, %p18393_p9 }
 0xe6f   : > { %p18391_p8 = pneg %p18390_p7 }
 0xe70   : > { %p18397_p13 = por %p18396_p12, %p18395_p11 }
 0xe72   : > { %p18398_p0 = pnand %p18397_p13, %p18391_p8 }
 0xe74   : > { %18401 = shalt.err (!%p18398_p0)
}
 0xe75   : > { %17658 = dma.vmem_to_hbm [thread:$0]  (%p18556_p5), %s22682_s29, 128, %s22680_s14, %s13422_s22  }
 0xe76 PF: > { %p17664_p1 = scmp.ge.s32.totalorder %s18436_s20, 2  ;;  %s13447_s21 = sand.u32 1, %s18424_s17  }
 0xe77   : > { %s13448_s30 = scalar_lea.sflag [#allocation7], %s13447_s21 }
 0xe78   : > { %p17661_p2 = pnand %p17664_p1, %p18560_p6 }
 0xe7a   : > { %18419 = dma.done.wait (!%p17661_p2), %s13448_s30, 128  }
 0xe7b   : > { %18421 = vsyncadd (!%p17661_p2), %s13448_s30, 4294967168  ;;  %p21_p3 = scmp.ge.s32.totalorder %s18543_s23, 4   ;;  %s22839_s17 = smov %s18428_s18 }
 0xe7c   : > { %s22840_s18 = smov %s18432_s19  ;;  %s22841_s19 = smov %s18554_s26 }
 0xe7d   : > { %s22842_s20 = smov %s18543_s23  ;;  %23 = sbr.rel (!%p21_p3) target bundleno = 3 (0x3), region = 268 }
 0xe84   :  { %13453 = vsyncpa [#allocation7], 1 }
 0xe85   :  { %13455 = vsyncpa [#allocation7 + $0x1], 1 }

</bundles_post_ra>
